<compile_context>
chip_gen: v5e
topology: v5e:2x2
jax: 0.10.0
libtpu: 0.0.40
codegen_flags: <defaults>
</compile_context>

<pallas_src>
import jax
import jax.numpy as jnp
from jax.experimental import pallas as pl
from jax.experimental.pallas import tpu as pltpu


def _round_up(x, m):
    return (x + m - 1) // m * m


def _mlp_kernel(x_ref, w1_ref, b1_ref, w2_ref, b2_ref, w3_ref, b3_ref,
                w4_ref, b4_ref, o_ref):
    # Cast x to bf16 in-register (cheap VPU cast; the DMA stays f32).
    x = x_ref[...].astype(jnp.bfloat16)
    # fc1 + ReLU  (bf16 operands, f32 accumulation on the MXU)
    h = jnp.dot(x, w1_ref[...], preferred_element_type=jnp.float32)
    h = jnp.maximum(h + b1_ref[...], 0.0).astype(jnp.bfloat16)
    # fc2 + ReLU
    h = jnp.dot(h, w2_ref[...], preferred_element_type=jnp.float32)
    h = jnp.maximum(h + b2_ref[...], 0.0).astype(jnp.bfloat16)
    # fc3 + ReLU (output kept f32 for the final layer)
    h = jnp.dot(h, w3_ref[...], preferred_element_type=jnp.float32)
    h = jnp.maximum(h + b3_ref[...], 0.0)
    # out (logits) in f32 on a lane-padded (128-wide) weight; the padded bias
    # columns are -1e30 so they never win the max and contribute 0 to the sum.
    logits = jnp.dot(h, w4_ref[...], preferred_element_type=jnp.float32)
    logits = logits + b4_ref[...]
    # log_softmax over the last dim (padded columns are inert, sliced off in
    # the wrapper).
    m = jnp.max(logits, axis=-1, keepdims=True)
    s = logits - m
    lse = jnp.log(jnp.sum(jnp.exp(s), axis=-1, keepdims=True))
    o_ref[...] = (s - lse).astype(o_ref.dtype)


def prepare_params(params):
    """One-time weight preparation (do NOT call per forward).

    params: w1..w4 stored (in, out); b1..b4 stored (1, out), any float dtype.
    Returns a dict of device arrays ready to be fed to `deepdds_mlp_forward`.
    """
    H3, D_out = params["w4"].shape
    out_pad = _round_up(D_out, 128)  # lane-dense final store
    w4p = jnp.zeros((H3, out_pad), jnp.float32).at[:, :D_out].set(
        params["w4"].astype(jnp.float32))
    b4p = jnp.full((1, out_pad), -1e30, jnp.float32).at[:, :D_out].set(
        params["b4"].astype(jnp.float32))
    prepared = {
        # bf16 operands for the MXU-heavy layers; biases stay f32 (added
        # post-accumulation).
        "w1": params["w1"].astype(jnp.bfloat16),
        "w2": params["w2"].astype(jnp.bfloat16),
        "w3": params["w3"].astype(jnp.bfloat16),
        "b1": params["b1"].astype(jnp.float32),
        "b2": params["b2"].astype(jnp.float32),
        "b3": params["b3"].astype(jnp.float32),
        "w4p": w4p,
        "b4p": b4p,
        "d_out": int(D_out),
    }
    return prepared


def deepdds_mlp_forward(x, prepared, *, tile_b=512):
    """x: (B, D_in) f32. prepared: output of `prepare_params`."""
    B, D_in = x.shape
    w1, w2, w3 = prepared["w1"], prepared["w2"], prepared["w3"]
    b1, b2, b3 = prepared["b1"], prepared["b2"], prepared["b3"]
    w4p, b4p = prepared["w4p"], prepared["b4p"]
    D_out = prepared["d_out"]
    H1, H2, H3 = w1.shape[1], w2.shape[1], w3.shape[1]
    out_pad = w4p.shape[1]

    # Clamp the batch tile to the (8-rounded) batch.
    tb = _round_up(min(tile_b, _round_up(B, 8)), 8)
    n_tiles = -(-B // tb)
    # Even grid length when the batch spans >=2 tiles so both TensorCores on
    # v7x get work; a single tiny tile stays grid=1 (weight-DMA bound there).
    if n_tiles >= 2 and n_tiles % 2 == 1:
        n_tiles += 1
    Bp = n_tiles * tb
    if Bp != B:
        x = jnp.pad(x, ((0, Bp - B), (0, 0)))

    # Weights/biases: constant block index across the grid -> single-buffer
    # them (no overlap benefit from double-buffering, saves ~4.2 MiB VMEM).
    const = lambda shape: pl.BlockSpec(shape, lambda i: (0, 0),
                                       pipeline_mode=pl.Buffered(buffer_count=1))

    grid_spec = pltpu.PrefetchScalarGridSpec(
        num_scalar_prefetch=0,
        grid=(n_tiles,),
        in_specs=[
            pl.BlockSpec((tb, D_in), lambda i: (i, 0)),  # x batch tile (f32)
            const((D_in, H1)), const((1, H1)),
            const((H1, H2)), const((1, H2)),
            const((H2, H3)), const((1, H3)),
            const((H3, out_pad)), const((1, out_pad)),
        ],
        out_specs=pl.BlockSpec((tb, out_pad), lambda i: (i, 0)),
    )

    out_padded = pl.pallas_call(
        _mlp_kernel,
        out_shape=jax.ShapeDtypeStruct((Bp, out_pad), jnp.float32),
        grid_spec=grid_spec,
        compiler_params=pltpu.CompilerParams(
            dimension_semantics=("parallel",),
            # tile_b=512 peak (single-buffered weights ~4.2 MiB + x/out tiles
            # + the (512, 2048) f32 fc1 intermediate) stays well under this;
            # 48 MiB also fits v7x's 64 MiB physical VMEM.
            vmem_limit_bytes=48 * 1024 * 1024,
        ),
    )(x, w1, b1, w2, b2, w3, b3, w4p, b4p)

    return out_padded[:B, :D_out]


def _xavier_normal(key, fan_in, fan_out, dtype=jnp.float32):
    std = (2.0 / (fan_in + fan_out)) ** 0.5
    # stored as (in, out): transpose of PyTorch's (out, in) weight
    return std * jax.random.normal(key, (fan_in, fan_out), dtype=dtype)


def init_params(key, D_in=4 * 128, H1=2048, H2=512, H3=128, D_out=2):
    keys = jax.random.split(key, 8)
    dims = [(D_in, H1), (H1, H2), (H2, H3), (H3, D_out)]
    params = {}
    for idx, (fi, fo) in enumerate(dims, start=1):
        params[f"w{idx}"] = _xavier_normal(keys[2 * (idx - 1)], fi, fo)
        # bias ~ U(-1, 0), kept as (1, out) for 2D broadcast in-kernel
        params[f"b{idx}"] = jax.random.uniform(
            keys[2 * (idx - 1) + 1], (1, fo), minval=-1.0, maxval=0.0,
            dtype=jnp.float32)
    return params


def _reference_forward_f32(x, params):
    h = jax.nn.relu(x @ params["w1"] + params["b1"])
    h = jax.nn.relu(h @ params["w2"] + params["b2"])
    h = jax.nn.relu(h @ params["w3"] + params["b3"])
    logits = h @ params["w4"] + params["b4"]
    return jax.nn.log_softmax(logits, axis=-1)


def _reference_forward_bf16(x, params):
    # Mirrors the kernel's mixed precision: bf16 operands, f32 accumulation,
    # final layer + log_softmax in f32.
    bf = jnp.bfloat16
    h = jnp.dot(x.astype(bf), params["w1"].astype(bf),
                preferred_element_type=jnp.float32)
    h = jax.nn.relu(h + params["b1"]).astype(bf)
    h = jnp.dot(h, params["w2"].astype(bf), preferred_element_type=jnp.float32)
    h = jax.nn.relu(h + params["b2"]).astype(bf)
    h = jnp.dot(h, params["w3"].astype(bf), preferred_element_type=jnp.float32)
    h = jax.nn.relu(h + params["b3"])
    logits = jnp.dot(h, params["w4"], preferred_element_type=jnp.float32)
    logits = logits + params["b4"]
    return jax.nn.log_softmax(logits, axis=-1)


if __name__ == "__main__":
    key = jax.random.PRNGKey(0)
    k_param, k_x, k_x2 = jax.random.split(key, 3)

    D_in, H1, H2, H3, D_out = 4 * 128, 2048, 512, 128, 2
    B = 32  # small batch; tile_b is clamped to the batch size

    params = init_params(k_param, D_in, H1, H2, H3, D_out)
    prepared = jax.block_until_ready(prepare_params(params))  # one-time prep

    x = jax.random.normal(k_x, (B, D_in), dtype=jnp.float32)

    # Default (single batch tile) and an explicitly tiled run (grid of 4).
    out = jax.block_until_ready(deepdds_mlp_forward(x, prepared))
    out_tiled = jax.block_until_ready(deepdds_mlp_forward(x, prepared, tile_b=8))

    ref_bf16 = _reference_forward_bf16(x, params)
    ref_f32 = _reference_forward_f32(x, params)

    assert out.shape == (B, D_out)
    assert jnp.allclose(out, ref_bf16, atol=2e-3, rtol=2e-3), \
        "mismatch vs mixed-precision reference"
    assert jnp.allclose(out_tiled, ref_bf16, atol=2e-3, rtol=2e-3), \
        "tiled-grid mismatch vs mixed-precision reference"
    # Loose sanity check against the pure-f32 reference (bf16 quantization).
    max_diff = float(jnp.max(jnp.abs(out - ref_f32)))
    assert max_diff < 0.25, f"f32-reference drift too large: {max_diff}"

    # Exercise the odd->even grid bump + batch padding path (B=40, tb=16 ->
    # 3 tiles rounded up to 4, padded rows sliced off).
    B2 = 40
    x2 = jax.random.normal(k_x2, (B2, D_in), dtype=jnp.float32)
    out2 = jax.block_until_ready(deepdds_mlp_forward(x2, prepared, tile_b=16))
    ref2 = _reference_forward_bf16(x2, params)
    assert out2.shape == (B2, D_out)
    assert jnp.allclose(out2, ref2, atol=2e-3, rtol=2e-3), \
        "even-grid / padded-batch mismatch vs mixed-precision reference"

    print("KERNEL_OK")
</pallas_src>

<mosaic_0001>
module attributes {stable_mosaic.version = 11 : i64} {
  func.func @_mlp_kernel(%arg0: i32, %arg1: memref<32x512xf32, #tpu.memory_space<vmem>>, %arg2: memref<512x2048xbf16, #tpu.memory_space<vmem>>, %arg3: memref<1x2048xf32, #tpu.memory_space<vmem>>, %arg4: memref<2048x512xbf16, #tpu.memory_space<vmem>>, %arg5: memref<1x512xf32, #tpu.memory_space<vmem>>, %arg6: memref<512x128xbf16, #tpu.memory_space<vmem>>, %arg7: memref<1x128xf32, #tpu.memory_space<vmem>>, %arg8: memref<128x128xf32, #tpu.memory_space<vmem>>, %arg9: memref<1x128xf32, #tpu.memory_space<vmem>>, %arg10: memref<32x128xf32, #tpu.memory_space<vmem>>) attributes {dimension_semantics = [#tpu.dimension_semantics<parallel>], iteration_bounds = array<i64: 1>, scalar_prefetch = 0 : i64, scratch_operands = 0 : i64, tpu.core_type = #tpu.core_type<tc>, window_params = [{transform_indices = @transform_0, window_bounds = array<i64: 32, 512>}, {pipeline_mode = #tpu.pipeline_mode<synchronous>, transform_indices = @transform_1, window_bounds = array<i64: 512, 2048>}, {pipeline_mode = #tpu.pipeline_mode<synchronous>, transform_indices = @transform_2, window_bounds = array<i64: 1, 2048>}, {pipeline_mode = #tpu.pipeline_mode<synchronous>, transform_indices = @transform_3, window_bounds = array<i64: 2048, 512>}, {pipeline_mode = #tpu.pipeline_mode<synchronous>, transform_indices = @transform_4, window_bounds = array<i64: 1, 512>}, {pipeline_mode = #tpu.pipeline_mode<synchronous>, transform_indices = @transform_5, window_bounds = array<i64: 512, 128>}, {pipeline_mode = #tpu.pipeline_mode<synchronous>, transform_indices = @transform_6, window_bounds = array<i64: 1, 128>}, {pipeline_mode = #tpu.pipeline_mode<synchronous>, transform_indices = @transform_7, window_bounds = array<i64: 128, 128>}, {pipeline_mode = #tpu.pipeline_mode<synchronous>, transform_indices = @transform_8, window_bounds = array<i64: 1, 128>}, {transform_indices = @transform_9, window_bounds = array<i64: 32, 128>}]} {
    %c0 = arith.constant 0 : index
    %c0_0 = arith.constant 0 : index
    %0 = vector.load %arg1[%c0, %c0_0] : memref<32x512xf32, #tpu.memory_space<vmem>>, vector<32x512xf32>
    %1 = arith.truncf %0 : vector<32x512xf32> to vector<32x512xbf16>
    %c0_1 = arith.constant 0 : index
    %c0_2 = arith.constant 0 : index
    %2 = vector.load %arg2[%c0_1, %c0_2] : memref<512x2048xbf16, #tpu.memory_space<vmem>>, vector<512x2048xbf16>
    %cst = arith.constant dense<0.000000e+00> : vector<32x2048xf32>
    %3 = tpu.matmul %1, %2, %cst {dimension_numbers = #tpu.dot_dimension_numbers<[1], [0], [0], [1], [0, 0, 1, 1], [], []>} : vector<32x512xbf16>, vector<512x2048xbf16>, vector<32x2048xf32> -> vector<32x2048xf32>
    %c0_3 = arith.constant 0 : index
    %c0_4 = arith.constant 0 : index
    %4 = vector.load %arg3[%c0_3, %c0_4] : memref<1x2048xf32, #tpu.memory_space<vmem>>, vector<1x2048xf32>
    %5 = vector.broadcast %4 : vector<1x2048xf32> to vector<32x2048xf32>
    %6 = arith.addf %3, %5 : vector<32x2048xf32>
    %cst_5 = arith.constant 0.000000e+00 : f32
    %7 = vector.broadcast %cst_5 : f32 to vector<32x2048xf32>
    %8 = arith.maximumf %6, %7 : vector<32x2048xf32>
    %9 = arith.truncf %8 : vector<32x2048xf32> to vector<32x2048xbf16>
    %c0_6 = arith.constant 0 : index
    %c0_7 = arith.constant 0 : index
    %10 = vector.load %arg4[%c0_6, %c0_7] : memref<2048x512xbf16, #tpu.memory_space<vmem>>, vector<2048x512xbf16>
    %cst_8 = arith.constant dense<0.000000e+00> : vector<32x512xf32>
    %11 = tpu.matmul %9, %10, %cst_8 {dimension_numbers = #tpu.dot_dimension_numbers<[1], [0], [0], [1], [0, 0, 1, 1], [], []>} : vector<32x2048xbf16>, vector<2048x512xbf16>, vector<32x512xf32> -> vector<32x512xf32>
    %c0_9 = arith.constant 0 : index
    %c0_10 = arith.constant 0 : index
    %12 = vector.load %arg5[%c0_9, %c0_10] : memref<1x512xf32, #tpu.memory_space<vmem>>, vector<1x512xf32>
    %13 = vector.broadcast %12 : vector<1x512xf32> to vector<32x512xf32>
    %14 = arith.addf %11, %13 : vector<32x512xf32>
    %cst_11 = arith.constant 0.000000e+00 : f32
    %15 = vector.broadcast %cst_11 : f32 to vector<32x512xf32>
    %16 = arith.maximumf %14, %15 : vector<32x512xf32>
    %17 = arith.truncf %16 : vector<32x512xf32> to vector<32x512xbf16>
    %c0_12 = arith.constant 0 : index
    %c0_13 = arith.constant 0 : index
    %18 = vector.load %arg6[%c0_12, %c0_13] : memref<512x128xbf16, #tpu.memory_space<vmem>>, vector<512x128xbf16>
    %cst_14 = arith.constant dense<0.000000e+00> : vector<32x128xf32>
    %19 = tpu.matmul %17, %18, %cst_14 {dimension_numbers = #tpu.dot_dimension_numbers<[1], [0], [0], [1], [0, 0, 1, 1], [], []>} : vector<32x512xbf16>, vector<512x128xbf16>, vector<32x128xf32> -> vector<32x128xf32>
    %c0_15 = arith.constant 0 : index
    %c0_16 = arith.constant 0 : index
    %20 = vector.load %arg7[%c0_15, %c0_16] : memref<1x128xf32, #tpu.memory_space<vmem>>, vector<1x128xf32>
    %21 = vector.broadcast %20 : vector<1x128xf32> to vector<32x128xf32>
    %22 = arith.addf %19, %21 : vector<32x128xf32>
    %cst_17 = arith.constant 0.000000e+00 : f32
    %23 = vector.broadcast %cst_17 : f32 to vector<32x128xf32>
    %24 = arith.maximumf %22, %23 : vector<32x128xf32>
    %c0_18 = arith.constant 0 : index
    %c0_19 = arith.constant 0 : index
    %25 = vector.load %arg8[%c0_18, %c0_19] : memref<128x128xf32, #tpu.memory_space<vmem>>, vector<128x128xf32>
    %cst_20 = arith.constant dense<0.000000e+00> : vector<32x128xf32>
    %26 = tpu.matmul %24, %25, %cst_20 {dimension_numbers = #tpu.dot_dimension_numbers<[1], [0], [0], [1], [0, 0, 1, 1], [], []>} : vector<32x128xf32>, vector<128x128xf32>, vector<32x128xf32> -> vector<32x128xf32>
    %c0_21 = arith.constant 0 : index
    %c0_22 = arith.constant 0 : index
    %27 = vector.load %arg9[%c0_21, %c0_22] : memref<1x128xf32, #tpu.memory_space<vmem>>, vector<1x128xf32>
    %28 = vector.broadcast %27 : vector<1x128xf32> to vector<32x128xf32>
    %29 = arith.addf %26, %28 : vector<32x128xf32>
    %cst_23 = arith.constant dense<0xFF800000> : vector<32xf32>
    %30 = vector.multi_reduction <maximumf>, %29, %cst_23 [1] : vector<32x128xf32> to vector<32xf32>
    %31 = vector.shape_cast %30 : vector<32xf32> to vector<32x1xf32>
    %32 = vector.broadcast %31 : vector<32x1xf32> to vector<32x128xf32>
    %33 = arith.subf %29, %32 : vector<32x128xf32>
    %34 = math.exp %33 : vector<32x128xf32>
    %cst_24 = arith.constant dense<0.000000e+00> : vector<32xf32>
    %35 = vector.multi_reduction <add>, %34, %cst_24 [1] : vector<32x128xf32> to vector<32xf32>
    %36 = vector.shape_cast %35 : vector<32xf32> to vector<32x1xf32>
    %37 = math.log %36 : vector<32x1xf32>
    %38 = vector.broadcast %37 : vector<32x1xf32> to vector<32x128xf32>
    %39 = arith.subf %33, %38 : vector<32x128xf32>
    %c0_25 = arith.constant 0 : index
    %c0_26 = arith.constant 0 : index
    %40 = vector.load %arg10[%c0_25, %c0_26] : memref<32x128xf32, #tpu.memory_space<vmem>>, vector<32x128xf32>
    tpu.vector_store %arg10[%c0_25, %c0_26], %39 {strides = array<i32>} : memref<32x128xf32, #tpu.memory_space<vmem>>, vector<32x128xf32>,
    return
  }
  func.func @transform_0(%arg0: i32) -> (i32, i32) {
    %c0_i32 = arith.constant 0 : i32
    %c0_i32_0 = arith.constant 0 : i32
    return %arg0, %c0_i32 : i32, i32
  }
  func.func @transform_1(%arg0: i32) -> (i32, i32) {
    %c0_i32 = arith.constant 0 : i32
    %c0_i32_0 = arith.constant 0 : i32
    %c0_i32_1 = arith.constant 0 : i32
    return %c0_i32, %c0_i32_0 : i32, i32
  }
  func.func @transform_2(%arg0: i32) -> (i32, i32) {
    %c0_i32 = arith.constant 0 : i32
    %c0_i32_0 = arith.constant 0 : i32
    %c0_i32_1 = arith.constant 0 : i32
    return %c0_i32, %c0_i32_0 : i32, i32
  }
  func.func @transform_3(%arg0: i32) -> (i32, i32) {
    %c0_i32 = arith.constant 0 : i32
    %c0_i32_0 = arith.constant 0 : i32
    %c0_i32_1 = arith.constant 0 : i32
    return %c0_i32, %c0_i32_0 : i32, i32
  }
  func.func @transform_4(%arg0: i32) -> (i32, i32) {
    %c0_i32 = arith.constant 0 : i32
    %c0_i32_0 = arith.constant 0 : i32
    %c0_i32_1 = arith.constant 0 : i32
    return %c0_i32, %c0_i32_0 : i32, i32
  }
  func.func @transform_5(%arg0: i32) -> (i32, i32) {
    %c0_i32 = arith.constant 0 : i32
    %c0_i32_0 = arith.constant 0 : i32
    %c0_i32_1 = arith.constant 0 : i32
    return %c0_i32, %c0_i32_0 : i32, i32
  }
  func.func @transform_6(%arg0: i32) -> (i32, i32) {
    %c0_i32 = arith.constant 0 : i32
    %c0_i32_0 = arith.constant 0 : i32
    %c0_i32_1 = arith.constant 0 : i32
    return %c0_i32, %c0_i32_0 : i32, i32
  }
  func.func @transform_7(%arg0: i32) -> (i32, i32) {
    %c0_i32 = arith.constant 0 : i32
    %c0_i32_0 = arith.constant 0 : i32
    %c0_i32_1 = arith.constant 0 : i32
    return %c0_i32, %c0_i32_0 : i32, i32
  }
  func.func @transform_8(%arg0: i32) -> (i32, i32) {
    %c0_i32 = arith.constant 0 : i32
    %c0_i32_0 = arith.constant 0 : i32
    %c0_i32_1 = arith.constant 0 : i32
    return %c0_i32, %c0_i32_0 : i32, i32
  }
  func.func @transform_9(%arg0: i32) -> (i32, i32) {
    %c0_i32 = arith.constant 0 : i32
    %c0_i32_0 = arith.constant 0 : i32
    return %arg0, %c0_i32 : i32, i32
  }
}

</mosaic_0001>

<bundles_post_ra>
// kernel: tpu_custom_call.1
= control target key start
LH: loop header
LB: loop body
LE: loop exit
PB: predicated region body
PF: predicated region fallthrough
CT: control target
= control target key end

     0   :  { %14 = vsyncpa [#allocation3], 0  ;;  %s15978_s0 = inlined_call_operand.hbm [shape: f32[32,512], index: 0, kind: input, shape index: {}]   ;;  %s15979_s1 = inlined_call_operand.hbm [shape: bf16[512,2048], index: 1, kind: input, shape index: {}]   ;;  %s15980_s2 = inlined_call_operand.hbm [shape: f32[1,2048], index: 2, kind: input, shape index: {}]   ;;  %s15981_s3 = inlined_call_operand.hbm [shape: bf16[2048,512], index: 3, kind: input, shape index: {}]   ;;  %s15982_s4 = inlined_call_operand.hbm [shape: f32[1,512], index: 4, kind: input, shape index: {}]   ;;  %s15983_s5 = inlined_call_operand.hbm [shape: bf16[512,128], index: 5, kind: input, shape index: {}]   ;;  %s15984_s6 = inlined_call_operand.hbm [shape: f32[1,128], index: 6, kind: input, shape index: {}]   ;;  %s15985_s7 = inlined_call_operand.hbm [shape: f32[128,128], index: 7, kind: input, shape index: {}]   ;;  %s15986_s8 = inlined_call_operand.hbm [shape: f32[1,128], index: 8, kind: input, shape index: {}]   ;;  %s15987_s9 = inlined_call_operand.hbm [shape: f32[32,128], index: 9, kind: output, shape index: {}]  }
   0x1   :  { %15 = vsyncpa [#allocation6], 0 }
   0x2   :  { %16 = vsyncpa [#allocation9], 0 }
   0x3   :  { %17 = vsyncpa [#allocation12], 0 }
   0x4   :  { %18 = vsyncpa [#allocation15], 0  ;;  %s37_s11 = sshll.u32 %s15979_s1, 4  ;;  %s38_s11 = int_to_ptr.hbm [resolvable:$true] %s37_s11 }
   0x5   :  { %19 = vsyncpa [#allocation4], 0  ;;  %s15010_s12 = smov [#allocation5]   ;;  %s61_s16 = sshll.u32 %s15981_s3, 4  ;;  %s62_s16 = int_to_ptr.hbm [resolvable:$true] %s61_s16 }
   0x6   :  { %s39_s13 = sshll.u32 %s15010_s12, 4  ;;  %s15011_s17 = smov 1024   ;;  %s40_s13 = int_to_ptr.vmem [resolvable:$true] %s39_s13 }
   0x7   :  { %s15012_s18 = smov 64   ;;  %s15013_s19 = smov [#allocation8]  }
   0x8   :  { %45 = dma.hbm_to_vmem [thread:$0]  %s38_s11, 65536, %s40_s13, [#allocation6], %s15011_s17, %s15011_s17, %s15012_s18  }
   0x9   :  { %s63_s20 = sshll.u32 %s15013_s19, 4  ;;  %s15014_s21 = smov 256   ;;  %s64_s20 = int_to_ptr.vmem [resolvable:$true] %s63_s20 }
   0xa   :  { %s15015_s22 = smov 16   ;;  %s85_s24 = sshll.u32 %s15983_s5, 4  ;;  %s86_s24 = int_to_ptr.hbm [resolvable:$true] %s85_s24 }
   0xb   :  { %69 = dma.hbm_to_vmem [thread:$0]  %s62_s16, 65536, %s64_s20, [#allocation9], %s15014_s21, %s15014_s21, %s15015_s22  }
   0xc   :  { %s15016_s25 = smov [#allocation11]   ;;  %s15017_s27 = smov 4  }
   0xd   :  { %s87_s26 = sshll.u32 %s15016_s25, 4  ;;  %s109_s29 = sshll.u32 %s15985_s7, 4  ;;  %s88_s26 = int_to_ptr.vmem [resolvable:$true] %s87_s26  ;;  %s110_s29 = int_to_ptr.hbm [resolvable:$true] %s109_s29 }
   0xe   :  { %93 = dma.hbm_to_vmem [thread:$0]  %s86_s24, 4096, %s88_s26, [#allocation12], %s15012_s18, %s15012_s18, %s15017_s27  }
   0xf   :  { %s15018_s30 = smov [#allocation14]   ;;  %s24_s13 = sshll.u32 %s15978_s0, 4  ;;  %s25_s13 = int_to_ptr.hbm [resolvable:$true] %s24_s13 }
  0x10   :  { %s111_s10 = sshll.u32 %s15018_s30, 4  ;;  %s15019_s14 = smov 128   ;;  %s112_s10 = int_to_ptr.vmem [resolvable:$true] %s111_s10 }
  0x11   :  { %s15020_s5 = smov 8   ;;  %s15021_s15 = smov [#allocation2]  }
  0x12   :  { %117 = dma.hbm_to_vmem [thread:$0]  %s110_s29, 2048, %s112_s10, [#allocation15], %s15019_s14, %s15019_s14, %s15020_s5  }
  0x13   :  { %s26_s16 = sshll.u32 %s15021_s15, 4  ;;  %s15022_s17 = smov 512   ;;  %s27_s16 = int_to_ptr.vmem [resolvable:$true] %s26_s16 }
  0x14   :  { %s15023_s7 = smov 32   ;;  %s51_s20 = sshll.u32 %s15980_s2, 4  ;;  %s52_s20 = int_to_ptr.hbm [resolvable:$true] %s51_s20 }
  0x15   :  { %32 = dma.hbm_to_vmem [thread:$0]  %s25_s13, 2048, %s27_s16, [#allocation3], %s15022_s17, %s15022_s17, %s15023_s7  }
  0x16   :  { %s15024_s21 = smov [#allocation7]   ;;  %s75_s23 = sshll.u32 %s15982_s4, 4  ;;  %s76_s23 = int_to_ptr.hbm [resolvable:$true] %s75_s23 }
  0x17   :  { %s53_s0 = sshll.u32 %s15024_s21, 4  ;;  %s15025_s24 = smov [#allocation10]   ;;  %s54_s0 = int_to_ptr.vmem [resolvable:$true] %s53_s0 }
  0x18   :  { %56 = dma.hbm_to_vmem [thread:$0]  %s52_s20, 256, %s54_s0, [#allocation6]  }
  0x19   :  { %s77_s25 = sshll.u32 %s15025_s24, 4  ;;  %s99_s3 = sshll.u32 %s15984_s6, 4  ;;  %s78_s25 = int_to_ptr.vmem [resolvable:$true] %s77_s25  ;;  %s100_s3 = int_to_ptr.hbm [resolvable:$true] %s99_s3 }
  0x1a   :  { %80 = dma.hbm_to_vmem [thread:$0]  %s76_s23, 64, %s78_s25, [#allocation9]  }
  0x1b   :  { %s123_s29 = sshll.u32 %s15986_s8, 4  ;;  %s15026_s30 = smov [#allocation13]   ;;  %s124_s29 = int_to_ptr.hbm [resolvable:$true] %s123_s29 }
  0x1c   :  { %s101_s10 = sshll.u32 %s15026_s30, 4  ;;  %s15027_s4 = smov [#allocation16]   ;;  %s102_s10 = int_to_ptr.vmem [resolvable:$true] %s101_s10 }
  0x1d   :  { %104 = dma.hbm_to_vmem [thread:$0]  %s100_s3, 16, %s102_s10, [#allocation12]  }
  0x1e   :  { %s125_s11 = sshll.u32 %s15027_s4, 4  ;;  %s126_s11 = int_to_ptr.vmem [resolvable:$true] %s125_s11 }
  0x1f   :  { %128 = dma.hbm_to_vmem [thread:$0]  %s124_s29, 16, %s126_s11, [#allocation15]  }
  0x20   :  { %14998 = dma.done.wait [#allocation3], 2048  }
  0x21   :  { %14999 = vsyncadd [#allocation3], 4294965248 }
  0x22   :  { %15000 = dma.done.wait [#allocation6], 65792  }
  0x23   :  { %15001 = vsyncadd [#allocation6], 4294901504 }
  0x24   :  { %15002 = dma.done.wait [#allocation9], 65600  }
  0x25   :  { %15003 = vsyncadd [#allocation9], 4294901696 }
  0x26   :  { %15004 = dma.done.wait [#allocation12], 4112  }
  0x27   :  { %15005 = vsyncadd [#allocation12], 4294963184 }
  0x28   :  { %15006 = dma.done.wait [#allocation15], 2064  }
  0x29   :  { %15007 = vsyncadd [#allocation15], 4294965232  ;;  %v9837_v0 = vld [vmem:[#allocation5 + $0x380] sm:$0xf]  ;;  %s15028_s6 = smov [#allocation17]   ;;  %s9370_s15 = sshll.u32 %s15987_s9, 4  ;;  %s9371_s15 = int_to_ptr.hbm [resolvable:$true] %s9370_s15 }
  0x2a   :  { %v13731_v1 = vld [vmem:[#allocation5 + $0x3bc] sm:$0xf0]  ;;  %s9368_s8 = sshll.u32 %s15028_s6, 4  ;;  %s9369_s8 = int_to_ptr.vmem [resolvable:$true] %s9368_s8 }
  0x2b   :  { %v10349_v2 = vld [vmem:[#allocation5 + $0x780] sm:$0xf]  ;;  %v9838_v3 = vor.u32 %v13731_v1, %v9837_v0 }
  0x2c   :  { %v13859_v4 = vld [vmem:[#allocation5 + $0x7bc] sm:$0xf0] }
  0x2d   :  { %v10861_v5 = vld [vmem:[#allocation5 + $0xb80] sm:$0xf]  ;;  %v10350_v7 = vor.u32 %v13859_v4, %v10349_v2  ;;  %3297 = vmatpush.bf16.msra.mxu0 %v9838_v3 }
  0x2e   :  { %v13987_v6 = vld [vmem:[#allocation5 + $0xbbc] sm:$0xf0] }
  0x2f   :  { %v10862_v8 = vor.u32 %v13987_v6, %v10861_v5  ;;  %v11373_v9 = vld [vmem:[#allocation5 + $0xf80] sm:$0xf]  ;;  %3316 = vmatpush.bf16.msra.mxu1 %v10350_v7 }
  0x30   :  { %v14115_v10 = vld [vmem:[#allocation5 + $0xfbc] sm:$0xf0] }
  0x31   :  { %v9773_v11 = vld [vmem:[#allocation5 + $0x300] sm:$0xf]  ;;  %v11374_v12 = vor.u32 %v14115_v10, %v11373_v9  ;;  %3335 = vmatpush.bf16.msra.mxu2 %v10862_v8 }
  0x32   :  { %v13715_v13 = vld [vmem:[#allocation5 + $0x33c] sm:$0xf0] }
  0x33   :  { %v10285_v14 = vld [vmem:[#allocation5 + $0x700] sm:$0xf]  ;;  %v9774_v16 = vor.u32 %v13715_v13, %v9773_v11  ;;  %3354 = vmatpush.bf16.msra.mxu3 %v11374_v12 }
  0x34   :  { %v13843_v15 = vld [vmem:[#allocation5 + $0x73c] sm:$0xf0] }
  0x35   :  { %v10286_v17 = vor.u32 %v13843_v15, %v10285_v14  ;;  %v10797_v18 = vld [vmem:[#allocation5 + $0xb00] sm:$0xf]  ;;  %3298 = vmatpush.bf16.msra.mxu0 %v9774_v16 }
  0x36   :  { %v13971_v19 = vld [vmem:[#allocation5 + $0xb3c] sm:$0xf0] }
  0x37   :  { %v11309_v20 = vld [vmem:[#allocation5 + $0xf00] sm:$0xf]  ;;  %v10798_v21 = vor.u32 %v13971_v19, %v10797_v18  ;;  %3317 = vmatpush.bf16.msra.mxu1 %v10286_v17 }
  0x38   :  { %v14099_v22 = vld [vmem:[#allocation5 + $0xf3c] sm:$0xf0] }
  0x39   :  { %v9709_v23 = vld [vmem:[#allocation5 + $0x280] sm:$0xf]  ;;  %v11310_v25 = vor.u32 %v14099_v22, %v11309_v20  ;;  %3336 = vmatpush.bf16.msra.mxu2 %v10798_v21 }
  0x3a   :  { %v13699_v24 = vld [vmem:[#allocation5 + $0x2bc] sm:$0xf0] }
  0x3b   :  { %v10221_v26 = vld [vmem:[#allocation5 + $0x680] sm:$0xf]  ;;  %v9710_v29 = vor.u32 %v13699_v24, %v9709_v23  ;;  %3355 = vmatpush.bf16.msra.mxu3 %v11310_v25 }
  0x3c   :  { %v13827_v27 = vld [vmem:[#allocation5 + $0x6bc] sm:$0xf0] }
  0x3d   :  { %v10733_v28 = vld [vmem:[#allocation5 + $0xa80] sm:$0xf]  ;;  %v10222_v33 = vor.u32 %v13827_v27, %v10221_v26  ;;  %3299 = vmatpush.bf16.msra.mxu0 %v9710_v29 }
  0x3e   :  { %v13955_v30 = vld [vmem:[#allocation5 + $0xabc] sm:$0xf0] }
  0x3f   :  { %v11245_v31 = vld [vmem:[#allocation5 + $0xe80] sm:$0xf]  ;;  %v10734_v34 = vor.u32 %v13955_v30, %v10733_v28  ;;  %3318 = vmatpush.bf16.msra.mxu1 %v10222_v33  ;;  %v166_v30 = vld [vmem:[#allocation2 + $0x8] sm:$0xff]  ;;  %v10863_v33 = vld [vmem:[#allocation5 + $0xbc0] sm:$0xf0] }
  0x40   :  { %v14083_v32 = vld [vmem:[#allocation5 + $0xebc] sm:$0xf0] }
  0x41   :  { %v9645_v35 = vld [vmem:[#allocation5 + $0x200] sm:$0xf]  ;;  %v11246_v38 = vor.u32 %v14083_v32, %v11245_v31  ;;  %3337 = vmatpush.bf16.msra.mxu2 %v10734_v34  ;;  %v170_v31 = vld [vmem:[#allocation2 + $0x28] sm:$0xff]  ;;  %v13979_v32 = vld [vmem:[#allocation5 + $0xb84] sm:$0xf] }
  0x42   :  { %v13683_v36 = vld [vmem:[#allocation5 + $0x23c] sm:$0xf0] }
  0x43   :  { %v10157_v37 = vld [vmem:[#allocation5 + $0x600] sm:$0xf]  ;;  %v9646_v44 = vor.u32 %v13683_v36, %v9645_v35  ;;  %3356 = vmatpush.bf16.msra.mxu3 %v11246_v38  ;;  %v167_v35 = vld [vmem:[#allocation2 + $0x10] sm:$0xff]  ;;  %v13851_v36 = vld [vmem:[#allocation5 + $0x784] sm:$0xf] }
  0x44   :  { %v13811_v39 = vld [vmem:[#allocation5 + $0x63c] sm:$0xf0] }
  0x45   :  { %v10669_v40 = vld [vmem:[#allocation5 + $0xa00] sm:$0xf]  ;;  %v10158_v45 = vor.u32 %v13811_v39, %v10157_v37  ;;  %3300 = vmatpush.bf16.msra.mxu0 %v9646_v44  ;;  %v10351_v37 = vld [vmem:[#allocation5 + $0x7c0] sm:$0xf0]  ;;  %v10866_v44 = vor.u32 %v13979_v32, %v10863_v33  ;;  %v175_v32 = vld [vmem:[#allocation2 + $0x50] sm:$0xff] }
  0x46   :  { %v13939_v41 = vld [vmem:[#allocation5 + $0xa3c] sm:$0xf0]  ;;  %v13787_v33 = vld [vmem:[#allocation5 + $0x584] sm:$0xf] }
  0x47   :  { %v11181_v42 = vld [vmem:[#allocation5 + $0xe00] sm:$0xf]  ;;  %v10670_v46 = vor.u32 %v13939_v41, %v10669_v40  ;;  %3319 = vmatpush.bf16.msra.mxu1 %v10158_v45  ;;  %v171_v40 = vld [vmem:[#allocation2 + $0x30] sm:$0xff]  ;;  %v168_v41 = vld [vmem:[#allocation2 + $0x18] sm:$0xff] }
  0x48   :  { %v14067_v43 = vld [vmem:[#allocation5 + $0xe3c] sm:$0xf0]  ;;  %v13723_v45 = vld [vmem:[#allocation5 + $0x384] sm:$0xf] }
  0x49   :  { %v9581_v47 = vld [vmem:[#allocation5 + $0x180] sm:$0xf]  ;;  %v11182_v50 = vor.u32 %v14067_v43, %v11181_v42  ;;  %3338 = vmatpush.bf16.msra.mxu2 %v10670_v46  ;;  %v172_v42 = vld [vmem:[#allocation2 + $0x38] sm:$0xff]  ;;  %v9839_v46 = vld [vmem:[#allocation5 + $0x3c0] sm:$0xf0] }
  0x4a   :  { %v13667_v48 = vld [vmem:[#allocation5 + $0x1bc] sm:$0xf0] }
  0x4b   :  { %v10093_v49 = vld [vmem:[#allocation5 + $0x580] sm:$0xf]  ;;  %v9582_v56 = vor.u32 %v13667_v48, %v9581_v47  ;;  %3357 = vmatpush.bf16.msra.mxu3 %v11182_v50  ;;  %v14107_v47 = vld [vmem:[#allocation5 + $0xf84] sm:$0xf] }
  0x4c   :  { %v13795_v51 = vld [vmem:[#allocation5 + $0x5bc] sm:$0xf0]  ;;  %v11375_v50 = vld [vmem:[#allocation5 + $0xfc0] sm:$0xf0] }
  0x4d   :  { %v10605_v52 = vld [vmem:[#allocation5 + $0x980] sm:$0xf]  ;;  %v10094_v57 = vor.u32 %v13795_v51, %v10093_v49  ;;  %3301 = vmatpush.bf16.msra.mxu0 %v9582_v56  ;;  %v10354_v49 = vor.u32 %v13851_v36, %v10351_v37  ;;  %v13963_v51 = vld [vmem:[#allocation5 + $0xb04] sm:$0xf]  ;;  %v179_v36 = vld [vmem:[#allocation2 + $0x70] sm:$0xff] }
  0x4e   :  { %v13923_v53 = vld [vmem:[#allocation5 + $0x9bc] sm:$0xf0]  ;;  %v10287_v56 = vld [vmem:[#allocation5 + $0x740] sm:$0xf0]  ;;  %v176_v37 = vld [vmem:[#allocation2 + $0x58] sm:$0xff] }
  0x4f   :  { %v11117_v54 = vld [vmem:[#allocation5 + $0xd80] sm:$0xf]  ;;  %v10606_v58 = vor.u32 %v13923_v53, %v10605_v52  ;;  %3320 = vmatpush.bf16.msra.mxu1 %v10094_v57  ;;  %v10799_v52 = vld [vmem:[#allocation5 + $0xb40] sm:$0xf0]  ;;  %v15111_v53 = vpack.c.bf16 %v170_v31, %v166_v30  ;;  %v15115_v57 = vpack.c.bf16 %v172_v42, %v168_v41 }
  0x50   :  { %v14051_v55 = vld [vmem:[#allocation5 + $0xdbc] sm:$0xf0]  ;;  %v13915_v30 = vld [vmem:[#allocation5 + $0x984] sm:$0xf] }
  0x51   :  { %v9517_v59 = vld [vmem:[#allocation5 + $0x100] sm:$0xf]  ;;  %v11118_v62 = vor.u32 %v14051_v55, %v11117_v54  ;;  %3339 = vmatpush.bf16.msra.mxu2 %v10606_v58  ;;  %v15113_v54 = vpack.c.bf16 %v171_v40, %v167_v35  ;;  %v13835_v55 = vld [vmem:[#allocation5 + $0x704] sm:$0xf]  ;;  %v9842_v58 = vor.u32 %v13723_v45, %v9839_v46 }
  0x52   :  { %v13651_v60 = vld [vmem:[#allocation5 + $0x13c] sm:$0xf0]  ;;  %v10607_v31 = vld [vmem:[#allocation5 + $0x9c0] sm:$0xf0] }
  0x53   :  { %v10029_v61 = vld [vmem:[#allocation5 + $0x500] sm:$0xf]  ;;  %v9518_v4 = vor.u32 %v13651_v60, %v9517_v59  ;;  %3358 = vmatpush.bf16.msra.mxu3 %v11118_v62  ;;  %v11378_v59 = vor.u32 %v14107_v47, %v11375_v50  ;;  %v10802_v60 = vor.u32 %v13963_v51, %v10799_v52  ;;  %v9775_v62 = vld [vmem:[#allocation5 + $0x340] sm:$0xf0]  ;;  %v10610_v40 = vor.u32 %v13915_v30, %v10607_v31  ;;  %v9845_v31 = vld [vmem:[#allocation5 + $0x388] sm:$0xf] }
  0x54   :  { %v13779_v63 = vld [vmem:[#allocation5 + $0x53c] sm:$0xf0]  ;;  %v13659_v41 = vld [vmem:[#allocation5 + $0x184] sm:$0xf]  ;;  %v15125_v51 = vpack.c.bf16 %v179_v36, %v175_v32  ;;  %v13732_v32 = vld [vmem:[#allocation5 + $0x3c4] sm:$0xf0] }
  0x55   :  { %v10541_v0 = vld [vmem:[#allocation5 + $0x900] sm:$0xf]  ;;  %v10030_v5 = vor.u32 %v13779_v63, %v10029_v61  ;;  %3302 = vmatpush.bf16.msra.mxu0 %v9518_v4  ;;  %v13707_v61 = vld [vmem:[#allocation5 + $0x304] sm:$0xf]  ;;  %v10805_v36 = vld [vmem:[#allocation5 + $0xb08] sm:$0xf] }
  0x56   :  { %v13907_v1 = vld [vmem:[#allocation5 + $0x93c] sm:$0xf0]  ;;  %v14091_v63 = vld [vmem:[#allocation5 + $0xf04] sm:$0xf] }
  0x57   :  { %v11053_v2 = vld [vmem:[#allocation5 + $0xd00] sm:$0xf]  ;;  %v10542_v6 = vor.u32 %v13907_v1, %v10541_v0  ;;  %3321 = vmatpush.bf16.msra.mxu1 %v10030_v5  ;;  %v10290_v0 = vor.u32 %v13835_v55, %v10287_v56  ;;  %v11311_v1 = vld [vmem:[#allocation5 + $0xf40] sm:$0xf0] }
  0x58   :  { %v14035_v3 = vld [vmem:[#allocation5 + $0xd3c] sm:$0xf0]  ;;  %v13819_v4 = vld [vmem:[#allocation5 + $0x684] sm:$0xf] }
  0x59   :  { %v9453_v7 = vld [vmem:[#allocation5 + $0x80] sm:$0xf]  ;;  %v11054_v10 = vor.u32 %v14035_v3, %v11053_v2  ;;  %3340 = vmatpush.bf16.msra.mxu2 %v10542_v6  ;;  %v13947_v2 = vld [vmem:[#allocation5 + $0xa84] sm:$0xf]  ;;  %v9778_v6 = vor.u32 %v13707_v61, %v9775_v62 }
  0x5a   :  { %v13635_v8 = vld [vmem:[#allocation5 + $0xbc] sm:$0xf0]  ;;  %v10735_v3 = vld [vmem:[#allocation5 + $0xac0] sm:$0xf0] }
  0x5b   :  { %v9965_v9 = vld [vmem:[#allocation5 + $0x480] sm:$0xf]  ;;  %v9454_v17 = vor.u32 %v13635_v8, %v9453_v7  ;;  %3359 = vmatpush.bf16.msra.mxu3 %v11054_v10  ;;  %v10223_v5 = vld [vmem:[#allocation5 + $0x6c0] sm:$0xf0]  ;;  %v11314_v7 = vor.u32 %v14091_v63, %v11311_v1  ;;  %v10738_v8 = vor.u32 %v13947_v2, %v10735_v3 }
  0x5c   :  { %v13763_v11 = vld [vmem:[#allocation5 + $0x4bc] sm:$0xf0]  ;;  %v9711_v10 = vld [vmem:[#allocation5 + $0x2c0] sm:$0xf0] }
  0x5d   :  { %v10477_v12 = vld [vmem:[#allocation5 + $0x880] sm:$0xf]  ;;  %v9966_v21 = vor.u32 %v13763_v11, %v9965_v9  ;;  %3303 = vmatpush.bf16.msra.mxu0 %v9454_v17  ;;  %v13691_v9 = vld [vmem:[#allocation5 + $0x284] sm:$0xf] }
  0x5e   :  { %v13891_v13 = vld [vmem:[#allocation5 + $0x8bc] sm:$0xf0]  ;;  %v14075_v11 = vld [vmem:[#allocation5 + $0xe84] sm:$0xf] }
  0x5f   :  { %v10989_v14 = vld [vmem:[#allocation5 + $0xc80] sm:$0xf]  ;;  %v10478_v22 = vor.u32 %v13891_v13, %v10477_v12  ;;  %3322 = vmatpush.bf16.msra.mxu1 %v9966_v21  ;;  %v10226_v12 = vor.u32 %v13819_v4, %v10223_v5  ;;  %v11247_v13 = vld [vmem:[#allocation5 + $0xec0] sm:$0xf0] }
  0x60   :  { %v14019_v15 = vld [vmem:[#allocation5 + $0xcbc] sm:$0xf0]  ;;  %v10159_v17 = vld [vmem:[#allocation5 + $0x640] sm:$0xf0] }
  0x61   :  { %v9389_v16 = vld [vmem:[#allocation5] sm:$0xf]  ;;  %v10990_v26 = vor.u32 %v14019_v15, %v10989_v14  ;;  %3341 = vmatpush.bf16.msra.mxu2 %v10478_v22  ;;  %v13931_v14 = vld [vmem:[#allocation5 + $0xa04] sm:$0xf]  ;;  %v11250_v22 = vor.u32 %v14075_v11, %v11247_v13 }
  0x62   :  { %v13619_v18 = vld [vmem:[#allocation5 + $0x3c] sm:$0xf0]  ;;  %v10671_v15 = vld [vmem:[#allocation5 + $0xa40] sm:$0xf0] }
  0x63   :  { %v9901_v19 = vld [vmem:[#allocation5 + $0x400] sm:$0xf]  ;;  %v9390_v34 = vor.u32 %v13619_v18, %v9389_v16  ;;  %3360 = vmatpush.bf16.msra.mxu3 %v10990_v26  ;;  %v13803_v16 = vld [vmem:[#allocation5 + $0x604] sm:$0xf]  ;;  %v9714_v18 = vor.u32 %v13691_v9, %v9711_v10 }
  0x64   :  { %v13747_v20 = vld [vmem:[#allocation5 + $0x43c] sm:$0xf0]  ;;  %v14059_v21 = vld [vmem:[#allocation5 + $0xe04] sm:$0xf] }
  0x65   :  { %v10413_v23 = vld [vmem:[#allocation5 + $0x800] sm:$0xf]  ;;  %v9902_v38 = vor.u32 %v13747_v20, %v9901_v19  ;;  %3304 = vmatpush.bf16.msra.mxu0 %v9390_v34  ;;  %v13675_v19 = vld [vmem:[#allocation5 + $0x204] sm:$0xf] }
  0x66   :  { %v13875_v24 = vld [vmem:[#allocation5 + $0x83c] sm:$0xf0]  ;;  %v9647_v20 = vld [vmem:[#allocation5 + $0x240] sm:$0xf0] }
  0x67   :  { %v10925_v25 = vld [vmem:[#allocation5 + $0xc00] sm:$0xf]  ;;  %v10414_v39 = vor.u32 %v13875_v24, %v10413_v23  ;;  %3323 = vmatpush.bf16.msra.mxu1 %v9902_v38  ;;  %v10674_v23 = vor.u32 %v13931_v14, %v10671_v15  ;;  %v11183_v24 = vld [vmem:[#allocation5 + $0xe40] sm:$0xf0]  ;;  %v9650_v35 = vor.u32 %v13675_v19, %v9647_v20  ;;  %v180_v38 = vld [vmem:[#allocation2 + $0x78] sm:$0xff] }
  0x68   :  { %v14003_v27 = vld [vmem:[#allocation5 + $0xc3c] sm:$0xf0]  ;;  %v10095_v34 = vld [vmem:[#allocation5 + $0x5c0] sm:$0xf0]  ;;  %v15127_v56 = vpack.c.bf16 %v180_v38, %v176_v37  ;;  %v13988_v19 = vld [vmem:[#allocation5 + $0xbc4] sm:$0xf0] }
  0x69   :  { %v165_v28 = vld [vmem:[#allocation2] sm:$0xff]  ;;  %v10926_v43 = vor.u32 %v14003_v27, %v10925_v25  ;;  %3342 = vmatpush.bf16.msra.mxu2 %v10414_v39  ;;  %3373 = vmatpush.bf16.msrb.mxu0 %v9842_v58  ;;  %v10162_v27 = vor.u32 %v13803_v16, %v10159_v17  ;;  %v11186_v39 = vor.u32 %v14059_v21, %v11183_v24  ;;  %v13972_v37 = vld [vmem:[#allocation5 + $0xb44] sm:$0xf0] }
  0x6a   :  { %v169_v29 = vld [vmem:[#allocation2 + $0x20] sm:$0xff]  ;;  %3324 = vmatmul.bf16.vlgmr.msra.gmra.mxu1 %v15111_v53  ;;  %v10098_v45 = vor.u32 %v13787_v33, %v10095_v34  ;;  %v11381_v33 = vld [vmem:[#allocation5 + $0xf88] sm:$0xf] }
  0x6b   :  { %v15109_v48 = vpack.c.bf16 %v169_v29, %v165_v28  ;;  %3361 = vmatpush.bf16.msra.mxu3 %v10926_v43  ;;  %3392 = vmatpush.bf16.msrb.mxu1 %v10354_v49  ;;  %v173_v25 = vld [vmem:[#allocation2 + $0x40] sm:$0xff]  ;;  %v174_v28 = vld [vmem:[#allocation2 + $0x48] sm:$0xff] }
  0x6c   :  { %3343 = vmatmul.bf16.vlgmr.msra.gmra.mxu2 %v15113_v54  ;;  %v177_v26 = vld [vmem:[#allocation2 + $0x60] sm:$0xff]  ;;  %v178_v29 = vld [vmem:[#allocation2 + $0x68] sm:$0xff] }
  0x6d   :  { %3411 = vmatpush.bf16.msrb.mxu2 %v10866_v44  ;;  %3305 = vmatmul.bf16.vlgmr.msra.gmra.mxu0 %v15109_v48  ;;  %v9583_v42 = vld [vmem:[#allocation5 + $0x1c0] sm:$0xf0]  ;;  %v15121_v44 = vpack.c.bf16 %v177_v26, %v173_v25  ;;  %v15123_v50 = vpack.c.bf16 %v178_v29, %v174_v28 }
  0x6e   :  { %3362 = vmatmul.bf16.vlgmr.msra.gmra.mxu3 %v15115_v57  ;;  %3374 = vmatpush.bf16.msrb.mxu0 %v9778_v6  ;;  %v14043_v43 = vld [vmem:[#allocation5 + $0xd84] sm:$0xf]  ;;  %v9586_v58 = vor.u32 %v13659_v41, %v9583_v42  ;;  %v9781_v41 = vld [vmem:[#allocation5 + $0x308] sm:$0xf] }
  0x6f   :  { %3430 = vmatpush.bf16.msrb.mxu3 %v11378_v59  ;;  %3393 = vmatpush.bf16.msrb.mxu1 %v10290_v0  ;;  %v11119_v46 = vld [vmem:[#allocation5 + $0xdc0] sm:$0xf0]  ;;  %v13716_v42 = vld [vmem:[#allocation5 + $0x344] sm:$0xf0] }
  0x70   :  { %v13899_v47 = vld [vmem:[#allocation5 + $0x904] sm:$0xf]  ;;  %v11122_v59 = vor.u32 %v14043_v43, %v11119_v46  ;;  %v10293_v46 = vld [vmem:[#allocation5 + $0x708] sm:$0xf] }
  0x71   :  { %3412 = vmatpush.bf16.msrb.mxu2 %v10802_v60  ;;  %v10543_v49 = vld [vmem:[#allocation5 + $0x940] sm:$0xf0] }
  0x72   :  { %3375 = vmatpush.bf16.msrb.mxu0 %v9714_v18  ;;  %v13771_v52 = vld [vmem:[#allocation5 + $0x504] sm:$0xf]  ;;  %v10546_v60 = vor.u32 %v13899_v47, %v10543_v49  ;;  %v10869_v18 = vld [vmem:[#allocation5 + $0xb88] sm:$0xf] }
  0x73   :  { %3431 = vmatpush.bf16.msrb.mxu3 %v11314_v7  ;;  %3394 = vmatpush.bf16.msrb.mxu1 %v10226_v12  ;;  %v10031_v55 = vld [vmem:[#allocation5 + $0x540] sm:$0xf0]  ;;  %v10870_v30 = vor.u32 %v13988_v19, %v10869_v18  ;;  %v13844_v47 = vld [vmem:[#allocation5 + $0x744] sm:$0xf0] }
  0x74   :  { %v13643_v61 = vld [vmem:[#allocation5 + $0x104] sm:$0xf]  ;;  %v10034_v0 = vor.u32 %v13771_v52, %v10031_v55  ;;  %v11317_v49 = vld [vmem:[#allocation5 + $0xf08] sm:$0xf] }
  0x75   :  { %3413 = vmatpush.bf16.msrb.mxu2 %v10738_v8  ;;  %v9519_v62 = vld [vmem:[#allocation5 + $0x140] sm:$0xf0]  ;;  %v14100_v52 = vld [vmem:[#allocation5 + $0xf44] sm:$0xf0] }
  0x76   :  { %3376 = vmatpush.bf16.msrb.mxu0 %v9650_v35  ;;  %v14027_v63 = vld [vmem:[#allocation5 + $0xd04] sm:$0xf]  ;;  %v9522_v6 = vor.u32 %v13643_v61, %v9519_v62  ;;  %v14116_v35 = vld [vmem:[#allocation5 + $0xfc4] sm:$0xf0] }
  0x77   :  { %3432 = vmatpush.bf16.msrb.mxu3 %v11250_v22  ;;  %3395 = vmatpush.bf16.msrb.mxu1 %v10162_v27  ;;  %v11055_v1 = vld [vmem:[#allocation5 + $0xd40] sm:$0xf0]  ;;  %v10357_v22 = vld [vmem:[#allocation5 + $0x788] sm:$0xf]  ;;  %v11382_v43 = vor.u32 %v14116_v35, %v11381_v33 }
  0x78   :  { %v13883_v2 = vld [vmem:[#allocation5 + $0x884] sm:$0xf]  ;;  %v11058_v8 = vor.u32 %v14027_v63, %v11055_v1  ;;  %v10741_v55 = vld [vmem:[#allocation5 + $0xa88] sm:$0xf]  ;;  %v11318_v63 = vor.u32 %v14100_v52, %v11317_v49 }
  0x79   :  { %3414 = vmatpush.bf16.msrb.mxu2 %v10674_v23  ;;  %v10479_v3 = vld [vmem:[#allocation5 + $0x8c0] sm:$0xf0]  ;;  %v13860_v23 = vld [vmem:[#allocation5 + $0x7c4] sm:$0xf0] }
  0x7a   :  { %3329 = vmatmul.bf16.gmra.mxu1 %v15123_v50  ;;  %v13755_v4 = vld [vmem:[#allocation5 + $0x484] sm:$0xf]  ;;  %3377 = vmatpush.bf16.msrb.mxu0 %v9586_v58  ;;  %v10482_v9 = vor.u32 %v13883_v2, %v10479_v3  ;;  %v10358_v34 = vor.u32 %v13860_v23, %v10357_v22  ;;  %v13956_v58 = vld [vmem:[#allocation5 + $0xac4] sm:$0xf0] }
  0x7b   :  { %3433 = vmatpush.bf16.msrb.mxu3 %v11186_v39  ;;  %3396 = vmatpush.bf16.msrb.mxu1 %v10098_v45  ;;  %v9967_v5 = vld [vmem:[#allocation5 + $0x4c0] sm:$0xf0]  ;;  %v10806_v45 = vor.u32 %v13972_v37, %v10805_v36  ;;  %v9717_v61 = vld [vmem:[#allocation5 + $0x288] sm:$0xf] }
  0x7c   :  { %3348 = vmatmul.bf16.gmra.mxu2 %v15125_v51  ;;  %v13627_v7 = vld [vmem:[#allocation5 + $0x84] sm:$0xf]  ;;  %v9970_v13 = vor.u32 %v13755_v4, %v9967_v5  ;;  %v13700_v62 = vld [vmem:[#allocation5 + $0x2c4] sm:$0xf0] }
  0x7d   :  { %3415 = vmatpush.bf16.msrb.mxu2 %v10610_v40  ;;  %3310 = vmatmul.bf16.gmra.mxu0 %v15121_v44  ;;  %v9455_v10 = vld [vmem:[#allocation5 + $0xc0] sm:$0xf0]  ;;  %v9846_v40 = vor.u32 %v13732_v32, %v9845_v31  ;;  %v10229_v1 = vld [vmem:[#allocation5 + $0x688] sm:$0xf] }
  0x7e   :  { %3367 = vmatmul.bf16.gmra.mxu3 %v15127_v56  ;;  %v14011_v11 = vld [vmem:[#allocation5 + $0xc84] sm:$0xf]  ;;  %3378 = vmatpush.bf16.msrb.mxu0 %v9522_v6  ;;  %v9458_v20 = vor.u32 %v13627_v7, %v9455_v10  ;;  %v13828_v2 = vld [vmem:[#allocation5 + $0x6c4] sm:$0xf0]  ;;  %v9718_v7 = vor.u32 %v13700_v62, %v9717_v61 }
  0x7f   :  { %3434 = vmatpush.bf16.msrb.mxu3 %v11122_v59  ;;  %v10991_v12 = vld [vmem:[#allocation5 + $0xcc0] sm:$0xf0]  ;;  %3397 = vmatpush.bf16.msrb.mxu1 %v10034_v0  ;;  %v9782_v59 = vor.u32 %v13716_v42, %v9781_v41  ;;  %v10742_v0 = vor.u32 %v13956_v58, %v10741_v55  ;;  %v11253_v3 = vld [vmem:[#allocation5 + $0xe88] sm:$0xf] }
  0x80   :  { %v13867_v14 = vld [vmem:[#allocation5 + $0x804] sm:$0xf]  ;;  %v10994_v24 = vor.u32 %v14011_v11, %v10991_v12  ;;  %v14084_v4 = vld [vmem:[#allocation5 + $0xec4] sm:$0xf0] }
  0x81   :  { %3416 = vmatpush.bf16.msrb.mxu2 %v10546_v60  ;;  %v10415_v15 = vld [vmem:[#allocation5 + $0x840] sm:$0xf0]  ;;  %v10294_v60 = vor.u32 %v13844_v47, %v10293_v46  ;;  %v10677_v5 = vld [vmem:[#allocation5 + $0xa08] sm:$0xf]  ;;  %v11254_v11 = vor.u32 %v14084_v4, %v11253_v3 }
  0x82   :  { %v13739_v16 = vld [vmem:[#allocation5 + $0x404] sm:$0xf]  ;;  %v10418_v25 = vor.u32 %v13867_v14, %v10415_v15  ;;  %3379 = vmatpush.bf16.msrb.mxu0 %v9458_v20  ;;  %v13940_v6 = vld [vmem:[#allocation5 + $0xa44] sm:$0xf0] }
  0x83   :  { %v9903_v17 = vld [vmem:[#allocation5 + $0x440] sm:$0xf0]  ;;  %3435 = vmatpush.bf16.msrb.mxu3 %v11058_v8  ;;  %3398 = vmatpush.bf16.msrb.mxu1 %v9970_v13  ;;  %v10230_v8 = vor.u32 %v13828_v2, %v10229_v1  ;;  %v13684_v10 = vld [vmem:[#allocation5 + $0x244] sm:$0xf0]  ;;  %v10678_v12 = vor.u32 %v13940_v6, %v10677_v5 }
  0x84   :  { %v13611_v21 = vld [vmem:[#allocation5 + $0x4] sm:$0xf]  ;;  %v9906_v29 = vor.u32 %v13739_v16, %v9903_v17  ;;  %v10165_v13 = vld [vmem:[#allocation5 + $0x608] sm:$0xf] }
  0x85   :  { %3417 = vmatpush.bf16.msrb.mxu2 %v10482_v9  ;;  %v9391_v26 = vld [vmem:[#allocation5 + $0x40] sm:$0xf0]  ;;  %v9653_v9 = vld [vmem:[#allocation5 + $0x208] sm:$0xf] }
  0x86   :  { %v13995_v27 = vld [vmem:[#allocation5 + $0xc04] sm:$0xf]  ;;  %v9394_v38 = vor.u32 %v13611_v21, %v9391_v26  ;;  %v13812_v14 = vld [vmem:[#allocation5 + $0x644] sm:$0xf0]  ;;  %v9654_v19 = vor.u32 %v13684_v10, %v9653_v9 }
  0x87   :  { %v10927_v28 = vld [vmem:[#allocation5 + $0xc40] sm:$0xf0]  ;;  %3436 = vmatpush.bf16.msrb.mxu3 %v10994_v24  ;;  %3399 = vmatpush.bf16.msrb.mxu1 %v9906_v29  ;;  %v11189_v15 = vld [vmem:[#allocation5 + $0xe08] sm:$0xf]  ;;  %v10166_v20 = vor.u32 %v13812_v14, %v10165_v13  ;;  %v9847_v13 = vld [vmem:[#allocation5 + $0x3c8] sm:$0xf0] }
  0x88   :  { %v10930_v39 = vor.u32 %v13995_v27, %v10927_v28  ;;  %3380 = vmatpush.bf16.msrb.mxu0 %v9394_v38  ;;  %v14068_v16 = vld [vmem:[#allocation5 + $0xe44] sm:$0xf0]  ;;  %v13852_v14 = vld [vmem:[#allocation5 + $0x78c] sm:$0xf] }
  0x89   :  { %3418 = vmatpush.bf16.msrb.mxu2 %v10418_v25  ;;  %v10613_v17 = vld [vmem:[#allocation5 + $0x988] sm:$0xf]  ;;  %v11190_v23 = vor.u32 %v14068_v16, %v11189_v15  ;;  %v10359_v15 = vld [vmem:[#allocation5 + $0x7c8] sm:$0xf0] }
  0x8a   :  { %3400 = vmatmul.bf16.vlgmr.msrb.gmra.mxu1 %v15111_v53  ;;  %v13924_v18 = vld [vmem:[#allocation5 + $0x9c4] sm:$0xf0]  ;;  %v14108_v16 = vld [vmem:[#allocation5 + $0xf8c] sm:$0xf] }
  0x8b   :  { %3468 = vmatpush.bf16.msra.mxu1 %v10358_v34  ;;  %3437 = vmatpush.bf16.msrb.mxu3 %v10930_v39  ;;  %v9589_v21 = vld [vmem:[#allocation5 + $0x188] sm:$0xf]  ;;  %v10614_v24 = vor.u32 %v13924_v18, %v10613_v17  ;;  %v11383_v17 = vld [vmem:[#allocation5 + $0xfc8] sm:$0xf0] }
  0x8c   :  { %3449 = vmatpush.bf16.msra.mxu0 %v9846_v40  ;;  %3419 = vmatmul.bf16.vlgmr.msrb.gmra.mxu2 %v15113_v54  ;;  %v13668_v22 = vld [vmem:[#allocation5 + $0x1c4] sm:$0xf0] }
  0x8d   :  { %3487 = vmatpush.bf16.msra.mxu2 %v10870_v30  ;;  %3381 = vmatmul.bf16.vlgmr.msrb.gmra.mxu0 %v15109_v48  ;;  %v10101_v25 = vld [vmem:[#allocation5 + $0x588] sm:$0xf]  ;;  %v9590_v31 = vor.u32 %v13668_v22, %v9589_v21  ;;  %v10807_v21 = vld [vmem:[#allocation5 + $0xb48] sm:$0xf0] }
  0x8e   :  { %3438 = vmatmul.bf16.vlgmr.msrb.gmra.mxu3 %v15115_v57  ;;  %v13796_v26 = vld [vmem:[#allocation5 + $0x5c4] sm:$0xf0] }
  0x8f   :  { %3506 = vmatpush.bf16.msra.mxu3 %v11382_v43  ;;  %3469 = vmatpush.bf16.msra.mxu1 %v10294_v60  ;;  %v11125_v27 = vld [vmem:[#allocation5 + $0xd88] sm:$0xf]  ;;  %v10102_v32 = vor.u32 %v13796_v26, %v10101_v25  ;;  %v11386_v25 = vor.u32 %v14108_v16, %v11383_v17  ;;  %v13708_v26 = vld [vmem:[#allocation5 + $0x30c] sm:$0xf] }
  0x90   :  { %3450 = vmatpush.bf16.msra.mxu0 %v9782_v59  ;;  %v14052_v28 = vld [vmem:[#allocation5 + $0xdc4] sm:$0xf0]  ;;  %v13644_v16 = vld [vmem:[#allocation5 + $0x10c] sm:$0xf] }
  0x91   :  { %3488 = vmatpush.bf16.msra.mxu2 %v10806_v45  ;;  %v10549_v29 = vld [vmem:[#allocation5 + $0x908] sm:$0xf]  ;;  %v11126_v35 = vor.u32 %v14052_v28, %v11125_v27  ;;  %v9783_v27 = vld [vmem:[#allocation5 + $0x348] sm:$0xf0] }
  0x92   :  { %v13908_v30 = vld [vmem:[#allocation5 + $0x944] sm:$0xf0]  ;;  %v9527_v17 = vld [vmem:[#allocation5 + $0x148] sm:$0xf0] }
  0x93   :  { %3507 = vmatpush.bf16.msra.mxu3 %v11318_v63  ;;  %3470 = vmatpush.bf16.msra.mxu1 %v10230_v8  ;;  %v9525_v33 = vld [vmem:[#allocation5 + $0x108] sm:$0xf]  ;;  %v10550_v36 = vor.u32 %v13908_v30, %v10549_v29  ;;  %v13980_v63 = vld [vmem:[#allocation5 + $0xb8c] sm:$0xf] }
  0x94   :  { %3451 = vmatpush.bf16.msra.mxu0 %v9718_v7  ;;  %v13652_v34 = vld [vmem:[#allocation5 + $0x144] sm:$0xf0]  ;;  %v13836_v29 = vld [vmem:[#allocation5 + $0x70c] sm:$0xf] }
  0x95   :  { %3489 = vmatpush.bf16.msra.mxu2 %v10742_v0  ;;  %v10037_v37 = vld [vmem:[#allocation5 + $0x508] sm:$0xf]  ;;  %v9526_v43 = vor.u32 %v13652_v34, %v9525_v33  ;;  %v10871_v0 = vld [vmem:[#allocation5 + $0xbc8] sm:$0xf0] }
  0x96   :  { %v13780_v38 = vld [vmem:[#allocation5 + $0x544] sm:$0xf0]  ;;  %v10295_v30 = vld [vmem:[#allocation5 + $0x748] sm:$0xf0] }
  0x97   :  { %3508 = vmatpush.bf16.msra.mxu3 %v11254_v11  ;;  %3471 = vmatpush.bf16.msra.mxu1 %v10166_v20  ;;  %v11061_v39 = vld [vmem:[#allocation5 + $0xd08] sm:$0xf]  ;;  %v10038_v45 = vor.u32 %v13780_v38, %v10037_v37  ;;  %v10874_v11 = vor.u32 %v13980_v63, %v10871_v0  ;;  %v13964_v20 = vld [vmem:[#allocation5 + $0xb0c] sm:$0xf]  ;;  %v10298_v38 = vor.u32 %v13836_v29, %v10295_v30 }
  0x98   :  { %3452 = vmatpush.bf16.msra.mxu0 %v9654_v19  ;;  %v14036_v40 = vld [vmem:[#allocation5 + $0xd44] sm:$0xf0]  ;;  %v10810_v28 = vor.u32 %v13964_v20, %v10807_v21  ;;  %v11319_v33 = vld [vmem:[#allocation5 + $0xf48] sm:$0xf0] }
  0x99   :  { %3490 = vmatpush.bf16.msra.mxu2 %v10678_v12  ;;  %v10485_v41 = vld [vmem:[#allocation5 + $0x888] sm:$0xf]  ;;  %v11062_v49 = vor.u32 %v14036_v40, %v11061_v39  ;;  %v13724_v12 = vld [vmem:[#allocation5 + $0x38c] sm:$0xf] }
  0x9a   :  { %v13892_v42 = vld [vmem:[#allocation5 + $0x8c4] sm:$0xf0]  ;;  %3405 = vmatmul.bf16.gmra.mxu1 %v15123_v50  ;;  %v13948_v34 = vld [vmem:[#allocation5 + $0xa8c] sm:$0xf] }
  0x9b   :  { %3509 = vmatpush.bf16.msra.mxu3 %v11190_v23  ;;  %3472 = vmatpush.bf16.msra.mxu1 %v10102_v32  ;;  %v9461_v46 = vld [vmem:[#allocation5 + $0x88] sm:$0xf]  ;;  %v10486_v52 = vor.u32 %v13892_v42, %v10485_v41  ;;  %v9850_v23 = vor.u32 %v13724_v12, %v9847_v13  ;;  %v14092_v32 = vld [vmem:[#allocation5 + $0xf0c] sm:$0xf] }
  0x9c   :  { %3453 = vmatpush.bf16.msra.mxu0 %v9590_v31  ;;  %v13636_v47 = vld [vmem:[#allocation5 + $0xc4] sm:$0xf0]  ;;  %3424 = vmatmul.bf16.gmra.mxu2 %v15125_v51  ;;  %v9786_v31 = vor.u32 %v13708_v26, %v9783_v27  ;;  %v9719_v37 = vld [vmem:[#allocation5 + $0x2c8] sm:$0xf0]  ;;  %v11322_v39 = vor.u32 %v14092_v32, %v11319_v33 }
  0x9d   :  { %3491 = vmatpush.bf16.msra.mxu2 %v10614_v24  ;;  %v9973_v55 = vld [vmem:[#allocation5 + $0x488] sm:$0xf]  ;;  %3386 = vmatmul.bf16.gmra.mxu0 %v15121_v44  ;;  %v9462_v1 = vor.u32 %v13636_v47, %v9461_v46  ;;  %v10362_v24 = vor.u32 %v13852_v14, %v10359_v15  ;;  %v13820_v40 = vld [vmem:[#allocation5 + $0x68c] sm:$0xf] }
  0x9e   :  { %v13764_v58 = vld [vmem:[#allocation5 + $0x4c4] sm:$0xf0]  ;;  %3443 = vmatmul.bf16.gmra.mxu3 %v15127_v56  ;;  %v10231_v41 = vld [vmem:[#allocation5 + $0x6c8] sm:$0xf0] }
  0x9f   :  { %3510 = vmatpush.bf16.msra.mxu3 %v11126_v35  ;;  %v10997_v59 = vld [vmem:[#allocation5 + $0xc88] sm:$0xf]  ;;  %3473 = vmatpush.bf16.msra.mxu1 %v10038_v45  ;;  %v9974_v2 = vor.u32 %v13764_v58, %v9973_v55  ;;  %v10743_v35 = vld [vmem:[#allocation5 + $0xac8] sm:$0xf0]  ;;  %v10234_v58 = vor.u32 %v13820_v40, %v10231_v41 }
  0xa0   :  { %v14020_v60 = vld [vmem:[#allocation5 + $0xcc4] sm:$0xf0]  ;;  %3454 = vmatpush.bf16.msra.mxu0 %v9526_v43  ;;  %v10746_v42 = vor.u32 %v13948_v34, %v10743_v35  ;;  %v14076_v45 = vld [vmem:[#allocation5 + $0xe8c] sm:$0xf] }
  0xa1   :  { %3492 = vmatpush.bf16.msra.mxu2 %v10550_v36  ;;  %v10421_v61 = vld [vmem:[#allocation5 + $0x808] sm:$0xf]  ;;  %v10998_v6 = vor.u32 %v14020_v60, %v10997_v59  ;;  %v13692_v36 = vld [vmem:[#allocation5 + $0x28c] sm:$0xf] }
  0xa2   :  { %v13876_v62 = vld [vmem:[#allocation5 + $0x844] sm:$0xf0]  ;;  %v9722_v43 = vor.u32 %v13692_v36, %v9719_v37  ;;  %v11255_v46 = vld [vmem:[#allocation5 + $0xec8] sm:$0xf0] }
  0xa3   :  { %v9397_v3 = vld [vmem:[#allocation5 + $0x8] sm:$0xf]  ;;  %3511 = vmatpush.bf16.msra.mxu3 %v11062_v49  ;;  %v10422_v7 = vor.u32 %v13876_v62, %v10421_v61  ;;  %3474 = vmatpush.bf16.msra.mxu1 %v9974_v2  ;;  %v13932_v47 = vld [vmem:[#allocation5 + $0xa0c] sm:$0xf]  ;;  %v11258_v59 = vor.u32 %v14076_v45, %v11255_v46  ;;  %v9853_v45 = vld [vmem:[#allocation5 + $0x390] sm:$0xf] }
  0xa4   :  { %v13620_v4 = vld [vmem:[#allocation5 + $0x44] sm:$0xf0]  ;;  %3455 = vmatpush.bf16.msra.mxu0 %v9462_v1  ;;  %v10679_v49 = vld [vmem:[#allocation5 + $0xa48] sm:$0xf0]  ;;  %v13733_v46 = vld [vmem:[#allocation5 + $0x3cc] sm:$0xf0] }
  0xa5   :  { %v9909_v5 = vld [vmem:[#allocation5 + $0x408] sm:$0xf]  ;;  %3493 = vmatpush.bf16.msra.mxu2 %v10486_v52  ;;  %v9398_v18 = vor.u32 %v13620_v4, %v9397_v3  ;;  %v13676_v52 = vld [vmem:[#allocation5 + $0x20c] sm:$0xf]  ;;  %v10682_v62 = vor.u32 %v13932_v47, %v10679_v49 }
  0xa6   :  { %v13748_v8 = vld [vmem:[#allocation5 + $0x444] sm:$0xf0]  ;;  %v9655_v55 = vld [vmem:[#allocation5 + $0x248] sm:$0xf0] }
  0xa7   :  { %v10933_v9 = vld [vmem:[#allocation5 + $0xc08] sm:$0xf]  ;;  %v9910_v19 = vor.u32 %v13748_v8, %v9909_v5  ;;  %3512 = vmatpush.bf16.msra.mxu3 %v10998_v6  ;;  %v13804_v60 = vld [vmem:[#allocation5 + $0x60c] sm:$0xf]  ;;  %v9658_v63 = vor.u32 %v13676_v52, %v9655_v55 }
  0xa8   :  { %v14004_v10 = vld [vmem:[#allocation5 + $0xc44] sm:$0xf0]  ;;  %3456 = vmatpush.bf16.msra.mxu0 %v9398_v18  ;;  %v10167_v61 = vld [vmem:[#allocation5 + $0x648] sm:$0xf0] }
  0xa9   :  { %3494 = vmatpush.bf16.msra.mxu2 %v10422_v7  ;;  %v10934_v22 = vor.u32 %v14004_v10, %v10933_v9  ;;  %3475 = vmatpush.bf16.msra.mxu1 %v9910_v19  ;;  %v14060_v0 = vld [vmem:[#allocation5 + $0xe0c] sm:$0xf]  ;;  %v10170_v6 = vor.u32 %v13804_v60, %v10167_v61 }
  0xaa   :  { %v11191_v1 = vld [vmem:[#allocation5 + $0xe48] sm:$0xf0] }
  0xab   :  { %3513 = vmatpush.bf16.msra.mxu3 %v10934_v22  ;;  %v13916_v2 = vld [vmem:[#allocation5 + $0x98c] sm:$0xf]  ;;  %v11194_v7 = vor.u32 %v14060_v0, %v11191_v1  ;;  %v9854_v1 = vor.u32 %v13733_v46, %v9853_v45 }
  0xac   :  { %3525 = vmatpush.bf16.msrb.mxu0 %v9850_v23  ;;  %3476 = vmatmul.bf16.vlgmr.msra.gmra.mxu1 %v15111_v53  ;;  %v10615_v3 = vld [vmem:[#allocation5 + $0x9c8] sm:$0xf0]  ;;  %v9530_v23 = vor.u32 %v13644_v16, %v9527_v17  ;;  %v11325_v16 = vld [vmem:[#allocation5 + $0xf10] sm:$0xf] }
  0xad   :  { %3563 = vmatpush.bf16.msrb.mxu2 %v10874_v11  ;;  %3544 = vmatpush.bf16.msrb.mxu1 %v10362_v24  ;;  %v13660_v4 = vld [vmem:[#allocation5 + $0x18c] sm:$0xf]  ;;  %v10618_v10 = vor.u32 %v13916_v2, %v10615_v3  ;;  %v11389_v2 = vld [vmem:[#allocation5 + $0xf90] sm:$0xf] }
  0xae   :  { %3457 = vmatmul.bf16.vlgmr.msra.gmra.mxu0 %v15109_v48  ;;  %3495 = vmatmul.bf16.vlgmr.msra.gmra.mxu2 %v15113_v54  ;;  %v9591_v5 = vld [vmem:[#allocation5 + $0x1c8] sm:$0xf0]  ;;  %v14117_v3 = vld [vmem:[#allocation5 + $0xfcc] sm:$0xf0] }
  0xaf   :  { %3582 = vmatpush.bf16.msrb.mxu3 %v11386_v25  ;;  %v13788_v8 = vld [vmem:[#allocation5 + $0x58c] sm:$0xf]  ;;  %v9594_v11 = vor.u32 %v13660_v4, %v9591_v5  ;;  %v10813_v4 = vld [vmem:[#allocation5 + $0xb10] sm:$0xf] }
  0xb0   :  { %3526 = vmatpush.bf16.msrb.mxu0 %v9786_v31  ;;  %3514 = vmatmul.bf16.vlgmr.msra.gmra.mxu3 %v15115_v57  ;;  %v10103_v9 = vld [vmem:[#allocation5 + $0x5c8] sm:$0xf0]  ;;  %v13973_v5 = vld [vmem:[#allocation5 + $0xb4c] sm:$0xf0] }
  0xb1   :  { %3564 = vmatpush.bf16.msrb.mxu2 %v10810_v28  ;;  %3545 = vmatpush.bf16.msrb.mxu1 %v10298_v38  ;;  %v14044_v12 = vld [vmem:[#allocation5 + $0xd8c] sm:$0xf]  ;;  %v10106_v18 = vor.u32 %v13788_v8, %v10103_v9  ;;  %v14101_v17 = vld [vmem:[#allocation5 + $0xf4c] sm:$0xf0] }
  0xb2   :  { %v11127_v13 = vld [vmem:[#allocation5 + $0xdc8] sm:$0xf0] }
  0xb3   :  { %3583 = vmatpush.bf16.msrb.mxu3 %v11322_v39  ;;  %v13900_v14 = vld [vmem:[#allocation5 + $0x90c] sm:$0xf]  ;;  %v11130_v19 = vor.u32 %v14044_v12, %v11127_v13  ;;  %v10301_v12 = vld [vmem:[#allocation5 + $0x710] sm:$0xf]  ;;  %v10814_v13 = vor.u32 %v13973_v5, %v10813_v4 }
  0xb4   :  { %3527 = vmatpush.bf16.msrb.mxu0 %v9722_v43  ;;  %v10551_v15 = vld [vmem:[#allocation5 + $0x948] sm:$0xf0]  ;;  %v13989_v43 = vld [vmem:[#allocation5 + $0xbcc] sm:$0xf0] }
  0xb5   :  { %3565 = vmatpush.bf16.msrb.mxu2 %v10746_v42  ;;  %3546 = vmatpush.bf16.msrb.mxu1 %v10234_v58  ;;  %v13772_v20 = vld [vmem:[#allocation5 + $0x50c] sm:$0xf]  ;;  %v10554_v22 = vor.u32 %v13900_v14, %v10551_v15  ;;  %v10877_v42 = vld [vmem:[#allocation5 + $0xb90] sm:$0xf] }
  0xb6   :  { %v10039_v21 = vld [vmem:[#allocation5 + $0x548] sm:$0xf0]  ;;  %v10878_v0 = vor.u32 %v13989_v43, %v10877_v42  ;;  %v13845_v15 = vld [vmem:[#allocation5 + $0x74c] sm:$0xf0] }
  0xb7   :  { %3584 = vmatpush.bf16.msrb.mxu3 %v11258_v59  ;;  %v14028_v24 = vld [vmem:[#allocation5 + $0xd0c] sm:$0xf]  ;;  %v10042_v30 = vor.u32 %v13772_v20, %v10039_v21  ;;  %v10302_v20 = vor.u32 %v13845_v15, %v10301_v12  ;;  %v11326_v21 = vor.u32 %v14101_v17, %v11325_v16  ;;  %v10621_v42 = vld [vmem:[#allocation5 + $0x990] sm:$0xf] }
  0xb8   :  { %3528 = vmatpush.bf16.msrb.mxu0 %v9658_v63  ;;  %v11063_v25 = vld [vmem:[#allocation5 + $0xd48] sm:$0xf0]  ;;  %v13861_v63 = vld [vmem:[#allocation5 + $0x7cc] sm:$0xf0] }
  0xb9   :  { %3566 = vmatpush.bf16.msrb.mxu2 %v10682_v62  ;;  %3547 = vmatpush.bf16.msrb.mxu1 %v10170_v6  ;;  %v13884_v26 = vld [vmem:[#allocation5 + $0x88c] sm:$0xf]  ;;  %v11066_v31 = vor.u32 %v14028_v24, %v11063_v25  ;;  %v10365_v62 = vld [vmem:[#allocation5 + $0x790] sm:$0xf] }
  0xba   :  { %v10487_v27 = vld [vmem:[#allocation5 + $0x8c8] sm:$0xf0]  ;;  %v9789_v6 = vld [vmem:[#allocation5 + $0x310] sm:$0xf] }
  0xbb   :  { %3585 = vmatpush.bf16.msrb.mxu3 %v11194_v7  ;;  %v13628_v28 = vld [vmem:[#allocation5 + $0x8c] sm:$0xf]  ;;  %v10490_v35 = vor.u32 %v13884_v26, %v10487_v27  ;;  %v13717_v7 = vld [vmem:[#allocation5 + $0x34c] sm:$0xf0] }
  0xbc   :  { %3529 = vmatpush.bf16.msrb.mxu0 %v9594_v11  ;;  %v9463_v29 = vld [vmem:[#allocation5 + $0xc8] sm:$0xf0]  ;;  %3481 = vmatmul.bf16.gmra.mxu1 %v15123_v50  ;;  %v11390_v11 = vor.u32 %v14117_v3, %v11389_v2  ;;  %v9790_v14 = vor.u32 %v13717_v7, %v9789_v6  ;;  %v10237_v24 = vld [vmem:[#allocation5 + $0x690] sm:$0xf] }
  0xbd   :  { %3567 = vmatpush.bf16.msrb.mxu2 %v10618_v10  ;;  %3548 = vmatpush.bf16.msrb.mxu1 %v10106_v18  ;;  %v13756_v32 = vld [vmem:[#allocation5 + $0x48c] sm:$0xf]  ;;  %v9466_v36 = vor.u32 %v13628_v28, %v9463_v29  ;;  %v10366_v10 = vor.u32 %v13861_v63, %v10365_v62  ;;  %v10749_v18 = vld [vmem:[#allocation5 + $0xa90] sm:$0xf] }
  0xbe   :  { %v9975_v33 = vld [vmem:[#allocation5 + $0x4c8] sm:$0xf0]  ;;  %3462 = vmatmul.bf16.gmra.mxu0 %v15121_v44  ;;  %3500 = vmatmul.bf16.gmra.mxu2 %v15125_v51  ;;  %v13829_v25 = vld [vmem:[#allocation5 + $0x6cc] sm:$0xf0] }
  0xbf   :  { %3586 = vmatpush.bf16.msrb.mxu3 %v11130_v19  ;;  %v14012_v34 = vld [vmem:[#allocation5 + $0xc8c] sm:$0xf]  ;;  %v9978_v47 = vor.u32 %v13756_v32, %v9975_v33  ;;  %v13957_v19 = vld [vmem:[#allocation5 + $0xacc] sm:$0xf0]  ;;  %v10238_v32 = vor.u32 %v13829_v25, %v10237_v24 }
  0xc0   :  { %3530 = vmatpush.bf16.msrb.mxu0 %v9530_v23  ;;  %v10999_v37 = vld [vmem:[#allocation5 + $0xcc8] sm:$0xf0]  ;;  %3519 = vmatmul.bf16.gmra.mxu3 %v15127_v56  ;;  %v13701_v23 = vld [vmem:[#allocation5 + $0x2cc] sm:$0xf0]  ;;  %v10750_v28 = vor.u32 %v13957_v19, %v10749_v18 }
  0xc1   :  { %3568 = vmatpush.bf16.msrb.mxu2 %v10554_v22  ;;  %v13868_v38 = vld [vmem:[#allocation5 + $0x80c] sm:$0xf]  ;;  %3549 = vmatpush.bf16.msrb.mxu1 %v10042_v30  ;;  %v11002_v49 = vor.u32 %v14012_v34, %v10999_v37  ;;  %v9725_v22 = vld [vmem:[#allocation5 + $0x290] sm:$0xf] }
  0xc2   :  { %v10423_v39 = vld [vmem:[#allocation5 + $0x848] sm:$0xf0]  ;;  %v11261_v26 = vld [vmem:[#allocation5 + $0xe90] sm:$0xf]  ;;  %v9726_v29 = vor.u32 %v13701_v23, %v9725_v22 }
  0xc3   :  { %v13612_v40 = vld [vmem:[#allocation5 + $0xc] sm:$0xf]  ;;  %3587 = vmatpush.bf16.msrb.mxu3 %v11066_v31  ;;  %v10426_v59 = vor.u32 %v13868_v38, %v10423_v39  ;;  %v14085_v27 = vld [vmem:[#allocation5 + $0xecc] sm:$0xf0] }
  0xc4   :  { %v9399_v41 = vld [vmem:[#allocation5 + $0x48] sm:$0xf0]  ;;  %3531 = vmatpush.bf16.msrb.mxu0 %v9466_v36  ;;  %v10685_v30 = vld [vmem:[#allocation5 + $0xa10] sm:$0xf]  ;;  %v11262_v33 = vor.u32 %v14085_v27, %v11261_v26 }
  0xc5   :  { %v13740_v52 = vld [vmem:[#allocation5 + $0x40c] sm:$0xf]  ;;  %3569 = vmatpush.bf16.msrb.mxu2 %v10490_v35  ;;  %v9402_v60 = vor.u32 %v13612_v40, %v9399_v41  ;;  %3550 = vmatpush.bf16.msrb.mxu1 %v9978_v47  ;;  %v13941_v31 = vld [vmem:[#allocation5 + $0xa4c] sm:$0xf0] }
  0xc6   :  { %v9911_v55 = vld [vmem:[#allocation5 + $0x448] sm:$0xf0]  ;;  %v9661_v34 = vld [vmem:[#allocation5 + $0x210] sm:$0xf]  ;;  %v10686_v40 = vor.u32 %v13941_v31, %v10685_v30 }
  0xc7   :  { %v13996_v58 = vld [vmem:[#allocation5 + $0xc0c] sm:$0xf]  ;;  %3588 = vmatpush.bf16.msrb.mxu3 %v11002_v49  ;;  %v9914_v8 = vor.u32 %v13740_v52, %v9911_v55  ;;  %v13685_v35 = vld [vmem:[#allocation5 + $0x24c] sm:$0xf0] }
  0xc8   :  { %v10935_v61 = vld [vmem:[#allocation5 + $0xc48] sm:$0xf0]  ;;  %3532 = vmatpush.bf16.msrb.mxu0 %v9402_v60  ;;  %v10173_v36 = vld [vmem:[#allocation5 + $0x610] sm:$0xf]  ;;  %v9662_v41 = vor.u32 %v13685_v35, %v9661_v34  ;;  %v13725_v34 = vld [vmem:[#allocation5 + $0x394] sm:$0xf] }
  0xc9   :  { %v10938_v9 = vor.u32 %v13996_v58, %v10935_v61  ;;  %3570 = vmatpush.bf16.msrb.mxu2 %v10426_v59  ;;  %3551 = vmatpush.bf16.msrb.mxu1 %v9914_v8  ;;  %v13813_v37 = vld [vmem:[#allocation5 + $0x64c] sm:$0xf0]  ;;  %v9855_v35 = vld [vmem:[#allocation5 + $0x3d0] sm:$0xf0] }
  0xca   :  { %v11197_v38 = vld [vmem:[#allocation5 + $0xe10] sm:$0xf]  ;;  %v10174_v45 = vor.u32 %v13813_v37, %v10173_v36  ;;  %v13853_v36 = vld [vmem:[#allocation5 + $0x794] sm:$0xf] }
  0xcb   :  { %3589 = vmatpush.bf16.msrb.mxu3 %v10938_v9  ;;  %v14069_v39 = vld [vmem:[#allocation5 + $0xe4c] sm:$0xf0] }
  0xcc   :  { %3601 = vmatpush.bf16.msra.mxu0 %v9854_v1  ;;  %3552 = vmatmul.bf16.vlgmr.msrb.gmra.mxu1 %v15111_v53  ;;  %v13925_v43 = vld [vmem:[#allocation5 + $0x9cc] sm:$0xf0]  ;;  %v11198_v46 = vor.u32 %v14069_v39, %v11197_v38  ;;  %v10367_v39 = vld [vmem:[#allocation5 + $0x7d0] sm:$0xf0] }
  0xcd   :  { %3639 = vmatpush.bf16.msra.mxu2 %v10878_v0  ;;  %3620 = vmatpush.bf16.msra.mxu1 %v10366_v10  ;;  %v9597_v47 = vld [vmem:[#allocation5 + $0x190] sm:$0xf]  ;;  %v10622_v60 = vor.u32 %v13925_v43, %v10621_v42 }
  0xce   :  { %3533 = vmatmul.bf16.vlgmr.msrb.gmra.mxu0 %v15109_v48  ;;  %3571 = vmatmul.bf16.vlgmr.msrb.gmra.mxu2 %v15113_v54  ;;  %v13669_v49 = vld [vmem:[#allocation5 + $0x1cc] sm:$0xf0] }
  0xcf   :  { %3658 = vmatpush.bf16.msra.mxu3 %v11390_v11  ;;  %v10109_v52 = vld [vmem:[#allocation5 + $0x590] sm:$0xf]  ;;  %v9598_v61 = vor.u32 %v13669_v49, %v9597_v47  ;;  %v9858_v47 = vor.u32 %v13725_v34, %v9855_v35  ;;  %v13965_v49 = vld [vmem:[#allocation5 + $0xb14] sm:$0xf] }
  0xd0   :  { %3602 = vmatpush.bf16.msra.mxu0 %v9790_v14  ;;  %3590 = vmatmul.bf16.vlgmr.msrb.gmra.mxu3 %v15115_v57  ;;  %v13797_v55 = vld [vmem:[#allocation5 + $0x5cc] sm:$0xf0] }
  0xd1   :  { %3640 = vmatpush.bf16.msra.mxu2 %v10814_v13  ;;  %3621 = vmatpush.bf16.msra.mxu1 %v10302_v20  ;;  %v11133_v58 = vld [vmem:[#allocation5 + $0xd90] sm:$0xf]  ;;  %v10110_v0 = vor.u32 %v13797_v55, %v10109_v52  ;;  %v10815_v52 = vld [vmem:[#allocation5 + $0xb50] sm:$0xf0]  ;;  %v10370_v55 = vor.u32 %v13853_v36, %v10367_v39 }
  0xd2   :  { %v14053_v59 = vld [vmem:[#allocation5 + $0xdcc] sm:$0xf0]  ;;  %v13789_v39 = vld [vmem:[#allocation5 + $0x594] sm:$0xf] }
  0xd3   :  { %3659 = vmatpush.bf16.msra.mxu3 %v11326_v21  ;;  %v10557_v62 = vld [vmem:[#allocation5 + $0x910] sm:$0xf]  ;;  %v11134_v1 = vor.u32 %v14053_v59, %v11133_v58  ;;  %v13709_v59 = vld [vmem:[#allocation5 + $0x314] sm:$0xf] }
  0xd4   :  { %3603 = vmatpush.bf16.msra.mxu0 %v9726_v29  ;;  %v13909_v63 = vld [vmem:[#allocation5 + $0x94c] sm:$0xf0] }
  0xd5   :  { %3641 = vmatpush.bf16.msra.mxu2 %v10750_v28  ;;  %3622 = vmatpush.bf16.msra.mxu1 %v10238_v32  ;;  %v9533_v2 = vld [vmem:[#allocation5 + $0x110] sm:$0xf]  ;;  %v10558_v8 = vor.u32 %v13909_v63, %v10557_v62  ;;  %v13981_v32 = vld [vmem:[#allocation5 + $0xb94] sm:$0xf] }
  0xd6   :  { %v13653_v3 = vld [vmem:[#allocation5 + $0x14c] sm:$0xf0]  ;;  %v10303_v62 = vld [vmem:[#allocation5 + $0x750] sm:$0xf0] }
  0xd7   :  { %3660 = vmatpush.bf16.msra.mxu3 %v11262_v33  ;;  %v10045_v4 = vld [vmem:[#allocation5 + $0x510] sm:$0xf]  ;;  %v9534_v9 = vor.u32 %v13653_v3, %v9533_v2  ;;  %v10879_v33 = vld [vmem:[#allocation5 + $0xbd0] sm:$0xf0] }
  0xd8   :  { %3604 = vmatpush.bf16.msra.mxu0 %v9662_v41  ;;  %v13781_v5 = vld [vmem:[#allocation5 + $0x54c] sm:$0xf0]  ;;  %v11391_v41 = vld [vmem:[#allocation5 + $0xfd0] sm:$0xf0] }
  0xd9   :  { %3642 = vmatpush.bf16.msra.mxu2 %v10686_v40  ;;  %3623 = vmatpush.bf16.msra.mxu1 %v10174_v45  ;;  %v11069_v6 = vld [vmem:[#allocation5 + $0xd10] sm:$0xf]  ;;  %v10046_v12 = vor.u32 %v13781_v5, %v10045_v4  ;;  %v14109_v40 = vld [vmem:[#allocation5 + $0xf94] sm:$0xf]  ;;  %v15157_v45 = vld [vmem:[#allocation7] sm:$0xff] }
  0xda   :  { %v14037_v7 = vld [vmem:[#allocation5 + $0xd4c] sm:$0xf0]  ;;  %v11394_v58 = vor.u32 %v14109_v40, %v11391_v41  ;;  %v14093_v63 = vld [vmem:[#allocation5 + $0xf14] sm:$0xf]  ;;  %v15160_v3 = vperm.slane %v15157_v45, 0 }
  0xdb   :  { %3661 = vmatpush.bf16.msra.mxu3 %v11198_v46  ;;  %v10493_v10 = vld [vmem:[#allocation5 + $0x890] sm:$0xf]  ;;  %v11070_v13 = vor.u32 %v14037_v7, %v11069_v6  ;;  %v10882_v46 = vor.u32 %v13981_v32, %v10879_v33  ;;  %v13949_v6 = vld [vmem:[#allocation5 + $0xa94] sm:$0xf] }
  0xdc   :  { %3605 = vmatpush.bf16.msra.mxu0 %v9598_v61  ;;  %v13893_v11 = vld [vmem:[#allocation5 + $0x8cc] sm:$0xf0]  ;;  %3557 = vmatmul.bf16.gmra.mxu1 %v15123_v50  ;;  %v13837_v61 = vld [vmem:[#allocation5 + $0x714] sm:$0xf] }
  0xdd   :  { %3643 = vmatpush.bf16.msra.mxu2 %v10622_v60  ;;  %3624 = vmatpush.bf16.msra.mxu1 %v10110_v0  ;;  %v9469_v14 = vld [vmem:[#allocation5 + $0x90] sm:$0xf]  ;;  %v10494_v21 = vor.u32 %v13893_v11, %v10493_v10  ;;  %v9791_v60 = vld [vmem:[#allocation5 + $0x350] sm:$0xf0]  ;;  %v10306_v4 = vor.u32 %v13837_v61, %v10303_v62 }
  0xde   :  { %v13637_v15 = vld [vmem:[#allocation5 + $0xcc] sm:$0xf0]  ;;  %3538 = vmatmul.bf16.gmra.mxu0 %v15121_v44  ;;  %3576 = vmatmul.bf16.gmra.mxu2 %v15125_v51  ;;  %v11327_v0 = vld [vmem:[#allocation5 + $0xf50] sm:$0xf0]  ;;  %v9794_v2 = vor.u32 %v13709_v59, %v9791_v60 }
  0xdf   :  { %3662 = vmatpush.bf16.msra.mxu3 %v11134_v1  ;;  %v9981_v16 = vld [vmem:[#allocation5 + $0x490] sm:$0xf]  ;;  %v9470_v22 = vor.u32 %v13637_v15, %v9469_v14  ;;  %v10818_v1 = vor.u32 %v13965_v49, %v10815_v52  ;;  %v11330_v5 = vor.u32 %v14093_v63, %v11327_v0  ;;  %v10751_v7 = vld [vmem:[#allocation5 + $0xad0] sm:$0xf0] }
  0xe0   :  { %v13765_v17 = vld [vmem:[#allocation5 + $0x4cc] sm:$0xf0]  ;;  %3606 = vmatpush.bf16.msra.mxu0 %v9534_v9  ;;  %3595 = vmatmul.bf16.gmra.mxu3 %v15127_v56  ;;  %v9727_v9 = vld [vmem:[#allocation5 + $0x2d0] sm:$0xf0] }
  0xe1   :  { %v11005_v18 = vld [vmem:[#allocation5 + $0xc90] sm:$0xf]  ;;  %3644 = vmatpush.bf16.msra.mxu2 %v10558_v8  ;;  %3625 = vmatpush.bf16.msra.mxu1 %v10046_v12  ;;  %v9982_v26 = vor.u32 %v13765_v17, %v9981_v16  ;;  %v13693_v8 = vld [vmem:[#allocation5 + $0x294] sm:$0xf]  ;;  %v10754_v17 = vor.u32 %v13949_v6, %v10751_v7 }
  0xe2   :  { %v14021_v19 = vld [vmem:[#allocation5 + $0xccc] sm:$0xf0]  ;;  %v13821_v10 = vld [vmem:[#allocation5 + $0x694] sm:$0xf] }
  0xe3   :  { %v10429_v20 = vld [vmem:[#allocation5 + $0x810] sm:$0xf]  ;;  %3663 = vmatpush.bf16.msra.mxu3 %v11070_v13  ;;  %v11006_v27 = vor.u32 %v14021_v19, %v11005_v18  ;;  %v10239_v12 = vld [vmem:[#allocation5 + $0x6d0] sm:$0xf0]  ;;  %v9730_v18 = vor.u32 %v13693_v8, %v9727_v9 }
  0xe4   :  { %v13877_v23 = vld [vmem:[#allocation5 + $0x84c] sm:$0xf0]  ;;  %3607 = vmatpush.bf16.msra.mxu0 %v9470_v22  ;;  %v14077_v13 = vld [vmem:[#allocation5 + $0xe94] sm:$0xf]  ;;  %v10242_v22 = vor.u32 %v13821_v10, %v10239_v12 }
  0xe5   :  { %v9405_v24 = vld [vmem:[#allocation5 + $0x10] sm:$0xf]  ;;  %3645 = vmatpush.bf16.msra.mxu2 %v10494_v21  ;;  %v10430_v37 = vor.u32 %v13877_v23, %v10429_v20  ;;  %3626 = vmatpush.bf16.msra.mxu1 %v9982_v26  ;;  %v11263_v14 = vld [vmem:[#allocation5 + $0xed0] sm:$0xf0] }
  0xe6   :  { %v13621_v25 = vld [vmem:[#allocation5 + $0x4c] sm:$0xf0]  ;;  %v13933_v19 = vld [vmem:[#allocation5 + $0xa14] sm:$0xf]  ;;  %v11266_v23 = vor.u32 %v14077_v13, %v11263_v14 }
  0xe7   :  { %v9917_v28 = vld [vmem:[#allocation5 + $0x410] sm:$0xf]  ;;  %v9406_v38 = vor.u32 %v13621_v25, %v9405_v24  ;;  %3664 = vmatpush.bf16.msra.mxu3 %v11006_v27  ;;  %v3325_v16 = vpop.f32.mrf.mxu1  ;;  %v10687_v20 = vld [vmem:[#allocation5 + $0xa50] sm:$0xf0] }
  0xe8   :  { %v13749_v29 = vld [vmem:[#allocation5 + $0x44c] sm:$0xf0]  ;;  %v13677_v24 = vld [vmem:[#allocation5 + $0x214] sm:$0xf] }
  0xe9   :  { %v10941_v30 = vld [vmem:[#allocation5 + $0xc10] sm:$0xf]  ;;  %v9918_v42 = vor.u32 %v13749_v29, %v9917_v28  ;;  %3646 = vmatpush.bf16.msra.mxu2 %v10430_v37  ;;  %3608 = vmatpush.bf16.msra.mxu0 %v9406_v38  ;;  %v9663_v25 = vld [vmem:[#allocation5 + $0x250] sm:$0xf0] }
  0xea   :  { %v14005_v31 = vld [vmem:[#allocation5 + $0xc4c] sm:$0xf0]  ;;  %v3306_v11 = vpop.f32.mrf.mxu0  ;;  %v13805_v26 = vld [vmem:[#allocation5 + $0x614] sm:$0xf] }
  0xeb   :  { %v10942_v43 = vor.u32 %v14005_v31, %v10941_v30  ;;  %3627 = vmatpush.bf16.msra.mxu1 %v9918_v42  ;;  %v3307_v15 = vadd.f32 %v3306_v11, %v15160_v3  ;;  %v10175_v27 = vld [vmem:[#allocation5 + $0x650] sm:$0xf0]  ;;  %v10690_v30 = vor.u32 %v13933_v19, %v10687_v20  ;;  %v9666_v31 = vor.u32 %v13677_v24, %v9663_v25 }
  0xec   :  { %v14061_v28 = vld [vmem:[#allocation5 + $0xe14] sm:$0xf]  ;;  %v10178_v35 = vor.u32 %v13805_v26, %v10175_v27 }
  0xed   :  { %3665 = vmatpush.bf16.msra.mxu3 %v10942_v43  ;;  %3715 = vmatpush.bf16.msrb.mxu2 %v10882_v46  ;;  %v3326_v21 = vadd.f32 %v3325_v16, %v3307_v15  ;;  %v11199_v29 = vld [vmem:[#allocation5 + $0xe50] sm:$0xf0] }
  0xee   :  { %3677 = vmatpush.bf16.msrb.mxu0 %v9858_v47  ;;  %3628 = vmatmul.bf16.vlgmr.msra.gmra.mxu1 %v15111_v53  ;;  %v13917_v32 = vld [vmem:[#allocation5 + $0x994] sm:$0xf]  ;;  %v11202_v36 = vor.u32 %v14061_v28, %v11199_v29 }
  0xef   :  { %3696 = vmatpush.bf16.msrb.mxu1 %v10370_v55  ;;  %3609 = vmatmul.bf16.vlgmr.msra.gmra.mxu0 %v15109_v48  ;;  %v10623_v33 = vld [vmem:[#allocation5 + $0x9d0] sm:$0xf0]  ;;  %v3344_v34 = vpop.f32.mrf.mxu2  ;;  %v3327_v52 = vpop.f32.mrf.mxu1 }
  0xf0   :  { %3647 = vmatmul.bf16.vlgmr.msra.gmra.mxu2 %v15113_v54  ;;  %3666 = vmatmul.bf16.vlgmr.msra.gmra.mxu3 %v15115_v57  ;;  %v13661_v37 = vld [vmem:[#allocation5 + $0x194] sm:$0xf]  ;;  %v3345_v40 = vadd.f32 %v3344_v34, %v3326_v21 }
  0xf1   :  { %3734 = vmatpush.bf16.msrb.mxu3 %v11394_v58  ;;  %3716 = vmatpush.bf16.msrb.mxu2 %v10818_v1  ;;  %v9599_v38 = vld [vmem:[#allocation5 + $0x1d0] sm:$0xf0]  ;;  %v3363_v41 = vpop.f32.mrf.mxu3  ;;  %v10626_v58 = vor.u32 %v13917_v32, %v10623_v33 }
  0xf2   :  { %3678 = vmatpush.bf16.msrb.mxu0 %v9794_v2  ;;  %v3308_v42 = vpop.f32.mrf.mxu0  ;;  %v10111_v43 = vld [vmem:[#allocation5 + $0x5d0] sm:$0xf0]  ;;  %v15168_v55 = vadd.f32 %v3363_v41, %v3345_v40  ;;  %v9602_v59 = vor.u32 %v13661_v37, %v9599_v38 }
  0xf3   :  { %3697 = vmatpush.bf16.msrb.mxu1 %v10306_v4  ;;  %v14045_v46 = vld [vmem:[#allocation5 + $0xd94] sm:$0xf]  ;;  %v3309_v49 = vadd.f32 %v3308_v42, %v15160_v3  ;;  %v10114_v63 = vor.u32 %v13789_v39, %v10111_v43  ;;  %v10885_v42 = vld [vmem:[#allocation5 + $0xb98] sm:$0xf] }
  0xf4   :  { %v11135_v47 = vld [vmem:[#allocation5 + $0xdd0] sm:$0xf0]  ;;  %v4513_v40 = vmax.f32 %v15168_v55, 0.0  ;;  %v13990_v43 = vld [vmem:[#allocation5 + $0xbd4] sm:$0xf0] }
  0xf5   :  { %3735 = vmatpush.bf16.msrb.mxu3 %v11330_v5  ;;  %3717 = vmatpush.bf16.msrb.mxu2 %v10754_v17  ;;  %v13901_v60 = vld [vmem:[#allocation5 + $0x914] sm:$0xf]  ;;  %v3328_v62 = vadd.f32 %v3327_v52, %v3309_v49  ;;  %v11138_v0 = vor.u32 %v14045_v46, %v11135_v47  ;;  %v9861_v46 = vld [vmem:[#allocation5 + $0x398] sm:$0xf] }
  0xf6   :  { %3679 = vmatpush.bf16.msrb.mxu0 %v9730_v18  ;;  %v10559_v61 = vld [vmem:[#allocation5 + $0x950] sm:$0xf0]  ;;  %v13734_v47 = vld [vmem:[#allocation5 + $0x3d4] sm:$0xf0] }
  0xf7   :  { %3698 = vmatpush.bf16.msrb.mxu1 %v10242_v22  ;;  %v13645_v1 = vld [vmem:[#allocation5 + $0x114] sm:$0xf]  ;;  %v10562_v8 = vor.u32 %v13901_v60, %v10559_v61  ;;  %v3346_v12 = vpop.f32.mrf.mxu2  ;;  %v3330_v25 = vpop.f32.mrf.mxu1  ;;  %v10373_v49 = vld [vmem:[#allocation5 + $0x798] sm:$0xf] }
  0xf8   :  { %v9535_v2 = vld [vmem:[#allocation5 + $0x150] sm:$0xf0]  ;;  %v3347_v18 = vadd.f32 %v3346_v12, %v3328_v62  ;;  %v11397_v60 = vld [vmem:[#allocation5 + $0xf98] sm:$0xf] }
  0xf9   :  { %3736 = vmatpush.bf16.msrb.mxu3 %v11266_v23  ;;  %3718 = vmatpush.bf16.msrb.mxu2 %v10690_v30  ;;  %v13773_v4 = vld [vmem:[#allocation5 + $0x514] sm:$0xf]  ;;  %v9538_v9 = vor.u32 %v13645_v1, %v9535_v2  ;;  %v3365_v19 = vpop.f32.mrf.mxu3  ;;  %v14118_v61 = vld [vmem:[#allocation5 + $0xfd4] sm:$0xf0] }
  0xfa   :  { %3680 = vmatpush.bf16.msrb.mxu0 %v9666_v31  ;;  %v10047_v5 = vld [vmem:[#allocation5 + $0x550] sm:$0xf0]  ;;  %v3311_v20 = vpop.f32.mrf.mxu0  ;;  %v3366_v28 = vadd.f32 %v3365_v19, %v3347_v18  ;;  %v11398_v12 = vor.u32 %v14118_v61, %v11397_v60  ;;  %v11333_v18 = vld [vmem:[#allocation5 + $0xf18] sm:$0xf] }
  0xfb   :  { %3699 = vmatpush.bf16.msrb.mxu1 %v10178_v35  ;;  %v14029_v6 = vld [vmem:[#allocation5 + $0xd14] sm:$0xf]  ;;  %v10050_v13 = vor.u32 %v13773_v4, %v10047_v5  ;;  %v3312_v24 = vadd.f32 %v3311_v20, %v15160_v3  ;;  %v10886_v5 = vor.u32 %v13990_v43, %v10885_v42  ;;  %v14102_v19 = vld [vmem:[#allocation5 + $0xf54] sm:$0xf0] }
  0xfc   :  { %v11071_v7 = vld [vmem:[#allocation5 + $0xd50] sm:$0xf0]  ;;  %v4529_v41 = vmax.f32 %v3366_v28, 0.0  ;;  %v9733_v28 = vld [vmem:[#allocation5 + $0x298] sm:$0xf] }
  0xfd   :  { %3737 = vmatpush.bf16.msrb.mxu3 %v11202_v36  ;;  %3719 = vmatpush.bf16.msrb.mxu2 %v10626_v58  ;;  %v13885_v10 = vld [vmem:[#allocation5 + $0x894] sm:$0xf]  ;;  %v11074_v14 = vor.u32 %v14029_v6, %v11071_v7  ;;  %v3331_v34 = vadd.f32 %v3330_v25, %v3312_v24  ;;  %v9862_v6 = vor.u32 %v13734_v47, %v9861_v46  ;;  %v10821_v7 = vld [vmem:[#allocation5 + $0xb18] sm:$0xf]  ;;  %v15180_v24 = vperm.slane %v15157_v45, 1 }
  0xfe   :  { %3681 = vmatpush.bf16.msrb.mxu0 %v9602_v59  ;;  %v10495_v11 = vld [vmem:[#allocation5 + $0x8d0] sm:$0xf0]  ;;  %3633 = vmatmul.bf16.gmra.mxu1 %v15123_v50  ;;  %v15176_v52 = vpack.c.bf16 %v4529_v41, %v4513_v40  ;;  %v13862_v59 = vld [vmem:[#allocation5 + $0x7d4] sm:$0xf0] }
  0xff   :  { %3700 = vmatpush.bf16.msrb.mxu1 %v10114_v63  ;;  %v13629_v15 = vld [vmem:[#allocation5 + $0x94] sm:$0xf]  ;;  %v10498_v29 = vor.u32 %v13885_v10, %v10495_v11  ;;  %3614 = vmatmul.bf16.gmra.mxu0 %v15121_v44  ;;  %v3349_v62 = vpop.f32.mrf.mxu2  ;;  %v3332_v10 = vpop.f32.mrf.mxu1  ;;  %v10374_v11 = vor.u32 %v13862_v59, %v10373_v49  ;;  %v10757_v25 = vld [vmem:[#allocation5 + $0xa98] sm:$0xf] }
 0x100   :  { %v9471_v16 = vld [vmem:[#allocation5 + $0xd0] sm:$0xf0]  ;;  %3652 = vmatmul.bf16.gmra.mxu2 %v15125_v51  ;;  %3671 = vmatmul.bf16.gmra.mxu3 %v15127_v56  ;;  %v3350_v1 = vadd.f32 %v3349_v62, %v3331_v34  ;;  %v11269_v34 = vld [vmem:[#allocation5 + $0xe98] sm:$0xf] }
 0x101   :  { %3738 = vmatpush.bf16.msrb.mxu3 %v11138_v0  ;;  %v13757_v17 = vld [vmem:[#allocation5 + $0x494] sm:$0xf]  ;;  %3720 = vmatpush.bf16.msrb.mxu2 %v10562_v8  ;;  %v9474_v30 = vor.u32 %v13629_v15, %v9471_v16  ;;  %v3368_v2 = vpop.f32.mrf.mxu3  ;;  %v13974_v8 = vld [vmem:[#allocation5 + $0xb54] sm:$0xf0] }
 0x102   :  { %v9983_v21 = vld [vmem:[#allocation5 + $0x4d0] sm:$0xf0]  ;;  %3682 = vmatpush.bf16.msrb.mxu0 %v9538_v9  ;;  %v3313_v4 = vpop.f32.mrf.mxu0  ;;  %v10309_v15 = vld [vmem:[#allocation5 + $0x718] sm:$0xf]  ;;  %v3369_v16 = vadd.f32 %v3368_v2, %v3350_v1 }
 0x103   :  { %v14013_v22 = vld [vmem:[#allocation5 + $0xc94] sm:$0xf]  ;;  %3701 = vmatpush.bf16.msrb.mxu1 %v10050_v13  ;;  %v9986_v35 = vor.u32 %v13757_v17, %v9983_v21  ;;  %v3314_v9 = vadd.f32 %v3313_v4, %v15160_v3  ;;  %v9797_v13 = vld [vmem:[#allocation5 + $0x318] sm:$0xf]  ;;  %v10822_v21 = vor.u32 %v13974_v8, %v10821_v7 }
 0x104   :  { %v11007_v23 = vld [vmem:[#allocation5 + $0xcd0] sm:$0xf0]  ;;  %v13846_v17 = vld [vmem:[#allocation5 + $0x754] sm:$0xf0]  ;;  %v4545_v60 = vmax.f32 %v3369_v16, 0.0 }
 0x105   :  { %v13869_v26 = vld [vmem:[#allocation5 + $0x814] sm:$0xf]  ;;  %3739 = vmatpush.bf16.msrb.mxu3 %v11074_v14  ;;  %v11010_v36 = vor.u32 %v14013_v22, %v11007_v23  ;;  %3721 = vmatpush.bf16.msrb.mxu2 %v10498_v29  ;;  %v13718_v14 = vld [vmem:[#allocation5 + $0x354] sm:$0xf0]  ;;  %v3333_v20 = vadd.f32 %v3332_v10, %v3314_v9  ;;  %v10310_v3 = vor.u32 %v13846_v17, %v10309_v15 }
 0x106   :  { %v10431_v27 = vld [vmem:[#allocation5 + $0x850] sm:$0xf0]  ;;  %3683 = vmatpush.bf16.msrb.mxu0 %v9474_v30  ;;  %v9798_v22 = vor.u32 %v13718_v14, %v9797_v13  ;;  %v11334_v23 = vor.u32 %v14102_v19, %v11333_v18  ;;  %v13702_v29 = vld [vmem:[#allocation5 + $0x2d4] sm:$0xf0] }
 0x107   :  { %v13613_v31 = vld [vmem:[#allocation5 + $0x14] sm:$0xf]  ;;  %v10434_v58 = vor.u32 %v13869_v26, %v10431_v27  ;;  %3702 = vmatpush.bf16.msrb.mxu1 %v9986_v35  ;;  %v13958_v26 = vld [vmem:[#allocation5 + $0xad4] sm:$0xf0]  ;;  %v3351_v27 = vpop.f32.mrf.mxu2  ;;  %v9734_v41 = vor.u32 %v13702_v29, %v9733_v28 }
 0x108   :  { %v9407_v32 = vld [vmem:[#allocation5 + $0x50] sm:$0xf0]  ;;  %v10245_v30 = vld [vmem:[#allocation5 + $0x698] sm:$0xf]  ;;  %v10758_v40 = vor.u32 %v13958_v26, %v10757_v25 }
 0x109   :  { %v13741_v33 = vld [vmem:[#allocation5 + $0x414] sm:$0xf]  ;;  %v9410_v55 = vor.u32 %v13613_v31, %v9407_v32  ;;  %3740 = vmatpush.bf16.msrb.mxu3 %v11010_v36  ;;  %3722 = vmatpush.bf16.msrb.mxu2 %v10434_v58  ;;  %v3352_v31 = vadd.f32 %v3351_v27, %v3333_v20  ;;  %v3370_v32 = vpop.f32.mrf.mxu3  ;;  %v14086_v35 = vld [vmem:[#allocation5 + $0xed4] sm:$0xf0] }
 0x10a   :  { %v9919_v37 = vld [vmem:[#allocation5 + $0x450] sm:$0xf0]  ;;  %v3382_v36 = vpop.f32.mrf.mxu0  ;;  %v10693_v42 = vld [vmem:[#allocation5 + $0xa18] sm:$0xf]  ;;  %v11270_v49 = vor.u32 %v14086_v35, %v11269_v34 }
 0x10b   :  { %v13997_v38 = vld [vmem:[#allocation5 + $0xc14] sm:$0xf]  ;;  %v9922_v63 = vor.u32 %v13741_v33, %v9919_v37  ;;  %3684 = vmatpush.bf16.msrb.mxu0 %v9410_v55  ;;  %v13830_v33 = vld [vmem:[#allocation5 + $0x6d4] sm:$0xf0]  ;;  %v3401_v37 = vpop.f32.mrf.mxu1 }
 0x10c   :  { %v10943_v39 = vld [vmem:[#allocation5 + $0xc50] sm:$0xf0]  ;;  %v13942_v43 = vld [vmem:[#allocation5 + $0xa54] sm:$0xf0]  ;;  %v10246_v47 = vor.u32 %v13830_v33, %v10245_v30 }
 0x10d   :  { %v10946_v0 = vor.u32 %v13997_v38, %v10943_v39  ;;  %3703 = vmatpush.bf16.msrb.mxu1 %v9922_v63  ;;  %3791 = vmatpush.bf16.msra.mxu2 %v10886_v5  ;;  %v3371_v38 = vadd.f32 %v3370_v32, %v3352_v31  ;;  %v3383_v39 = vadd.f32 %v3382_v36, %v15180_v24  ;;  %v9669_v46 = vld [vmem:[#allocation5 + $0x218] sm:$0xf] }
 0x10e   :  { %v13686_v58 = vld [vmem:[#allocation5 + $0x254] sm:$0xf0]  ;;  %v10694_v2 = vor.u32 %v13942_v43, %v10693_v42 }
 0x10f   :  { %3741 = vmatpush.bf16.msrb.mxu3 %v10946_v0  ;;  %3753 = vmatpush.bf16.msra.mxu0 %v9862_v6  ;;  %v10181_v55 = vld [vmem:[#allocation5 + $0x618] sm:$0xf]  ;;  %v4561_v61 = vmax.f32 %v3371_v38, 0.0  ;;  %v3402_v62 = vadd.f32 %v3401_v37, %v3383_v39  ;;  %v9670_v4 = vor.u32 %v13686_v58, %v9669_v46 }
 0x110   :  { %v13814_v59 = vld [vmem:[#allocation5 + $0x654] sm:$0xf0]  ;;  %3685 = vmatmul.bf16.vlgmr.msrb.gmra.mxu0 %v15109_v48  ;;  %3704 = vmatmul.bf16.vlgmr.msrb.gmra.mxu1 %v15111_v53 }
 0x111   :  { %3772 = vmatpush.bf16.msra.mxu1 %v10374_v11  ;;  %3792 = vmatpush.bf16.msra.mxu2 %v10822_v21  ;;  %v11205_v63 = vld [vmem:[#allocation5 + $0xe18] sm:$0xf]  ;;  %v15187_v1 = vpack.c.bf16 %v4561_v61, %v4545_v60  ;;  %v10182_v7 = vor.u32 %v13814_v59, %v10181_v55  ;;  %v3439_v13 = vpop.f32.mrf.mxu3 }
 0x112   :  { %v14070_v0 = vld [vmem:[#allocation5 + $0xe54] sm:$0xf0]  ;;  %3723 = vmatmul.bf16.vlgmr.msrb.gmra.mxu2 %v15113_v54  ;;  %3742 = vmatmul.bf16.vlgmr.msrb.gmra.mxu3 %v15115_v57  ;;  %v3384_v18 = vpop.f32.mrf.mxu0 }
 0x113   :  { %3810 = vmatpush.bf16.msra.mxu3 %v11398_v12  ;;  %3754 = vmatpush.bf16.msra.mxu0 %v9798_v22  ;;  %v10629_v5 = vld [vmem:[#allocation5 + $0x998] sm:$0xf]  ;;  %v11206_v8 = vor.u32 %v14070_v0, %v11205_v63  ;;  %v3420_v12 = vpop.f32.mrf.mxu2  ;;  %v3403_v19 = vpop.f32.mrf.mxu1  ;;  %v3385_v20 = vadd.f32 %v3384_v18, %v15180_v24 }
 0x114   :  { %v13926_v6 = vld [vmem:[#allocation5 + $0x9d4] sm:$0xf0]  ;;  %v3421_v17 = vadd.f32 %v3420_v12, %v3402_v62 }
 0x115   :  { %3773 = vmatpush.bf16.msra.mxu1 %v10310_v3  ;;  %3793 = vmatpush.bf16.msra.mxu2 %v10758_v40  ;;  %v9605_v9 = vld [vmem:[#allocation5 + $0x198] sm:$0xf]  ;;  %v10630_v21 = vor.u32 %v13926_v6, %v10629_v5  ;;  %v3404_v31 = vadd.f32 %v3403_v19, %v3385_v20  ;;  %v9863_v20 = vld [vmem:[#allocation5 + $0x3d8] sm:$0xf0] }
 0x116   :  { %v13670_v10 = vld [vmem:[#allocation5 + $0x1d4] sm:$0xf0]  ;;  %v15190_v25 = vadd.f32 %v3439_v13, %v3421_v17  ;;  %v13726_v17 = vld [vmem:[#allocation5 + $0x39c] sm:$0xf] }
 0x117   :  { %3811 = vmatpush.bf16.msra.mxu3 %v11334_v23  ;;  %3755 = vmatpush.bf16.msra.mxu0 %v9734_v41  ;;  %v10117_v11 = vld [vmem:[#allocation5 + $0x598] sm:$0xf]  ;;  %v9606_v22 = vor.u32 %v13670_v10, %v9605_v9 }
 0x118   :  { %v13798_v14 = vld [vmem:[#allocation5 + $0x5d4] sm:$0xf0]  ;;  %v4514_v18 = vmax.f32 %v15190_v25, 0.0 }
 0x119   :  { %3774 = vmatpush.bf16.msra.mxu1 %v10246_v47  ;;  %v11141_v15 = vld [vmem:[#allocation5 + $0xd98] sm:$0xf]  ;;  %3794 = vmatpush.bf16.msra.mxu2 %v10694_v2  ;;  %v10118_v26 = vor.u32 %v13798_v14, %v10117_v11  ;;  %v3441_v47 = vpop.f32.mrf.mxu3 }
 0x11a   :  { %v14054_v16 = vld [vmem:[#allocation5 + $0xdd4] sm:$0xf0]  ;;  %v3387_v60 = vpop.f32.mrf.mxu0 }
 0x11b   :  { %3812 = vmatpush.bf16.msra.mxu3 %v11270_v49  ;;  %3756 = vmatpush.bf16.msra.mxu0 %v9670_v4  ;;  %v10565_v3 = vld [vmem:[#allocation5 + $0x918] sm:$0xf]  ;;  %v11142_v27 = vor.u32 %v14054_v16, %v11141_v15  ;;  %v3422_v46 = vpop.f32.mrf.mxu2  ;;  %v3406_v61 = vpop.f32.mrf.mxu1  ;;  %v3388_v0 = vadd.f32 %v3387_v60, %v15180_v24  ;;  %v13982_v15 = vld [vmem:[#allocation5 + $0xb9c] sm:$0xf] }
 0x11c   :  { %v13910_v23 = vld [vmem:[#allocation5 + $0x954] sm:$0xf0]  ;;  %v3423_v59 = vadd.f32 %v3422_v46, %v3404_v31  ;;  %v10887_v16 = vld [vmem:[#allocation5 + $0xbd8] sm:$0xf0] }
 0x11d   :  { %3775 = vmatpush.bf16.msra.mxu1 %v10182_v7  ;;  %v9541_v28 = vld [vmem:[#allocation5 + $0x118] sm:$0xf]  ;;  %3795 = vmatpush.bf16.msra.mxu2 %v10630_v21  ;;  %v10566_v35 = vor.u32 %v13910_v23, %v10565_v3  ;;  %v3407_v14 = vadd.f32 %v3406_v61, %v3388_v0  ;;  %v13854_v21 = vld [vmem:[#allocation5 + $0x79c] sm:$0xf]  ;;  %v15202_v0 = vperm.slane %v15157_v45, 2 }
 0x11e   :  { %v13654_v29 = vld [vmem:[#allocation5 + $0x154] sm:$0xf0]  ;;  %v10375_v23 = vld [vmem:[#allocation5 + $0x7d8] sm:$0xf0] }
 0x11f   :  { %3813 = vmatpush.bf16.msra.mxu3 %v11206_v8  ;;  %v10053_v30 = vld [vmem:[#allocation5 + $0x518] sm:$0xf]  ;;  %3757 = vmatpush.bf16.msra.mxu0 %v9606_v22  ;;  %v9542_v36 = vor.u32 %v13654_v29, %v9541_v28  ;;  %v3442_v8 = vadd.f32 %v3441_v47, %v3423_v59  ;;  %v10311_v47 = vld [vmem:[#allocation5 + $0x758] sm:$0xf0] }
 0x120   :  { %v13782_v32 = vld [vmem:[#allocation5 + $0x554] sm:$0xf0]  ;;  %3690 = vmatmul.bf16.gmra.mxu0 %v15121_v44  ;;  %3709 = vmatmul.bf16.gmra.mxu1 %v15123_v50 }
 0x121   :  { %v11077_v33 = vld [vmem:[#allocation5 + $0xd18] sm:$0xf]  ;;  %3776 = vmatpush.bf16.msra.mxu1 %v10118_v26  ;;  %v10054_v39 = vor.u32 %v13782_v32, %v10053_v30  ;;  %3796 = vmatpush.bf16.msra.mxu2 %v10566_v35  ;;  %v4530_v19 = vmax.f32 %v3442_v8, 0.0  ;;  %v14110_v26 = vld [vmem:[#allocation5 + $0xf9c] sm:$0xf]  ;;  %v3444_v31 = vpop.f32.mrf.mxu3  ;;  %v10890_v32 = vor.u32 %v13982_v15, %v10887_v16 }
 0x122   :  { %v14038_v34 = vld [vmem:[#allocation5 + $0xd54] sm:$0xf0]  ;;  %3728 = vmatmul.bf16.gmra.mxu2 %v15125_v51  ;;  %3747 = vmatmul.bf16.gmra.mxu3 %v15127_v56  ;;  %v10823_v35 = vld [vmem:[#allocation5 + $0xb58] sm:$0xf0] }
 0x123   :  { %v10501_v37 = vld [vmem:[#allocation5 + $0x898] sm:$0xf]  ;;  %3814 = vmatpush.bf16.msra.mxu3 %v11142_v27  ;;  %v11078_v40 = vor.u32 %v14038_v34, %v11077_v33  ;;  %3758 = vmatpush.bf16.msra.mxu0 %v9542_v36  ;;  %v11399_v27 = vld [vmem:[#allocation5 + $0xfd8] sm:$0xf0]  ;;  %v15198_v28 = vpack.c.bf16 %v4530_v19, %v4514_v18  ;;  %v3425_v30 = vpop.f32.mrf.mxu2  ;;  %v9866_v33 = vor.u32 %v13726_v17, %v9863_v20 }
 0x124   :  { %v13894_v38 = vld [vmem:[#allocation5 + $0x8d4] sm:$0xf0]  ;;  %v13966_v34 = vld [vmem:[#allocation5 + $0xb1c] sm:$0xf]  ;;  %v3426_v36 = vadd.f32 %v3425_v30, %v3407_v14 }
 0x125   :  { %v9477_v41 = vld [vmem:[#allocation5 + $0x98] sm:$0xf]  ;;  %v10502_v2 = vor.u32 %v13894_v38, %v10501_v37  ;;  %3777 = vmatpush.bf16.msra.mxu1 %v10054_v39  ;;  %v3389_v37 = vpop.f32.mrf.mxu0  ;;  %v3408_v38 = vpop.f32.mrf.mxu1  ;;  %v10378_v39 = vor.u32 %v13854_v21, %v10375_v23  ;;  %v10826_v60 = vor.u32 %v13966_v34, %v10823_v35  ;;  %v13934_v17 = vld [vmem:[#allocation5 + $0xa1c] sm:$0xf] }
 0x126   :  { %v13638_v42 = vld [vmem:[#allocation5 + $0xd4] sm:$0xf0]  ;;  %v3390_v46 = vadd.f32 %v3389_v37, %v15180_v24  ;;  %v13950_v24 = vld [vmem:[#allocation5 + $0xa9c] sm:$0xf] }
 0x127   :  { %v9989_v43 = vld [vmem:[#allocation5 + $0x498] sm:$0xf]  ;;  %v9478_v4 = vor.u32 %v13638_v42, %v9477_v41  ;;  %3815 = vmatpush.bf16.msra.mxu3 %v11078_v40  ;;  %3797 = vmatpush.bf16.msra.mxu2 %v10502_v2  ;;  %v11402_v40 = vor.u32 %v14110_v26, %v11399_v27  ;;  %v13710_v41 = vld [vmem:[#allocation5 + $0x31c] sm:$0xf] }
 0x128   :  { %v13766_v49 = vld [vmem:[#allocation5 + $0x4d4] sm:$0xf0]  ;;  %v9799_v42 = vld [vmem:[#allocation5 + $0x358] sm:$0xf0]  ;;  %v3409_v59 = vadd.f32 %v3408_v38, %v3390_v46 }
 0x129   :  { %v11013_v58 = vld [vmem:[#allocation5 + $0xc98] sm:$0xf]  ;;  %v9990_v9 = vor.u32 %v13766_v49, %v9989_v43  ;;  %3759 = vmatpush.bf16.msra.mxu0 %v9478_v4  ;;  %v13838_v43 = vld [vmem:[#allocation5 + $0x71c] sm:$0xf]  ;;  %v9802_v61 = vor.u32 %v13710_v41, %v9799_v42  ;;  %v3446_v8 = vpop.f32.mrf.mxu3 }
 0x12a   :  { %v14022_v55 = vld [vmem:[#allocation5 + $0xcd4] sm:$0xf0]  ;;  %v14094_v49 = vld [vmem:[#allocation5 + $0xf1c] sm:$0xf] }
 0x12b   :  { %v10437_v62 = vld [vmem:[#allocation5 + $0x818] sm:$0xf]  ;;  %v11014_v10 = vor.u32 %v14022_v55, %v11013_v58  ;;  %3778 = vmatpush.bf16.msra.mxu1 %v9990_v9  ;;  %v11335_v58 = vld [vmem:[#allocation5 + $0xf58] sm:$0xf0]  ;;  %v3445_v55 = vadd.f32 %v3444_v31, %v3426_v36 }
 0x12c   :  { %v13878_v63 = vld [vmem:[#allocation5 + $0x854] sm:$0xf0]  ;;  %v10759_v2 = vld [vmem:[#allocation5 + $0xad8] sm:$0xf0] }
 0x12d   :  { %v9413_v5 = vld [vmem:[#allocation5 + $0x18] sm:$0xf]  ;;  %v10438_v22 = vor.u32 %v13878_v63, %v10437_v62  ;;  %3816 = vmatpush.bf16.msra.mxu3 %v11014_v10  ;;  %v10314_v62 = vor.u32 %v13838_v43, %v10311_v47  ;;  %v11338_v63 = vor.u32 %v14094_v49, %v11335_v58  ;;  %v13694_v4 = vld [vmem:[#allocation5 + $0x29c] sm:$0xf]  ;;  %v3477_v14 = vpop.f32.mrf.mxu1  ;;  %v10762_v15 = vor.u32 %v13950_v24, %v10759_v2 }
 0x12e   :  { %v13622_v6 = vld [vmem:[#allocation5 + $0x54] sm:$0xf0]  ;;  %v10247_v9 = vld [vmem:[#allocation5 + $0x6d8] sm:$0xf0]  ;;  %v4546_v30 = vmax.f32 %v3445_v55, 0.0 }
 0x12f   :  { %v9925_v7 = vld [vmem:[#allocation5 + $0x418] sm:$0xf]  ;;  %v9414_v3 = vor.u32 %v13622_v6, %v9413_v5  ;;  %3798 = vmatpush.bf16.msra.mxu2 %v10438_v22  ;;  %v9735_v5 = vld [vmem:[#allocation5 + $0x2d8] sm:$0xf0] }
 0x130   :  { %v13750_v11 = vld [vmem:[#allocation5 + $0x454] sm:$0xf0]  ;;  %v13822_v6 = vld [vmem:[#allocation5 + $0x69c] sm:$0xf]  ;;  %v9738_v16 = vor.u32 %v13694_v4, %v9735_v5 }
 0x131   :  { %v10949_v12 = vld [vmem:[#allocation5 + $0xc18] sm:$0xf]  ;;  %v9926_v29 = vor.u32 %v13750_v11, %v9925_v7  ;;  %3760 = vmatpush.bf16.msra.mxu0 %v9414_v3  ;;  %v3427_v7 = vpop.f32.mrf.mxu2  ;;  %v14078_v10 = vld [vmem:[#allocation5 + $0xe9c] sm:$0xf]  ;;  %v10250_v20 = vor.u32 %v13822_v6, %v10247_v9 }
 0x132   :  { %v14006_v13 = vld [vmem:[#allocation5 + $0xc54] sm:$0xf0]  ;;  %v11271_v11 = vld [vmem:[#allocation5 + $0xed8] sm:$0xf0]  ;;  %3799 = vmatmul.bf16.vlgmr.msra.gmra.mxu2 %v15113_v54 }
 0x133   :  { %v10950_v25 = vor.u32 %v14006_v13, %v10949_v12  ;;  %3779 = vmatpush.bf16.msra.mxu1 %v9926_v29  ;;  %3867 = vmatpush.bf16.msrb.mxu2 %v10890_v32  ;;  %v3428_v12 = vadd.f32 %v3427_v7, %v3409_v59  ;;  %v3458_v13 = vpop.f32.mrf.mxu0  ;;  %v10695_v18 = vld [vmem:[#allocation5 + $0xa58] sm:$0xf0]  ;;  %v11274_v21 = vor.u32 %v14078_v10, %v11271_v11  ;;  %v3515_v43 = vpop.f32.mrf.mxu3 }
 0x134   :  { %v3459_v45 = vadd.f32 %v3458_v13, %v15202_v0  ;;  %v13678_v22 = vld [vmem:[#allocation5 + $0x21c] sm:$0xf]  ;;  %3761 = vmatmul.bf16.vlgmr.msra.gmra.mxu0 %v15109_v48  ;;  %v10698_v32 = vor.u32 %v13934_v17, %v10695_v18 }
 0x135   :  { %3817 = vmatpush.bf16.msra.mxu3 %v10950_v25  ;;  %3829 = vmatpush.bf16.msrb.mxu0 %v9866_v33  ;;  %v3447_v19 = vadd.f32 %v3446_v8, %v3428_v12  ;;  %v9671_v3 = vld [vmem:[#allocation5 + $0x258] sm:$0xf0]  ;;  %v3479_v59 = vpop.f32.mrf.mxu1 }
 0x136   :  { %v13806_v23 = vld [vmem:[#allocation5 + $0x61c] sm:$0xf]  ;;  %v3478_v26 = vadd.f32 %v3477_v14, %v3459_v45  ;;  %3780 = vmatmul.bf16.vlgmr.msra.gmra.mxu1 %v15111_v53  ;;  %v9674_v33 = vor.u32 %v13678_v22, %v9671_v3 }
 0x137   :  { %3848 = vmatpush.bf16.msrb.mxu1 %v10378_v39  ;;  %3868 = vmatpush.bf16.msrb.mxu2 %v10826_v60  ;;  %v10183_v27 = vld [vmem:[#allocation5 + $0x658] sm:$0xf0]  ;;  %v4562_v31 = vmax.f32 %v3447_v19, 0.0 }
 0x138   :  { %v14062_v29 = vld [vmem:[#allocation5 + $0xe1c] sm:$0xf]  ;;  %3818 = vmatmul.bf16.vlgmr.msra.gmra.mxu3 %v15115_v57  ;;  %v10186_v37 = vor.u32 %v13806_v23, %v10183_v27 }
 0x139   :  { %3886 = vmatpush.bf16.msrb.mxu3 %v11402_v40  ;;  %3830 = vmatpush.bf16.msrb.mxu0 %v9802_v61  ;;  %v11207_v25 = vld [vmem:[#allocation5 + $0xe58] sm:$0xf0]  ;;  %v15209_v36 = vpack.c.bf16 %v4562_v31, %v4546_v30  ;;  %v3496_v42 = vpop.f32.mrf.mxu2 }
 0x13a   :  { %v13918_v34 = vld [vmem:[#allocation5 + $0x99c] sm:$0xf]  ;;  %v11210_v38 = vor.u32 %v14062_v29, %v11207_v25  ;;  %v3497_v58 = vadd.f32 %v3496_v42, %v3478_v26 }
 0x13b   :  { %3849 = vmatpush.bf16.msrb.mxu1 %v10314_v62  ;;  %3869 = vmatpush.bf16.msrb.mxu2 %v10762_v15  ;;  %v10631_v35 = vld [vmem:[#allocation5 + $0x9d8] sm:$0xf0]  ;;  %v3460_v55 = vpop.f32.mrf.mxu0  ;;  %v3517_v22 = vpop.f32.mrf.mxu3 }
 0x13c   :  { %v13662_v39 = vld [vmem:[#allocation5 + $0x19c] sm:$0xf]  ;;  %v3461_v60 = vadd.f32 %v3460_v55, %v15202_v0  ;;  %v10634_v61 = vor.u32 %v13918_v34, %v10631_v35  ;;  %v15212_v2 = vadd.f32 %v3515_v43, %v3497_v58  ;;  %v13991_v58 = vld [vmem:[#allocation5 + $0xbdc] sm:$0xf0] }
 0x13d   :  { %3887 = vmatpush.bf16.msrb.mxu3 %v11338_v63  ;;  %3831 = vmatpush.bf16.msrb.mxu0 %v9738_v16  ;;  %v9607_v40 = vld [vmem:[#allocation5 + $0x1d8] sm:$0xf0]  ;;  %v3482_v25 = vpop.f32.mrf.mxu1  ;;  %v9869_v55 = vld [vmem:[#allocation5 + $0x3a0] sm:$0xf] }
 0x13e   :  { %v13790_v41 = vld [vmem:[#allocation5 + $0x59c] sm:$0xf]  ;;  %v9610_v62 = vor.u32 %v13662_v39, %v9607_v40  ;;  %v3480_v9 = vadd.f32 %v3479_v59, %v3461_v60  ;;  %v4515_v59 = vmax.f32 %v15212_v2, 0.0 }
 0x13f   :  { %3850 = vmatpush.bf16.msrb.mxu1 %v10250_v20  ;;  %v10119_v46 = vld [vmem:[#allocation5 + $0x5d8] sm:$0xf0]  ;;  %3870 = vmatpush.bf16.msrb.mxu2 %v10698_v32 }
 0x140   :  { %v14046_v47 = vld [vmem:[#allocation5 + $0xd9c] sm:$0xf]  ;;  %v10122_v4 = vor.u32 %v13790_v41, %v10119_v46 }
 0x141   :  { %3888 = vmatpush.bf16.msrb.mxu3 %v11274_v21  ;;  %v11143_v49 = vld [vmem:[#allocation5 + $0xdd8] sm:$0xf0]  ;;  %3832 = vmatpush.bf16.msrb.mxu0 %v9674_v33  ;;  %v3498_v21 = vpop.f32.mrf.mxu2 }
 0x142   :  { %v13902_v63 = vld [vmem:[#allocation5 + $0x91c] sm:$0xf]  ;;  %v11146_v5 = vor.u32 %v14046_v47, %v11143_v49  ;;  %v3499_v27 = vadd.f32 %v3498_v21, %v3480_v9  ;;  %v10893_v49 = vld [vmem:[#allocation5 + $0xba0] sm:$0xf]  ;;  %3804 = vmatmul.bf16.gmra.mxu2 %v15125_v51 }
 0x143   :  { %v10567_v24 = vld [vmem:[#allocation5 + $0x958] sm:$0xf0]  ;;  %3851 = vmatpush.bf16.msrb.mxu1 %v10186_v37  ;;  %3871 = vmatpush.bf16.msrb.mxu2 %v10634_v61  ;;  %v3463_v29 = vpop.f32.mrf.mxu0  ;;  %v13735_v61 = vld [vmem:[#allocation5 + $0x3dc] sm:$0xf0] }
 0x144   :  { %v13646_v6 = vld [vmem:[#allocation5 + $0x11c] sm:$0xf]  ;;  %v10570_v13 = vor.u32 %v13902_v63, %v10567_v24  ;;  %v3464_v32 = vadd.f32 %v3463_v29, %v15202_v0  ;;  %v3518_v39 = vadd.f32 %v3517_v22, %v3499_v27  ;;  %3766 = vmatmul.bf16.gmra.mxu0 %v15121_v44  ;;  %v10317_v21 = vld [vmem:[#allocation5 + $0x720] sm:$0xf] }
 0x145   :  { %3889 = vmatpush.bf16.msrb.mxu3 %v11210_v38  ;;  %v9543_v7 = vld [vmem:[#allocation5 + $0x158] sm:$0xf0]  ;;  %3833 = vmatpush.bf16.msrb.mxu0 %v9610_v62  ;;  %v10381_v62 = vld [vmem:[#allocation5 + $0x7a0] sm:$0xf] }
 0x146   :  { %v13774_v8 = vld [vmem:[#allocation5 + $0x51c] sm:$0xf]  ;;  %v9546_v14 = vor.u32 %v13646_v6, %v9543_v7  ;;  %v3483_v47 = vadd.f32 %v3482_v25, %v3464_v32  ;;  %3785 = vmatmul.bf16.gmra.mxu1 %v15123_v50  ;;  %v4531_v60 = vmax.f32 %v3518_v39, 0.0  ;;  %v14119_v6 = vld [vmem:[#allocation5 + $0xfdc] sm:$0xf0] }
 0x147   :  { %v10055_v10 = vld [vmem:[#allocation5 + $0x558] sm:$0xf0]  ;;  %3852 = vmatpush.bf16.msrb.mxu1 %v10122_v4  ;;  %3872 = vmatpush.bf16.msrb.mxu2 %v10570_v13  ;;  %v13863_v4 = vld [vmem:[#allocation5 + $0x7dc] sm:$0xf0] }
 0x148   :  { %v14030_v11 = vld [vmem:[#allocation5 + $0xd1c] sm:$0xf]  ;;  %v10058_v16 = vor.u32 %v13774_v8, %v10055_v10  ;;  %3823 = vmatmul.bf16.gmra.mxu3 %v15127_v56  ;;  %v15220_v7 = vpack.c.bf16 %v4531_v60, %v4515_v59  ;;  %v3520_v10 = vpop.f32.mrf.mxu3  ;;  %v10829_v13 = vld [vmem:[#allocation5 + $0xb20] sm:$0xf] }
 0x149   :  { %v11079_v12 = vld [vmem:[#allocation5 + $0xd58] sm:$0xf0]  ;;  %3890 = vmatpush.bf16.msrb.mxu3 %v11146_v5  ;;  %3834 = vmatpush.bf16.msrb.mxu0 %v9546_v14  ;;  %v11405_v5 = vld [vmem:[#allocation5 + $0xfa0] sm:$0xf]  ;;  %v3501_v9 = vpop.f32.mrf.mxu2 }
 0x14a   :  { %v13886_v45 = vld [vmem:[#allocation5 + $0x89c] sm:$0xf]  ;;  %v11082_v17 = vor.u32 %v14030_v11, %v11079_v12  ;;  %v10894_v11 = vor.u32 %v13991_v58, %v10893_v49  ;;  %v9870_v12 = vor.u32 %v13735_v61, %v9869_v55  ;;  %v13975_v14 = vld [vmem:[#allocation5 + $0xb5c] sm:$0xf0] }
 0x14b   :  { %v10503_v15 = vld [vmem:[#allocation5 + $0x8d8] sm:$0xf0]  ;;  %3853 = vmatpush.bf16.msrb.mxu1 %v10058_v16  ;;  %v3484_v16 = vpop.f32.mrf.mxu1  ;;  %v10830_v25 = vor.u32 %v13975_v14, %v10829_v13  ;;  %v10253_v39 = vld [vmem:[#allocation5 + $0x6a0] sm:$0xf] }
 0x14c   :  { %v13630_v18 = vld [vmem:[#allocation5 + $0x9c] sm:$0xf]  ;;  %v10506_v33 = vor.u32 %v13886_v45, %v10503_v15  ;;  %v3502_v45 = vadd.f32 %v3501_v9, %v3483_v47  ;;  %v3465_v15 = vpop.f32.mrf.mxu0  ;;  %v10701_v61 = vld [vmem:[#allocation5 + $0xa20] sm:$0xf] }
 0x14d   :  { %v9479_v19 = vld [vmem:[#allocation5 + $0xd8] sm:$0xf0]  ;;  %3891 = vmatpush.bf16.msrb.mxu3 %v11082_v17  ;;  %v10382_v17 = vor.u32 %v13863_v4, %v10381_v62  ;;  %v3466_v22 = vadd.f32 %v3465_v15, %v15202_v0  ;;  %v13943_v62 = vld [vmem:[#allocation5 + $0xa5c] sm:$0xf0] }
 0x14e   :  { %v13758_v20 = vld [vmem:[#allocation5 + $0x49c] sm:$0xf]  ;;  %v9482_v34 = vor.u32 %v13630_v18, %v9479_v19  ;;  %3873 = vmatpush.bf16.msrb.mxu2 %v10506_v33  ;;  %v11406_v18 = vor.u32 %v14119_v6, %v11405_v5  ;;  %v9805_v19 = vld [vmem:[#allocation5 + $0x320] sm:$0xf]  ;;  %v3521_v27 = vadd.f32 %v3520_v10, %v3502_v45  ;;  %v10702_v14 = vor.u32 %v13943_v62, %v10701_v61 }
 0x14f   :  { %v9991_v3 = vld [vmem:[#allocation5 + $0x4d8] sm:$0xf0]  ;;  %v3485_v29 = vadd.f32 %v3484_v16, %v3466_v22  ;;  %v15223_v33 = vld [vmem:[#allocation7] sm:$0xff] }
 0x150   :  { %v14014_v23 = vld [vmem:[#allocation5 + $0xc9c] sm:$0xf]  ;;  %v9994_v40 = vor.u32 %v13758_v20, %v9991_v3  ;;  %3835 = vmatpush.bf16.msrb.mxu0 %v9482_v34  ;;  %v13719_v20 = vld [vmem:[#allocation5 + $0x35c] sm:$0xf0]  ;;  %v15226_v0 = vperm.slane %v15223_v33, 3 }
 0x151   :  { %v11015_v26 = vld [vmem:[#allocation5 + $0xcd8] sm:$0xf0]  ;;  %v13847_v3 = vld [vmem:[#allocation5 + $0x75c] sm:$0xf0] }
 0x152   :  { %v13870_v30 = vld [vmem:[#allocation5 + $0x81c] sm:$0xf]  ;;  %v11018_v41 = vor.u32 %v14014_v23, %v11015_v26  ;;  %3854 = vmatpush.bf16.msrb.mxu1 %v9994_v40  ;;  %v11341_v23 = vld [vmem:[#allocation5 + $0xf20] sm:$0xf]  ;;  %v3503_v40 = vpop.f32.mrf.mxu2 }
 0x153   :  { %v10439_v31 = vld [vmem:[#allocation5 + $0x858] sm:$0xf0]  ;;  %v14103_v26 = vld [vmem:[#allocation5 + $0xf5c] sm:$0xf0]  ;;  %v3504_v47 = vadd.f32 %v3503_v40, %v3485_v29  ;;  %v3553_v58 = vpop.f32.mrf.mxu1 }
 0x154   :  { %v13614_v35 = vld [vmem:[#allocation5 + $0x1c] sm:$0xf]  ;;  %v10442_v63 = vor.u32 %v13870_v30, %v10439_v31  ;;  %3892 = vmatpush.bf16.msrb.mxu3 %v11018_v41  ;;  %v9806_v30 = vor.u32 %v13719_v20, %v9805_v19  ;;  %v10318_v31 = vor.u32 %v13847_v3, %v10317_v21  ;;  %v11342_v32 = vor.u32 %v14103_v26, %v11341_v23  ;;  %v10765_v34 = vld [vmem:[#allocation5 + $0xaa0] sm:$0xf]  ;;  %v3522_v41 = vpop.f32.mrf.mxu3  ;;  %v3534_v49 = vpop.f32.mrf.mxu0 }
 0x155   :  { %v9415_v37 = vld [vmem:[#allocation5 + $0x58] sm:$0xf0]  ;;  %v3535_v55 = vadd.f32 %v3534_v49, %v15226_v0  ;;  %v9677_v5 = vld [vmem:[#allocation5 + $0x220] sm:$0xf] }
 0x156   :  { %v13742_v38 = vld [vmem:[#allocation5 + $0x41c] sm:$0xf]  ;;  %v9418_v24 = vor.u32 %v13614_v35, %v9415_v37  ;;  %3874 = vmatpush.bf16.msrb.mxu2 %v10442_v63  ;;  %v13959_v35 = vld [vmem:[#allocation5 + $0xadc] sm:$0xf0]  ;;  %v3523_v63 = vadd.f32 %v3522_v41, %v3504_v47 }
 0x157   :  { %v9927_v42 = vld [vmem:[#allocation5 + $0x458] sm:$0xf0]  ;;  %v9741_v37 = vld [vmem:[#allocation5 + $0x2a0] sm:$0xf]  ;;  %v10766_v59 = vor.u32 %v13959_v35, %v10765_v34 }
 0x158   :  { %v13998_v43 = vld [vmem:[#allocation5 + $0xc1c] sm:$0xf]  ;;  %v9930_v8 = vor.u32 %v13742_v38, %v9927_v42  ;;  %3836 = vmatpush.bf16.msrb.mxu0 %v9418_v24  ;;  %v13703_v38 = vld [vmem:[#allocation5 + $0x2dc] sm:$0xf0]  ;;  %v4563_v13 = vmax.f32 %v3523_v63, 0.0 }
 0x159   :  { %v10951_v46 = vld [vmem:[#allocation5 + $0xc58] sm:$0xf0]  ;;  %v13831_v42 = vld [vmem:[#allocation5 + $0x6dc] sm:$0xf0]  ;;  %v9742_v60 = vor.u32 %v13703_v38, %v9741_v37  ;;  %3875 = vmatmul.bf16.vlgmr.msrb.gmra.mxu2 %v15113_v54 }
 0x15a   :  { %v10954_v2 = vor.u32 %v13998_v43, %v10951_v46  ;;  %3855 = vmatpush.bf16.msrb.mxu1 %v9930_v8  ;;  %3943 = vmatpush.bf16.msra.mxu2 %v10894_v11  ;;  %v11277_v43 = vld [vmem:[#allocation5 + $0xea0] sm:$0xf]  ;;  %v10254_v24 = vor.u32 %v13831_v42, %v10253_v39  ;;  %v3572_v3 = vpop.f32.mrf.mxu2 }
 0x15b   :  { %v14087_v46 = vld [vmem:[#allocation5 + $0xedc] sm:$0xf0]  ;;  %3837 = vmatmul.bf16.vlgmr.msrb.gmra.mxu0 %v15109_v48 }
 0x15c   :  { %3893 = vmatpush.bf16.msrb.mxu3 %v10954_v2  ;;  %3905 = vmatpush.bf16.msra.mxu0 %v9870_v12  ;;  %v11278_v4 = vor.u32 %v14087_v46, %v11277_v43  ;;  %v13687_v6 = vld [vmem:[#allocation5 + $0x25c] sm:$0xf0]  ;;  %v3554_v2 = vadd.f32 %v3553_v58, %v3535_v55  ;;  %v4547_v12 = vmax.f32 %v3521_v27, 0.0  ;;  %v3591_v23 = vpop.f32.mrf.mxu3 }
 0x15d   :  { %v10189_v8 = vld [vmem:[#allocation5 + $0x620] sm:$0xf]  ;;  %3856 = vmatmul.bf16.vlgmr.msrb.gmra.mxu1 %v15111_v53  ;;  %v9678_v45 = vor.u32 %v13687_v6, %v9677_v5 }
 0x15e   :  { %3924 = vmatpush.bf16.msra.mxu1 %v10382_v17  ;;  %3944 = vmatpush.bf16.msra.mxu2 %v10830_v25  ;;  %v13815_v9 = vld [vmem:[#allocation5 + $0x65c] sm:$0xf0]  ;;  %v15233_v17 = vpack.c.bf16 %v4563_v13, %v4547_v12  ;;  %v3573_v25 = vadd.f32 %v3572_v3, %v3554_v2 }
 0x15f   :  { %v11213_v10 = vld [vmem:[#allocation5 + $0xe20] sm:$0xf]  ;;  %3894 = vmatmul.bf16.vlgmr.msrb.gmra.mxu3 %v15115_v57 }
 0x160   :  { %3962 = vmatpush.bf16.msra.mxu3 %v11406_v18  ;;  %3906 = vmatpush.bf16.msra.mxu0 %v9806_v30  ;;  %v14071_v11 = vld [vmem:[#allocation5 + $0xe5c] sm:$0xf0]  ;;  %v10190_v18 = vor.u32 %v13815_v9, %v10189_v8  ;;  %v3536_v30 = vpop.f32.mrf.mxu0  ;;  %v15236_v39 = vadd.f32 %v3591_v23, %v3573_v25 }
 0x161   :  { %v10637_v15 = vld [vmem:[#allocation5 + $0x9a0] sm:$0xf]  ;;  %v11214_v19 = vor.u32 %v14071_v11, %v11213_v10 }
 0x162   :  { %3925 = vmatpush.bf16.msra.mxu1 %v10318_v31  ;;  %3945 = vmatpush.bf16.msra.mxu2 %v10766_v59  ;;  %v13927_v16 = vld [vmem:[#allocation5 + $0x9dc] sm:$0xf0]  ;;  %v3555_v31 = vpop.f32.mrf.mxu1  ;;  %v3574_v8 = vpop.f32.mrf.mxu2 }
 0x163   :  { %v9613_v20 = vld [vmem:[#allocation5 + $0x1a0] sm:$0xf]  ;;  %v10638_v34 = vor.u32 %v13927_v16, %v10637_v15 }
 0x164   :  { %3963 = vmatpush.bf16.msra.mxu3 %v11342_v32  ;;  %3907 = vmatpush.bf16.msra.mxu0 %v9742_v60  ;;  %v13671_v21 = vld [vmem:[#allocation5 + $0x1dc] sm:$0xf0]  ;;  %v3537_v32 = vadd.f32 %v3536_v30, %v15226_v0  ;;  %v3593_v2 = vpop.f32.mrf.mxu3 }
 0x165   :  { %v10125_v22 = vld [vmem:[#allocation5 + $0x5a0] sm:$0xf]  ;;  %v9614_v35 = vor.u32 %v13671_v21, %v9613_v20 }
 0x166   :  { %3926 = vmatpush.bf16.msra.mxu1 %v10254_v24  ;;  %v13799_v26 = vld [vmem:[#allocation5 + $0x5dc] sm:$0xf0]  ;;  %3946 = vmatpush.bf16.msra.mxu2 %v10702_v14  ;;  %v3556_v47 = vadd.f32 %v3555_v31, %v3537_v32  ;;  %v13983_v31 = vld [vmem:[#allocation5 + $0xba4] sm:$0xf] }
 0x167   :  { %v11149_v27 = vld [vmem:[#allocation5 + $0xda0] sm:$0xf]  ;;  %v10126_v40 = vor.u32 %v13799_v26, %v10125_v22  ;;  %v10895_v32 = vld [vmem:[#allocation5 + $0xbe0] sm:$0xf0] }
 0x168   :  { %3964 = vmatpush.bf16.msra.mxu3 %v11278_v4  ;;  %v14055_v29 = vld [vmem:[#allocation5 + $0xddc] sm:$0xf0]  ;;  %3908 = vmatpush.bf16.msra.mxu0 %v9678_v45  ;;  %v3575_v12 = vadd.f32 %v3574_v8, %v3556_v47  ;;  %v3539_v13 = vpop.f32.mrf.mxu0  ;;  %v11407_v47 = vld [vmem:[#allocation5 + $0xfe0] sm:$0xf0] }
 0x169   :  { %v10573_v37 = vld [vmem:[#allocation5 + $0x920] sm:$0xf]  ;;  %v11150_v41 = vor.u32 %v14055_v29, %v11149_v27  ;;  %v3540_v16 = vadd.f32 %v3539_v13, %v15226_v0  ;;  %3880 = vmatmul.bf16.gmra.mxu2 %v15125_v51  ;;  %v14095_v13 = vld [vmem:[#allocation5 + $0xf24] sm:$0xf] }
 0x16a   :  { %v13911_v38 = vld [vmem:[#allocation5 + $0x95c] sm:$0xf0]  ;;  %3927 = vmatpush.bf16.msra.mxu1 %v10190_v18  ;;  %3947 = vmatpush.bf16.msra.mxu2 %v10638_v34  ;;  %v3558_v14 = vpop.f32.mrf.mxu1  ;;  %v3594_v3 = vadd.f32 %v3593_v2, %v3575_v12  ;;  %v13727_v34 = vld [vmem:[#allocation5 + $0x3a4] sm:$0xf] }
 0x16b   :  { %v9549_v42 = vld [vmem:[#allocation5 + $0x120] sm:$0xf]  ;;  %v10574_v59 = vor.u32 %v13911_v38, %v10573_v37  ;;  %v3559_v30 = vadd.f32 %v3558_v14, %v3540_v16  ;;  %3842 = vmatmul.bf16.gmra.mxu0 %v15121_v44  ;;  %v9871_v38 = vld [vmem:[#allocation5 + $0x3e0] sm:$0xf0] }
 0x16c   :  { %3965 = vmatpush.bf16.msra.mxu3 %v11214_v19  ;;  %v13655_v43 = vld [vmem:[#allocation5 + $0x15c] sm:$0xf0]  ;;  %3909 = vmatpush.bf16.msra.mxu0 %v9614_v35  ;;  %v4516_v35 = vmax.f32 %v15236_v39, 0.0  ;;  %v4532_v37 = vmax.f32 %v3594_v3, 0.0  ;;  %v13711_v2 = vld [vmem:[#allocation5 + $0x324] sm:$0xf] }
 0x16d   :  { %v10061_v46 = vld [vmem:[#allocation5 + $0x520] sm:$0xf]  ;;  %v9550_v60 = vor.u32 %v13655_v43, %v9549_v42  ;;  %3861 = vmatmul.bf16.gmra.mxu1 %v15123_v50  ;;  %v10383_v43 = vld [vmem:[#allocation5 + $0x7e0] sm:$0xf0] }
 0x16e   :  { %v13783_v49 = vld [vmem:[#allocation5 + $0x55c] sm:$0xf0]  ;;  %3928 = vmatpush.bf16.msra.mxu1 %v10126_v40  ;;  %3948 = vmatpush.bf16.msra.mxu2 %v10574_v59  ;;  %v13855_v40 = vld [vmem:[#allocation5 + $0x7a4] sm:$0xf]  ;;  %v3596_v59 = vpop.f32.mrf.mxu3 }
 0x16f   :  { %v11085_v58 = vld [vmem:[#allocation5 + $0xd20] sm:$0xf]  ;;  %v10062_v63 = vor.u32 %v13783_v49, %v10061_v46  ;;  %3899 = vmatmul.bf16.gmra.mxu3 %v15127_v56  ;;  %v14111_v46 = vld [vmem:[#allocation5 + $0xfa4] sm:$0xf]  ;;  %v15244_v49 = vpack.c.bf16 %v4532_v37, %v4516_v35 }
 0x170   :  { %v14039_v55 = vld [vmem:[#allocation5 + $0xd5c] sm:$0xf0]  ;;  %3966 = vmatpush.bf16.msra.mxu3 %v11150_v41  ;;  %3910 = vmatpush.bf16.msra.mxu0 %v9550_v60  ;;  %v10898_v60 = vor.u32 %v13983_v31, %v10895_v32  ;;  %v11410_v8 = vor.u32 %v14111_v46, %v11407_v47  ;;  %v10319_v12 = vld [vmem:[#allocation5 + $0x760] sm:$0xf0] }
 0x171   :  { %v10509_v61 = vld [vmem:[#allocation5 + $0x8a0] sm:$0xf]  ;;  %v11086_v24 = vor.u32 %v14039_v55, %v11085_v58  ;;  %16023 = vst [vmem:[#allocation24_spill] sm:$0xff] %v15244_v49  ;;  %v3577_v55 = vpop.f32.mrf.mxu2  ;;  %v11343_v14 = vld [vmem:[#allocation5 + $0xf60] sm:$0xf0] }
 0x172   :  { %v13895_v62 = vld [vmem:[#allocation5 + $0x8dc] sm:$0xf0]  ;;  %3929 = vmatpush.bf16.msra.mxu1 %v10062_v63  ;;  %v10831_v63 = vld [vmem:[#allocation5 + $0xb60] sm:$0xf0] }
 0x173   :  { %v9485_v4 = vld [vmem:[#allocation5 + $0xa0] sm:$0xf]  ;;  %v10510_v18 = vor.u32 %v13895_v62, %v10509_v61  ;;  %v9874_v61 = vor.u32 %v13727_v34, %v9871_v38  ;;  %v13967_v62 = vld [vmem:[#allocation5 + $0xb24] sm:$0xf] }
 0x174   :  { %v13639_v5 = vld [vmem:[#allocation5 + $0xdc] sm:$0xf0]  ;;  %3967 = vmatpush.bf16.msra.mxu3 %v11086_v24  ;;  %v3578_v24 = vadd.f32 %v3577_v55, %v3559_v30  ;;  %v10834_v16 = vor.u32 %v13967_v62, %v10831_v63  ;;  %v13695_v3 = vld [vmem:[#allocation5 + $0x2a4] sm:$0xf] }
 0x175   :  { %v9997_v6 = vld [vmem:[#allocation5 + $0x4a0] sm:$0xf]  ;;  %v9486_v19 = vor.u32 %v13639_v5, %v9485_v4  ;;  %3949 = vmatpush.bf16.msra.mxu2 %v10510_v18  ;;  %v3541_v4 = vpop.f32.mrf.mxu0  ;;  %v3560_v5 = vpop.f32.mrf.mxu1  ;;  %v14079_v30 = vld [vmem:[#allocation5 + $0xea4] sm:$0xf] }
 0x176   :  { %v13767_v9 = vld [vmem:[#allocation5 + $0x4dc] sm:$0xf0]  ;;  %v11279_v31 = vld [vmem:[#allocation5 + $0xee0] sm:$0xf0] }
 0x177   :  { %v11021_v10 = vld [vmem:[#allocation5 + $0xca0] sm:$0xf]  ;;  %v9998_v23 = vor.u32 %v13767_v9, %v9997_v6  ;;  %3911 = vmatpush.bf16.msra.mxu0 %v9486_v19  ;;  %v10386_v6 = vor.u32 %v13855_v40, %v10383_v43  ;;  %v9807_v9 = vld [vmem:[#allocation5 + $0x360] sm:$0xf0]  ;;  %v11282_v47 = vor.u32 %v14079_v30, %v11279_v31 }
 0x178   :  { %v14023_v11 = vld [vmem:[#allocation5 + $0xcdc] sm:$0xf0]  ;;  %v9810_v18 = vor.u32 %v13711_v2, %v9807_v9  ;;  %v13807_v55 = vld [vmem:[#allocation5 + $0x624] sm:$0xf] }
 0x179   :  { %v10445_v45 = vld [vmem:[#allocation5 + $0x820] sm:$0xf]  ;;  %v11022_v26 = vor.u32 %v14023_v11, %v11021_v10  ;;  %3930 = vmatpush.bf16.msra.mxu1 %v9998_v23  ;;  %v13839_v10 = vld [vmem:[#allocation5 + $0x724] sm:$0xf]  ;;  %v3542_v11 = vadd.f32 %v3541_v4, %v15226_v0 }
 0x17a   :  { %v13879_v15 = vld [vmem:[#allocation5 + $0x85c] sm:$0xf0]  ;;  %v10322_v19 = vor.u32 %v13839_v10, %v10319_v12  ;;  %v13951_v0 = vld [vmem:[#allocation5 + $0xaa4] sm:$0xf] }
 0x17b   :  { %v9421_v20 = vld [vmem:[#allocation5 + $0x20] sm:$0xf]  ;;  %v10446_v41 = vor.u32 %v13879_v15, %v10445_v45  ;;  %3968 = vmatpush.bf16.msra.mxu3 %v11022_v26  ;;  %v3597_v45 = vadd.f32 %v3596_v59, %v3578_v24  ;;  %v3561_v15 = vadd.f32 %v3560_v5, %v3542_v11  ;;  %v9743_v23 = vld [vmem:[#allocation5 + $0x2e0] sm:$0xf0] }
 0x17c   :  { %v13623_v21 = vld [vmem:[#allocation5 + $0x5c] sm:$0xf0]  ;;  %v13823_v26 = vld [vmem:[#allocation5 + $0x6a4] sm:$0xf]  ;;  %v9746_v40 = vor.u32 %v13695_v3, %v9743_v23 }
 0x17d   :  { %v9933_v22 = vld [vmem:[#allocation5 + $0x420] sm:$0xf]  ;;  %v9422_v42 = vor.u32 %v13623_v21, %v9421_v20  ;;  %3950 = vmatpush.bf16.msra.mxu2 %v10446_v41  ;;  %v11346_v20 = vor.u32 %v14095_v13, %v11343_v14  ;;  %v15248_v21 = vperm.slane %v15223_v33, 4  ;;  %v3610_v34 = vpop.f32.mrf.mxu0  ;;  %v3629_v35 = vpop.f32.mrf.mxu1  ;;  %v13935_v41 = vld [vmem:[#allocation5 + $0xa24] sm:$0xf]  ;;  %v4548_v63 = vmax.f32 %v3597_v45, 0.0 }
 0x17e   :  { %v13751_v27 = vld [vmem:[#allocation5 + $0x45c] sm:$0xf0]  ;;  %v11215_v62 = vld [vmem:[#allocation5 + $0xe60] sm:$0xf0] }
 0x17f   :  { %v10957_v29 = vld [vmem:[#allocation5 + $0xc20] sm:$0xf]  ;;  %v9934_v58 = vor.u32 %v13751_v27, %v9933_v22  ;;  %3912 = vmatpush.bf16.msra.mxu0 %v9422_v42  ;;  %v10767_v22 = vld [vmem:[#allocation5 + $0xae0] sm:$0xf0]  ;;  %v3579_v27 = vpop.f32.mrf.mxu2  ;;  %v3611_v37 = vadd.f32 %v3610_v34, %v15248_v21 }
 0x180   :  { %v14007_v25 = vld [vmem:[#allocation5 + $0xc5c] sm:$0xf0]  ;;  %v3580_v32 = vadd.f32 %v3579_v27, %v3561_v15  ;;  %v10770_v38 = vor.u32 %v13951_v0, %v10767_v22  ;;  %v10703_v42 = vld [vmem:[#allocation5 + $0xa60] sm:$0xf0]  ;;  %3951 = vmatmul.bf16.vlgmr.msra.gmra.mxu2 %v15113_v54 }
 0x181   :  { %v10958_v39 = vor.u32 %v14007_v25, %v10957_v29  ;;  %3931 = vmatpush.bf16.msra.mxu1 %v9934_v58  ;;  %4019 = vmatpush.bf16.msrb.mxu2 %v10898_v60  ;;  %v3598_v29 = vpop.f32.mrf.mxu3  ;;  %v10255_v25 = vld [vmem:[#allocation5 + $0x6e0] sm:$0xf0]  ;;  %v3630_v59 = vadd.f32 %v3629_v35, %v3611_v37  ;;  %v10706_v4 = vor.u32 %v13935_v41, %v10703_v42 }
 0x182   :  { %v3599_v43 = vadd.f32 %v3598_v29, %v3580_v32  ;;  %v10258_v46 = vor.u32 %v13823_v26, %v10255_v25  ;;  %v13679_v58 = vld [vmem:[#allocation5 + $0x224] sm:$0xf]  ;;  %3913 = vmatmul.bf16.vlgmr.msra.gmra.mxu0 %v15109_v48 }
 0x183   :  { %3969 = vmatpush.bf16.msra.mxu3 %v10958_v39  ;;  %3981 = vmatpush.bf16.msrb.mxu0 %v9874_v61  ;;  %v9679_v39 = vld [vmem:[#allocation5 + $0x260] sm:$0xf0] }
 0x184   :  { %3932 = vmatmul.bf16.vlgmr.msra.gmra.mxu1 %v15111_v53  ;;  %v10191_v60 = vld [vmem:[#allocation5 + $0x660] sm:$0xf0]  ;;  %v4564_v24 = vmax.f32 %v3599_v43, 0.0  ;;  %v9682_v5 = vor.u32 %v13679_v58, %v9679_v39 }
 0x185   :  { %4000 = vmatpush.bf16.msrb.mxu1 %v10386_v6  ;;  %4020 = vmatpush.bf16.msrb.mxu2 %v10834_v16  ;;  %v14063_v61 = vld [vmem:[#allocation5 + $0xe24] sm:$0xf]  ;;  %v10194_v9 = vor.u32 %v13807_v55, %v10191_v60  ;;  %v3631_v0 = vpop.f32.mrf.mxu1 }
 0x186   :  { %3970 = vmatmul.bf16.vlgmr.msra.gmra.mxu3 %v15115_v57  ;;  %v13919_v6 = vld [vmem:[#allocation5 + $0x9a4] sm:$0xf]  ;;  %v15255_v2 = vpack.c.bf16 %v4564_v24, %v4548_v63  ;;  %v11218_v10 = vor.u32 %v14063_v61, %v11215_v62 }
 0x187   :  { %4038 = vmatpush.bf16.msrb.mxu3 %v11410_v8  ;;  %3982 = vmatpush.bf16.msrb.mxu0 %v9810_v18  ;;  %v10639_v8 = vld [vmem:[#allocation5 + $0x9e0] sm:$0xf0]  ;;  %v3648_v14 = vpop.f32.mrf.mxu2 }
 0x188   :  { %16024 = vst [vmem:[#allocation25_spill] sm:$0xff] %v15255_v2  ;;  %v13663_v11 = vld [vmem:[#allocation5 + $0x1a4] sm:$0xf]  ;;  %v10642_v3 = vor.u32 %v13919_v6, %v10639_v8 }
 0x189   :  { %4001 = vmatpush.bf16.msrb.mxu1 %v10322_v19  ;;  %4021 = vmatpush.bf16.msrb.mxu2 %v10770_v38  ;;  %v9615_v12 = vld [vmem:[#allocation5 + $0x1e0] sm:$0xf0]  ;;  %v3667_v45 = vpop.f32.mrf.mxu3  ;;  %v3649_v19 = vadd.f32 %v3648_v14, %v3630_v59 }
 0x18a   :  { %v13791_v13 = vld [vmem:[#allocation5 + $0x5a4] sm:$0xf]  ;;  %v9618_v23 = vor.u32 %v13663_v11, %v9615_v12 }
 0x18b   :  { %4039 = vmatpush.bf16.msrb.mxu3 %v11346_v20  ;;  %3983 = vmatpush.bf16.msrb.mxu0 %v9746_v40  ;;  %v10127_v15 = vld [vmem:[#allocation5 + $0x5e0] sm:$0xf0]  ;;  %v3612_v20 = vpop.f32.mrf.mxu0  ;;  %v15258_v29 = vadd.f32 %v3667_v45, %v3649_v19 }
 0x18c   :  { %v14047_v16 = vld [vmem:[#allocation5 + $0xda4] sm:$0xf]  ;;  %v3613_v22 = vadd.f32 %v3612_v20, %v15248_v21  ;;  %v10130_v25 = vor.u32 %v13791_v13, %v10127_v15 }
 0x18d   :  { %4002 = vmatpush.bf16.msrb.mxu1 %v10258_v46  ;;  %v11151_v18 = vld [vmem:[#allocation5 + $0xde0] sm:$0xf0]  ;;  %4022 = vmatpush.bf16.msrb.mxu2 %v10706_v4  ;;  %v3634_v6 = vpop.f32.mrf.mxu1 }
 0x18e   :  { %v13903_v26 = vld [vmem:[#allocation5 + $0x924] sm:$0xf]  ;;  %v11154_v30 = vor.u32 %v14047_v16, %v11151_v18  ;;  %v3632_v35 = vadd.f32 %v3631_v0, %v3613_v22 }
 0x18f   :  { %4040 = vmatpush.bf16.msrb.mxu3 %v11282_v47  ;;  %3984 = vmatpush.bf16.msrb.mxu0 %v9682_v5  ;;  %v10575_v27 = vld [vmem:[#allocation5 + $0x960] sm:$0xf0]  ;;  %v3650_v60 = vpop.f32.mrf.mxu2 }
 0x190   :  { %v13647_v31 = vld [vmem:[#allocation5 + $0x124] sm:$0xf]  ;;  %v10578_v41 = vor.u32 %v13903_v26, %v10575_v27  ;;  %v3651_v4 = vadd.f32 %v3650_v60, %v3632_v35  ;;  %v9877_v26 = vld [vmem:[#allocation5 + $0x3a8] sm:$0xf]  ;;  %v4517_v27 = vmax.f32 %v15258_v29, 0.0  ;;  %3956 = vmatmul.bf16.gmra.mxu2 %v15125_v51 }
 0x191   :  { %4003 = vmatpush.bf16.msrb.mxu1 %v10194_v9  ;;  %v9551_v32 = vld [vmem:[#allocation5 + $0x160] sm:$0xf0]  ;;  %4023 = vmatpush.bf16.msrb.mxu2 %v10642_v3  ;;  %v3669_v61 = vpop.f32.mrf.mxu3  ;;  %v10901_v3 = vld [vmem:[#allocation5 + $0xba8] sm:$0xf] }
 0x192   :  { %v13775_v34 = vld [vmem:[#allocation5 + $0x524] sm:$0xf]  ;;  %v9554_v42 = vor.u32 %v13647_v31, %v9551_v32  ;;  %v3670_v15 = vadd.f32 %v3669_v61, %v3651_v4  ;;  %3918 = vmatmul.bf16.gmra.mxu0 %v15121_v44  ;;  %v10389_v31 = vld [vmem:[#allocation5 + $0x7a8] sm:$0xf] }
 0x193   :  { %4041 = vmatpush.bf16.msrb.mxu3 %v11218_v10  ;;  %v10063_v37 = vld [vmem:[#allocation5 + $0x560] sm:$0xf0]  ;;  %3985 = vmatpush.bf16.msrb.mxu0 %v9618_v23  ;;  %v3615_v5 = vpop.f32.mrf.mxu0  ;;  %v13992_v23 = vld [vmem:[#allocation5 + $0xbe4] sm:$0xf0] }
 0x194   :  { %v14031_v38 = vld [vmem:[#allocation5 + $0xd24] sm:$0xf]  ;;  %v10066_v47 = vor.u32 %v13775_v34, %v10063_v37  ;;  %v3616_v10 = vadd.f32 %v3615_v5, %v15248_v21  ;;  %3937 = vmatmul.bf16.gmra.mxu1 %v15123_v50  ;;  %v13864_v35 = vld [vmem:[#allocation5 + $0x7e4] sm:$0xf0] }
 0x195   :  { %v11087_v40 = vld [vmem:[#allocation5 + $0xd60] sm:$0xf0]  ;;  %4004 = vmatpush.bf16.msrb.mxu1 %v10130_v25  ;;  %4024 = vmatpush.bf16.msrb.mxu2 %v10578_v41  ;;  %v4533_v25 = vmax.f32 %v3670_v15, 0.0  ;;  %v11413_v37 = vld [vmem:[#allocation5 + $0xfa8] sm:$0xf]  ;;  %v3636_v60 = vpop.f32.mrf.mxu1  ;;  %v10390_v61 = vor.u32 %v13864_v35, %v10389_v31  ;;  %v15270_v15 = vperm.slane %v15223_v33, 5 }
 0x196   :  { %v13887_v43 = vld [vmem:[#allocation5 + $0x8a4] sm:$0xf]  ;;  %v11090_v58 = vor.u32 %v14031_v38, %v11087_v40  ;;  %v3635_v22 = vadd.f32 %v3634_v6, %v3616_v10  ;;  %3975 = vmatmul.bf16.gmra.mxu3 %v15127_v56  ;;  %v14120_v38 = vld [vmem:[#allocation5 + $0xfe4] sm:$0xf0] }
 0x197   :  { %v10511_v46 = vld [vmem:[#allocation5 + $0x8e0] sm:$0xf0]  ;;  %4042 = vmatpush.bf16.msrb.mxu3 %v11154_v30  ;;  %3986 = vmatpush.bf16.msrb.mxu0 %v9554_v42  ;;  %v13736_v30 = vld [vmem:[#allocation5 + $0x3e4] sm:$0xf0]  ;;  %v15266_v40 = vpack.c.bf16 %v4533_v25, %v4517_v27  ;;  %v3653_v42 = vpop.f32.mrf.mxu2 }
 0x198   :  { %v13631_v39 = vld [vmem:[#allocation5 + $0xa4] sm:$0xf]  ;;  %v10514_v11 = vor.u32 %v13887_v43, %v10511_v46  ;;  %v10902_v46 = vor.u32 %v13992_v23, %v10901_v3  ;;  %v10325_v4 = vld [vmem:[#allocation5 + $0x728] sm:$0xf] }
 0x199   :  { %v9487_v55 = vld [vmem:[#allocation5 + $0xe0] sm:$0xf0]  ;;  %4005 = vmatpush.bf16.msrb.mxu1 %v10066_v47  ;;  %16025 = vst [vmem:[#allocation26_spill] sm:$0xff] %v15266_v40  ;;  %v3672_v43 = vpop.f32.mrf.mxu3  ;;  %v9878_v47 = vor.u32 %v13736_v30, %v9877_v26  ;;  %v13848_v6 = vld [vmem:[#allocation5 + $0x764] sm:$0xf0] }
 0x19a   :  { %v13759_v59 = vld [vmem:[#allocation5 + $0x4a4] sm:$0xf]  ;;  %v9490_v12 = vor.u32 %v13631_v39, %v9487_v55  ;;  %4025 = vmatpush.bf16.msrb.mxu2 %v10514_v11  ;;  %v13976_v39 = vld [vmem:[#allocation5 + $0xb64] sm:$0xf0]  ;;  %v3654_v55 = vadd.f32 %v3653_v42, %v3635_v22 }
 0x19b   :  { %v9999_v62 = vld [vmem:[#allocation5 + $0x4e0] sm:$0xf0]  ;;  %4043 = vmatpush.bf16.msrb.mxu3 %v11090_v58  ;;  %v10837_v58 = vld [vmem:[#allocation5 + $0xb28] sm:$0xf] }
 0x19c   :  { %v14015_v63 = vld [vmem:[#allocation5 + $0xca4] sm:$0xf]  ;;  %v10002_v16 = vor.u32 %v13759_v59, %v9999_v62  ;;  %3987 = vmatpush.bf16.msrb.mxu0 %v9490_v12  ;;  %v3617_v59 = vpop.f32.mrf.mxu0  ;;  %v11414_v62 = vor.u32 %v14120_v38, %v11413_v37  ;;  %v3673_v10 = vadd.f32 %v3672_v43, %v3654_v55  ;;  %v10838_v12 = vor.u32 %v13976_v39, %v10837_v58  ;;  %v13832_v3 = vld [vmem:[#allocation5 + $0x6e4] sm:$0xf0] }
 0x19d   :  { %v11023_v24 = vld [vmem:[#allocation5 + $0xce0] sm:$0xf0]  ;;  %v3618_v5 = vadd.f32 %v3617_v59, %v15248_v21  ;;  %v10773_v21 = vld [vmem:[#allocation5 + $0xaa8] sm:$0xf]  ;;  %v3705_v30 = vpop.f32.mrf.mxu1 }
 0x19e   :  { %v13871_v8 = vld [vmem:[#allocation5 + $0x824] sm:$0xf]  ;;  %v11026_v18 = vor.u32 %v14015_v63, %v11023_v24  ;;  %4006 = vmatpush.bf16.msrb.mxu1 %v10002_v16  ;;  %v9813_v63 = vld [vmem:[#allocation5 + $0x328] sm:$0xf]  ;;  %v4549_v55 = vmax.f32 %v3673_v10, 0.0 }
 0x19f   :  { %v10447_v9 = vld [vmem:[#allocation5 + $0x860] sm:$0xf0]  ;;  %v13720_v24 = vld [vmem:[#allocation5 + $0x364] sm:$0xf0]  ;;  %v3637_v11 = vadd.f32 %v3636_v60, %v3618_v5 }
 0x1a0   :  { %v13615_v13 = vld [vmem:[#allocation5 + $0x24] sm:$0xf]  ;;  %v10450_v32 = vor.u32 %v13871_v8, %v10447_v9  ;;  %4044 = vmatpush.bf16.msrb.mxu3 %v11026_v18  ;;  %v11349_v8 = vld [vmem:[#allocation5 + $0xf28] sm:$0xf] }
 0x1a1   :  { %v9423_v14 = vld [vmem:[#allocation5 + $0x60] sm:$0xf0]  ;;  %v14104_v9 = vld [vmem:[#allocation5 + $0xf64] sm:$0xf0]  ;;  %v3674_v22 = vpop.f32.mrf.mxu3 }
 0x1a2   :  { %v13743_v45 = vld [vmem:[#allocation5 + $0x424] sm:$0xf]  ;;  %v9426_v34 = vor.u32 %v13615_v13, %v9423_v14  ;;  %4026 = vmatpush.bf16.msrb.mxu2 %v10450_v32  ;;  %v9814_v13 = vor.u32 %v13720_v24, %v9813_v63  ;;  %v10326_v14 = vor.u32 %v13848_v6, %v10325_v4  ;;  %v13960_v16 = vld [vmem:[#allocation5 + $0xae4] sm:$0xf0] }
 0x1a3   :  { %v9935_v19 = vld [vmem:[#allocation5 + $0x460] sm:$0xf0]  ;;  %v9749_v18 = vld [vmem:[#allocation5 + $0x2a8] sm:$0xf]  ;;  %v10774_v31 = vor.u32 %v13960_v16, %v10773_v21 }
 0x1a4   :  { %v13999_v20 = vld [vmem:[#allocation5 + $0xc24] sm:$0xf]  ;;  %v9938_v41 = vor.u32 %v13743_v45, %v9935_v19  ;;  %3988 = vmatpush.bf16.msrb.mxu0 %v9426_v34  ;;  %v11350_v45 = vor.u32 %v14104_v9, %v11349_v8  ;;  %v13704_v19 = vld [vmem:[#allocation5 + $0x2e4] sm:$0xf0]  ;;  %v3686_v25 = vpop.f32.mrf.mxu0 }
 0x1a5   :  { %v10959_v0 = vld [vmem:[#allocation5 + $0xc60] sm:$0xf0]  ;;  %v11285_v23 = vld [vmem:[#allocation5 + $0xea8] sm:$0xf]  ;;  %v3687_v33 = vadd.f32 %v3686_v25, %v15270_v15  ;;  %v9750_v32 = vor.u32 %v13704_v19, %v9749_v18  ;;  %4027 = vmatmul.bf16.vlgmr.msrb.gmra.mxu2 %v15113_v54  ;;  %v3707_v16 = vpop.f32.mrf.mxu1 }
 0x1a6   :  { %v10962_v29 = vor.u32 %v13999_v20, %v10959_v0  ;;  %4007 = vmatpush.bf16.msrb.mxu1 %v9938_v41  ;;  %4095 = vmatpush.bf16.msra.mxu2 %v10902_v46  ;;  %v10261_v20 = vld [vmem:[#allocation5 + $0x6a8] sm:$0xf]  ;;  %v3655_v0 = vpop.f32.mrf.mxu2 }
 0x1a7   :  { %v14088_v26 = vld [vmem:[#allocation5 + $0xee4] sm:$0xf0]  ;;  %v3656_v27 = vadd.f32 %v3655_v0, %v3637_v11  ;;  %v10262_v38 = vor.u32 %v13832_v3, %v10261_v20  ;;  %v3706_v46 = vadd.f32 %v3705_v30, %v3687_v33  ;;  %3989 = vmatmul.bf16.vlgmr.msrb.gmra.mxu0 %v15109_v48 }
 0x1a8   :  { %4045 = vmatpush.bf16.msrb.mxu3 %v10962_v29  ;;  %4057 = vmatpush.bf16.msra.mxu0 %v9878_v47  ;;  %v10709_v34 = vld [vmem:[#allocation5 + $0xa28] sm:$0xf]  ;;  %v11286_v41 = vor.u32 %v14088_v26, %v11285_v23 }
 0x1a9   :  { %v13944_v35 = vld [vmem:[#allocation5 + $0xa64] sm:$0xf0]  ;;  %v3675_v37 = vadd.f32 %v3674_v22, %v3656_v27  ;;  %4008 = vmatmul.bf16.vlgmr.msrb.gmra.mxu1 %v15111_v53  ;;  %v3743_v11 = vpop.f32.mrf.mxu3 }
 0x1aa   :  { %4076 = vmatpush.bf16.msra.mxu1 %v10390_v61  ;;  %4096 = vmatpush.bf16.msra.mxu2 %v10838_v12  ;;  %v9685_v29 = vld [vmem:[#allocation5 + $0x228] sm:$0xf]  ;;  %v10710_v60 = vor.u32 %v13944_v35, %v10709_v34 }
 0x1ab   :  { %v13688_v42 = vld [vmem:[#allocation5 + $0x264] sm:$0xf0]  ;;  %v4565_v59 = vmax.f32 %v3675_v37, 0.0  ;;  %4046 = vmatmul.bf16.vlgmr.msrb.gmra.mxu3 %v15115_v57 }
 0x1ac   :  { %4114 = vmatpush.bf16.msra.mxu3 %v11414_v62  ;;  %4058 = vmatpush.bf16.msra.mxu0 %v9814_v13  ;;  %v10197_v43 = vld [vmem:[#allocation5 + $0x628] sm:$0xf]  ;;  %v9686_v61 = vor.u32 %v13688_v42, %v9685_v29  ;;  %v3688_v21 = vpop.f32.mrf.mxu0 }
 0x1ad   :  { %v13816_v47 = vld [vmem:[#allocation5 + $0x664] sm:$0xf0]  ;;  %v15277_v24 = vpack.c.bf16 %v4565_v59, %v4549_v55  ;;  %v3689_v18 = vadd.f32 %v3688_v21, %v15270_v15 }
 0x1ae   :  { %4077 = vmatpush.bf16.msra.mxu1 %v10326_v14  ;;  %v11221_v58 = vld [vmem:[#allocation5 + $0xe28] sm:$0xf]  ;;  %4097 = vmatpush.bf16.msra.mxu2 %v10774_v31  ;;  %v10198_v4 = vor.u32 %v13816_v47, %v10197_v43  ;;  %v3724_v10 = vpop.f32.mrf.mxu2 }
 0x1af   :  { %v14072_v39 = vld [vmem:[#allocation5 + $0xe64] sm:$0xf0]  ;;  %16026 = vst [vmem:[#allocation27_spill] sm:$0xff] %v15277_v24  ;;  %v3708_v33 = vadd.f32 %v3707_v16, %v3689_v18 }
 0x1b0   :  { %4115 = vmatpush.bf16.msra.mxu3 %v11350_v45  ;;  %4059 = vmatpush.bf16.msra.mxu0 %v9750_v32  ;;  %v10645_v62 = vld [vmem:[#allocation5 + $0x9a8] sm:$0xf]  ;;  %v11222_v5 = vor.u32 %v14072_v39, %v11221_v58  ;;  %v3725_v45 = vadd.f32 %v3724_v10, %v3706_v46 }
 0x1b1   :  { %v13928_v63 = vld [vmem:[#allocation5 + $0x9e4] sm:$0xf0]  ;;  %v3745_v39 = vpop.f32.mrf.mxu3 }
 0x1b2   :  { %4078 = vmatpush.bf16.msra.mxu1 %v10262_v38  ;;  %v9621_v6 = vld [vmem:[#allocation5 + $0x1a8] sm:$0xf]  ;;  %4098 = vmatpush.bf16.msra.mxu2 %v10710_v60  ;;  %v10646_v19 = vor.u32 %v13928_v63, %v10645_v62  ;;  %v15280_v3 = vadd.f32 %v3743_v11, %v3725_v45  ;;  %v3710_v63 = vpop.f32.mrf.mxu1 }
 0x1b3   :  { %v13672_v8 = vld [vmem:[#allocation5 + $0x1e4] sm:$0xf0] }
 0x1b4   :  { %4116 = vmatpush.bf16.msra.mxu3 %v11286_v41  ;;  %v10133_v9 = vld [vmem:[#allocation5 + $0x5a8] sm:$0xf]  ;;  %4060 = vmatpush.bf16.msra.mxu0 %v9686_v61  ;;  %v9622_v20 = vor.u32 %v13672_v8, %v9621_v6  ;;  %v3691_v62 = vpop.f32.mrf.mxu0 }
 0x1b5   :  { %v13800_v12 = vld [vmem:[#allocation5 + $0x5e4] sm:$0xf0]  ;;  %v3692_v6 = vadd.f32 %v3691_v62, %v15270_v15  ;;  %4032 = vmatmul.bf16.gmra.mxu2 %v15125_v51  ;;  %v13840_v62 = vld [vmem:[#allocation5 + $0x72c] sm:$0xf] }
 0x1b6   :  { %v11157_v13 = vld [vmem:[#allocation5 + $0xda8] sm:$0xf]  ;;  %4079 = vmatpush.bf16.msra.mxu1 %v10198_v4  ;;  %v10134_v23 = vor.u32 %v13800_v12, %v10133_v9  ;;  %4099 = vmatpush.bf16.msra.mxu2 %v10646_v19  ;;  %v3726_v58 = vpop.f32.mrf.mxu2 }
 0x1b7   :  { %v14056_v14 = vld [vmem:[#allocation5 + $0xde4] sm:$0xf0]  ;;  %v3727_v61 = vadd.f32 %v3726_v58, %v3708_v33  ;;  %v3711_v19 = vadd.f32 %v3710_v63, %v3692_v6  ;;  %3994 = vmatmul.bf16.gmra.mxu0 %v15121_v44  ;;  %v11351_v6 = vld [vmem:[#allocation5 + $0xf68] sm:$0xf0] }
 0x1b8   :  { %v10581_v0 = vld [vmem:[#allocation5 + $0x928] sm:$0xf]  ;;  %4117 = vmatpush.bf16.msra.mxu3 %v11222_v5  ;;  %v11158_v26 = vor.u32 %v14056_v14, %v11157_v13  ;;  %4061 = vmatpush.bf16.msra.mxu0 %v9622_v20  ;;  %v13984_v20 = vld [vmem:[#allocation5 + $0xbac] sm:$0xf] }
 0x1b9   :  { %v13912_v22 = vld [vmem:[#allocation5 + $0x964] sm:$0xf0]  ;;  %v3746_v13 = vadd.f32 %v3745_v39, %v3727_v61  ;;  %4013 = vmatmul.bf16.gmra.mxu1 %v15123_v50  ;;  %v9815_v61 = vld [vmem:[#allocation5 + $0x368] sm:$0xf0] }
 0x1ba   :  { %v9557_v27 = vld [vmem:[#allocation5 + $0x128] sm:$0xf]  ;;  %v10582_v35 = vor.u32 %v13912_v22, %v10581_v0  ;;  %4080 = vmatpush.bf16.msra.mxu1 %v10134_v23  ;;  %v10903_v0 = vld [vmem:[#allocation5 + $0xbe8] sm:$0xf0]  ;;  %v4518_v23 = vmax.f32 %v15280_v3, 0.0  ;;  %v3712_v39 = vpop.f32.mrf.mxu1 }
 0x1bb   :  { %v13656_v25 = vld [vmem:[#allocation5 + $0x164] sm:$0xf0]  ;;  %v13728_v22 = vld [vmem:[#allocation5 + $0x3ac] sm:$0xf]  ;;  %4051 = vmatmul.bf16.gmra.mxu3 %v15127_v56 }
 0x1bc   :  { %v10069_v30 = vld [vmem:[#allocation5 + $0x528] sm:$0xf]  ;;  %v9558_v37 = vor.u32 %v13656_v25, %v9557_v27  ;;  %4118 = vmatpush.bf16.msra.mxu3 %v11158_v26  ;;  %4100 = vmatpush.bf16.msra.mxu2 %v10582_v35  ;;  %v4534_v26 = vmax.f32 %v3746_v13, 0.0  ;;  %v9879_v27 = vld [vmem:[#allocation5 + $0x3e8] sm:$0xf0]  ;;  %v3693_v58 = vpop.f32.mrf.mxu0 }
 0x1bd   :  { %v13784_v31 = vld [vmem:[#allocation5 + $0x564] sm:$0xf0]  ;;  %v13856_v25 = vld [vmem:[#allocation5 + $0x7ac] sm:$0xf]  ;;  %v3694_v63 = vadd.f32 %v3693_v58, %v15270_v15 }
 0x1be   :  { %v11093_v32 = vld [vmem:[#allocation5 + $0xd28] sm:$0xf]  ;;  %v10070_v29 = vor.u32 %v13784_v31, %v10069_v30  ;;  %4062 = vmatpush.bf16.msra.mxu0 %v9558_v37  ;;  %v10391_v31 = vld [vmem:[#allocation5 + $0x7e8] sm:$0xf0]  ;;  %v15288_v35 = vpack.c.bf16 %v4534_v26, %v4518_v23 }
 0x1bf   :  { %v14040_v34 = vld [vmem:[#allocation5 + $0xd64] sm:$0xf0]  ;;  %v14080_v23 = vld [vmem:[#allocation5 + $0xeac] sm:$0xf] }
 0x1c0   :  { %v10517_v38 = vld [vmem:[#allocation5 + $0x8a8] sm:$0xf]  ;;  %v11094_v42 = vor.u32 %v14040_v34, %v11093_v32  ;;  %4081 = vmatpush.bf16.msra.mxu1 %v10070_v29  ;;  %v14112_v32 = vld [vmem:[#allocation5 + $0xfac] sm:$0xf]  ;;  %16027 = vst [vmem:[#allocation28_spill] sm:$0xff] %v15288_v35  ;;  %v10906_v29 = vor.u32 %v13984_v20, %v10903_v0 }
 0x1c1   :  { %v13896_v41 = vld [vmem:[#allocation5 + $0x8e4] sm:$0xf0]  ;;  %v11415_v34 = vld [vmem:[#allocation5 + $0xfe8] sm:$0xf0] }
 0x1c2   :  { %v9493_v43 = vld [vmem:[#allocation5 + $0xa8] sm:$0xf]  ;;  %v10518_v8 = vor.u32 %v13896_v41, %v10517_v38  ;;  %4119 = vmatpush.bf16.msra.mxu3 %v11094_v42  ;;  %v3729_v38 = vpop.f32.mrf.mxu2  ;;  %v3748_v41 = vpop.f32.mrf.mxu3  ;;  %v9882_v42 = vor.u32 %v13728_v22, %v9879_v27  ;;  %v10263_v22 = vld [vmem:[#allocation5 + $0x6e8] sm:$0xf0] }
 0x1c3   :  { %v13640_v46 = vld [vmem:[#allocation5 + $0xe4] sm:$0xf0]  ;;  %v11287_v26 = vld [vmem:[#allocation5 + $0xee8] sm:$0xf0] }
 0x1c4   :  { %v10005_v47 = vld [vmem:[#allocation5 + $0x4a8] sm:$0xf]  ;;  %v9494_v9 = vor.u32 %v13640_v46, %v9493_v43  ;;  %4101 = vmatpush.bf16.msra.mxu2 %v10518_v8  ;;  %v13968_v43 = vld [vmem:[#allocation5 + $0xb2c] sm:$0xf] }
 0x1c5   :  { %v13768_v55 = vld [vmem:[#allocation5 + $0x4e4] sm:$0xf0]  ;;  %v10839_v46 = vld [vmem:[#allocation5 + $0xb68] sm:$0xf0] }
 0x1c6   :  { %v11029_v59 = vld [vmem:[#allocation5 + $0xca8] sm:$0xf]  ;;  %v10006_v14 = vor.u32 %v13768_v55, %v10005_v47  ;;  %4063 = vmatpush.bf16.msra.mxu0 %v9494_v9  ;;  %v3730_v47 = vadd.f32 %v3729_v38, %v3711_v19  ;;  %v10394_v55 = vor.u32 %v13856_v25, %v10391_v31  ;;  %v3713_v9 = vadd.f32 %v3712_v39, %v3694_v63  ;;  %v13824_v19 = vld [vmem:[#allocation5 + $0x6ac] sm:$0xf]  ;;  %v3762_v25 = vpop.f32.mrf.mxu0 }
 0x1c7   :  { %v14024_v60 = vld [vmem:[#allocation5 + $0xce4] sm:$0xf0]  ;;  %v10266_v38 = vor.u32 %v13824_v19, %v10263_v22  ;;  %v14064_v58 = vld [vmem:[#allocation5 + $0xe2c] sm:$0xf] }
 0x1c8   :  { %v10453_v4 = vld [vmem:[#allocation5 + $0x828] sm:$0xf]  ;;  %v11030_v45 = vor.u32 %v14024_v60, %v11029_v59  ;;  %4082 = vmatpush.bf16.msra.mxu1 %v10006_v14  ;;  %v11418_v59 = vor.u32 %v14112_v32, %v11415_v34  ;;  %v13712_v60 = vld [vmem:[#allocation5 + $0x32c] sm:$0xf]  ;;  %v3749_v8 = vadd.f32 %v3748_v41, %v3730_v47  ;;  %v15291_v14 = vld [vmem:[#allocation7] sm:$0xff]  ;;  %v11290_v41 = vor.u32 %v14080_v23, %v11287_v26 }
 0x1c9   :  { %v13880_v5 = vld [vmem:[#allocation5 + $0x864] sm:$0xf0]  ;;  %v15294_v15 = vperm.slane %v15291_v14, 6  ;;  %v13936_v34 = vld [vmem:[#allocation5 + $0xa2c] sm:$0xf] }
 0x1ca   :  { %v9429_v10 = vld [vmem:[#allocation5 + $0x28] sm:$0xf]  ;;  %v10454_v30 = vor.u32 %v13880_v5, %v10453_v4  ;;  %4120 = vmatpush.bf16.msra.mxu3 %v11030_v45  ;;  %v10327_v4 = vld [vmem:[#allocation5 + $0x768] sm:$0xf0]  ;;  %v3731_v20 = vpop.f32.mrf.mxu2  ;;  %v3750_v0 = vpop.f32.mrf.mxu3 }
 0x1cb   :  { %v13624_v11 = vld [vmem:[#allocation5 + $0x64] sm:$0xf0]  ;;  %v14096_v5 = vld [vmem:[#allocation5 + $0xf2c] sm:$0xf]  ;;  %v3732_v27 = vadd.f32 %v3731_v20, %v3713_v9 }
 0x1cc   :  { %v9941_v12 = vld [vmem:[#allocation5 + $0x428] sm:$0xf]  ;;  %v9430_v33 = vor.u32 %v13624_v11, %v9429_v10  ;;  %4102 = vmatpush.bf16.msra.mxu2 %v10454_v30  ;;  %v10842_v10 = vor.u32 %v13968_v43, %v10839_v46  ;;  %v9818_v11 = vor.u32 %v13712_v60, %v9815_v61  ;;  %v11354_v13 = vor.u32 %v14096_v5, %v11351_v6  ;;  %v13952_v45 = vld [vmem:[#allocation5 + $0xaac] sm:$0xf]  ;;  %v3781_v30 = vpop.f32.mrf.mxu1 }
 0x1cd   :  { %v13752_v21 = vld [vmem:[#allocation5 + $0x464] sm:$0xf0]  ;;  %v13808_v43 = vld [vmem:[#allocation5 + $0x62c] sm:$0xf] }
 0x1ce   :  { %v10965_v16 = vld [vmem:[#allocation5 + $0xc28] sm:$0xf]  ;;  %v9942_v37 = vor.u32 %v13752_v21, %v9941_v12  ;;  %4064 = vmatpush.bf16.msra.mxu0 %v9430_v33  ;;  %v10330_v12 = vor.u32 %v13840_v62, %v10327_v4  ;;  %v10775_v21 = vld [vmem:[#allocation5 + $0xae8] sm:$0xf0]  ;;  %v3763_v33 = vadd.f32 %v3762_v25, %v15294_v15 }
 0x1cf   :  { %v14008_v18 = vld [vmem:[#allocation5 + $0xc64] sm:$0xf0]  ;;  %v10778_v31 = vor.u32 %v13952_v45, %v10775_v21  ;;  %v10199_v47 = vld [vmem:[#allocation5 + $0x668] sm:$0xf0]  ;;  %4103 = vmatmul.bf16.vlgmr.msra.gmra.mxu2 %v15113_v54 }
 0x1d0   :  { %v10966_v3 = vor.u32 %v14008_v18, %v10965_v16  ;;  %4083 = vmatpush.bf16.msra.mxu1 %v9942_v37  ;;  %4171 = vmatpush.bf16.msrb.mxu2 %v10906_v29  ;;  %v13696_v16 = vld [vmem:[#allocation5 + $0x2ac] sm:$0xf]  ;;  %v3782_v46 = vadd.f32 %v3781_v30, %v3763_v33  ;;  %v10202_v5 = vor.u32 %v13808_v43, %v10199_v47 }
 0x1d1   :  { %v9751_v18 = vld [vmem:[#allocation5 + $0x2e8] sm:$0xf0]  ;;  %4065 = vmatmul.bf16.vlgmr.msra.gmra.mxu0 %v15109_v48 }
 0x1d2   :  { %4121 = vmatpush.bf16.msra.mxu3 %v10966_v3  ;;  %4133 = vmatpush.bf16.msrb.mxu0 %v9882_v42  ;;  %v9754_v32 = vor.u32 %v13696_v16, %v9751_v18  ;;  %v10711_v37 = vld [vmem:[#allocation5 + $0xa68] sm:$0xf0]  ;;  %v3751_v3 = vadd.f32 %v3750_v0, %v3732_v27  ;;  %v3764_v18 = vpop.f32.mrf.mxu0 }
 0x1d3   :  { %v13680_v29 = vld [vmem:[#allocation5 + $0x22c] sm:$0xf]  ;;  %4084 = vmatmul.bf16.vlgmr.msra.gmra.mxu1 %v15111_v53  ;;  %v10714_v60 = vor.u32 %v13936_v34, %v10711_v37  ;;  %v3765_v20 = vadd.f32 %v3764_v18, %v15294_v15 }
 0x1d4   :  { %4152 = vmatpush.bf16.msrb.mxu1 %v10394_v55  ;;  %4172 = vmatpush.bf16.msrb.mxu2 %v10842_v10  ;;  %v9687_v42 = vld [vmem:[#allocation5 + $0x268] sm:$0xf0]  ;;  %v4550_v55 = vmax.f32 %v3749_v8, 0.0  ;;  %v3783_v19 = vpop.f32.mrf.mxu1 }
 0x1d5   :  { %v11223_v39 = vld [vmem:[#allocation5 + $0xe68] sm:$0xf0]  ;;  %4122 = vmatmul.bf16.vlgmr.msra.gmra.mxu3 %v15115_v57  ;;  %v9690_v61 = vor.u32 %v13680_v29, %v9687_v42  ;;  %v3784_v34 = vadd.f32 %v3783_v19, %v3765_v20 }
 0x1d6   :  { %4190 = vmatpush.bf16.msrb.mxu3 %v11418_v59  ;;  %4134 = vmatpush.bf16.msrb.mxu0 %v9818_v11  ;;  %v4566_v59 = vmax.f32 %v3751_v3, 0.0  ;;  %v13920_v62 = vld [vmem:[#allocation5 + $0x9ac] sm:$0xf]  ;;  %v11226_v6 = vor.u32 %v14064_v58, %v11223_v39  ;;  %v3800_v11 = vpop.f32.mrf.mxu2 }
 0x1d7   :  { %v10647_v63 = vld [vmem:[#allocation5 + $0x9e8] sm:$0xf0]  ;;  %v3801_v16 = vadd.f32 %v3800_v11, %v3782_v46 }
 0x1d8   :  { %4153 = vmatpush.bf16.msrb.mxu1 %v10330_v12  ;;  %4173 = vmatpush.bf16.msrb.mxu2 %v10778_v31  ;;  %v15301_v4 = vpack.c.bf16 %v4566_v59, %v4550_v55  ;;  %v13664_v9 = vld [vmem:[#allocation5 + $0x1ac] sm:$0xf]  ;;  %v3819_v12 = vpop.f32.mrf.mxu3  ;;  %v10650_v0 = vor.u32 %v13920_v62, %v10647_v63 }
 0x1d9   :  { %v9623_v10 = vld [vmem:[#allocation5 + $0x1e8] sm:$0xf0]  ;;  %v15304_v27 = vadd.f32 %v3819_v12, %v3801_v16 }
 0x1da   :  { %4191 = vmatpush.bf16.msrb.mxu3 %v11354_v13  ;;  %4135 = vmatpush.bf16.msrb.mxu0 %v9754_v32  ;;  %16028 = vst [vmem:[#allocation29_spill] sm:$0xff] %v15301_v4  ;;  %v13792_v8 = vld [vmem:[#allocation5 + $0x5ac] sm:$0xf]  ;;  %v9626_v22 = vor.u32 %v13664_v9, %v9623_v10 }
 0x1db   :  { %v10135_v13 = vld [vmem:[#allocation5 + $0x5e8] sm:$0xf0] }
 0x1dc   :  { %4154 = vmatpush.bf16.msrb.mxu1 %v10266_v38  ;;  %v14048_v45 = vld [vmem:[#allocation5 + $0xdac] sm:$0xf]  ;;  %4174 = vmatpush.bf16.msrb.mxu2 %v10714_v60  ;;  %v10138_v25 = vor.u32 %v13792_v8, %v10135_v13  ;;  %v3786_v9 = vpop.f32.mrf.mxu1 }
 0x1dd   :  { %v11159_v21 = vld [vmem:[#allocation5 + $0xde8] sm:$0xf0] }
 0x1de   :  { %4192 = vmatpush.bf16.msrb.mxu3 %v11290_v41  ;;  %4136 = vmatpush.bf16.msrb.mxu0 %v9690_v61  ;;  %v13904_v23 = vld [vmem:[#allocation5 + $0x92c] sm:$0xf]  ;;  %v11162_v30 = vor.u32 %v14048_v45, %v11159_v21  ;;  %v3802_v59 = vpop.f32.mrf.mxu2 }
 0x1df   :  { %v10583_v26 = vld [vmem:[#allocation5 + $0x968] sm:$0xf0]  ;;  %4108 = vmatmul.bf16.gmra.mxu2 %v15125_v51 }
 0x1e0   :  { %4155 = vmatpush.bf16.msrb.mxu1 %v10202_v5  ;;  %v13648_v33 = vld [vmem:[#allocation5 + $0x12c] sm:$0xf]  ;;  %4175 = vmatpush.bf16.msrb.mxu2 %v10650_v0  ;;  %v10586_v41 = vor.u32 %v13904_v23, %v10583_v26  ;;  %v3821_v60 = vpop.f32.mrf.mxu3  ;;  %v3803_v5 = vadd.f32 %v3802_v59, %v3784_v34  ;;  %v13737_v34 = vld [vmem:[#allocation5 + $0x3ec] sm:$0xf0] }
 0x1e1   :  { %v9559_v31 = vld [vmem:[#allocation5 + $0x168] sm:$0xf0]  ;;  %4070 = vmatmul.bf16.gmra.mxu0 %v15121_v44  ;;  %v10845_v59 = vld [vmem:[#allocation5 + $0xb30] sm:$0xf] }
 0x1e2   :  { %4193 = vmatpush.bf16.msrb.mxu3 %v11226_v6  ;;  %v13776_v32 = vld [vmem:[#allocation5 + $0x52c] sm:$0xf]  ;;  %4137 = vmatpush.bf16.msrb.mxu0 %v9626_v22  ;;  %v9562_v29 = vor.u32 %v13648_v33, %v9559_v31  ;;  %v3767_v6 = vpop.f32.mrf.mxu0  ;;  %v3822_v18 = vadd.f32 %v3821_v60, %v3803_v5  ;;  %v9885_v33 = vld [vmem:[#allocation5 + $0x3b0] sm:$0xf]  ;;  %v4519_v31 = vmax.f32 %v15304_v27, 0.0 }
 0x1e3   :  { %v10071_v37 = vld [vmem:[#allocation5 + $0x568] sm:$0xf0]  ;;  %v3768_v11 = vadd.f32 %v3767_v6, %v15294_v15  ;;  %4089 = vmatmul.bf16.gmra.mxu1 %v15123_v50  ;;  %v13977_v60 = vld [vmem:[#allocation5 + $0xb6c] sm:$0xf0] }
 0x1e4   :  { %v14032_v3 = vld [vmem:[#allocation5 + $0xd2c] sm:$0xf]  ;;  %4156 = vmatpush.bf16.msrb.mxu1 %v10138_v25  ;;  %v10074_v46 = vor.u32 %v13776_v32, %v10071_v37  ;;  %4176 = vmatpush.bf16.msrb.mxu2 %v10586_v41  ;;  %v10909_v25 = vld [vmem:[#allocation5 + $0xbb0] sm:$0xf]  ;;  %v4535_v32 = vmax.f32 %v3822_v18, 0.0  ;;  %v10846_v18 = vor.u32 %v13977_v60, %v10845_v59 }
 0x1e5   :  { %v11095_v38 = vld [vmem:[#allocation5 + $0xd68] sm:$0xf0]  ;;  %v3787_v26 = vadd.f32 %v3786_v9, %v3768_v11  ;;  %4127 = vmatmul.bf16.gmra.mxu3 %v15127_v56  ;;  %v10397_v37 = vld [vmem:[#allocation5 + $0x7b0] sm:$0xf] }
 0x1e6   :  { %v13888_v42 = vld [vmem:[#allocation5 + $0x8ac] sm:$0xf]  ;;  %4194 = vmatpush.bf16.msrb.mxu3 %v11162_v30  ;;  %v11098_v47 = vor.u32 %v14032_v3, %v11095_v38  ;;  %4138 = vmatpush.bf16.msrb.mxu0 %v9562_v29  ;;  %v13993_v30 = vld [vmem:[#allocation5 + $0xbec] sm:$0xf0] }
 0x1e7   :  { %v10519_v43 = vld [vmem:[#allocation5 + $0x8e8] sm:$0xf0]  ;;  %v13865_v41 = vld [vmem:[#allocation5 + $0x7ec] sm:$0xf0] }
 0x1e8   :  { %v13632_v58 = vld [vmem:[#allocation5 + $0xac] sm:$0xf]  ;;  %v10522_v12 = vor.u32 %v13888_v42, %v10519_v43  ;;  %4157 = vmatpush.bf16.msrb.mxu1 %v10074_v46  ;;  %v11421_v29 = vld [vmem:[#allocation5 + $0xfb0] sm:$0xf]  ;;  %v15312_v43 = vpack.c.bf16 %v4535_v32, %v4519_v31  ;;  %v10398_v5 = vor.u32 %v13865_v41, %v10397_v37 }
 0x1e9   :  { %v9495_v39 = vld [vmem:[#allocation5 + $0xe8] sm:$0xf0]  ;;  %v14121_v42 = vld [vmem:[#allocation5 + $0xfec] sm:$0xf0] }
 0x1ea   :  { %v13760_v55 = vld [vmem:[#allocation5 + $0x4ac] sm:$0xf]  ;;  %v9498_v13 = vor.u32 %v13632_v58, %v9495_v39  ;;  %4195 = vmatpush.bf16.msrb.mxu3 %v11098_v47  ;;  %4177 = vmatpush.bf16.msrb.mxu2 %v10522_v12  ;;  %16029 = vst [vmem:[#allocation30_spill] sm:$0xff] %v15312_v43  ;;  %v3805_v47 = vpop.f32.mrf.mxu2  ;;  %v3824_v58 = vpop.f32.mrf.mxu3  ;;  %v10910_v39 = vor.u32 %v13993_v30, %v10909_v25  ;;  %v9821_v9 = vld [vmem:[#allocation5 + $0x330] sm:$0xf] }
 0x1eb   :  { %v10007_v61 = vld [vmem:[#allocation5 + $0x4e8] sm:$0xf0]  ;;  %v11422_v6 = vor.u32 %v14121_v42, %v11421_v29  ;;  %v13849_v12 = vld [vmem:[#allocation5 + $0x76c] sm:$0xf0] }
 0x1ec   :  { %v14016_v62 = vld [vmem:[#allocation5 + $0xcac] sm:$0xf]  ;;  %v10010_v19 = vor.u32 %v13760_v55, %v10007_v61  ;;  %4139 = vmatpush.bf16.msrb.mxu0 %v9498_v13  ;;  %v9886_v55 = vor.u32 %v13737_v34, %v9885_v33  ;;  %v3806_v61 = vadd.f32 %v3805_v47, %v3787_v26  ;;  %v11357_v13 = vld [vmem:[#allocation5 + $0xf30] sm:$0xf] }
 0x1ed   :  { %v11031_v63 = vld [vmem:[#allocation5 + $0xce8] sm:$0xf0]  ;;  %v9757_v26 = vld [vmem:[#allocation5 + $0x2b0] sm:$0xf] }
 0x1ee   :  { %v13872_v10 = vld [vmem:[#allocation5 + $0x82c] sm:$0xf]  ;;  %v11034_v20 = vor.u32 %v14016_v62, %v11031_v63  ;;  %4158 = vmatpush.bf16.msrb.mxu1 %v10010_v19  ;;  %v3769_v62 = vpop.f32.mrf.mxu0  ;;  %v3788_v63 = vpop.f32.mrf.mxu1  ;;  %v13705_v25 = vld [vmem:[#allocation5 + $0x2ec] sm:$0xf0] }
 0x1ef   :  { %v10455_v8 = vld [vmem:[#allocation5 + $0x868] sm:$0xf0]  ;;  %v3770_v11 = vadd.f32 %v3769_v62, %v15294_v15  ;;  %v10781_v15 = vld [vmem:[#allocation5 + $0xab0] sm:$0xf]  ;;  %v9758_v42 = vor.u32 %v13705_v25, %v9757_v26 }
 0x1f0   :  { %v13616_v45 = vld [vmem:[#allocation5 + $0x2c] sm:$0xf]  ;;  %v10458_v3 = vor.u32 %v13872_v10, %v10455_v8  ;;  %4196 = vmatpush.bf16.msrb.mxu3 %v11034_v20  ;;  %v13721_v10 = vld [vmem:[#allocation5 + $0x36c] sm:$0xf0] }
 0x1f1   :  { %v9431_v21 = vld [vmem:[#allocation5 + $0x68] sm:$0xf0]  ;;  %v10333_v8 = vld [vmem:[#allocation5 + $0x730] sm:$0xf]  ;;  %v9822_v19 = vor.u32 %v13721_v10, %v9821_v9 }
 0x1f2   :  { %v13744_v16 = vld [vmem:[#allocation5 + $0x42c] sm:$0xf]  ;;  %v9434_v38 = vor.u32 %v13616_v45, %v9431_v21  ;;  %4178 = vmatpush.bf16.msrb.mxu2 %v10458_v3  ;;  %v14105_v45 = vld [vmem:[#allocation5 + $0xf6c] sm:$0xf0]  ;;  %v3825_v21 = vadd.f32 %v3824_v58, %v3806_v61  ;;  %v10334_v20 = vor.u32 %v13849_v12, %v10333_v8  ;;  %v3807_v33 = vpop.f32.mrf.mxu2  ;;  %v3826_v31 = vpop.f32.mrf.mxu3 }
 0x1f3   :  { %v9943_v0 = vld [vmem:[#allocation5 + $0x468] sm:$0xf0]  ;;  %v10269_v30 = vld [vmem:[#allocation5 + $0x6b0] sm:$0xf] }
 0x1f4   :  { %v14000_v22 = vld [vmem:[#allocation5 + $0xc2c] sm:$0xf]  ;;  %v9946_v46 = vor.u32 %v13744_v16, %v9943_v0  ;;  %4140 = vmatpush.bf16.msrb.mxu0 %v9434_v38  ;;  %v3789_v16 = vadd.f32 %v3788_v63, %v3770_v11  ;;  %v11358_v0 = vor.u32 %v14105_v45, %v11357_v13  ;;  %v13833_v32 = vld [vmem:[#allocation5 + $0x6ec] sm:$0xf0] }
 0x1f5   :  { %v10967_v23 = vld [vmem:[#allocation5 + $0xc68] sm:$0xf0]  ;;  %v11293_v34 = vld [vmem:[#allocation5 + $0xeb0] sm:$0xf]  ;;  %v10270_v58 = vor.u32 %v13833_v32, %v10269_v30  ;;  %4179 = vmatmul.bf16.vlgmr.msrb.gmra.mxu2 %v15113_v54 }
 0x1f6   :  { %v10970_v27 = vor.u32 %v14000_v22, %v10967_v23  ;;  %4159 = vmatpush.bf16.msrb.mxu1 %v9946_v46  ;;  %4247 = vmatpush.bf16.msra.mxu2 %v10910_v39  ;;  %v15316_v22 = vperm.slane %v15291_v14, 7  ;;  %v13961_v23 = vld [vmem:[#allocation5 + $0xaec] sm:$0xf0]  ;;  %v3808_v3 = vadd.f32 %v3807_v33, %v3789_v16  ;;  %v3838_v38 = vpop.f32.mrf.mxu0  ;;  %v3857_v41 = vpop.f32.mrf.mxu1 }
 0x1f7   :  { %v14089_v37 = vld [vmem:[#allocation5 + $0xeec] sm:$0xf0]  ;;  %v10782_v29 = vor.u32 %v13961_v23, %v10781_v15  ;;  %4141 = vmatmul.bf16.vlgmr.msrb.gmra.mxu0 %v15109_v48 }
 0x1f8   :  { %4197 = vmatpush.bf16.msrb.mxu3 %v10970_v27  ;;  %4209 = vmatpush.bf16.msra.mxu0 %v9886_v55  ;;  %v3839_v14 = vadd.f32 %v3838_v38, %v15316_v22  ;;  %v10717_v46 = vld [vmem:[#allocation5 + $0xa30] sm:$0xf]  ;;  %v3827_v47 = vadd.f32 %v3826_v31, %v3808_v3  ;;  %v11294_v39 = vor.u32 %v14089_v37, %v11293_v34 }
 0x1f9   :  { %v13945_v27 = vld [vmem:[#allocation5 + $0xa6c] sm:$0xf0]  ;;  %4160 = vmatmul.bf16.vlgmr.msrb.gmra.mxu1 %v15111_v53 }
 0x1fa   :  { %4228 = vmatpush.bf16.msra.mxu1 %v10398_v5  ;;  %4248 = vmatpush.bf16.msra.mxu2 %v10846_v18  ;;  %v9693_v55 = vld [vmem:[#allocation5 + $0x230] sm:$0xf]  ;;  %v3858_v61 = vadd.f32 %v3857_v41, %v3839_v14  ;;  %v4567_v9 = vmax.f32 %v3827_v47, 0.0  ;;  %v10718_v10 = vor.u32 %v13945_v27, %v10717_v46 }
 0x1fb   :  { %v13689_v59 = vld [vmem:[#allocation5 + $0x26c] sm:$0xf0]  ;;  %4198 = vmatmul.bf16.vlgmr.msrb.gmra.mxu3 %v15115_v57 }
 0x1fc   :  { %4266 = vmatpush.bf16.msra.mxu3 %v11422_v6  ;;  %4210 = vmatpush.bf16.msra.mxu0 %v9822_v19  ;;  %v10205_v60 = vld [vmem:[#allocation5 + $0x630] sm:$0xf]  ;;  %v4551_v6 = vmax.f32 %v3825_v21, 0.0  ;;  %v9694_v8 = vor.u32 %v13689_v59, %v9693_v55 }
 0x1fd   :  { %v13817_v62 = vld [vmem:[#allocation5 + $0x66c] sm:$0xf0] }
 0x1fe   :  { %4229 = vmatpush.bf16.msra.mxu1 %v10334_v20  ;;  %v11229_v63 = vld [vmem:[#allocation5 + $0xe30] sm:$0xf]  ;;  %4249 = vmatpush.bf16.msra.mxu2 %v10782_v29  ;;  %v15323_v13 = vpack.c.bf16 %v4567_v9, %v4551_v6  ;;  %v10206_v45 = vor.u32 %v13817_v62, %v10205_v60  ;;  %v3876_v20 = vpop.f32.mrf.mxu2  ;;  %v3840_v30 = vpop.f32.mrf.mxu0 }
 0x1ff   :  { %v14073_v5 = vld [vmem:[#allocation5 + $0xe6c] sm:$0xf0]  ;;  %v3877_v25 = vadd.f32 %v3876_v20, %v3858_v61  ;;  %v3859_v33 = vpop.f32.mrf.mxu1  ;;  %v3841_v31 = vadd.f32 %v3840_v30, %v15316_v22 }
 0x200   :  { %4267 = vmatpush.bf16.msra.mxu3 %v11358_v0  ;;  %4211 = vmatpush.bf16.msra.mxu0 %v9758_v42  ;;  %v10653_v11 = vld [vmem:[#allocation5 + $0x9b0] sm:$0xf]  ;;  %16030 = vst [vmem:[#allocation31_spill] sm:$0xff] %v15323_v13  ;;  %v11230_v16 = vor.u32 %v14073_v5, %v11229_v63  ;;  %v3895_v0 = vpop.f32.mrf.mxu3 }
 0x201   :  { %v13929_v12 = vld [vmem:[#allocation5 + $0x9ec] sm:$0xf0]  ;;  %v15326_v38 = vadd.f32 %v3895_v0, %v3877_v25  ;;  %v3860_v27 = vadd.f32 %v3859_v33, %v3841_v31 }
 0x202   :  { %4230 = vmatpush.bf16.msra.mxu1 %v10270_v58  ;;  %v9629_v18 = vld [vmem:[#allocation5 + $0x1b0] sm:$0xf]  ;;  %4250 = vmatpush.bf16.msra.mxu2 %v10718_v10  ;;  %v10654_v32 = vor.u32 %v13929_v12, %v10653_v11 }
 0x203   :  { %v13673_v19 = vld [vmem:[#allocation5 + $0x1ec] sm:$0xf0] }
 0x204   :  { %4268 = vmatpush.bf16.msra.mxu3 %v11294_v39  ;;  %v10141_v21 = vld [vmem:[#allocation5 + $0x5b0] sm:$0xf]  ;;  %4212 = vmatpush.bf16.msra.mxu0 %v9694_v8  ;;  %v9630_v34 = vor.u32 %v13673_v19, %v9629_v18 }
 0x205   :  { %v13801_v15 = vld [vmem:[#allocation5 + $0x5ec] sm:$0xf0]  ;;  %4184 = vmatmul.bf16.gmra.mxu2 %v15125_v51 }
 0x206   :  { %v11165_v23 = vld [vmem:[#allocation5 + $0xdb0] sm:$0xf]  ;;  %4231 = vmatpush.bf16.msra.mxu1 %v10206_v45  ;;  %v10142_v41 = vor.u32 %v13801_v15, %v10141_v21  ;;  %4251 = vmatpush.bf16.msra.mxu2 %v10654_v32  ;;  %v3878_v10 = vpop.f32.mrf.mxu2  ;;  %v3843_v18 = vpop.f32.mrf.mxu0 }
 0x207   :  { %v14057_v26 = vld [vmem:[#allocation5 + $0xdec] sm:$0xf0]  ;;  %v3862_v19 = vpop.f32.mrf.mxu1  ;;  %v3844_v0 = vadd.f32 %v3843_v18, %v15316_v22  ;;  %4146 = vmatmul.bf16.gmra.mxu0 %v15121_v44 }
 0x208   :  { %v10589_v37 = vld [vmem:[#allocation5 + $0x930] sm:$0xf]  ;;  %4269 = vmatpush.bf16.msra.mxu3 %v11230_v16  ;;  %v11166_v14 = vor.u32 %v14057_v26, %v11165_v23  ;;  %4213 = vmatpush.bf16.msra.mxu0 %v9630_v34  ;;  %v3897_v8 = vpop.f32.mrf.mxu3  ;;  %v3879_v16 = vadd.f32 %v3878_v10, %v3860_v27 }
 0x209   :  { %v13913_v3 = vld [vmem:[#allocation5 + $0x96c] sm:$0xf0]  ;;  %4165 = vmatmul.bf16.gmra.mxu1 %v15123_v50 }
 0x20a   :  { %v9565_v29 = vld [vmem:[#allocation5 + $0x130] sm:$0xf]  ;;  %v10590_v55 = vor.u32 %v13913_v3, %v10589_v37  ;;  %4232 = vmatpush.bf16.msra.mxu1 %v10142_v41  ;;  %v3898_v33 = vadd.f32 %v3897_v8, %v3879_v16  ;;  %v3863_v41 = vadd.f32 %v3862_v19, %v3844_v0  ;;  %v13969_v8 = vld [vmem:[#allocation5 + $0xb34] sm:$0xf] }
 0x20b   :  { %v13657_v42 = vld [vmem:[#allocation5 + $0x16c] sm:$0xf0]  ;;  %4203 = vmatmul.bf16.gmra.mxu3 %v15127_v56  ;;  %v13841_v0 = vld [vmem:[#allocation5 + $0x734] sm:$0xf] }
 0x20c   :  { %v10077_v46 = vld [vmem:[#allocation5 + $0x530] sm:$0xf]  ;;  %v9566_v59 = vor.u32 %v13657_v42, %v9565_v29  ;;  %4270 = vmatpush.bf16.msra.mxu3 %v11166_v14  ;;  %4252 = vmatpush.bf16.msra.mxu2 %v10590_v55  ;;  %v13985_v14 = vld [vmem:[#allocation5 + $0xbb4] sm:$0xf]  ;;  %v4536_v27 = vmax.f32 %v3898_v33, 0.0  ;;  %v15337_v33 = vld [vmem:[#allocation7 + $0x8] sm:$0xff] }
 0x20d   :  { %v13785_v47 = vld [vmem:[#allocation5 + $0x56c] sm:$0xf0]  ;;  %v10911_v29 = vld [vmem:[#allocation5 + $0xbf0] sm:$0xf0] }
 0x20e   :  { %v11101_v58 = vld [vmem:[#allocation5 + $0xd30] sm:$0xf]  ;;  %v10078_v62 = vor.u32 %v13785_v47, %v10077_v46  ;;  %4214 = vmatpush.bf16.msra.mxu0 %v9566_v59  ;;  %v13729_v42 = vld [vmem:[#allocation5 + $0x3b4] sm:$0xf]  ;;  %v4520_v46 = vmax.f32 %v15326_v38, 0.0 }
 0x20f   :  { %v14041_v39 = vld [vmem:[#allocation5 + $0xd6c] sm:$0xf0]  ;;  %v9887_v47 = vld [vmem:[#allocation5 + $0x3f0] sm:$0xf0]  ;;  %v3864_v16 = vpop.f32.mrf.mxu1 }
 0x210   :  { %v10525_v60 = vld [vmem:[#allocation5 + $0x8b0] sm:$0xf]  ;;  %v11102_v63 = vor.u32 %v14041_v39, %v11101_v58  ;;  %4233 = vmatpush.bf16.msra.mxu1 %v10078_v62  ;;  %v13857_v58 = vld [vmem:[#allocation5 + $0x7b4] sm:$0xf]  ;;  %v15334_v62 = vpack.c.bf16 %v4536_v27, %v4520_v46  ;;  %v9890_v10 = vor.u32 %v13729_v42, %v9887_v47 }
 0x211   :  { %v13897_v61 = vld [vmem:[#allocation5 + $0x8ec] sm:$0xf0]  ;;  %v10399_v59 = vld [vmem:[#allocation5 + $0x7f0] sm:$0xf0] }
 0x212   :  { %v9501_v5 = vld [vmem:[#allocation5 + $0xb0] sm:$0xf]  ;;  %v10526_v15 = vor.u32 %v13897_v61, %v10525_v60  ;;  %4271 = vmatpush.bf16.msra.mxu3 %v11102_v63  ;;  %v14113_v60 = vld [vmem:[#allocation5 + $0xfb4] sm:$0xf]  ;;  %16031 = vst [vmem:[#allocation32_spill] sm:$0xff] %v15334_v62  ;;  %v10402_v18 = vor.u32 %v13857_v58, %v10399_v59 }
 0x213   :  { %v13641_v6 = vld [vmem:[#allocation5 + $0xec] sm:$0xf0]  ;;  %v11423_v61 = vld [vmem:[#allocation5 + $0xff0] sm:$0xf0] }
 0x214   :  { %v10013_v9 = vld [vmem:[#allocation5 + $0x4b0] sm:$0xf]  ;;  %v9502_v23 = vor.u32 %v13641_v6, %v9501_v5  ;;  %4253 = vmatpush.bf16.msra.mxu2 %v10526_v15  ;;  %v3881_v5 = vpop.f32.mrf.mxu2  ;;  %v3900_v6 = vpop.f32.mrf.mxu3  ;;  %v11426_v19 = vor.u32 %v14113_v60, %v11423_v61  ;;  %v9759_v42 = vld [vmem:[#allocation5 + $0x2f0] sm:$0xf0] }
 0x215   :  { %v13769_v11 = vld [vmem:[#allocation5 + $0x4ec] sm:$0xf0]  ;;  %v13825_v46 = vld [vmem:[#allocation5 + $0x6b4] sm:$0xf] }
 0x216   :  { %v11037_v12 = vld [vmem:[#allocation5 + $0xcb0] sm:$0xf]  ;;  %v10014_v31 = vor.u32 %v13769_v11, %v10013_v9  ;;  %4215 = vmatpush.bf16.msra.mxu0 %v9502_v23  ;;  %v10914_v9 = vor.u32 %v13985_v14, %v10911_v29  ;;  %v10847_v11 = vld [vmem:[#allocation5 + $0xb70] sm:$0xf0] }
 0x217   :  { %v14025_v45 = vld [vmem:[#allocation5 + $0xcec] sm:$0xf0]  ;;  %v10335_v23 = vld [vmem:[#allocation5 + $0x770] sm:$0xf0]  ;;  %v3933_v61 = vpop.f32.mrf.mxu1 }
 0x218   :  { %v10461_v21 = vld [vmem:[#allocation5 + $0x830] sm:$0xf]  ;;  %v11038_v32 = vor.u32 %v14025_v45, %v11037_v12  ;;  %4234 = vmatpush.bf16.msra.mxu1 %v10014_v31  ;;  %v3882_v12 = vadd.f32 %v3881_v5, %v3863_v41  ;;  %v3845_v45 = vpop.f32.mrf.mxu0  ;;  %v13953_v41 = vld [vmem:[#allocation5 + $0xab4] sm:$0xf] }
 0x219   :  { %v13881_v20 = vld [vmem:[#allocation5 + $0x86c] sm:$0xf0]  ;;  %v3846_v15 = vadd.f32 %v3845_v45, %v15316_v22  ;;  %v15340_v22 = vperm.slane %v15337_v33, 0  ;;  %v10783_v14 = vld [vmem:[#allocation5 + $0xaf0] sm:$0xf0] }
 0x21a   :  { %v9437_v26 = vld [vmem:[#allocation5 + $0x30] sm:$0xf]  ;;  %v10462_v39 = vor.u32 %v13881_v20, %v10461_v21  ;;  %4272 = vmatpush.bf16.msra.mxu3 %v11038_v32  ;;  %v13713_v21 = vld [vmem:[#allocation5 + $0x334] sm:$0xf]  ;;  %v10850_v32 = vor.u32 %v13969_v8, %v10847_v11 }
 0x21b   :  { %v13625_v25 = vld [vmem:[#allocation5 + $0x6c] sm:$0xf0]  ;;  %v9823_v20 = vld [vmem:[#allocation5 + $0x370] sm:$0xf0]  ;;  %v3865_v31 = vadd.f32 %v3864_v16, %v3846_v15 }
 0x21c   :  { %v9949_v30 = vld [vmem:[#allocation5 + $0x430] sm:$0xf]  ;;  %v9438_v55 = vor.u32 %v13625_v25, %v9437_v26  ;;  %4254 = vmatpush.bf16.msra.mxu2 %v10462_v39  ;;  %v14097_v26 = vld [vmem:[#allocation5 + $0xf34] sm:$0xf]  ;;  %v3883_v27 = vpop.f32.mrf.mxu2  ;;  %v3902_v47 = vpop.f32.mrf.mxu3 }
 0x21d   :  { %v13753_v34 = vld [vmem:[#allocation5 + $0x46c] sm:$0xf0]  ;;  %v11359_v25 = vld [vmem:[#allocation5 + $0xf70] sm:$0xf0]  ;;  %v3884_v59 = vadd.f32 %v3883_v27, %v3865_v31 }
 0x21e   :  { %v10973_v37 = vld [vmem:[#allocation5 + $0xc30] sm:$0xf]  ;;  %v9950_v63 = vor.u32 %v13753_v34, %v9949_v30  ;;  %4216 = vmatpush.bf16.msra.mxu0 %v9438_v55  ;;  %v3901_v30 = vadd.f32 %v3900_v6, %v3882_v12  ;;  %v9826_v34 = vor.u32 %v13713_v21, %v9823_v20  ;;  %v13697_v29 = vld [vmem:[#allocation5 + $0x2b4] sm:$0xf] }
 0x21f   :  { %v14009_v3 = vld [vmem:[#allocation5 + $0xc6c] sm:$0xf0]  ;;  %v10271_v58 = vld [vmem:[#allocation5 + $0x6f0] sm:$0xf0]  ;;  %v9762_v5 = vor.u32 %v13697_v29, %v9759_v42  ;;  %4255 = vmatmul.bf16.vlgmr.msra.gmra.mxu2 %v15113_v54 }
 0x220   :  { %v10974_v38 = vor.u32 %v14009_v3, %v10973_v37  ;;  %4235 = vmatpush.bf16.msra.mxu1 %v9950_v63  ;;  %4323 = vmatpush.bf16.msrb.mxu2 %v10914_v9  ;;  %v10338_v37 = vor.u32 %v13841_v0, %v10335_v23  ;;  %v11362_v3 = vor.u32 %v14097_v26, %v11359_v25  ;;  %v14081_v39 = vld [vmem:[#allocation5 + $0xeb4] sm:$0xf]  ;;  %v3914_v60 = vpop.f32.mrf.mxu0  ;;  %v4552_v0 = vmax.f32 %v3901_v30, 0.0 }
 0x221   :  { %v11295_v55 = vld [vmem:[#allocation5 + $0xef0] sm:$0xf0]  ;;  %v3915_v63 = vadd.f32 %v3914_v60, %v15340_v22  ;;  %v10274_v8 = vor.u32 %v13825_v46, %v10271_v58  ;;  %4217 = vmatmul.bf16.vlgmr.msra.gmra.mxu0 %v15109_v48 }
 0x222   :  { %4273 = vmatpush.bf16.msra.mxu3 %v10974_v38  ;;  %4285 = vmatpush.bf16.msrb.mxu0 %v9890_v10  ;;  %v10786_v38 = vor.u32 %v13953_v41, %v10783_v14  ;;  %v13937_v6 = vld [vmem:[#allocation5 + $0xa34] sm:$0xf]  ;;  %v3903_v10 = vadd.f32 %v3902_v47, %v3884_v59  ;;  %v11298_v11 = vor.u32 %v14081_v39, %v11295_v55  ;;  %v3935_v39 = vpop.f32.mrf.mxu1 }
 0x223   :  { %v10719_v9 = vld [vmem:[#allocation5 + $0xa70] sm:$0xf0]  ;;  %4236 = vmatmul.bf16.vlgmr.msra.gmra.mxu1 %v15111_v53 }
 0x224   :  { %4304 = vmatpush.bf16.msrb.mxu1 %v10402_v18  ;;  %4324 = vmatpush.bf16.msrb.mxu2 %v10850_v32  ;;  %v13681_v12 = vld [vmem:[#allocation5 + $0x234] sm:$0xf]  ;;  %v3934_v18 = vadd.f32 %v3933_v61, %v3915_v63  ;;  %v4568_v15 = vmax.f32 %v3903_v10, 0.0  ;;  %v10722_v23 = vor.u32 %v13937_v6, %v10719_v9  ;;  %v3952_v14 = vpop.f32.mrf.mxu2  ;;  %v3971_v29 = vpop.f32.mrf.mxu3 }
 0x225   :  { %v9695_v45 = vld [vmem:[#allocation5 + $0x270] sm:$0xf0]  ;;  %4274 = vmatmul.bf16.vlgmr.msra.gmra.mxu3 %v15115_v57 }
 0x226   :  { %4342 = vmatpush.bf16.msrb.mxu3 %v11426_v19  ;;  %4286 = vmatpush.bf16.msrb.mxu0 %v9826_v34  ;;  %v13809_v16 = vld [vmem:[#allocation5 + $0x634] sm:$0xf]  ;;  %v9698_v26 = vor.u32 %v13681_v12, %v9695_v45  ;;  %v15347_v32 = vpack.c.bf16 %v4568_v15, %v4552_v0  ;;  %v3953_v47 = vadd.f32 %v3952_v14, %v3934_v18 }
 0x227   :  { %v10207_v19 = vld [vmem:[#allocation5 + $0x670] sm:$0xf0] }
 0x228   :  { %4305 = vmatpush.bf16.msrb.mxu1 %v10338_v37  ;;  %v14065_v21 = vld [vmem:[#allocation5 + $0xe34] sm:$0xf]  ;;  %4325 = vmatpush.bf16.msrb.mxu2 %v10786_v38  ;;  %16032 = vst [vmem:[#allocation33_spill] sm:$0xff] %v15347_v32  ;;  %v10210_v34 = vor.u32 %v13809_v16, %v10207_v19  ;;  %v3916_v58 = vpop.f32.mrf.mxu0  ;;  %v15350_v38 = vadd.f32 %v3971_v29, %v3953_v47 }
 0x229   :  { %v11231_v20 = vld [vmem:[#allocation5 + $0xe70] sm:$0xf0]  ;;  %v3917_v55 = vadd.f32 %v3916_v58, %v15340_v22 }
 0x22a   :  { %4343 = vmatpush.bf16.msrb.mxu3 %v11362_v3  ;;  %4287 = vmatpush.bf16.msrb.mxu0 %v9762_v5  ;;  %v13921_v25 = vld [vmem:[#allocation5 + $0x9b4] sm:$0xf]  ;;  %v11234_v37 = vor.u32 %v14065_v21, %v11231_v20  ;;  %v3938_v29 = vpop.f32.mrf.mxu1 }
 0x22b   :  { %v10655_v31 = vld [vmem:[#allocation5 + $0x9f0] sm:$0xf0] }
 0x22c   :  { %4306 = vmatpush.bf16.msrb.mxu1 %v10274_v8  ;;  %v13665_v3 = vld [vmem:[#allocation5 + $0x1b4] sm:$0xf]  ;;  %4326 = vmatpush.bf16.msrb.mxu2 %v10722_v23  ;;  %v10658_v59 = vor.u32 %v13921_v25, %v10655_v31  ;;  %v3954_v31 = vpop.f32.mrf.mxu2 }
 0x22d   :  { %v9631_v41 = vld [vmem:[#allocation5 + $0x1f0] sm:$0xf0] }
 0x22e   :  { %4344 = vmatpush.bf16.msrb.mxu3 %v11298_v11  ;;  %v13793_v30 = vld [vmem:[#allocation5 + $0x5b4] sm:$0xf]  ;;  %4288 = vmatpush.bf16.msrb.mxu0 %v9698_v26  ;;  %v9634_v60 = vor.u32 %v13665_v3, %v9631_v41  ;;  %v3936_v11 = vadd.f32 %v3935_v39, %v3917_v55 }
 0x22f   :  { %v10143_v42 = vld [vmem:[#allocation5 + $0x5f0] sm:$0xf0]  ;;  %4260 = vmatmul.bf16.gmra.mxu2 %v15125_v51 }
 0x230   :  { %v14049_v46 = vld [vmem:[#allocation5 + $0xdb4] sm:$0xf]  ;;  %4307 = vmatpush.bf16.msrb.mxu1 %v10210_v34  ;;  %v10146_v5 = vor.u32 %v13793_v30, %v10143_v42  ;;  %4327 = vmatpush.bf16.msrb.mxu2 %v10658_v59  ;;  %v3973_v34 = vpop.f32.mrf.mxu3  ;;  %v3955_v30 = vadd.f32 %v3954_v31, %v3936_v11  ;;  %v3919_v14 = vpop.f32.mrf.mxu0  ;;  %v13994_v11 = vld [vmem:[#allocation5 + $0xbf4] sm:$0xf0] }
 0x231   :  { %v11167_v27 = vld [vmem:[#allocation5 + $0xdf0] sm:$0xf0]  ;;  %4222 = vmatmul.bf16.gmra.mxu0 %v15121_v44 }
 0x232   :  { %v13905_v61 = vld [vmem:[#allocation5 + $0x934] sm:$0xf]  ;;  %4345 = vmatpush.bf16.msrb.mxu3 %v11234_v37  ;;  %v11170_v6 = vor.u32 %v14049_v46, %v11167_v27  ;;  %4289 = vmatpush.bf16.msrb.mxu0 %v9634_v60  ;;  %v3920_v27 = vadd.f32 %v3919_v14, %v15340_v22  ;;  %v3974_v60 = vadd.f32 %v3973_v34, %v3955_v30  ;;  %v13978_v30 = vld [vmem:[#allocation5 + $0xb74] sm:$0xf0] }
 0x233   :  { %v10591_v63 = vld [vmem:[#allocation5 + $0x970] sm:$0xf0]  ;;  %4241 = vmatmul.bf16.gmra.mxu1 %v15123_v50 }
 0x234   :  { %v13649_v9 = vld [vmem:[#allocation5 + $0x134] sm:$0xf]  ;;  %v10594_v18 = vor.u32 %v13905_v61, %v10591_v63  ;;  %4308 = vmatpush.bf16.msrb.mxu1 %v10146_v5  ;;  %v3957_v31 = vpop.f32.mrf.mxu2 }
 0x235   :  { %v9567_v10 = vld [vmem:[#allocation5 + $0x170] sm:$0xf0]  ;;  %4279 = vmatmul.bf16.gmra.mxu3 %v15127_v56 }
 0x236   :  { %v13777_v8 = vld [vmem:[#allocation5 + $0x534] sm:$0xf]  ;;  %v9570_v19 = vor.u32 %v13649_v9, %v9567_v10  ;;  %4346 = vmatpush.bf16.msrb.mxu3 %v11170_v6  ;;  %4328 = vmatpush.bf16.msrb.mxu2 %v10594_v18  ;;  %v3939_v10 = vadd.f32 %v3938_v29, %v3920_v27  ;;  %v13738_v18 = vld [vmem:[#allocation5 + $0x3f4] sm:$0xf0]  ;;  %v3940_v27 = vpop.f32.mrf.mxu1 }
 0x237   :  { %v10079_v12 = vld [vmem:[#allocation5 + $0x570] sm:$0xf0] }
 0x238   :  { %v14033_v45 = vld [vmem:[#allocation5 + $0xd34] sm:$0xf]  ;;  %v10082_v0 = vor.u32 %v13777_v8, %v10079_v12  ;;  %4290 = vmatpush.bf16.msrb.mxu0 %v9570_v19  ;;  %v10917_v8 = vld [vmem:[#allocation5 + $0xbb8] sm:$0xf]  ;;  %v3976_v34 = vpop.f32.mrf.mxu3  ;;  %v3958_v14 = vadd.f32 %v3957_v31, %v3939_v10  ;;  %v3921_v29 = vpop.f32.mrf.mxu0 }
 0x239   :  { %v11103_v16 = vld [vmem:[#allocation5 + $0xd70] sm:$0xf0]  ;;  %v9893_v12 = vld [vmem:[#allocation5 + $0x3b8] sm:$0xf] }
 0x23a   :  { %v13889_v21 = vld [vmem:[#allocation5 + $0x8b4] sm:$0xf]  ;;  %v11106_v15 = vor.u32 %v14033_v45, %v11103_v16  ;;  %4309 = vmatpush.bf16.msrb.mxu1 %v10082_v0  ;;  %v4521_v45 = vmax.f32 %v15350_v38, 0.0  ;;  %v4537_v16 = vmax.f32 %v3974_v60, 0.0  ;;  %v10405_v19 = vld [vmem:[#allocation5 + $0x7b8] sm:$0xf] }
 0x23b   :  { %v10527_v20 = vld [vmem:[#allocation5 + $0x8f0] sm:$0xf0]  ;;  %v13866_v0 = vld [vmem:[#allocation5 + $0x7f4] sm:$0xf0] }
 0x23c   :  { %v13633_v23 = vld [vmem:[#allocation5 + $0xb4] sm:$0xf]  ;;  %v10530_v47 = vor.u32 %v13889_v21, %v10527_v20  ;;  %4347 = vmatpush.bf16.msrb.mxu3 %v11106_v15  ;;  %v11429_v15 = vld [vmem:[#allocation5 + $0xfb8] sm:$0xf] }
 0x23d   :  { %v9503_v26 = vld [vmem:[#allocation5 + $0xf0] sm:$0xf0]  ;;  %v11365_v60 = vld [vmem:[#allocation5 + $0xf38] sm:$0xf] }
 0x23e   :  { %v13761_v25 = vld [vmem:[#allocation5 + $0x4b4] sm:$0xf]  ;;  %v9506_v58 = vor.u32 %v13633_v23, %v9503_v26  ;;  %4329 = vmatpush.bf16.msrb.mxu2 %v10530_v47  ;;  %v14122_v23 = vld [vmem:[#allocation5 + $0xff4] sm:$0xf0]  ;;  %v15358_v26 = vpack.c.bf16 %v4537_v16, %v4521_v45 }
 0x23f   :  { %v10015_v37 = vld [vmem:[#allocation5 + $0x4f0] sm:$0xf0]  ;;  %v9829_v47 = vld [vmem:[#allocation5 + $0x338] sm:$0xf] }
 0x240   :  { %v14017_v3 = vld [vmem:[#allocation5 + $0xcb4] sm:$0xf]  ;;  %v10018_v61 = vor.u32 %v13761_v25, %v10015_v37  ;;  %4291 = vmatpush.bf16.msrb.mxu0 %v9506_v58  ;;  %16033 = vst [vmem:[#allocation34_spill] sm:$0xff] %v15358_v26  ;;  %v10918_v37 = vor.u32 %v13994_v11, %v10917_v8  ;;  %v13722_v58 = vld [vmem:[#allocation5 + $0x374] sm:$0xf0]  ;;  %v15362_v11 = vperm.slane %v15337_v33, 1 }
 0x241   :  { %v11039_v41 = vld [vmem:[#allocation5 + $0xcf0] sm:$0xf0]  ;;  %v9765_v45 = vld [vmem:[#allocation5 + $0x2b8] sm:$0xf] }
 0x242   :  { %v13873_v42 = vld [vmem:[#allocation5 + $0x834] sm:$0xf]  ;;  %v11042_v63 = vor.u32 %v14017_v3, %v11039_v41  ;;  %4310 = vmatpush.bf16.msrb.mxu1 %v10018_v61  ;;  %v9894_v3 = vor.u32 %v13738_v18, %v9893_v12  ;;  %v10853_v41 = vld [vmem:[#allocation5 + $0xb38] sm:$0xf] }
 0x243   :  { %v10463_v46 = vld [vmem:[#allocation5 + $0x870] sm:$0xf0]  ;;  %v14106_v61 = vld [vmem:[#allocation5 + $0xf74] sm:$0xf0] }
 0x244   :  { %v13617_v39 = vld [vmem:[#allocation5 + $0x34] sm:$0xf]  ;;  %v10466_v21 = vor.u32 %v13873_v42, %v10463_v46  ;;  %4348 = vmatpush.bf16.msrb.mxu3 %v11042_v63  ;;  %v10406_v42 = vor.u32 %v13866_v0, %v10405_v19  ;;  %v11430_v46 = vor.u32 %v14122_v23, %v11429_v15  ;;  %v3977_v63 = vadd.f32 %v3976_v34, %v3958_v14  ;;  %v13962_v12 = vld [vmem:[#allocation5 + $0xaf4] sm:$0xf0]  ;;  %v3959_v19 = vpop.f32.mrf.mxu2 }
 0x245   :  { %v9439_v55 = vld [vmem:[#allocation5 + $0x70] sm:$0xf0]  ;;  %v11366_v8 = vor.u32 %v14106_v61, %v11365_v60  ;;  %v13706_v16 = vld [vmem:[#allocation5 + $0x2f4] sm:$0xf0] }
 0x246   :  { %v13745_v59 = vld [vmem:[#allocation5 + $0x434] sm:$0xf]  ;;  %v9442_v20 = vor.u32 %v13617_v39, %v9439_v55  ;;  %v10341_v39 = vld [vmem:[#allocation5 + $0x738] sm:$0xf]  ;;  %v3922_v55 = vadd.f32 %v3921_v29, %v15340_v22  ;;  %4330 = vmatpush.bf16.msrb.mxu2 %v10466_v21  ;;  %v3978_v21 = vpop.f32.mrf.mxu3 }
 0x247   :  { %v9951_v5 = vld [vmem:[#allocation5 + $0x470] sm:$0xf0]  ;;  %v10789_v22 = vld [vmem:[#allocation5 + $0xab8] sm:$0xf] }
 0x248   :  { %v14001_v6 = vld [vmem:[#allocation5 + $0xc34] sm:$0xf]  ;;  %v9954_v25 = vor.u32 %v13745_v59, %v9951_v5  ;;  %4292 = vmatpush.bf16.msrb.mxu0 %v9442_v20  ;;  %v13850_v59 = vld [vmem:[#allocation5 + $0x774] sm:$0xf0]  ;;  %v3941_v5 = vadd.f32 %v3940_v27, %v3922_v55  ;;  %v10790_v34 = vor.u32 %v13962_v12, %v10789_v22 }
 0x249   :  { %v10975_v9 = vld [vmem:[#allocation5 + $0xc70] sm:$0xf0]  ;;  %v10342_v10 = vor.u32 %v13850_v59, %v10341_v39  ;;  %v10277_v18 = vld [vmem:[#allocation5 + $0x6b8] sm:$0xf]  ;;  %v4553_v59 = vmax.f32 %v3977_v63, 0.0  ;;  %4331 = vmatmul.bf16.vlgmr.msrb.gmra.mxu2 %v15113_v54 }
 0x24a   :  { %v10978_v38 = vor.u32 %v14001_v6, %v10975_v9  ;;  %4311 = vmatpush.bf16.msrb.mxu1 %v9954_v25  ;;  %4399 = vmatpush.bf16.msra.mxu2 %v10918_v37  ;;  %v10854_v6 = vor.u32 %v13978_v30, %v10853_v41  ;;  %v9830_v9 = vor.u32 %v13722_v58, %v9829_v47  ;;  %v13834_v20 = vld [vmem:[#allocation5 + $0x6f4] sm:$0xf0]  ;;  %v3990_v25 = vpop.f32.mrf.mxu0 }
 0x24b   :  { %v11301_v0 = vld [vmem:[#allocation5 + $0xeb8] sm:$0xf]  ;;  %v3960_v23 = vadd.f32 %v3959_v19, %v3941_v5  ;;  %v3991_v31 = vadd.f32 %v3990_v25, %v15362_v11  ;;  %v9766_v37 = vor.u32 %v13706_v16, %v9765_v45  ;;  %v10278_v14 = vor.u32 %v13834_v20, %v10277_v18  ;;  %4293 = vmatmul.bf16.vlgmr.msrb.gmra.mxu0 %v15109_v48 }
 0x24c   :  { %4349 = vmatpush.bf16.msrb.mxu3 %v10978_v38  ;;  %4361 = vmatpush.bf16.msra.mxu0 %v9894_v3  ;;  %v14090_v15 = vld [vmem:[#allocation5 + $0xef4] sm:$0xf0]  ;;  %v4009_v38 = vpop.f32.mrf.mxu1  ;;  %v4028_v16 = vpop.f32.mrf.mxu2 }
 0x24d   :  { %v10725_v3 = vld [vmem:[#allocation5 + $0xa38] sm:$0xf]  ;;  %v3979_v30 = vadd.f32 %v3978_v21, %v3960_v23  ;;  %v11302_v29 = vor.u32 %v14090_v15, %v11301_v0  ;;  %v4010_v47 = vadd.f32 %v4009_v38, %v3991_v31  ;;  %4312 = vmatmul.bf16.vlgmr.msrb.gmra.mxu1 %v15111_v53 }
 0x24e   :  { %4380 = vmatpush.bf16.msra.mxu1 %v10406_v42  ;;  %4400 = vmatpush.bf16.msra.mxu2 %v10854_v6  ;;  %v13946_v41 = vld [vmem:[#allocation5 + $0xa74] sm:$0xf0]  ;;  %v4047_v18 = vpop.f32.mrf.mxu3 }
 0x24f   :  { %v9701_v27 = vld [vmem:[#allocation5 + $0x238] sm:$0xf]  ;;  %v4569_v60 = vmax.f32 %v3979_v30, 0.0  ;;  %4350 = vmatmul.bf16.vlgmr.msrb.gmra.mxu3 %v15115_v57  ;;  %v10726_v61 = vor.u32 %v13946_v41, %v10725_v3  ;;  %v4029_v0 = vadd.f32 %v4028_v16, %v4010_v47 }
 0x250   :  { %4418 = vmatpush.bf16.msra.mxu3 %v11430_v46  ;;  %4362 = vmatpush.bf16.msra.mxu0 %v9830_v9  ;;  %v13690_v42 = vld [vmem:[#allocation5 + $0x274] sm:$0xf0] }
 0x251   :  { %v10213_v46 = vld [vmem:[#allocation5 + $0x638] sm:$0xf]  ;;  %v9702_v5 = vor.u32 %v13690_v42, %v9701_v27  ;;  %v15372_v3 = vadd.f32 %v4047_v18, %v4029_v0 }
 0x252   :  { %4381 = vmatpush.bf16.msra.mxu1 %v10342_v10  ;;  %v13818_v58 = vld [vmem:[#allocation5 + $0x674] sm:$0xf0]  ;;  %4401 = vmatpush.bf16.msra.mxu2 %v10790_v34  ;;  %v15369_v10 = vpack.c.bf16 %v4569_v60, %v4553_v59  ;;  %v3992_v15 = vpop.f32.mrf.mxu0 }
 0x253   :  { %v11237_v39 = vld [vmem:[#allocation5 + $0xe38] sm:$0xf]  ;;  %v3993_v25 = vadd.f32 %v3992_v15, %v15362_v11 }
 0x254   :  { %4419 = vmatpush.bf16.msra.mxu3 %v11366_v8  ;;  %v14074_v55 = vld [vmem:[#allocation5 + $0xe74] sm:$0xf0]  ;;  %4363 = vmatpush.bf16.msra.mxu0 %v9766_v37  ;;  %v10214_v8 = vor.u32 %v13818_v58, %v10213_v46  ;;  %v4011_v23 = vpop.f32.mrf.mxu1 }
 0x255   :  { %v10661_v6 = vld [vmem:[#allocation5 + $0x9b8] sm:$0xf]  ;;  %v11238_v22 = vor.u32 %v14074_v55, %v11237_v39  ;;  %v4012_v42 = vadd.f32 %v4011_v23, %v3993_v25 }
 0x256   :  { %v13930_v9 = vld [vmem:[#allocation5 + $0x9f4] sm:$0xf0]  ;;  %4382 = vmatpush.bf16.msra.mxu1 %v10278_v14  ;;  %4402 = vmatpush.bf16.msra.mxu2 %v10726_v61 }
 0x257   :  { %v9637_v12 = vld [vmem:[#allocation5 + $0x1b8] sm:$0xf]  ;;  %v10662_v38 = vor.u32 %v13930_v9, %v10661_v6 }
 0x258   :  { %4420 = vmatpush.bf16.msra.mxu3 %v11302_v29  ;;  %v13674_v45 = vld [vmem:[#allocation5 + $0x1f4] sm:$0xf0]  ;;  %4364 = vmatpush.bf16.msra.mxu0 %v9702_v5 }
 0x259   :  { %v10149_v63 = vld [vmem:[#allocation5 + $0x5b8] sm:$0xf]  ;;  %v9638_v31 = vor.u32 %v13674_v45, %v9637_v12  ;;  %v4049_v12 = vpop.f32.mrf.mxu3  ;;  %4336 = vmatmul.bf16.gmra.mxu2 %v15125_v51 }
 0x25a   :  { %v13802_v19 = vld [vmem:[#allocation5 + $0x5f4] sm:$0xf0]  ;;  %4383 = vmatpush.bf16.msra.mxu1 %v10214_v8  ;;  %4403 = vmatpush.bf16.msra.mxu2 %v10662_v38 }
 0x25b   :  { %v11173_v21 = vld [vmem:[#allocation5 + $0xdb8] sm:$0xf]  ;;  %v10150_v41 = vor.u32 %v13802_v19, %v10149_v63  ;;  %v3995_v19 = vpop.f32.mrf.mxu0  ;;  %4298 = vmatmul.bf16.gmra.mxu0 %v15121_v44 }
 0x25c   :  { %v14058_v20 = vld [vmem:[#allocation5 + $0xdf4] sm:$0xf0]  ;;  %4421 = vmatpush.bf16.msra.mxu3 %v11238_v22  ;;  %4365 = vmatpush.bf16.msra.mxu0 %v9638_v31  ;;  %v4030_v22 = vpop.f32.mrf.mxu2  ;;  %v3996_v15 = vadd.f32 %v3995_v19, %v15362_v11  ;;  %v13970_v19 = vld [vmem:[#allocation5 + $0xb3c] sm:$0xf] }
 0x25d   :  { %v10597_v34 = vld [vmem:[#allocation5 + $0x938] sm:$0xf]  ;;  %v11174_v30 = vor.u32 %v14058_v20, %v11173_v21  ;;  %v4031_v18 = vadd.f32 %v4030_v22, %v4012_v42  ;;  %v4014_v21 = vpop.f32.mrf.mxu1  ;;  %4317 = vmatmul.bf16.gmra.mxu1 %v15123_v50 }
 0x25e   :  { %v13914_v37 = vld [vmem:[#allocation5 + $0x974] sm:$0xf0]  ;;  %4384 = vmatpush.bf16.msra.mxu1 %v10150_v41  ;;  %v4015_v42 = vadd.f32 %v4014_v21, %v3996_v15  ;;  %v10855_v21 = vld [vmem:[#allocation5 + $0xb78] sm:$0xf0] }
 0x25f   :  { %v9573_v14 = vld [vmem:[#allocation5 + $0x138] sm:$0xf]  ;;  %v10598_v39 = vor.u32 %v13914_v37, %v10597_v34  ;;  %v4050_v37 = vadd.f32 %v4049_v12, %v4031_v18  ;;  %4355 = vmatmul.bf16.gmra.mxu3 %v15127_v56 }
 0x260   :  { %v13658_v29 = vld [vmem:[#allocation5 + $0x174] sm:$0xf0]  ;;  %4422 = vmatpush.bf16.msra.mxu3 %v11174_v30 }
 0x261   :  { %v10085_v27 = vld [vmem:[#allocation5 + $0x538] sm:$0xf]  ;;  %v9574_v55 = vor.u32 %v13658_v29, %v9573_v14  ;;  %4404 = vmatpush.bf16.msra.mxu2 %v10598_v39  ;;  %v4522_v39 = vmax.f32 %v15372_v3, 0.0 }
 0x262   :  { %v13786_v46 = vld [vmem:[#allocation5 + $0x574] sm:$0xf0] }
 0x263   :  { %v11109_v47 = vld [vmem:[#allocation5 + $0xd38] sm:$0xf]  ;;  %v10086_v61 = vor.u32 %v13786_v46, %v10085_v27  ;;  %4366 = vmatpush.bf16.msra.mxu0 %v9574_v55  ;;  %v13986_v46 = vld [vmem:[#allocation5 + $0xbbc] sm:$0xf]  ;;  %v4538_v55 = vmax.f32 %v4050_v37, 0.0 }
 0x264   :  { %v14042_v58 = vld [vmem:[#allocation5 + $0xd74] sm:$0xf0]  ;;  %v13842_v37 = vld [vmem:[#allocation5 + $0x73c] sm:$0xf] }
 0x265   :  { %v10533_v59 = vld [vmem:[#allocation5 + $0x8b8] sm:$0xf]  ;;  %v11110_v5 = vor.u32 %v14042_v58, %v11109_v47  ;;  %4385 = vmatpush.bf16.msra.mxu1 %v10086_v61  ;;  %v10919_v47 = vld [vmem:[#allocation5 + $0xbf8] sm:$0xf0]  ;;  %v15380_v22 = vpack.c.bf16 %v4538_v55, %v4522_v39 }
 0x266   :  { %v13898_v60 = vld [vmem:[#allocation5 + $0x8f4] sm:$0xf0]  ;;  %v13730_v58 = vld [vmem:[#allocation5 + $0x3bc] sm:$0xf] }
 0x267   :  { %v9509_v6 = vld [vmem:[#allocation5 + $0xb8] sm:$0xf]  ;;  %v10534_v23 = vor.u32 %v13898_v60, %v10533_v59  ;;  %4423 = vmatpush.bf16.msra.mxu3 %v11110_v5  ;;  %v9895_v59 = vld [vmem:[#allocation5 + $0x3f8] sm:$0xf0]  ;;  %16034 = vst [vmem:[#allocation35_spill] sm:$0xff] %v15380_v22 }
 0x268   :  { %v13642_v9 = vld [vmem:[#allocation5 + $0xf4] sm:$0xf0]  ;;  %v13858_v60 = vld [vmem:[#allocation5 + $0x7bc] sm:$0xf]  ;;  %v9898_v18 = vor.u32 %v13730_v58, %v9895_v59  ;;  %v15384_v58 = vperm.slane %v15337_v33, 2 }
 0x269   :  { %v10021_v8 = vld [vmem:[#allocation5 + $0x4b8] sm:$0xf]  ;;  %v9510_v25 = vor.u32 %v13642_v9, %v9509_v6  ;;  %4405 = vmatpush.bf16.msra.mxu2 %v10534_v23  ;;  %v10407_v6 = vld [vmem:[#allocation5 + $0x7f8] sm:$0xf0]  ;;  %v3997_v23 = vpop.f32.mrf.mxu0 }
 0x26a   :  { %v13770_v45 = vld [vmem:[#allocation5 + $0x4f4] sm:$0xf0]  ;;  %v14114_v9 = vld [vmem:[#allocation5 + $0xfbc] sm:$0xf]  ;;  %v3998_v39 = vadd.f32 %v3997_v23, %v15362_v11 }
 0x26b   :  { %v11045_v63 = vld [vmem:[#allocation5 + $0xcb8] sm:$0xf]  ;;  %v10022_v41 = vor.u32 %v13770_v45, %v10021_v8  ;;  %4367 = vmatpush.bf16.msra.mxu0 %v9510_v25  ;;  %v11431_v8 = vld [vmem:[#allocation5 + $0xff8] sm:$0xf0]  ;;  %v4033_v45 = vpop.f32.mrf.mxu2  ;;  %v4016_v25 = vpop.f32.mrf.mxu1 }
 0x26c   :  { %v14026_v16 = vld [vmem:[#allocation5 + $0xcf4] sm:$0xf0]  ;;  %v4034_v15 = vadd.f32 %v4033_v45, %v4015_v42  ;;  %v13954_v11 = vld [vmem:[#allocation5 + $0xabc] sm:$0xf] }
 0x26d   :  { %v10469_v20 = vld [vmem:[#allocation5 + $0x838] sm:$0xf]  ;;  %v11046_v30 = vor.u32 %v14026_v16, %v11045_v63  ;;  %4386 = vmatpush.bf16.msra.mxu1 %v10022_v41  ;;  %v4052_v63 = vpop.f32.mrf.mxu3  ;;  %v10922_v16 = vor.u32 %v13986_v46, %v10919_v47  ;;  %v14098_v41 = vld [vmem:[#allocation5 + $0xf3c] sm:$0xf] }
 0x26e   :  { %v13882_v0 = vld [vmem:[#allocation5 + $0x874] sm:$0xf0]  ;;  %v10791_v55 = vld [vmem:[#allocation5 + $0xaf8] sm:$0xf0] }
 0x26f   :  { %v9445_v38 = vld [vmem:[#allocation5 + $0x38] sm:$0xf]  ;;  %v10470_v61 = vor.u32 %v13882_v0, %v10469_v20  ;;  %4424 = vmatpush.bf16.msra.mxu3 %v11046_v30  ;;  %v10410_v20 = vor.u32 %v13858_v60, %v10407_v6  ;;  %v11434_v0 = vor.u32 %v14114_v9, %v11431_v8  ;;  %v11367_v30 = vld [vmem:[#allocation5 + $0xf78] sm:$0xf0] }
 0x270   :  { %v13626_v31 = vld [vmem:[#allocation5 + $0x74] sm:$0xf0]  ;;  %v11370_v47 = vor.u32 %v14098_v41, %v11367_v30  ;;  %v13698_v59 = vld [vmem:[#allocation5 + $0x2bc] sm:$0xf] }
 0x271   :  { %v9957_v34 = vld [vmem:[#allocation5 + $0x438] sm:$0xf]  ;;  %v9446_v5 = vor.u32 %v13626_v31, %v9445_v38  ;;  %v13714_v38 = vld [vmem:[#allocation5 + $0x33c] sm:$0xf]  ;;  %4406 = vmatpush.bf16.msra.mxu2 %v10470_v61  ;;  %v4066_v45 = vpop.f32.mrf.mxu0 }
 0x272   :  { %v13754_v14 = vld [vmem:[#allocation5 + $0x474] sm:$0xf0]  ;;  %v9831_v31 = vld [vmem:[#allocation5 + $0x378] sm:$0xf0]  ;;  %v4067_v33 = vadd.f32 %v4066_v45, %v15384_v58 }
 0x273   :  { %v10981_v29 = vld [vmem:[#allocation5 + $0xc38] sm:$0xf]  ;;  %v9958_v12 = vor.u32 %v13754_v14, %v9957_v34  ;;  %4368 = vmatpush.bf16.msra.mxu0 %v9446_v5  ;;  %v10343_v34 = vld [vmem:[#allocation5 + $0x778] sm:$0xf0]  ;;  %v4053_v14 = vadd.f32 %v4052_v63, %v4034_v15  ;;  %v9834_v42 = vor.u32 %v13714_v38, %v9831_v31  ;;  %v4035_v5 = vpop.f32.mrf.mxu2  ;;  %v4085_v63 = vpop.f32.mrf.mxu1 }
 0x274   :  { %v14010_v27 = vld [vmem:[#allocation5 + $0xc74] sm:$0xf0]  ;;  %v10346_v46 = vor.u32 %v13842_v37, %v10343_v34  ;;  %v9767_v60 = vld [vmem:[#allocation5 + $0x2f8] sm:$0xf0]  ;;  %v4086_v31 = vadd.f32 %v4085_v63, %v4067_v33  ;;  %4407 = vmatmul.bf16.vlgmr.msra.gmra.mxu2 %v15113_v54 }
 0x275   :  { %v10982_v3 = vor.u32 %v14010_v27, %v10981_v29  ;;  %4387 = vmatpush.bf16.msra.mxu1 %v9958_v12  ;;  %v4017_v29 = vadd.f32 %v4016_v25, %v3998_v39  ;;  %4475 = vmatpush.bf16.msrb.mxu2 %v10922_v16  ;;  %v10858_v27 = vor.u32 %v13970_v19, %v10855_v21  ;;  %v13826_v61 = vld [vmem:[#allocation5 + $0x6bc] sm:$0xf]  ;;  %v4054_v6 = vpop.f32.mrf.mxu3  ;;  %v4554_v41 = vmax.f32 %v4053_v14, 0.0 }
 0x276   :  { %v10279_v9 = vld [vmem:[#allocation5 + $0x6f8] sm:$0xf0]  ;;  %v10794_v16 = vor.u32 %v13954_v11, %v10791_v55  ;;  %4369 = vmatmul.bf16.vlgmr.msra.gmra.mxu0 %v15109_v48 }
 0x277   :  { %4425 = vmatpush.bf16.msra.mxu3 %v10982_v3  ;;  %4437 = vmatpush.bf16.msrb.mxu0 %v9898_v18  ;;  %v14082_v8 = vld [vmem:[#allocation5 + $0xebc] sm:$0xf]  ;;  %v4036_v3 = vadd.f32 %v4035_v5, %v4017_v29  ;;  %v9770_v18 = vor.u32 %v13698_v59, %v9767_v60  ;;  %v10282_v23 = vor.u32 %v13826_v61, %v10279_v9 }
 0x278   :  { %v11303_v12 = vld [vmem:[#allocation5 + $0xef8] sm:$0xf0]  ;;  %4388 = vmatmul.bf16.vlgmr.msra.gmra.mxu1 %v15111_v53 }
 0x279   :  { %4456 = vmatpush.bf16.msrb.mxu1 %v10410_v20  ;;  %4476 = vmatpush.bf16.msrb.mxu2 %v10858_v27  ;;  %v13938_v19 = vld [vmem:[#allocation5 + $0xa3c] sm:$0xf]  ;;  %v4055_v15 = vadd.f32 %v4054_v6, %v4036_v3  ;;  %v11306_v25 = vor.u32 %v14082_v8, %v11303_v12  ;;  %v4068_v3 = vpop.f32.mrf.mxu0 }
 0x27a   :  { %v10727_v21 = vld [vmem:[#allocation5 + $0xa78] sm:$0xf0]  ;;  %4426 = vmatmul.bf16.vlgmr.msra.gmra.mxu3 %v15115_v57  ;;  %v4069_v63 = vadd.f32 %v4068_v3, %v15384_v58 }
 0x27b   :  { %4494 = vmatpush.bf16.msrb.mxu3 %v11434_v0  ;;  %4438 = vmatpush.bf16.msrb.mxu0 %v9834_v42  ;;  %v13682_v20 = vld [vmem:[#allocation5 + $0x23c] sm:$0xf]  ;;  %v4570_v30 = vmax.f32 %v4055_v15, 0.0  ;;  %v10730_v29 = vor.u32 %v13938_v19, %v10727_v21  ;;  %v4104_v61 = vpop.f32.mrf.mxu2  ;;  %v4087_v45 = vpop.f32.mrf.mxu1 }
 0x27c   :  { %v9703_v0 = vld [vmem:[#allocation5 + $0x278] sm:$0xf0]  ;;  %v4105_v12 = vadd.f32 %v4104_v61, %v4086_v31 }
 0x27d   :  { %4457 = vmatpush.bf16.msrb.mxu1 %v10346_v46  ;;  %v13810_v38 = vld [vmem:[#allocation5 + $0x63c] sm:$0xf]  ;;  %4477 = vmatpush.bf16.msrb.mxu2 %v10794_v16  ;;  %v9706_v27 = vor.u32 %v13682_v20, %v9703_v0  ;;  %v4123_v5 = vpop.f32.mrf.mxu3 }
 0x27e   :  { %v10215_v37 = vld [vmem:[#allocation5 + $0x678] sm:$0xf0]  ;;  %v15394_v21 = vadd.f32 %v4123_v5, %v4105_v12 }
 0x27f   :  { %4495 = vmatpush.bf16.msrb.mxu3 %v11370_v47  ;;  %v14066_v39 = vld [vmem:[#allocation5 + $0xe3c] sm:$0xf]  ;;  %4439 = vmatpush.bf16.msrb.mxu0 %v9770_v18  ;;  %v15391_v47 = vpack.c.bf16 %v4570_v30, %v4554_v41  ;;  %v10218_v11 = vor.u32 %v13810_v38, %v10215_v37  ;;  %v4088_v38 = vadd.f32 %v4087_v45, %v4069_v63 }
 0x280   :  { %v11239_v34 = vld [vmem:[#allocation5 + $0xe78] sm:$0xf0] }
 0x281   :  { %v13922_v42 = vld [vmem:[#allocation5 + $0x9bc] sm:$0xf]  ;;  %16035 = vst [vmem:[#allocation36_spill] sm:$0xff] %v15391_v47  ;;  %4458 = vmatpush.bf16.msrb.mxu1 %v10282_v23  ;;  %v11242_v55 = vor.u32 %v14066_v39, %v11239_v34  ;;  %4478 = vmatpush.bf16.msrb.mxu2 %v10730_v29  ;;  %v11789_v47 = vld [vmem:[#allocation8 + $0x2c0] sm:$0xf] }
 0x282   :  { %v10663_v46 = vld [vmem:[#allocation5 + $0x9f8] sm:$0xf0] }
 0x283   :  { %4496 = vmatpush.bf16.msrb.mxu3 %v11306_v25  ;;  %v13666_v59 = vld [vmem:[#allocation5 + $0x1bc] sm:$0xf]  ;;  %4440 = vmatpush.bf16.msrb.mxu0 %v9706_v27  ;;  %v10666_v33 = vor.u32 %v13922_v42, %v10663_v46 }
 0x284   :  { %v9639_v60 = vld [vmem:[#allocation5 + $0x1f8] sm:$0xf0]  ;;  %4412 = vmatmul.bf16.gmra.mxu2 %v15125_v51 }
 0x285   :  { %v13794_v14 = vld [vmem:[#allocation5 + $0x5bc] sm:$0xf]  ;;  %v9642_v16 = vor.u32 %v13666_v59, %v9639_v60  ;;  %4459 = vmatpush.bf16.msrb.mxu1 %v10218_v11  ;;  %4479 = vmatpush.bf16.msrb.mxu2 %v10666_v33  ;;  %v4106_v59 = vpop.f32.mrf.mxu2  ;;  %v4125_v60 = vpop.f32.mrf.mxu3 }
 0x286   :  { %v10151_v6 = vld [vmem:[#allocation5 + $0x5f8] sm:$0xf0]  ;;  %4374 = vmatmul.bf16.gmra.mxu0 %v15121_v44 }
 0x287   :  { %v14050_v9 = vld [vmem:[#allocation5 + $0xdbc] sm:$0xf]  ;;  %4497 = vmatpush.bf16.msrb.mxu3 %v11242_v55  ;;  %v10154_v15 = vor.u32 %v13794_v14, %v10151_v6  ;;  %4441 = vmatpush.bf16.msrb.mxu0 %v9642_v16  ;;  %v4107_v6 = vadd.f32 %v4106_v59, %v4088_v38  ;;  %v14249_v59 = vld [vmem:[#allocation8 + $0x3ec] sm:$0xf0] }
 0x288   :  { %v11175_v8 = vld [vmem:[#allocation5 + $0xdf8] sm:$0xf0]  ;;  %4393 = vmatmul.bf16.gmra.mxu1 %v15123_v50 }
 0x289   :  { %v13906_v18 = vld [vmem:[#allocation5 + $0x93c] sm:$0xf]  ;;  %v11178_v23 = vor.u32 %v14050_v9, %v11175_v8  ;;  %4460 = vmatpush.bf16.msrb.mxu1 %v10154_v15  ;;  %v4071_v9 = vpop.f32.mrf.mxu0  ;;  %v4090_v8 = vpop.f32.mrf.mxu1  ;;  %v4126_v15 = vadd.f32 %v4125_v60, %v4107_v6 }
 0x28a   :  { %v10599_v19 = vld [vmem:[#allocation5 + $0x978] sm:$0xf0]  ;;  %v4072_v45 = vadd.f32 %v4071_v9, %v15384_v58  ;;  %4431 = vmatmul.bf16.gmra.mxu3 %v15127_v56 }
 0x28b   :  { %v13650_v25 = vld [vmem:[#allocation5 + $0x13c] sm:$0xf]  ;;  %v10602_v34 = vor.u32 %v13906_v18, %v10599_v19  ;;  %4498 = vmatpush.bf16.msrb.mxu3 %v11178_v23 }
 0x28c   :  { %v9575_v20 = vld [vmem:[#allocation5 + $0x178] sm:$0xf0] }
 0x28d   :  { %v13778_v0 = vld [vmem:[#allocation5 + $0x53c] sm:$0xf]  ;;  %v9578_v41 = vor.u32 %v13650_v25, %v9575_v20  ;;  %4480 = vmatpush.bf16.msrb.mxu2 %v10602_v34  ;;  %v11677_v34 = vld [vmem:[#allocation8 + $0x1e0] sm:$0xf] }
 0x28e   :  { %v10087_v31 = vld [vmem:[#allocation5 + $0x578] sm:$0xf0] }
 0x28f   :  { %v14034_v37 = vld [vmem:[#allocation5 + $0xd3c] sm:$0xf]  ;;  %v10090_v27 = vor.u32 %v13778_v0, %v10087_v31  ;;  %4442 = vmatpush.bf16.msrb.mxu0 %v9578_v41  ;;  %v4091_v31 = vadd.f32 %v4090_v8, %v4072_v45  ;;  %v4523_v41 = vmax.f32 %v15394_v21, 0.0  ;;  %v11533_v8 = vld [vmem:[#allocation8 + $0xc0] sm:$0xf] }
 0x290   :  { %v11111_v39 = vld [vmem:[#allocation5 + $0xd78] sm:$0xf0]  ;;  %v14149_v45 = vld [vmem:[#allocation8 + $0xcc] sm:$0xf0] }
 0x291   :  { %v13890_v30 = vld [vmem:[#allocation5 + $0x8bc] sm:$0xf]  ;;  %v11114_v42 = vor.u32 %v14034_v37, %v11111_v39  ;;  %4461 = vmatpush.bf16.msrb.mxu1 %v10090_v27  ;;  %v11549_v37 = vld [vmem:[#allocation8 + $0xe0] sm:$0xf]  ;;  %v14153_v39 = vld [vmem:[#allocation8 + $0xec] sm:$0xf0] }
 0x292   :  { %v10535_v29 = vld [vmem:[#allocation5 + $0x8f8] sm:$0xf0]  ;;  %v11805_v27 = vld [vmem:[#allocation8 + $0x2e0] sm:$0xf]  ;;  %v11550_v6 = vor.u32 %v14153_v39, %v11549_v37 }
 0x293   :  { %v13634_v46 = vld [vmem:[#allocation5 + $0xbc] sm:$0xf]  ;;  %v10538_v63 = vor.u32 %v13890_v30, %v10535_v29  ;;  %4499 = vmatpush.bf16.msrb.mxu3 %v11114_v42  ;;  %v4539_v30 = vmax.f32 %v4126_v15, 0.0  ;;  %v14185_v29 = vld [vmem:[#allocation8 + $0x1ec] sm:$0xf0] }
 0x294   :  { %v9511_v11 = vld [vmem:[#allocation5 + $0xf8] sm:$0xf0]  ;;  %v11678_v9 = vor.u32 %v14185_v29, %v11677_v34  ;;  %v15405_v34 = vld [vmem:[#allocation7 + $0x8] sm:$0xff]  ;;  %v14145_v29 = vld [vmem:[#allocation8 + $0xac] sm:$0xf0] }
 0x295   :  { %v13762_v55 = vld [vmem:[#allocation5 + $0x4bc] sm:$0xf]  ;;  %v9514_v33 = vor.u32 %v13634_v46, %v9511_v11  ;;  %4481 = vmatpush.bf16.msrb.mxu2 %v10538_v63  ;;  %v14217_v11 = vld [vmem:[#allocation8 + $0x2ec] sm:$0xf0]  ;;  %v15402_v60 = vpack.c.bf16 %v4539_v30, %v4523_v41  ;;  %v4073_v63 = vpop.f32.mrf.mxu0  ;;  %v11517_v30 = vld [vmem:[#allocation8 + $0xa0] sm:$0xf] }
 0x296   :  { %v10023_v14 = vld [vmem:[#allocation5 + $0x4f8] sm:$0xf0]  ;;  %v4074_v41 = vadd.f32 %v4073_v63, %v15384_v58  ;;  %v15408_v58 = vperm.slane %v15405_v34, 3 }
 0x297   :  { %v14018_v61 = vld [vmem:[#allocation5 + $0xcbc] sm:$0xf]  ;;  %v10026_v23 = vor.u32 %v13762_v55, %v10023_v14  ;;  %4443 = vmatpush.bf16.msrb.mxu0 %v9514_v33  ;;  %v11933_v55 = vld [vmem:[#allocation8 + $0x3e0] sm:$0xf]  ;;  %16036 = vst [vmem:[#allocation37_spill] sm:$0xff] %v15402_v60  ;;  %v4092_v33 = vpop.f32.mrf.mxu1 }
 0x298   :  { %v11047_v5 = vld [vmem:[#allocation5 + $0xcf8] sm:$0xf0] }
 0x299   :  { %v13874_v12 = vld [vmem:[#allocation5 + $0x83c] sm:$0xf]  ;;  %v11050_v25 = vor.u32 %v14018_v61, %v11047_v5  ;;  %4462 = vmatpush.bf16.msrb.mxu1 %v10026_v23  ;;  %v4109_v61 = vpop.f32.mrf.mxu2  ;;  %v4128_v5 = vpop.f32.mrf.mxu3  ;;  %v11917_v23 = vld [vmem:[#allocation8 + $0x3c0] sm:$0xf] }
 0x29a   :  { %v10471_v3 = vld [vmem:[#allocation5 + $0x878] sm:$0xf0]  ;;  %v4110_v15 = vadd.f32 %v4109_v61, %v4091_v31 }
 0x29b   :  { %v13618_v16 = vld [vmem:[#allocation5 + $0x3c] sm:$0xf]  ;;  %v10474_v42 = vor.u32 %v13874_v12, %v10471_v3  ;;  %4500 = vmatpush.bf16.msrb.mxu3 %v11050_v25  ;;  %v11806_v12 = vor.u32 %v14217_v11, %v11805_v27  ;;  %v11934_v3 = vor.u32 %v14249_v59, %v11933_v55  ;;  %v14245_v25 = vld [vmem:[#allocation8 + $0x3cc] sm:$0xf0]  ;;  %v11645_v27 = vld [vmem:[#allocation8 + $0x1a0] sm:$0xf] }
 0x29c   :  { %v9447_v18 = vld [vmem:[#allocation5 + $0x78] sm:$0xf0]  ;;  %v11918_v39 = vor.u32 %v14245_v25, %v11917_v23  ;;  %v14209_v59 = vld [vmem:[#allocation8 + $0x2ac] sm:$0xf0]  ;;  %v11885_v23 = vld [vmem:[#allocation8 + $0x380] sm:$0xf] }
 0x29d   :  { %v13746_v19 = vld [vmem:[#allocation5 + $0x43c] sm:$0xf]  ;;  %v9450_v46 = vor.u32 %v13618_v16, %v9447_v18  ;;  %v11661_v16 = vld [vmem:[#allocation8 + $0x1c0] sm:$0xf]  ;;  %v14181_v18 = vld [vmem:[#allocation8 + $0x1cc] sm:$0xf0]  ;;  %4482 = vmatpush.bf16.msrb.mxu2 %v10474_v42 }
 0x29e   :  { %v9959_v20 = vld [vmem:[#allocation5 + $0x478] sm:$0xf0]  ;;  %v11662_v31 = vor.u32 %v14181_v18, %v11661_v16  ;;  %v14177_v42 = vld [vmem:[#allocation8 + $0x1ac] sm:$0xf0]  ;;  %v11757_v18 = vld [vmem:[#allocation8 + $0x280] sm:$0xf] }
 0x29f   :  { %v14002_v0 = vld [vmem:[#allocation5 + $0xc3c] sm:$0xf]  ;;  %v9962_v14 = vor.u32 %v13746_v19, %v9959_v20  ;;  %4444 = vmatpush.bf16.msrb.mxu0 %v9450_v46  ;;  %v14213_v19 = vld [vmem:[#allocation8 + $0x2cc] sm:$0xf0]  ;;  %v4129_v20 = vadd.f32 %v4128_v5, %v4110_v15  ;;  %v11773_v46 = vld [vmem:[#allocation8 + $0x2a0] sm:$0xf]  ;;  %v4161_v5 = vpop.f32.mrf.mxu1 }
 0x2a0   :  { %v10983_v38 = vld [vmem:[#allocation5 + $0xc78] sm:$0xf0]  ;;  %v11790_v37 = vor.u32 %v14213_v19, %v11789_v47  ;;  %v4142_v47 = vpop.f32.mrf.mxu0  ;;  %v14141_v15 = vld [vmem:[#allocation8 + $0x8c] sm:$0xf0]  ;;  %4483 = vmatmul.bf16.vlgmr.msrb.gmra.mxu2 %v15113_v54 }
 0x2a1   :  { %v10986_v21 = vor.u32 %v14002_v0, %v10983_v38  ;;  %4463 = vmatpush.bf16.msrb.mxu1 %v9962_v14  ;;  %v4093_v0 = vadd.f32 %v4092_v33, %v4074_v41  ;;  %v11534_v38 = vor.u32 %v14149_v45, %v11533_v8  ;;  %7729 = vmatpush.bf16.msra.mxu2 %v11806_v12  ;;  %v4111_v11 = vpop.f32.mrf.mxu2  ;;  %v4130_v55 = vpop.f32.mrf.mxu3  ;;  %v11901_v14 = vld [vmem:[#allocation8 + $0x3a0] sm:$0xf]  ;;  %v14173_v16 = vld [vmem:[#allocation8 + $0x18c] sm:$0xf0] }
 0x2a2   :  { %v11646_v8 = vor.u32 %v14177_v42, %v11645_v27  ;;  %v11501_v45 = vld [vmem:[#allocation8 + $0x80] sm:$0xf]  ;;  %v11774_v33 = vor.u32 %v14209_v59, %v11773_v46  ;;  %4445 = vmatmul.bf16.vlgmr.msrb.gmra.mxu0 %v15109_v48  ;;  %v14205_v19 = vld [vmem:[#allocation8 + $0x28c] sm:$0xf0] }
 0x2a3   :  { %4501 = vmatpush.bf16.msrb.mxu3 %v10986_v21  ;;  %7691 = vmatpush.bf16.msra.mxu0 %v11550_v6  ;;  %v14241_v21 = vld [vmem:[#allocation8 + $0x3ac] sm:$0xf0]  ;;  %v4112_v61 = vadd.f32 %v4111_v11, %v4093_v0  ;;  %v4143_v6 = vadd.f32 %v4142_v47, %v15408_v58  ;;  %v4555_v0 = vmax.f32 %v4129_v20, 0.0  ;;  %v11758_v48 = vor.u32 %v14205_v19, %v11757_v18  ;;  %v11613_v27 = vld [vmem:[#allocation8 + $0x160] sm:$0xf] }
 0x2a4   :  { %v11902_v12 = vor.u32 %v14241_v21, %v11901_v14  ;;  %4464 = vmatmul.bf16.vlgmr.msrb.gmra.mxu1 %v15111_v53  ;;  %v14237_v25 = vld [vmem:[#allocation8 + $0x38c] sm:$0xf0]  ;;  %v11741_v20 = vld [vmem:[#allocation8 + $0x260] sm:$0xf] }
 0x2a5   :  { %7710 = vmatpush.bf16.msra.mxu1 %v11678_v9  ;;  %7730 = vmatpush.bf16.msra.mxu2 %v11790_v37  ;;  %v11518_v9 = vor.u32 %v14145_v29, %v11517_v30  ;;  %v4131_v63 = vadd.f32 %v4130_v55, %v4112_v61  ;;  %v4162_v41 = vadd.f32 %v4161_v5, %v4143_v6  ;;  %v14137_v30 = vld [vmem:[#allocation8 + $0x6c] sm:$0xf0]  ;;  %v11869_v55 = vld [vmem:[#allocation8 + $0x360] sm:$0xf] }
 0x2a6   :  { %4502 = vmatmul.bf16.vlgmr.msrb.gmra.mxu3 %v15115_v57  ;;  %v11886_v53 = vor.u32 %v14237_v25, %v11885_v23  ;;  %v14169_v42 = vld [vmem:[#allocation8 + $0x16c] sm:$0xf0]  ;;  %v11469_v6 = vld [vmem:[#allocation8 + $0x40] sm:$0xf] }
 0x2a7   :  { %7748 = vmatpush.bf16.msra.mxu3 %v11934_v3  ;;  %7692 = vmatpush.bf16.msra.mxu0 %v11534_v38  ;;  %v11629_v3 = vld [vmem:[#allocation8 + $0x180] sm:$0xf]  ;;  %v4571_v38 = vmax.f32 %v4131_v63, 0.0  ;;  %v14201_v54 = vld [vmem:[#allocation8 + $0x26c] sm:$0xf0]  ;;  %v4163_v21 = vpop.f32.mrf.mxu1  ;;  %v11614_v5 = vor.u32 %v14169_v42, %v11613_v27 }
 0x2a8   :  { %v11630_v37 = vor.u32 %v14173_v16, %v11629_v3  ;;  %v14233_v57 = vld [vmem:[#allocation8 + $0x36c] sm:$0xf0]  ;;  %v4144_v14 = vpop.f32.mrf.mxu0  ;;  %v11597_v63 = vld [vmem:[#allocation8 + $0x140] sm:$0xf] }
 0x2a9   :  { %7711 = vmatpush.bf16.msra.mxu1 %v11662_v31  ;;  %v11502_v31 = vor.u32 %v14141_v15, %v11501_v45  ;;  %v15415_v29 = vpack.c.bf16 %v4571_v38, %v4555_v0  ;;  %7731 = vmatpush.bf16.msra.mxu2 %v11774_v33  ;;  %v4180_v46 = vpop.f32.mrf.mxu2  ;;  %v4199_v11 = vpop.f32.mrf.mxu3  ;;  %v4145_v61 = vadd.f32 %v4144_v14, %v15408_v58  ;;  %v14165_v33 = vld [vmem:[#allocation8 + $0x14c] sm:$0xf0]  ;;  %v11853_v18 = vld [vmem:[#allocation8 + $0x340] sm:$0xf] }
 0x2aa   :  { %v4181_v59 = vadd.f32 %v4180_v46, %v4162_v41  ;;  %v11742_v45 = vor.u32 %v14201_v54, %v11741_v20  ;;  %v11870_v15 = vor.u32 %v14233_v57, %v11869_v55  ;;  %v14197_v16 = vld [vmem:[#allocation8 + $0x24c] sm:$0xf0]  ;;  %v11598_v23 = vor.u32 %v14165_v33, %v11597_v63  ;;  %v11453_v25 = vld [vmem:[#allocation8 + $0x20] sm:$0xf] }
 0x2ab   :  { %7749 = vmatpush.bf16.msra.mxu3 %v11918_v39  ;;  %7693 = vmatpush.bf16.msra.mxu0 %v11518_v9  ;;  %v11485_v39 = vld [vmem:[#allocation8 + $0x60] sm:$0xf]  ;;  %v14133_v9 = vld [vmem:[#allocation8 + $0x4c] sm:$0xf0]  ;;  %v4164_v3 = vadd.f32 %v4163_v21, %v4145_v61 }
 0x2ac   :  { %v11486_v47 = vor.u32 %v14137_v30, %v11485_v39  ;;  %v14229_v41 = vld [vmem:[#allocation8 + $0x34c] sm:$0xf0]  ;;  %v11470_v19 = vor.u32 %v14133_v9, %v11469_v6  ;;  %v11709_v30 = vld [vmem:[#allocation8 + $0x220] sm:$0xf] }
 0x2ad   :  { %7712 = vmatpush.bf16.msra.mxu1 %v11646_v8  ;;  %v15418_v8 = vadd.f32 %v4199_v11, %v4181_v59  ;;  %7732 = vmatpush.bf16.msra.mxu2 %v11758_v48  ;;  %v14129_v0 = vld [vmem:[#allocation8 + $0x2c] sm:$0xf0]  ;;  %v11837_v42 = vld [vmem:[#allocation8 + $0x320] sm:$0xf] }
 0x2ae   :  { %v14161_v39 = vld [vmem:[#allocation8 + $0x12c] sm:$0xf0]  ;;  %v11437_v55 = vld [vmem:[#allocation8] sm:$0xf]  ;;  %v11454_v14 = vor.u32 %v14129_v0, %v11453_v25 }
 0x2af   :  { %7750 = vmatpush.bf16.msra.mxu3 %v11902_v12  ;;  %7694 = vmatpush.bf16.msra.mxu0 %v11502_v31  ;;  %v11725_v12 = vld [vmem:[#allocation8 + $0x240] sm:$0xf]  ;;  %v11854_v31 = vor.u32 %v14229_v41, %v11853_v18  ;;  %v14193_v27 = vld [vmem:[#allocation8 + $0x22c] sm:$0xf0]  ;;  %v4166_v54 = vpop.f32.mrf.mxu1  ;;  %v4524_v41 = vmax.f32 %v15418_v8, 0.0 }
 0x2b0   :  { %v11726_v38 = vor.u32 %v14197_v16, %v11725_v12  ;;  %v14225_v20 = vld [vmem:[#allocation8 + $0x32c] sm:$0xf0]  ;;  %v4147_v11 = vpop.f32.mrf.mxu0  ;;  %v11565_v61 = vld [vmem:[#allocation8 + $0x100] sm:$0xf]  ;;  %v11710_v9 = vor.u32 %v14193_v27, %v11709_v30  ;;  %4488 = vmatmul.bf16.gmra.mxu2 %v15125_v51 }
 0x2b1   :  { %7713 = vmatpush.bf16.msra.mxu1 %v11630_v37  ;;  %7733 = vmatpush.bf16.msra.mxu2 %v11742_v45  ;;  %v11581_v37 = vld [vmem:[#allocation8 + $0x120] sm:$0xf]  ;;  %v4182_v48 = vpop.f32.mrf.mxu2  ;;  %v14125_v57 = vld [vmem:[#allocation8 + $0xc] sm:$0xf0]  ;;  %v4148_v59 = vadd.f32 %v4147_v11, %v15408_v58  ;;  %v11838_v45 = vor.u32 %v14225_v20, %v11837_v42 }
 0x2b2   :  { %v4183_v46 = vadd.f32 %v4182_v48, %v4164_v3  ;;  %v11582_v21 = vor.u32 %v14161_v39, %v11581_v37  ;;  %v11821_v63 = vld [vmem:[#allocation8 + $0x300] sm:$0xf]  ;;  %v14221_v33 = vld [vmem:[#allocation8 + $0x30c] sm:$0xf0]  ;;  %4450 = vmatmul.bf16.gmra.mxu0 %v15121_v44  ;;  %v11438_v0 = vor.u32 %v14125_v57, %v11437_v55 }
 0x2b3   :  { %7751 = vmatpush.bf16.msra.mxu3 %v11886_v53  ;;  %7695 = vmatpush.bf16.msra.mxu0 %v11486_v47  ;;  %v4201_v53 = vpop.f32.mrf.mxu3  ;;  %v14157_v47 = vld [vmem:[#allocation8 + $0x10c] sm:$0xf0]  ;;  %v4167_v12 = vadd.f32 %v4166_v54, %v4148_v59  ;;  %v12061_v3 = vld [vmem:[#allocation8 + $0x4e0] sm:$0xf]  ;;  %v11822_v8 = vor.u32 %v14221_v33, %v11821_v63  ;;  %v15430_v33 = vperm.slane %v15405_v34, 4 }
 0x2b4   :  { %v4202_v6 = vadd.f32 %v4201_v53, %v4183_v46  ;;  %4469 = vmatmul.bf16.gmra.mxu1 %v15123_v50  ;;  %v14281_v16 = vld [vmem:[#allocation8 + $0x4ec] sm:$0xf0]  ;;  %v12189_v18 = vld [vmem:[#allocation8 + $0x5e0] sm:$0xf] }
 0x2b5   :  { %7714 = vmatpush.bf16.msra.mxu1 %v11614_v5  ;;  %v11693_v5 = vld [vmem:[#allocation8 + $0x200] sm:$0xf]  ;;  %7734 = vmatpush.bf16.msra.mxu2 %v11726_v38  ;;  %v11566_v38 = vor.u32 %v14157_v47, %v11565_v61  ;;  %v14377_v37 = vld [vmem:[#allocation8 + $0x7ec] sm:$0xf0]  ;;  %v12062_v51 = vor.u32 %v14281_v16, %v12061_v3 }
 0x2b6   :  { %4507 = vmatmul.bf16.gmra.mxu3 %v15127_v56  ;;  %v12317_v25 = vld [vmem:[#allocation8 + $0x6e0] sm:$0xf]  ;;  %v14277_v27 = vld [vmem:[#allocation8 + $0x4cc] sm:$0xf0] }
 0x2b7   :  { %7752 = vmatpush.bf16.msra.mxu3 %v11870_v15  ;;  %7696 = vmatpush.bf16.msra.mxu0 %v11470_v19  ;;  %v14189_v15 = vld [vmem:[#allocation8 + $0x20c] sm:$0xf0]  ;;  %v4540_v19 = vmax.f32 %v4202_v6, 0.0  ;;  %v12445_v44 = vld [vmem:[#allocation8 + $0x7e0] sm:$0xf]  ;;  %v4168_v46 = vpop.f32.mrf.mxu1 }
 0x2b8   :  { %v11694_v39 = vor.u32 %v14189_v15, %v11693_v5  ;;  %v12045_v56 = vld [vmem:[#allocation8 + $0x4c0] sm:$0xf]  ;;  %v4149_v20 = vpop.f32.mrf.mxu0  ;;  %v12446_v54 = vor.u32 %v14377_v37, %v12445_v44  ;;  %v14309_v57 = vld [vmem:[#allocation8 + $0x5cc] sm:$0xf0] }
 0x2b9   :  { %7715 = vmatpush.bf16.msra.mxu1 %v11598_v23  ;;  %v14313_v23 = vld [vmem:[#allocation8 + $0x5ec] sm:$0xf0]  ;;  %v15426_v50 = vpack.c.bf16 %v4540_v19, %v4524_v41  ;;  %7735 = vmatpush.bf16.msra.mxu2 %v11710_v9  ;;  %v4185_v30 = vpop.f32.mrf.mxu2  ;;  %v12173_v55 = vld [vmem:[#allocation8 + $0x5c0] sm:$0xf]  ;;  %v12046_v9 = vor.u32 %v14277_v27, %v12045_v56 }
 0x2ba   :  { %v12190_v53 = vor.u32 %v14313_v23, %v12189_v18  ;;  %v4186_v42 = vadd.f32 %v4185_v30, %v4167_v12  ;;  %v12301_v59 = vld [vmem:[#allocation8 + $0x6c0] sm:$0xf]  ;;  %v14373_v47 = vld [vmem:[#allocation8 + $0x7cc] sm:$0xf0] }
 0x2bb   :  { %7753 = vmatpush.bf16.msra.mxu3 %v11854_v31  ;;  %7697 = vmatpush.bf16.msra.mxu0 %v11454_v14  ;;  %v14345_v31 = vld [vmem:[#allocation8 + $0x6ec] sm:$0xf0]  ;;  %16037 = vst [vmem:[#allocation38_spill] sm:$0xff] %v15426_v50  ;;  %v4204_v48 = vpop.f32.mrf.mxu3  ;;  %v4150_v14 = vadd.f32 %v4149_v20, %v15408_v58  ;;  %v12429_v61 = vld [vmem:[#allocation8 + $0x7c0] sm:$0xf] }
 0x2bc   :  { %v12318_v11 = vor.u32 %v14345_v31, %v12317_v25  ;;  %v4205_v5 = vadd.f32 %v4204_v48, %v4186_v42  ;;  %v12430_v63 = vor.u32 %v14373_v47, %v12429_v61  ;;  %v12029_v58 = vld [vmem:[#allocation8 + $0x4a0] sm:$0xf]  ;;  %v14273_v12 = vld [vmem:[#allocation8 + $0x4ac] sm:$0xf0] }
 0x2bd   :  { %7716 = vmatpush.bf16.msra.mxu1 %v11582_v21  ;;  %v14341_v21 = vld [vmem:[#allocation8 + $0x6cc] sm:$0xf0]  ;;  %7736 = vmatpush.bf16.msra.mxu2 %v11694_v39  ;;  %v4169_v6 = vadd.f32 %v4168_v46, %v4150_v14  ;;  %v12157_v3 = vld [vmem:[#allocation8 + $0x5a0] sm:$0xf]  ;;  %v12030_v37 = vor.u32 %v14273_v12, %v12029_v58 }
 0x2be   :  { %v12302_v15 = vor.u32 %v14341_v21, %v12301_v59  ;;  %v14305_v16 = vld [vmem:[#allocation8 + $0x5ac] sm:$0xf0]  ;;  %v12285_v18 = vld [vmem:[#allocation8 + $0x6a0] sm:$0xf] }
 0x2bf   :  { %7754 = vmatpush.bf16.msra.mxu3 %v11838_v45  ;;  %7698 = vmatpush.bf16.msra.mxu0 %v11438_v0  ;;  %v12174_v45 = vor.u32 %v14309_v57, %v12173_v55  ;;  %v14337_v23 = vld [vmem:[#allocation8 + $0x6ac] sm:$0xf0]  ;;  %v12413_v25 = vld [vmem:[#allocation8 + $0x7a0] sm:$0xf]  ;;  %v4237_v44 = vpop.f32.mrf.mxu1  ;;  %v12158_v39 = vor.u32 %v14305_v16, %v12157_v3  ;;  %v4556_v55 = vmax.f32 %v4205_v5, 0.0 }
 0x2c0   :  { %v14369_v0 = vld [vmem:[#allocation8 + $0x7ac] sm:$0xf0]  ;;  %v4218_v31 = vpop.f32.mrf.mxu0  ;;  %v12141_v56 = vld [vmem:[#allocation8 + $0x580] sm:$0xf]  ;;  %7737 = vmatmul.bf16.vlgmr.msra.gmra.mxu2 %v15220_v7 }
 0x2c1   :  { %7717 = vmatpush.bf16.msra.mxu1 %v11566_v38  ;;  %7805 = vmatpush.bf16.msrb.mxu2 %v12318_v11  ;;  %v4187_v41 = vpop.f32.mrf.mxu2  ;;  %v4219_v34 = vadd.f32 %v4218_v31, %v15430_v33  ;;  %v14269_v30 = vld [vmem:[#allocation8 + $0x48c] sm:$0xf0]  ;;  %v12269_v42 = vld [vmem:[#allocation8 + $0x680] sm:$0xf] }
 0x2c2   :  { %v4188_v38 = vadd.f32 %v4187_v41, %v4169_v6  ;;  %v14301_v27 = vld [vmem:[#allocation8 + $0x58c] sm:$0xf0]  ;;  %7699 = vmatmul.bf16.vlgmr.msra.gmra.mxu0 %v15176_v52  ;;  %v12397_v11 = vld [vmem:[#allocation8 + $0x780] sm:$0xf] }
 0x2c3   :  { %7755 = vmatpush.bf16.msra.mxu3 %v11822_v8  ;;  %7767 = vmatpush.bf16.msrb.mxu0 %v12062_v51  ;;  %v4206_v19 = vpop.f32.mrf.mxu3  ;;  %v12013_v8 = vld [vmem:[#allocation8 + $0x480] sm:$0xf]  ;;  %v12286_v51 = vor.u32 %v14337_v23, %v12285_v18  ;;  %v4238_v20 = vadd.f32 %v4237_v44, %v4219_v34  ;;  %v14333_v46 = vld [vmem:[#allocation8 + $0x68c] sm:$0xf0]  ;;  %v12142_v14 = vor.u32 %v14301_v27, %v12141_v56 }
 0x2c4   :  { %v4207_v48 = vadd.f32 %v4206_v19, %v4188_v38  ;;  %7718 = vmatmul.bf16.vlgmr.msra.gmra.mxu1 %v15198_v28  ;;  %v12014_v59 = vor.u32 %v14269_v30, %v12013_v8  ;;  %v11997_v21 = vld [vmem:[#allocation8 + $0x460] sm:$0xf]  ;;  %v14265_v61 = vld [vmem:[#allocation8 + $0x46c] sm:$0xf0]  ;;  %v12270_v6 = vor.u32 %v14333_v46, %v12269_v42 }
 0x2c5   :  { %7786 = vmatpush.bf16.msrb.mxu1 %v12190_v53  ;;  %7806 = vmatpush.bf16.msrb.mxu2 %v12302_v15  ;;  %v12414_v53 = vor.u32 %v14369_v0, %v12413_v25  ;;  %v14297_v15 = vld [vmem:[#allocation8 + $0x56c] sm:$0xf0]  ;;  %v12253_v5 = vld [vmem:[#allocation8 + $0x660] sm:$0xf]  ;;  %v11998_v25 = vor.u32 %v14265_v61, %v11997_v21 }
 0x2c6   :  { %v4572_v57 = vmax.f32 %v4207_v48, 0.0  ;;  %7756 = vmatmul.bf16.vlgmr.msra.gmra.mxu3 %v15244_v49  ;;  %v14329_v12 = vld [vmem:[#allocation8 + $0x66c] sm:$0xf0]  ;;  %v12381_v3 = vld [vmem:[#allocation8 + $0x760] sm:$0xf] }
 0x2c7   :  { %7824 = vmatpush.bf16.msrb.mxu3 %v12446_v54  ;;  %7768 = vmatpush.bf16.msrb.mxu0 %v12046_v9  ;;  %v14365_v54 = vld [vmem:[#allocation8 + $0x78c] sm:$0xf0]  ;;  %v4239_v19 = vpop.f32.mrf.mxu1  ;;  %v11981_v38 = vld [vmem:[#allocation8 + $0x440] sm:$0xf]  ;;  %v12254_v34 = vor.u32 %v14329_v12, %v12253_v5 }
 0x2c8   :  { %v15437_v47 = vpack.c.bf16 %v4572_v57, %v4556_v55  ;;  %v12398_v9 = vor.u32 %v14365_v54, %v12397_v11  ;;  %v14361_v16 = vld [vmem:[#allocation8 + $0x76c] sm:$0xf0]  ;;  %v4220_v41 = vpop.f32.mrf.mxu0  ;;  %v12237_v30 = vld [vmem:[#allocation8 + $0x640] sm:$0xf] }
 0x2c9   :  { %7787 = vmatpush.bf16.msrb.mxu1 %v12174_v45  ;;  %7807 = vmatpush.bf16.msrb.mxu2 %v12286_v51  ;;  %v12125_v45 = vld [vmem:[#allocation8 + $0x560] sm:$0xf]  ;;  %v4221_v23 = vadd.f32 %v4220_v41, %v15430_v33  ;;  %v14261_v31 = vld [vmem:[#allocation8 + $0x44c] sm:$0xf0] }
 0x2ca   :  { %16038 = vst [vmem:[#allocation39_spill] sm:$0xff] %v15437_v47  ;;  %v12126_v0 = vor.u32 %v14297_v15, %v12125_v45  ;;  %v14293_v8 = vld [vmem:[#allocation8 + $0x54c] sm:$0xf0]  ;;  %v11982_v27 = vor.u32 %v14261_v31, %v11981_v38  ;;  %v12093_v55 = vld [vmem:[#allocation8 + $0x520] sm:$0xf] }
 0x2cb   :  { %7825 = vmatpush.bf16.msrb.mxu3 %v12430_v63  ;;  %7769 = vmatpush.bf16.msrb.mxu0 %v12030_v37  ;;  %v4256_v63 = vpop.f32.mrf.mxu2  ;;  %v4275_v58 = vpop.f32.mrf.mxu3  ;;  %v12382_v37 = vor.u32 %v14361_v16, %v12381_v3  ;;  %v4240_v48 = vadd.f32 %v4239_v19, %v4221_v23  ;;  %v14325_v51 = vld [vmem:[#allocation8 + $0x64c] sm:$0xf0]  ;;  %v12205_v19 = vld [vmem:[#allocation8 + $0x600] sm:$0xf] }
 0x2cc   :  { %v4257_v18 = vadd.f32 %v4256_v63, %v4238_v20  ;;  %v14357_v56 = vld [vmem:[#allocation8 + $0x74c] sm:$0xf0]  ;;  %v11965_v20 = vld [vmem:[#allocation8 + $0x420] sm:$0xf]  ;;  %v12238_v11 = vor.u32 %v14325_v51, %v12237_v30 }
 0x2cd   :  { %7788 = vmatpush.bf16.msrb.mxu1 %v12158_v39  ;;  %7808 = vmatpush.bf16.msrb.mxu2 %v12270_v6  ;;  %v12109_v39 = vld [vmem:[#allocation8 + $0x540] sm:$0xf]  ;;  %v14257_v46 = vld [vmem:[#allocation8 + $0x42c] sm:$0xf0] }
 0x2ce   :  { %v15440_v44 = vadd.f32 %v4275_v58, %v4257_v18  ;;  %v12110_v42 = vor.u32 %v14293_v8, %v12109_v39  ;;  %v14289_v57 = vld [vmem:[#allocation8 + $0x52c] sm:$0xf0]  ;;  %v12349_v6 = vld [vmem:[#allocation8 + $0x720] sm:$0xf]  ;;  %v11966_v3 = vor.u32 %v14257_v46, %v11965_v20 }
 0x2cf   :  { %7826 = vmatpush.bf16.msrb.mxu3 %v12414_v53  ;;  %7770 = vmatpush.bf16.msrb.mxu0 %v12014_v59  ;;  %v12365_v53 = vld [vmem:[#allocation8 + $0x740] sm:$0xf]  ;;  %v14321_v61 = vld [vmem:[#allocation8 + $0x62c] sm:$0xf0]  ;;  %v4242_v5 = vpop.f32.mrf.mxu1  ;;  %v12094_v16 = vor.u32 %v14289_v57, %v12093_v55 }
 0x2d0   :  { %v12366_v54 = vor.u32 %v14357_v56, %v12365_v53  ;;  %v12221_v59 = vld [vmem:[#allocation8 + $0x620] sm:$0xf]  ;;  %v4223_v15 = vpop.f32.mrf.mxu0  ;;  %v14253_v58 = vld [vmem:[#allocation8 + $0x40c] sm:$0xf0]  ;;  %7742 = vmatmul.bf16.gmra.mxu2 %v15233_v17 }
 0x2d1   :  { %7789 = vmatpush.bf16.msrb.mxu1 %v12142_v14  ;;  %7809 = vmatpush.bf16.msrb.mxu2 %v12254_v34  ;;  %v11949_v63 = vld [vmem:[#allocation8 + $0x400] sm:$0xf]  ;;  %v4224_v12 = vadd.f32 %v4223_v15, %v15430_v33  ;;  %v14285_v41 = vld [vmem:[#allocation8 + $0x50c] sm:$0xf0] }
 0x2d2   :  { %v12077_v18 = vld [vmem:[#allocation8 + $0x500] sm:$0xf]  ;;  %v14317_v38 = vld [vmem:[#allocation8 + $0x60c] sm:$0xf0]  ;;  %7704 = vmatmul.bf16.gmra.mxu0 %v15187_v1 }
 0x2d3   :  { %7827 = vmatpush.bf16.msrb.mxu3 %v12398_v9  ;;  %7771 = vmatpush.bf16.msrb.mxu0 %v11998_v25  ;;  %v4258_v14 = vpop.f32.mrf.mxu2  ;;  %v4277_v21 = vpop.f32.mrf.mxu3  ;;  %v14353_v9 = vld [vmem:[#allocation8 + $0x72c] sm:$0xf0]  ;;  %v12222_v25 = vor.u32 %v14321_v61, %v12221_v59  ;;  %v12333_v31 = vld [vmem:[#allocation8 + $0x700] sm:$0xf]  ;;  %v12206_v55 = vor.u32 %v14317_v38, %v12205_v19 }
 0x2d4   :  { %v4259_v45 = vadd.f32 %v4258_v14, %v4240_v48  ;;  %v14349_v34 = vld [vmem:[#allocation8 + $0x70c] sm:$0xf0]  ;;  %7723 = vmatmul.bf16.gmra.mxu1 %v15209_v36  ;;  %v12573_v39 = vld [vmem:[#allocation8 + $0x8e0] sm:$0xf]  ;;  %v4525_v48 = vmax.f32 %v15440_v44, 0.0 }
 0x2d5   :  { %7790 = vmatpush.bf16.msrb.mxu1 %v12126_v0  ;;  %7810 = vmatpush.bf16.msrb.mxu2 %v12238_v11  ;;  %v12350_v0 = vor.u32 %v14353_v9, %v12349_v6  ;;  %v14409_v8 = vld [vmem:[#allocation8 + $0x8ec] sm:$0xf0]  ;;  %v12701_v30 = vld [vmem:[#allocation8 + $0x9e0] sm:$0xf]  ;;  %v12334_v44 = vor.u32 %v14349_v34, %v12333_v31 }
 0x2d6   :  { %v4278_v23 = vadd.f32 %v4277_v21, %v4259_v45  ;;  %7761 = vmatmul.bf16.gmra.mxu3 %v15255_v2  ;;  %v14441_v53 = vld [vmem:[#allocation8 + $0x9ec] sm:$0xf0]  ;;  %v12829_v56 = vld [vmem:[#allocation8 + $0xae0] sm:$0xf]  ;;  %v12574_v14 = vor.u32 %v14409_v8, %v12573_v39 }
 0x2d7   :  { %7828 = vmatpush.bf16.msrb.mxu3 %v12382_v37  ;;  %7772 = vmatpush.bf16.msrb.mxu0 %v11982_v27  ;;  %v4243_v37 = vadd.f32 %v4242_v5, %v4224_v12  ;;  %v11950_v27 = vor.u32 %v14253_v58, %v11949_v63  ;;  %v14473_v20 = vld [vmem:[#allocation8 + $0xaec] sm:$0xf0]  ;;  %v12957_v46 = vld [vmem:[#allocation8 + $0xbe0] sm:$0xf]  ;;  %v12702_v21 = vor.u32 %v14441_v53, %v12701_v30  ;;  %v4244_v15 = vpop.f32.mrf.mxu1 }
 0x2d8   :  { %v4541_v51 = vmax.f32 %v4278_v23, 0.0  ;;  %v14505_v11 = vld [vmem:[#allocation8 + $0xbec] sm:$0xf0]  ;;  %v12557_v61 = vld [vmem:[#allocation8 + $0x8c0] sm:$0xf]  ;;  %v4225_v45 = vpop.f32.mrf.mxu0  ;;  %v12830_v5 = vor.u32 %v14473_v20, %v12829_v56 }
 0x2d9   :  { %7791 = vmatpush.bf16.msrb.mxu1 %v12110_v42  ;;  %v12078_v42 = vor.u32 %v14285_v41, %v12077_v18  ;;  %7811 = vmatpush.bf16.msrb.mxu2 %v12222_v25  ;;  %v14405_v6 = vld [vmem:[#allocation8 + $0x8cc] sm:$0xf0]  ;;  %v12958_v63 = vor.u32 %v14505_v11, %v12957_v46  ;;  %v12685_v58 = vld [vmem:[#allocation8 + $0x9c0] sm:$0xf] }
 0x2da   :  { %v14437_v12 = vld [vmem:[#allocation8 + $0x9cc] sm:$0xf0]  ;;  %v12941_v41 = vld [vmem:[#allocation8 + $0xbc0] sm:$0xf] }
 0x2db   :  { %7829 = vmatpush.bf16.msrb.mxu3 %v12366_v54  ;;  %7773 = vmatpush.bf16.msrb.mxu0 %v11966_v3  ;;  %v15448_v54 = vpack.c.bf16 %v4541_v51, %v4525_v48  ;;  %v4261_v57 = vpop.f32.mrf.mxu2  ;;  %v4280_v59 = vpop.f32.mrf.mxu3  ;;  %v12813_v3 = vld [vmem:[#allocation8 + $0xac0] sm:$0xf]  ;;  %v14469_v18 = vld [vmem:[#allocation8 + $0xacc] sm:$0xf0]  ;;  %v12686_v38 = vor.u32 %v14437_v12, %v12685_v58 }
 0x2dc   :  { %v4262_v9 = vadd.f32 %v4261_v57, %v4243_v37  ;;  %v14501_v19 = vld [vmem:[#allocation8 + $0xbcc] sm:$0xf0]  ;;  %v12814_v31 = vor.u32 %v14469_v18, %v12813_v3  ;;  %v12541_v37 = vld [vmem:[#allocation8 + $0x8a0] sm:$0xf] }
 0x2dd   :  { %7792 = vmatpush.bf16.msrb.mxu1 %v12094_v16  ;;  %v4226_v16 = vadd.f32 %v4225_v45, %v15430_v33  ;;  %7812 = vmatpush.bf16.msrb.mxu2 %v12206_v55  ;;  %v12942_v34 = vor.u32 %v14501_v19, %v12941_v41  ;;  %v14401_v39 = vld [vmem:[#allocation8 + $0x8ac] sm:$0xf0]  ;;  %v12669_v33 = vld [vmem:[#allocation8 + $0x9a0] sm:$0xf] }
 0x2de   :  { %v4281_v23 = vadd.f32 %v4280_v59, %v4262_v9  ;;  %v14433_v8 = vld [vmem:[#allocation8 + $0x9ac] sm:$0xf0]  ;;  %v12797_v30 = vld [vmem:[#allocation8 + $0xaa0] sm:$0xf]  ;;  %v12542_v11 = vor.u32 %v14401_v39, %v12541_v37 }
 0x2df   :  { %7830 = vmatpush.bf16.msrb.mxu3 %v12350_v0  ;;  %7774 = vmatpush.bf16.msrb.mxu0 %v11950_v27  ;;  %v4245_v25 = vadd.f32 %v4244_v15, %v4226_v16  ;;  %v12558_v0 = vor.u32 %v14405_v6, %v12557_v61  ;;  %v14465_v53 = vld [vmem:[#allocation8 + $0xaac] sm:$0xf0]  ;;  %v12925_v56 = vld [vmem:[#allocation8 + $0xba0] sm:$0xf]  ;;  %v15453_v46 = vpop.f32.mrf.mxu1  ;;  %v12670_v55 = vor.u32 %v14433_v8, %v12669_v33 }
 0x2e0   :  { %v14497_v27 = vld [vmem:[#allocation8 + $0xbac] sm:$0xf0]  ;;  %v15451_v20 = vpop.f32.mrf.mxu0  ;;  %v12653_v61 = vld [vmem:[#allocation8 + $0x980] sm:$0xf]  ;;  %7813 = vmatmul.bf16.vlgmr.msrb.gmra.mxu2 %v15312_v43 }
 0x2e1   :  { %7793 = vmatpush.bf16.msrb.mxu1 %v12078_v42  ;;  %7881 = vmatpush.bf16.msra.mxu2 %v12830_v5  ;;  %v14397_v57 = vld [vmem:[#allocation8 + $0x88c] sm:$0xf0]  ;;  %v12781_v9 = vld [vmem:[#allocation8 + $0xa80] sm:$0xf] }
 0x2e2   :  { %v14429_v6 = vld [vmem:[#allocation8 + $0x98c] sm:$0xf0]  ;;  %7775 = vmatmul.bf16.vlgmr.msrb.gmra.mxu0 %v15266_v40  ;;  %v12909_v15 = vld [vmem:[#allocation8 + $0xb80] sm:$0xf] }
 0x2e3   :  { %7831 = vmatpush.bf16.msrb.mxu3 %v12334_v44  ;;  %7843 = vmatpush.bf16.msra.mxu0 %v12574_v14  ;;  %v4263_v48 = vpop.f32.mrf.mxu2  ;;  %v4282_v51 = vpop.f32.mrf.mxu3  ;;  %v12525_v44 = vld [vmem:[#allocation8 + $0x880] sm:$0xf]  ;;  %v12798_v14 = vor.u32 %v14465_v53, %v12797_v30  ;;  %v14461_v45 = vld [vmem:[#allocation8 + $0xa8c] sm:$0xf0]  ;;  %v12654_v3 = vor.u32 %v14429_v6, %v12653_v61 }
 0x2e4   :  { %v4264_v42 = vadd.f32 %v4263_v48, %v4245_v25  ;;  %7794 = vmatmul.bf16.vlgmr.msrb.gmra.mxu1 %v15288_v35  ;;  %v14493_v5 = vld [vmem:[#allocation8 + $0xb8c] sm:$0xf0]  ;;  %v12526_v12 = vor.u32 %v14397_v57, %v12525_v44  ;;  %v12509_v16 = vld [vmem:[#allocation8 + $0x860] sm:$0xf]  ;;  %v12782_v19 = vor.u32 %v14461_v45, %v12781_v9 }
 0x2e5   :  { %7862 = vmatpush.bf16.msra.mxu1 %v12702_v21  ;;  %7882 = vmatpush.bf16.msra.mxu2 %v12814_v31  ;;  %v12926_v21 = vor.u32 %v14497_v27, %v12925_v56  ;;  %v14393_v18 = vld [vmem:[#allocation8 + $0x86c] sm:$0xf0]  ;;  %v12910_v25 = vor.u32 %v14493_v5, %v12909_v15  ;;  %v12893_v39 = vld [vmem:[#allocation8 + $0xb60] sm:$0xf] }
 0x2e6   :  { %v4283_v59 = vadd.f32 %v4282_v51, %v4264_v42  ;;  %7832 = vmatmul.bf16.vlgmr.msrb.gmra.mxu3 %v15334_v62  ;;  %v14457_v37 = vld [vmem:[#allocation8 + $0xa6c] sm:$0xf0]  ;;  %v12510_v48 = vor.u32 %v14393_v18, %v12509_v16  ;;  %v12493_v53 = vld [vmem:[#allocation8 + $0x840] sm:$0xf] }
 0x2e7   :  { %7900 = vmatpush.bf16.msra.mxu3 %v12958_v63  ;;  %7844 = vmatpush.bf16.msra.mxu0 %v12558_v0  ;;  %v4557_v63 = vmax.f32 %v4281_v23, 0.0  ;;  %v12637_v0 = vld [vmem:[#allocation8 + $0x960] sm:$0xf]  ;;  %v14489_v33 = vld [vmem:[#allocation8 + $0xb6c] sm:$0xf0]  ;;  %v15467_v30 = vpop.f32.mrf.mxu1 }
 0x2e8   :  { %v4573_v58 = vmax.f32 %v4283_v59, 0.0  ;;  %v12765_v23 = vld [vmem:[#allocation8 + $0xa60] sm:$0xf]  ;;  %v15465_v8 = vpop.f32.mrf.mxu0  ;;  %v14389_v56 = vld [vmem:[#allocation8 + $0x84c] sm:$0xf0]  ;;  %v12894_v42 = vor.u32 %v14489_v33, %v12893_v39 }
 0x2e9   :  { %7863 = vmatpush.bf16.msra.mxu1 %v12686_v38  ;;  %7883 = vmatpush.bf16.msra.mxu2 %v12798_v14  ;;  %v14425_v38 = vld [vmem:[#allocation8 + $0x96c] sm:$0xf0]  ;;  %v12766_v27 = vor.u32 %v14457_v37, %v12765_v23  ;;  %v12749_v44 = vld [vmem:[#allocation8 + $0xa40] sm:$0xf] }
 0x2ea   :  { %v15459_v41 = vpack.c.bf16 %v4573_v58, %v4557_v63  ;;  %v12638_v51 = vor.u32 %v14425_v38, %v12637_v0  ;;  %v14453_v57 = vld [vmem:[#allocation8 + $0xa4c] sm:$0xf0]  ;;  %v12877_v59 = vld [vmem:[#allocation8 + $0xb40] sm:$0xf] }
 0x2eb   :  { %7901 = vmatpush.bf16.msra.mxu3 %v12942_v34  ;;  %7845 = vmatpush.bf16.msra.mxu0 %v12542_v11  ;;  %v15461_v31 = vpop.f32.mrf.mxu2  ;;  %v15463_v34 = vpop.f32.mrf.mxu3  ;;  %v12621_v11 = vld [vmem:[#allocation8 + $0x940] sm:$0xf]  ;;  %v14485_v14 = vld [vmem:[#allocation8 + $0xb4c] sm:$0xf0]  ;;  %v12750_v45 = vor.u32 %v14453_v57, %v12749_v44 }
 0x2ec   :  { %v12477_v6 = vld [vmem:[#allocation8 + $0x820] sm:$0xf]  ;;  %v14385_v9 = vld [vmem:[#allocation8 + $0x82c] sm:$0xf0]  ;;  %v12878_v15 = vor.u32 %v14485_v14, %v12877_v59 }
 0x2ed   :  { %7864 = vmatpush.bf16.msra.mxu1 %v12670_v55  ;;  %7884 = vmatpush.bf16.msra.mxu2 %v12782_v19  ;;  %v14421_v55 = vld [vmem:[#allocation8 + $0x94c] sm:$0xf0]  ;;  %v12605_v5 = vld [vmem:[#allocation8 + $0x920] sm:$0xf]  ;;  %v12478_v38 = vor.u32 %v14385_v9, %v12477_v6 }
 0x2ee   :  { %v12622_v61 = vor.u32 %v14421_v55, %v12621_v11  ;;  %v14417_v63 = vld [vmem:[#allocation8 + $0x92c] sm:$0xf0]  ;;  %v12733_v58 = vld [vmem:[#allocation8 + $0xa20] sm:$0xf] }
 0x2ef   :  { %7902 = vmatpush.bf16.msra.mxu3 %v12926_v21  ;;  %7846 = vmatpush.bf16.msra.mxu0 %v12526_v12  ;;  %v12494_v21 = vor.u32 %v14389_v56, %v12493_v53  ;;  %v14449_v16 = vld [vmem:[#allocation8 + $0xa2c] sm:$0xf0]  ;;  %v12861_v18 = vld [vmem:[#allocation8 + $0xb20] sm:$0xf]  ;;  %v15475_v0 = vpop.f32.mrf.mxu1  ;;  %v12606_v23 = vor.u32 %v14417_v63, %v12605_v5 }
 0x2f0   :  { %v14481_v19 = vld [vmem:[#allocation8 + $0xb2c] sm:$0xf0]  ;;  %v12461_v37 = vld [vmem:[#allocation8 + $0x800] sm:$0xf]  ;;  %7818 = vmatmul.bf16.gmra.mxu2 %v15323_v13 }
 0x2f1   :  { %7865 = vmatpush.bf16.msra.mxu1 %v12654_v3  ;;  %7885 = vmatpush.bf16.msra.mxu2 %v12766_v27  ;;  %v14381_v39 = vld [vmem:[#allocation8 + $0x80c] sm:$0xf0]  ;;  %v12589_v33 = vld [vmem:[#allocation8 + $0x900] sm:$0xf] }
 0x2f2   :  { %v14413_v53 = vld [vmem:[#allocation8 + $0x90c] sm:$0xf0]  ;;  %v12717_v56 = vld [vmem:[#allocation8 + $0xa00] sm:$0xf]  ;;  %7780 = vmatmul.bf16.gmra.mxu0 %v15277_v24  ;;  %v12462_v14 = vor.u32 %v14381_v39, %v12461_v37 }
 0x2f3   :  { %7903 = vmatpush.bf16.msra.mxu3 %v12910_v25  ;;  %7847 = vmatpush.bf16.msra.mxu0 %v12510_v48  ;;  %v15469_v12 = vpop.f32.mrf.mxu2  ;;  %v15471_v3 = vpop.f32.mrf.mxu3  ;;  %v12734_v48 = vor.u32 %v14449_v16, %v12733_v58  ;;  %v14445_v27 = vld [vmem:[#allocation8 + $0xa0c] sm:$0xf0]  ;;  %v13085_v55 = vld [vmem:[#allocation8 + $0xce0] sm:$0xf] }
 0x2f4   :  { %v15473_v25 = vpop.f32.mrf.mxu0  ;;  %7799 = vmatmul.bf16.gmra.mxu1 %v15301_v4  ;;  %v14477_v11 = vld [vmem:[#allocation8 + $0xb0c] sm:$0xf0]  ;;  %v13213_v57 = vld [vmem:[#allocation8 + $0xde0] sm:$0xf]  ;;  %v12718_v9 = vor.u32 %v14445_v27, %v12717_v56 }
 0x2f5   :  { %7866 = vmatpush.bf16.msra.mxu1 %v12638_v51  ;;  %7886 = vmatpush.bf16.msra.mxu2 %v12750_v45  ;;  %v12862_v51 = vor.u32 %v14481_v19, %v12861_v18  ;;  %v14537_v44 = vld [vmem:[#allocation8 + $0xcec] sm:$0xf0]  ;;  %v13069_v19 = vld [vmem:[#allocation8 + $0xcc0] sm:$0xf] }
 0x2f6   :  { %7837 = vmatmul.bf16.gmra.mxu3 %v15347_v32  ;;  %v14569_v59 = vld [vmem:[#allocation8 + $0xdec] sm:$0xf0]  ;;  %v13086_v16 = vor.u32 %v14537_v44, %v13085_v55  ;;  %v13197_v39 = vld [vmem:[#allocation8 + $0xdc0] sm:$0xf] }
 0x2f7   :  { %7904 = vmatpush.bf16.msra.mxu3 %v12894_v42  ;;  %7848 = vmatpush.bf16.msra.mxu0 %v12494_v21  ;;  %v12845_v42 = vld [vmem:[#allocation8 + $0xb00] sm:$0xf]  ;;  %v12590_v21 = vor.u32 %v14413_v53, %v12589_v33  ;;  %v14601_v6 = vld [vmem:[#allocation8 + $0xeec] sm:$0xf0]  ;;  %v13214_v18 = vor.u32 %v14569_v59, %v13213_v57 }
 0x2f8   :  { %v12846_v45 = vor.u32 %v14477_v11, %v12845_v42  ;;  %v14633_v5 = vld [vmem:[#allocation8 + $0xfec] sm:$0xf0]  ;;  %v13453_v56 = vld [vmem:[#allocation8 + $0xfc0] sm:$0xf] }
 0x2f9   :  { %7867 = vmatpush.bf16.msra.mxu1 %v12622_v61  ;;  %v13341_v61 = vld [vmem:[#allocation8 + $0xee0] sm:$0xf]  ;;  %7887 = vmatpush.bf16.msra.mxu2 %v12734_v48  ;;  %v14533_v37 = vld [vmem:[#allocation8 + $0xccc] sm:$0xf0] }
 0x2fa   :  { %v14565_v33 = vld [vmem:[#allocation8 + $0xdcc] sm:$0xf0]  ;;  %v13070_v42 = vor.u32 %v14533_v37, %v13069_v19  ;;  %v13053_v57 = vld [vmem:[#allocation8 + $0xca0] sm:$0xf] }
 0x2fb   :  { %7905 = vmatpush.bf16.msra.mxu3 %v12878_v15  ;;  %7849 = vmatpush.bf16.msra.mxu0 %v12478_v38  ;;  %v13469_v15 = vld [vmem:[#allocation8 + $0xfe0] sm:$0xf]  ;;  %v15481_v63 = vpop.f32.mrf.mxu2  ;;  %v15483_v58 = vpop.f32.mrf.mxu3  ;;  %v14597_v53 = vld [vmem:[#allocation8 + $0xecc] sm:$0xf0]  ;;  %v13198_v11 = vor.u32 %v14565_v33, %v13197_v39 }
 0x2fc   :  { %v15485_v32 = vpop.f32.mrf.mxu0  ;;  %v15487_v38 = vpop.f32.mrf.mxu1  ;;  %v13470_v48 = vor.u32 %v14633_v5, %v13469_v15  ;;  %v14629_v27 = vld [vmem:[#allocation8 + $0xfcc] sm:$0xf0]  ;;  %v13037_v37 = vld [vmem:[#allocation8 + $0xc80] sm:$0xf] }
 0x2fd   :  { %7868 = vmatpush.bf16.msra.mxu1 %v12606_v23  ;;  %v13342_v23 = vor.u32 %v14601_v6, %v13341_v61  ;;  %7888 = vmatpush.bf16.msra.mxu2 %v12718_v9  ;;  %v13454_v44 = vor.u32 %v14629_v27, %v13453_v56  ;;  %v14529_v59 = vld [vmem:[#allocation8 + $0xcac] sm:$0xf0]  ;;  %v13181_v61 = vld [vmem:[#allocation8 + $0xda0] sm:$0xf] }
 0x2fe   :  { %v14561_v6 = vld [vmem:[#allocation8 + $0xdac] sm:$0xf0]  ;;  %v13054_v19 = vor.u32 %v14529_v59, %v13053_v57  ;;  %v13021_v57 = vld [vmem:[#allocation8 + $0xc60] sm:$0xf] }
 0x2ff   :  { %7906 = vmatpush.bf16.msra.mxu3 %v12862_v51  ;;  %7850 = vmatpush.bf16.msra.mxu0 %v12462_v14  ;;  %v13325_v51 = vld [vmem:[#allocation8 + $0xec0] sm:$0xf]  ;;  %v14593_v9 = vld [vmem:[#allocation8 + $0xeac] sm:$0xf0] }
 0x300   :  { %v13326_v55 = vor.u32 %v14597_v53, %v13325_v51  ;;  %v13309_v14 = vld [vmem:[#allocation8 + $0xea0] sm:$0xf]  ;;  %v14625_v5 = vld [vmem:[#allocation8 + $0xfac] sm:$0xf0]  ;;  %7889 = vmatmul.bf16.vlgmr.msra.gmra.mxu2 %v15402_v60 }
 0x301   :  { %7869 = vmatpush.bf16.msra.mxu1 %v12590_v21  ;;  %7957 = vmatpush.bf16.msrb.mxu2 %v13342_v23  ;;  %v13182_v23 = vor.u32 %v14561_v6, %v13181_v61  ;;  %v14525_v39 = vld [vmem:[#allocation8 + $0xc8c] sm:$0xf0]  ;;  %v13310_v33 = vor.u32 %v14593_v9, %v13309_v14  ;;  %v13293_v53 = vld [vmem:[#allocation8 + $0xe80] sm:$0xf] }
 0x302   :  { %v14557_v51 = vld [vmem:[#allocation8 + $0xd8c] sm:$0xf0]  ;;  %7851 = vmatmul.bf16.vlgmr.msra.gmra.mxu0 %v15358_v26  ;;  %v13149_v6 = vld [vmem:[#allocation8 + $0xd60] sm:$0xf] }
 0x303   :  { %7907 = vmatpush.bf16.msra.mxu3 %v12846_v45  ;;  %7919 = vmatpush.bf16.msrb.mxu0 %v13086_v16  ;;  %v15489_v21 = vpop.f32.mrf.mxu2  ;;  %v15491_v15 = vpop.f32.mrf.mxu3  ;;  %v13437_v45 = vld [vmem:[#allocation8 + $0xfa0] sm:$0xf]  ;;  %v14589_v27 = vld [vmem:[#allocation8 + $0xe8c] sm:$0xf0] }
 0x304   :  { %v15493_v16 = vpop.f32.mrf.mxu0  ;;  %v13438_v56 = vor.u32 %v14625_v5, %v13437_v45  ;;  %7870 = vmatmul.bf16.vlgmr.msra.gmra.mxu1 %v15380_v22  ;;  %v14521_v59 = vld [vmem:[#allocation8 + $0xc6c] sm:$0xf0]  ;;  %v13294_v61 = vor.u32 %v14589_v27, %v13293_v53  ;;  %v13277_v9 = vld [vmem:[#allocation8 + $0xe60] sm:$0xf] }
 0x305   :  { %7938 = vmatpush.bf16.msrb.mxu1 %v13214_v18  ;;  %v15495_v18 = vpop.f32.mrf.mxu1  ;;  %7958 = vmatpush.bf16.msrb.mxu2 %v13326_v55  ;;  %v13038_v55 = vor.u32 %v14525_v39, %v13037_v37  ;;  %v14553_v14 = vld [vmem:[#allocation8 + $0xd6c] sm:$0xf0]  ;;  %v13405_v26 = vld [vmem:[#allocation8 + $0xf60] sm:$0xf]  ;;  %v15507_v37 = vld [vmem:[#allocation7 + $0x8] sm:$0xff] }
 0x306   :  { %7908 = vmatmul.bf16.vlgmr.msra.gmra.mxu3 %v15426_v50  ;;  %v14585_v60 = vld [vmem:[#allocation8 + $0xe6c] sm:$0xf0]  ;;  %v15510_v39 = vperm.slane %v15507_v37, 5  ;;  %v13133_v27 = vld [vmem:[#allocation8 + $0xd40] sm:$0xf]  ;;  %v15513_v2 = vperm.slane %v15507_v37, 6 }
 0x307   :  { %7976 = vmatpush.bf16.msrb.mxu3 %v13470_v48  ;;  %7920 = vmatpush.bf16.msrb.mxu0 %v13070_v42  ;;  %v13165_v48 = vld [vmem:[#allocation8 + $0xd80] sm:$0xf]  ;;  %v14617_v50 = vld [vmem:[#allocation8 + $0xf6c] sm:$0xf0] }
 0x308   :  { %v13421_v42 = vld [vmem:[#allocation8 + $0xf80] sm:$0xf]  ;;  %v14517_v53 = vld [vmem:[#allocation8 + $0xc4c] sm:$0xf0]  ;;  %v13406_v62 = vor.u32 %v14617_v50, %v13405_v26 }
 0x309   :  { %7939 = vmatpush.bf16.msrb.mxu1 %v13198_v11  ;;  %v14621_v11 = vld [vmem:[#allocation8 + $0xf8c] sm:$0xf0]  ;;  %7959 = vmatpush.bf16.msrb.mxu2 %v13310_v33  ;;  %v13022_v33 = vor.u32 %v14521_v59, %v13021_v57  ;;  %v13389_v4 = vld [vmem:[#allocation8 + $0xf40] sm:$0xf] }
 0x30a   :  { %v13422_v45 = vor.u32 %v14621_v11, %v13421_v42  ;;  %v14549_v42 = vld [vmem:[#allocation8 + $0xd4c] sm:$0xf0]  ;;  %v13261_v11 = vld [vmem:[#allocation8 + $0xe40] sm:$0xf] }
 0x30b   :  { %7977 = vmatpush.bf16.msrb.mxu3 %v13454_v44  ;;  %7921 = vmatpush.bf16.msrb.mxu0 %v13054_v19  ;;  %v13166_v44 = vor.u32 %v14557_v51, %v13165_v48  ;;  %v15501_v5 = vpop.f32.mrf.mxu2  ;;  %v15503_v22 = vpop.f32.mrf.mxu3  ;;  %v13150_v48 = vor.u32 %v14553_v14, %v13149_v6  ;;  %v13005_v51 = vld [vmem:[#allocation8 + $0xc40] sm:$0xf]  ;;  %v14581_v13 = vld [vmem:[#allocation8 + $0xe4c] sm:$0xf0] }
 0x30c   :  { %v4372_v19 = vpop.f32.mrf.mxu0  ;;  %v14613_v24 = vld [vmem:[#allocation8 + $0xf4c] sm:$0xf0]  ;;  %v12989_v57 = vld [vmem:[#allocation8 + $0xc20] sm:$0xf] }
 0x30d   :  { %7940 = vmatpush.bf16.msrb.mxu1 %v13182_v23  ;;  %v15505_v23 = vpop.f32.mrf.mxu1  ;;  %7960 = vmatpush.bf16.msrb.mxu2 %v13294_v61  ;;  %v14513_v59 = vld [vmem:[#allocation8 + $0xc2c] sm:$0xf0]  ;;  %v13262_v61 = vor.u32 %v14581_v13, %v13261_v11  ;;  %v13117_v6 = vld [vmem:[#allocation8 + $0xd20] sm:$0xf]  ;;  %v13390_v50 = vor.u32 %v14613_v24, %v13389_v4 }
 0x30e   :  { %v14545_v14 = vld [vmem:[#allocation8 + $0xd2c] sm:$0xf0]  ;;  %v13245_v26 = vld [vmem:[#allocation8 + $0xe20] sm:$0xf]  ;;  %v12990_v24 = vor.u32 %v14513_v59, %v12989_v57  ;;  %v11551_v57 = vld [vmem:[#allocation8 + $0xf0] sm:$0xf0] }
 0x30f   :  { %7978 = vmatpush.bf16.msrb.mxu3 %v13438_v56  ;;  %7922 = vmatpush.bf16.msrb.mxu0 %v13038_v55  ;;  %v13278_v56 = vor.u32 %v14585_v60, %v13277_v9  ;;  %v13006_v55 = vor.u32 %v14517_v53, %v13005_v51  ;;  %v4297_v60 = vadd.f32 %v15465_v8, %v15510_v39  ;;  %v13373_v51 = vld [vmem:[#allocation8 + $0xf20] sm:$0xf]  ;;  %v14609_v53 = vld [vmem:[#allocation8 + $0xf2c] sm:$0xf0]  ;;  %v14183_v59 = vld [vmem:[#allocation8 + $0x1e4] sm:$0xf] }
 0x310   :  { %v4295_v9 = vadd.f32 %v15451_v20, %v15510_v39  ;;  %v4373_v8 = vadd.f32 %v4372_v19, %v15513_v2  ;;  %v13118_v4 = vor.u32 %v14545_v14, %v13117_v6  ;;  %v14509_v20 = vld [vmem:[#allocation8 + $0xc0c] sm:$0xf0]  ;;  %v13229_v40 = vld [vmem:[#allocation8 + $0xe00] sm:$0xf]  ;;  %v13374_v19 = vor.u32 %v14609_v53, %v13373_v51  ;;  %7894 = vmatmul.bf16.gmra.mxu2 %v15415_v29  ;;  %v14215_v14 = vld [vmem:[#allocation8 + $0x2e4] sm:$0xf] }
 0x311   :  { %7941 = vmatpush.bf16.msrb.mxu1 %v13166_v44  ;;  %v13134_v44 = vor.u32 %v14549_v42, %v13133_v27  ;;  %7961 = vmatpush.bf16.msrb.mxu2 %v13278_v56  ;;  %v4371_v27 = vadd.f32 %v15493_v16, %v15513_v2  ;;  %v13101_v42 = vld [vmem:[#allocation8 + $0xd00] sm:$0xf]  ;;  %v4316_v11 = vadd.f32 %v15467_v30, %v4297_v60  ;;  %v14541_v35 = vld [vmem:[#allocation8 + $0xd0c] sm:$0xf0] }
 0x312   :  { %v14573_v16 = vld [vmem:[#allocation8 + $0xe0c] sm:$0xf0]  ;;  %v4314_v49 = vadd.f32 %v15453_v46, %v4295_v9  ;;  %7856 = vmatmul.bf16.gmra.mxu0 %v15369_v10  ;;  %v4392_v60 = vadd.f32 %v15505_v23, %v4373_v8  ;;  %v11807_v46 = vld [vmem:[#allocation8 + $0x2f0] sm:$0xf0]  ;;  %v13357_v9 = vld [vmem:[#allocation8 + $0xf00] sm:$0xf] }
 0x313   :  { %7979 = vmatpush.bf16.msrb.mxu3 %v13422_v45  ;;  %7923 = vmatpush.bf16.msrb.mxu0 %v13022_v33  ;;  %v4410_v45 = vpop.f32.mrf.mxu2  ;;  %v15519_v33 = vpop.f32.mrf.mxu3  ;;  %v4335_v6 = vadd.f32 %v15469_v12, %v4316_v11  ;;  %v4390_v30 = vadd.f32 %v15495_v18, %v4371_v27  ;;  %v13230_v12 = vor.u32 %v14573_v16, %v13229_v40  ;;  %v14247_v18 = vld [vmem:[#allocation8 + $0x3e4] sm:$0xf]  ;;  %v11935_v23 = vld [vmem:[#allocation8 + $0x3f0] sm:$0xf0] }
 0x314   :  { %v15524_v13 = vpop.f32.mrf.mxu0  ;;  %v4411_v51 = vadd.f32 %v4410_v45, %v4392_v60  ;;  %v4333_v27 = vadd.f32 %v15461_v31, %v4314_v49  ;;  %v14211_v16 = vld [vmem:[#allocation8 + $0x2c4] sm:$0xf]  ;;  %v11938_v31 = vor.u32 %v14247_v18, %v11935_v23  ;;  %v11919_v60 = vld [vmem:[#allocation8 + $0x3d0] sm:$0xf0]  ;;  %v4300_v23 = vadd.f32 %v15473_v25, %v15510_v39 }
 0x315   :  { %7942 = vmatpush.bf16.msrb.mxu1 %v13150_v48  ;;  %v14577_v48 = vld [vmem:[#allocation8 + $0xe2c] sm:$0xf0]  ;;  %v15526_v56 = vpop.f32.mrf.mxu1  ;;  %7962 = vmatpush.bf16.msrb.mxu2 %v13262_v61  ;;  %v11679_v61 = vld [vmem:[#allocation8 + $0x1f0] sm:$0xf0] }
 0x316   :  { %v13246_v43 = vor.u32 %v14577_v48, %v13245_v26  ;;  %7913 = vmatmul.bf16.gmra.mxu3 %v15437_v47  ;;  %v14605_v48 = vld [vmem:[#allocation8 + $0xf0c] sm:$0xf0]  ;;  %v11682_v47 = vor.u32 %v14183_v59, %v11679_v61  ;;  %v14243_v59 = vld [vmem:[#allocation8 + $0x3c4] sm:$0xf]  ;;  %v11519_v61 = vld [vmem:[#allocation8 + $0xb0] sm:$0xf0] }
 0x317   :  { %7980 = vmatpush.bf16.msrb.mxu3 %v13406_v62  ;;  %7924 = vmatpush.bf16.msrb.mxu0 %v13006_v55  ;;  %v12973_v62 = vld [vmem:[#allocation8 + $0xc00] sm:$0xf]  ;;  %v16039_v55 = vld [vmem:[#allocation36_spill] sm:$0xff]  ;;  %v13358_v49 = vor.u32 %v14605_v48, %v13357_v9  ;;  %v14207_v9 = vld [vmem:[#allocation8 + $0x2a4] sm:$0xf] }
 0x318   :  { %7875 = vmatmul.bf16.gmra.mxu1 %v16039_v55  ;;  %v12974_v26 = vor.u32 %v14509_v20, %v12973_v62  ;;  %v11535_v62 = vld [vmem:[#allocation8 + $0xd0] sm:$0xf0]  ;;  %v4354_v20 = vadd.f32 %v15471_v3, %v4335_v6  ;;  %v4352_v3 = vadd.f32 %v15463_v34, %v4333_v27 }
 0x319   :  { %7943 = vmatpush.bf16.msrb.mxu1 %v13134_v44  ;;  %v14151_v44 = vld [vmem:[#allocation8 + $0xe4] sm:$0xf]  ;;  %7963 = vmatpush.bf16.msrb.mxu2 %v13246_v43  ;;  %v4409_v43 = vadd.f32 %v15501_v5, %v4390_v30  ;;  %v11775_v48 = vld [vmem:[#allocation8 + $0x2b0] sm:$0xf0] }
 0x31a   :  { %v11554_v53 = vor.u32 %v14151_v44, %v11551_v57  ;;  %v4430_v44 = vadd.f32 %v15519_v33, %v4411_v51  ;;  %v14143_v30 = vld [vmem:[#allocation8 + $0xa4] sm:$0xf]  ;;  %v4302_v33 = vadd.f32 %v15485_v32, %v15510_v39  ;;  %v11922_v51 = vor.u32 %v14243_v59, %v11919_v60  ;;  %v11887_v59 = vld [vmem:[#allocation8 + $0x390] sm:$0xf0] }
 0x31b   :  { %7981 = vmatpush.bf16.msrb.mxu3 %v13390_v50  ;;  %7925 = vmatpush.bf16.msrb.mxu0 %v12990_v24  ;;  %v13102_v50 = vor.u32 %v14541_v35, %v13101_v42  ;;  %v15538_v8 = vpop.f32.mrf.mxu2  ;;  %v15540_v11 = vpop.f32.mrf.mxu3  ;;  %v11810_v24 = vor.u32 %v14215_v14, %v11807_v46  ;;  %v14179_v35 = vld [vmem:[#allocation8 + $0x1c4] sm:$0xf]  ;;  %v11663_v42 = vld [vmem:[#allocation8 + $0x1d0] sm:$0xf0]  ;;  %v4542_v14 = vmax.f32 %v4354_v20, 0.0  ;;  %v4428_v46 = vadd.f32 %v15503_v22, %v4409_v43 }
 0x31c   :  { %v4377_v40 = vpop.f32.mrf.mxu0  ;;  %v11666_v5 = vor.u32 %v14179_v35, %v11663_v42  ;;  %v4543_v34 = vmax.f32 %v4430_v44, 0.0  ;;  %v4526_v18 = vmax.f32 %v4352_v3, 0.0  ;;  %v4376_v22 = vadd.f32 %v15524_v13, %v15513_v2  ;;  %v14139_v32 = vld [vmem:[#allocation8 + $0x84] sm:$0xf] }
 0x31d   :  { %7944 = vmatpush.bf16.msrb.mxu1 %v13118_v4  ;;  %v14147_v4 = vld [vmem:[#allocation8 + $0xc4] sm:$0xf]  ;;  %v15544_v45 = vpop.f32.mrf.mxu1  ;;  %7964 = vmatpush.bf16.msrb.mxu2 %v13230_v12  ;;  %v4378_v35 = vadd.f32 %v4377_v40, %v15513_v2  ;;  %v15559_v20 = vperm.slane %v15507_v37, 7  ;;  %v4321_v39 = vadd.f32 %v15487_v38, %v4302_v33  ;;  %v11778_v13 = vor.u32 %v14207_v9, %v11775_v48  ;;  %v11759_v40 = vld [vmem:[#allocation8 + $0x290] sm:$0xf0] }
 0x31e   :  { %v11538_v57 = vor.u32 %v14147_v4, %v11535_v62  ;;  %v14239_v12 = vld [vmem:[#allocation8 + $0x3a4] sm:$0xf]  ;;  %v11503_v4 = vld [vmem:[#allocation8 + $0x90] sm:$0xf0]  ;;  %v4527_v62 = vmax.f32 %v4428_v46, 0.0  ;;  %v15561_v25 = vpack.c.bf16 %v4542_v14, %v4526_v18  ;;  %v4319_v60 = vadd.f32 %v15475_v0, %v4300_v23 }
 0x31f   :  { %7982 = vmatpush.bf16.msrb.mxu3 %v13374_v19  ;;  %v11791_v19 = vld [vmem:[#allocation8 + $0x2d0] sm:$0xf0]  ;;  %7926 = vmatpush.bf16.msrb.mxu0 %v12974_v26  ;;  %v14175_v26 = vld [vmem:[#allocation8 + $0x1a4] sm:$0xf]  ;;  %v11506_v2 = vor.u32 %v14139_v32, %v11503_v4  ;;  %v4340_v3 = vadd.f32 %v15489_v21, %v4321_v39 }
 0x320   :  { %v11794_v6 = vor.u32 %v14211_v16, %v11791_v19  ;;  %16040 = vst [vmem:[#allocation36_spill] sm:$0xff] %v15561_v25  ;;  %v14171_v19 = vld [vmem:[#allocation8 + $0x184] sm:$0xf]  ;;  %v11615_v21 = vld [vmem:[#allocation8 + $0x170] sm:$0xf0] }
 0x321   :  { %7945 = vmatpush.bf16.msrb.mxu1 %v13102_v50  ;;  %8033 = vmatpush.bf16.msra.mxu2 %v11810_v24  ;;  %v11647_v50 = vld [vmem:[#allocation8 + $0x1b0] sm:$0xf0]  ;;  %v14235_v37 = vld [vmem:[#allocation8 + $0x384] sm:$0xf]  ;;  %v4359_v23 = vadd.f32 %v15491_v15, %v4340_v3 }
 0x322   :  { %v11650_v16 = vor.u32 %v14175_v26, %v11647_v50  ;;  %7927 = vmatmul.bf16.vlgmr.msrb.gmra.mxu0 %v15448_v54  ;;  %v14135_v38 = vld [vmem:[#allocation8 + $0x64] sm:$0xf]  ;;  %v11743_v9 = vld [vmem:[#allocation8 + $0x270] sm:$0xf0] }
 0x323   :  { %7995 = vmatpush.bf16.msra.mxu0 %v11554_v53  ;;  %7983 = vmatpush.bf16.msrb.mxu3 %v13358_v49  ;;  %v11903_v53 = vld [vmem:[#allocation8 + $0x3b0] sm:$0xf0]  ;;  %v4415_v27 = vpop.f32.mrf.mxu2  ;;  %v15555_v24 = vpop.f32.mrf.mxu3  ;;  %v14167_v46 = vld [vmem:[#allocation8 + $0x164] sm:$0xf] }
 0x324   :  { %v4446_v43 = vpop.f32.mrf.mxu0  ;;  %v11631_v49 = vld [vmem:[#allocation8 + $0x190] sm:$0xf0]  ;;  %v11906_v44 = vor.u32 %v14239_v12, %v11903_v53  ;;  %v14199_v26 = vld [vmem:[#allocation8 + $0x264] sm:$0xf] }
 0x325   :  { %8014 = vmatpush.bf16.msra.mxu1 %v11682_v47  ;;  %v11522_v47 = vor.u32 %v14143_v30, %v11519_v61  ;;  %8034 = vmatpush.bf16.msra.mxu2 %v11794_v6  ;;  %v4465_v42 = vpop.f32.mrf.mxu1  ;;  %v11487_v6 = vld [vmem:[#allocation8 + $0x70] sm:$0xf0]  ;;  %v4397_v30 = vadd.f32 %v15544_v45, %v4378_v35  ;;  %v4447_v61 = vadd.f32 %v4446_v43, %v15559_v20  ;;  %v14231_v48 = vld [vmem:[#allocation8 + $0x364] sm:$0xf] }
 0x326   :  { %v11634_v14 = vor.u32 %v14171_v19, %v11631_v49  ;;  %v11490_v50 = vor.u32 %v14135_v38, %v11487_v6  ;;  %v4338_v45 = vadd.f32 %v15481_v63, %v4319_v60  ;;  %v14131_v53 = vld [vmem:[#allocation8 + $0x44] sm:$0xf]  ;;  %v11471_v18 = vld [vmem:[#allocation8 + $0x50] sm:$0xf0] }
 0x327   :  { %8052 = vmatpush.bf16.msra.mxu3 %v11938_v31  ;;  %7996 = vmatpush.bf16.msra.mxu0 %v11538_v57  ;;  %v14203_v31 = vld [vmem:[#allocation8 + $0x284] sm:$0xf]  ;;  %v15564_v57 = vpack.c.bf16 %v4543_v34, %v4527_v62  ;;  %v4416_v33 = vadd.f32 %v4415_v27, %v4397_v30  ;;  %v11618_v27 = vor.u32 %v14167_v46, %v11615_v21  ;;  %v11599_v43 = vld [vmem:[#allocation8 + $0x150] sm:$0xf0] }
 0x328   :  { %7946 = vmatmul.bf16.vlgmr.msrb.gmra.mxu1 %v15561_v25  ;;  %v11762_v0 = vor.u32 %v14203_v31, %v11759_v40  ;;  %v11746_v62 = vor.u32 %v14199_v26, %v11743_v9  ;;  %v14163_v35 = vld [vmem:[#allocation8 + $0x144] sm:$0xf]  ;;  %v11727_v19 = vld [vmem:[#allocation8 + $0x250] sm:$0xf0]  ;;  %v4357_v49 = vadd.f32 %v15483_v58, %v4338_v45  ;;  %v4574_v40 = vmax.f32 %v4359_v23, 0.0 }
 0x329   :  { %8015 = vmatpush.bf16.msra.mxu1 %v11666_v5  ;;  %16041 = vst [vmem:[#allocation40_spill] sm:$0xff] %v15564_v57  ;;  %v4395_v5 = vadd.f32 %v15526_v56, %v4376_v22  ;;  %7965 = vmatmul.bf16.vlgmr.msrb.gmra.mxu2 %v15564_v57  ;;  %v11890_v56 = vor.u32 %v14235_v37, %v11887_v59  ;;  %v14227_v15 = vld [vmem:[#allocation8 + $0x344] sm:$0xf]  ;;  %v11583_v3 = vld [vmem:[#allocation8 + $0x130] sm:$0xf0] }
 0x32a   :  { %8035 = vmatpush.bf16.msra.mxu2 %v11778_v13  ;;  %v4466_v22 = vadd.f32 %v4465_v42, %v4447_v61  ;;  %v11474_v13 = vor.u32 %v14131_v53, %v11471_v18  ;;  %v11855_v42 = vld [vmem:[#allocation8 + $0x350] sm:$0xf0]  ;;  %v11602_v59 = vor.u32 %v14163_v35, %v11599_v43  ;;  %v14159_v60 = vld [vmem:[#allocation8 + $0x124] sm:$0xf] }
 0x32b   :  { %8053 = vmatpush.bf16.msra.mxu3 %v11922_v51  ;;  %7997 = vmatpush.bf16.msra.mxu0 %v11522_v47  ;;  %v11871_v51 = vld [vmem:[#allocation8 + $0x370] sm:$0xf0]  ;;  %v4414_v34 = vadd.f32 %v15538_v8, %v4395_v5  ;;  %v4484_v47 = vpop.f32.mrf.mxu2  ;;  %v4503_v12 = vpop.f32.mrf.mxu3  ;;  %v4435_v8 = vadd.f32 %v15555_v24, %v4416_v33  ;;  %v14191_v5 = vld [vmem:[#allocation8 + $0x224] sm:$0xf]  ;;  %v11858_v6 = vor.u32 %v14227_v15, %v11855_v42 }
 0x32c   :  { %v4448_v32 = vpop.f32.mrf.mxu0  ;;  %v11874_v63 = vor.u32 %v14231_v48, %v11871_v51  ;;  %v4485_v37 = vadd.f32 %v4484_v47, %v4466_v22  ;;  %v11711_v38 = vld [vmem:[#allocation8 + $0x230] sm:$0xf0]  ;;  %v11586_v45 = vor.u32 %v14159_v60, %v11583_v3  ;;  %v14279_v47 = vld [vmem:[#allocation8 + $0x4e4] sm:$0xf] }
 0x32d   :  { %8016 = vmatpush.bf16.msra.mxu1 %v11650_v16  ;;  %v4467_v4 = vpop.f32.mrf.mxu1  ;;  %v14195_v16 = vld [vmem:[#allocation8 + $0x244] sm:$0xf]  ;;  %v4449_v39 = vadd.f32 %v4448_v32, %v15559_v20  ;;  %v4433_v31 = vadd.f32 %v15540_v11, %v4414_v34  ;;  %v4575_v30 = vmax.f32 %v4435_v8, 0.0  ;;  %v11839_v11 = vld [vmem:[#allocation8 + $0x330] sm:$0xf0]  ;;  %v11714_v23 = vor.u32 %v14191_v5, %v11711_v38 }
 0x32e   :  { %8036 = vmatpush.bf16.msra.mxu2 %v11762_v0  ;;  %v11730_v24 = vor.u32 %v14195_v16, %v11727_v19  ;;  %v4558_v0 = vmax.f32 %v4357_v49, 0.0  ;;  %v11439_v33 = vld [vmem:[#allocation8 + $0x10] sm:$0xf0]  ;;  %v14155_v34 = vld [vmem:[#allocation8 + $0x104] sm:$0xf] }
 0x32f   :  { %8054 = vmatpush.bf16.msra.mxu3 %v11906_v44  ;;  %7998 = vmatpush.bf16.msra.mxu0 %v11506_v2  ;;  %v14127_v44 = vld [vmem:[#allocation8 + $0x24] sm:$0xf]  ;;  %v11455_v2 = vld [vmem:[#allocation8 + $0x30] sm:$0xf0]  ;;  %v4468_v61 = vadd.f32 %v4467_v4, %v4449_v39  ;;  %v4559_v46 = vmax.f32 %v4433_v31, 0.0 }
 0x330   :  { %v11458_v58 = vor.u32 %v14127_v44, %v11455_v2  ;;  %v12063_v53 = vld [vmem:[#allocation8 + $0x4f0] sm:$0xf0]  ;;  %v15581_v18 = vpack.c.bf16 %v4574_v40, %v4558_v0  ;;  %v14187_v32 = vld [vmem:[#allocation8 + $0x204] sm:$0xf] }
 0x331   :  { %8017 = vmatpush.bf16.msra.mxu1 %v11634_v14  ;;  %v14223_v14 = vld [vmem:[#allocation8 + $0x324] sm:$0xf]  ;;  %v11567_v22 = vld [vmem:[#allocation8 + $0x110] sm:$0xf0]  ;;  %v12066_v8 = vor.u32 %v14279_v47, %v12063_v53 }
 0x332   :  { %8037 = vmatpush.bf16.msra.mxu2 %v11746_v62  ;;  %v11695_v4 = vld [vmem:[#allocation8 + $0x210] sm:$0xf0]  ;;  %v15583_v62 = vpack.c.bf16 %v4575_v30, %v4559_v46  ;;  %v14311_v43 = vld [vmem:[#allocation8 + $0x5e4] sm:$0xf]  ;;  %7932 = vmatmul.bf16.gmra.mxu0 %v15459_v41  ;;  %v11570_v31 = vor.u32 %v14155_v34, %v11567_v22 }
 0x333   :  { %8055 = vmatpush.bf16.msra.mxu3 %v11890_v56  ;;  %7999 = vmatpush.bf16.msra.mxu0 %v11490_v50  ;;  %v4486_v21 = vpop.f32.mrf.mxu2  ;;  %v4505_v26 = vpop.f32.mrf.mxu3  ;;  %v14123_v56 = vld [vmem:[#allocation8 + $0x4] sm:$0xf]  ;;  %v4504_v50 = vadd.f32 %v4503_v12, %v4485_v37  ;;  %v12191_v16 = vld [vmem:[#allocation8 + $0x5f0] sm:$0xf0]  ;;  %v11698_v40 = vor.u32 %v14187_v32, %v11695_v4 }
 0x334   :  { %v4487_v9 = vadd.f32 %v4486_v21, %v4468_v61  ;;  %v4451_v48 = vpop.f32.mrf.mxu0  ;;  %v11442_v35 = vor.u32 %v14123_v56, %v11439_v33  ;;  %v12319_v39 = vld [vmem:[#allocation8 + $0x6f0] sm:$0xf0]  ;;  %v14275_v44 = vld [vmem:[#allocation8 + $0x4c4] sm:$0xf]  ;;  %v12194_v37 = vor.u32 %v14311_v43, %v12191_v16 }
 0x335   :  { %8018 = vmatpush.bf16.msra.mxu1 %v11618_v27  ;;  %v4470_v51 = vpop.f32.mrf.mxu1  ;;  %v11842_v27 = vor.u32 %v14223_v14, %v11839_v11  ;;  %v11823_v19 = vld [vmem:[#allocation8 + $0x310] sm:$0xf0]  ;;  %v4528_v15 = vmax.f32 %v4504_v50, 0.0  ;;  %v4452_v49 = vadd.f32 %v4451_v48, %v15559_v20  ;;  %v14375_v38 = vld [vmem:[#allocation8 + $0x7e4] sm:$0xf] }
 0x336   :  { %8038 = vmatpush.bf16.msra.mxu2 %v11730_v24  ;;  %v4506_v12 = vadd.f32 %v4505_v26, %v4487_v9  ;;  %v12047_v2 = vld [vmem:[#allocation8 + $0x4d0] sm:$0xf0]  ;;  %v14339_v14 = vld [vmem:[#allocation8 + $0x6c4] sm:$0xf]  ;;  %v5121_v50 = vld [vmem:[#allocation10] sm:$0xf] }
 0x337   :  { %8056 = vmatpush.bf16.msra.mxu3 %v11874_v63  ;;  %8000 = vmatpush.bf16.msra.mxu0 %v11474_v13  ;;  %v14343_v63 = vld [vmem:[#allocation8 + $0x6e4] sm:$0xf]  ;;  %v12175_v3 = vld [vmem:[#allocation8 + $0x5d0] sm:$0xf0]  ;;  %v4471_v46 = vadd.f32 %v4470_v51, %v4452_v49 }
 0x338   :  { %7951 = vmatmul.bf16.gmra.mxu1 %v15581_v18  ;;  %v14219_v13 = vld [vmem:[#allocation8 + $0x304] sm:$0xf]  ;;  %v4544_v42 = vmax.f32 %v4506_v12, 0.0  ;;  %v12322_v24 = vor.u32 %v14343_v63, %v12319_v39  ;;  %v12303_v11 = vld [vmem:[#allocation8 + $0x6d0] sm:$0xf0]  ;;  %v15593_v12 = vperm.slane %v5121_v50, 0 }
 0x339   :  { %8019 = vmatpush.bf16.msra.mxu1 %v11602_v59  ;;  %7970 = vmatmul.bf16.gmra.mxu2 %v15583_v62  ;;  %v14307_v59 = vld [vmem:[#allocation8 + $0x5c4] sm:$0xf]  ;;  %v11826_v5 = vor.u32 %v14219_v13, %v11823_v19  ;;  %v12031_v33 = vld [vmem:[#allocation8 + $0x4b0] sm:$0xf0]  ;;  %v12306_v34 = vor.u32 %v14339_v14, %v12303_v11 }
 0x33a   :  { %8039 = vmatpush.bf16.msra.mxu2 %v11714_v23  ;;  %v15589_v60 = vpack.c.bf16 %v4544_v42, %v4528_v15  ;;  %v14271_v56 = vld [vmem:[#allocation8 + $0x4a4] sm:$0xf]  ;;  %v12178_v9 = vor.u32 %v14307_v59, %v12175_v3  ;;  %v12159_v47 = vld [vmem:[#allocation8 + $0x5b0] sm:$0xf0] }
 0x33b   :  { %8057 = vmatpush.bf16.msra.mxu3 %v11858_v6  ;;  %8001 = vmatpush.bf16.msra.mxu0 %v11458_v58  ;;  %v12447_v6 = vld [vmem:[#allocation8 + $0x7f0] sm:$0xf0]  ;;  %v4489_v30 = vpop.f32.mrf.mxu2  ;;  %v4508_v61 = vpop.f32.mrf.mxu3  ;;  %v12050_v58 = vor.u32 %v14275_v44, %v12047_v2  ;;  %v14303_v48 = vld [vmem:[#allocation8 + $0x5a4] sm:$0xf]  ;;  %v12034_v23 = vor.u32 %v14271_v56, %v12031_v33 }
 0x33c   :  { %v12450_v0 = vor.u32 %v14375_v38, %v12447_v6  ;;  %7984 = vmatmul.bf16.vlgmr.msrb.gmra.mxu3 %v15589_v60  ;;  %v4453_v21 = vpop.f32.mrf.mxu0  ;;  %v14371_v53 = vld [vmem:[#allocation8 + $0x7c4] sm:$0xf]  ;;  %v12431_v51 = vld [vmem:[#allocation8 + $0x7d0] sm:$0xf0] }
 0x33d   :  { %8020 = vmatpush.bf16.msra.mxu1 %v11586_v45  ;;  %v4472_v26 = vpop.f32.mrf.mxu1  ;;  %v4454_v45 = vadd.f32 %v4453_v21, %v15559_v20  ;;  %v14335_v22 = vld [vmem:[#allocation8 + $0x6a4] sm:$0xf]  ;;  %v12287_v32 = vld [vmem:[#allocation8 + $0x6b0] sm:$0xf0]  ;;  %v12434_v4 = vor.u32 %v14371_v53, %v12431_v51 }
 0x33e   :  { %8040 = vmatpush.bf16.msra.mxu2 %v11698_v40  ;;  %v14267_v43 = vld [vmem:[#allocation8 + $0x484] sm:$0xf]  ;;  %v12015_v16 = vld [vmem:[#allocation8 + $0x490] sm:$0xf0] }
 0x33f   :  { %8058 = vmatpush.bf16.msra.mxu3 %v11842_v27  ;;  %8002 = vmatpush.bf16.msra.mxu0 %v11442_v35  ;;  %v4490_v27 = vadd.f32 %v4489_v30, %v4471_v46  ;;  %v12162_v35 = vor.u32 %v14303_v48, %v12159_v47  ;;  %v14299_v20 = vld [vmem:[#allocation8 + $0x584] sm:$0xf]  ;;  %v4473_v63 = vadd.f32 %v4472_v26, %v4454_v45  ;;  %v12143_v39 = vld [vmem:[#allocation8 + $0x590] sm:$0xf0] }
 0x340   :  { %v14367_v13 = vld [vmem:[#allocation8 + $0x7a4] sm:$0xf]  ;;  %v12415_v19 = vld [vmem:[#allocation8 + $0x7b0] sm:$0xf0]  ;;  %v12018_v59 = vor.u32 %v14267_v43, %v12015_v16  ;;  %v12146_v3 = vor.u32 %v14299_v20, %v12143_v39 }
 0x341   :  { %8021 = vmatpush.bf16.msra.mxu1 %v11570_v31  ;;  %v14331_v49 = vld [vmem:[#allocation8 + $0x684] sm:$0xf]  ;;  %v12271_v31 = vld [vmem:[#allocation8 + $0x690] sm:$0xf0]  ;;  %v4509_v44 = vadd.f32 %v4508_v61, %v4490_v27  ;;  %v12418_v30 = vor.u32 %v14367_v13, %v12415_v19 }
 0x342   :  { %8109 = vmatpush.bf16.msrb.mxu2 %v12322_v24  ;;  %v11999_v38 = vld [vmem:[#allocation8 + $0x470] sm:$0xf0]  ;;  %v14295_v6 = vld [vmem:[#allocation8 + $0x564] sm:$0xf]  ;;  %v12274_v14 = vor.u32 %v14331_v49, %v12271_v31  ;;  %8003 = vmatmul.bf16.vlgmr.msra.gmra.mxu0 %v15176_v52 }
 0x343   :  { %8071 = vmatpush.bf16.msrb.mxu0 %v12066_v8  ;;  %8059 = vmatpush.bf16.msra.mxu3 %v11826_v5  ;;  %v12290_v8 = vor.u32 %v14335_v22, %v12287_v32  ;;  %v4491_v15 = vpop.f32.mrf.mxu2  ;;  %v4510_v42 = vpop.f32.mrf.mxu3  ;;  %v14263_v5 = vld [vmem:[#allocation8 + $0x464] sm:$0xf]  ;;  %v12127_v11 = vld [vmem:[#allocation8 + $0x570] sm:$0xf0]  ;;  %v4560_v56 = vmax.f32 %v4509_v44, 0.0 }
 0x344   :  { %v4492_v2 = vadd.f32 %v4491_v15, %v4473_v63  ;;  %v7700_v40 = vpop.f32.mrf.mxu0  ;;  %v12399_v46 = vld [vmem:[#allocation8 + $0x790] sm:$0xf0]  ;;  %v14327_v61 = vld [vmem:[#allocation8 + $0x664] sm:$0xf]  ;;  %v12002_v50 = vor.u32 %v14263_v5, %v11999_v38 }
 0x345   :  { %8090 = vmatpush.bf16.msrb.mxu1 %v12194_v37  ;;  %v7719_v37 = vpop.f32.mrf.mxu1  ;;  %v7701_v24 = vadd.f32 %v7700_v40, %v15593_v12  ;;  %v12255_v26 = vld [vmem:[#allocation8 + $0x670] sm:$0xf0]  ;;  %v14259_v48 = vld [vmem:[#allocation8 + $0x444] sm:$0xf] }
 0x346   :  { %8110 = vmatpush.bf16.msrb.mxu2 %v12306_v34  ;;  %v11983_v45 = vld [vmem:[#allocation8 + $0x450] sm:$0xf0]  ;;  %v14291_v34 = vld [vmem:[#allocation8 + $0x544] sm:$0xf]  ;;  %v12258_v51 = vor.u32 %v14327_v61, %v12255_v26 }
 0x347   :  { %8072 = vmatpush.bf16.msrb.mxu0 %v12050_v58  ;;  %8128 = vmatpush.bf16.msrb.mxu3 %v12450_v0  ;;  %v4511_v58 = vadd.f32 %v4510_v42, %v4492_v2  ;;  %v14363_v0 = vld [vmem:[#allocation8 + $0x784] sm:$0xf]  ;;  %v7720_v21 = vadd.f32 %v7719_v37, %v7701_v24  ;;  %v12383_v32 = vld [vmem:[#allocation8 + $0x770] sm:$0xf0] }
 0x348   :  { %8022 = vmatmul.bf16.vlgmr.msra.gmra.mxu1 %v15198_v28  ;;  %v12402_v47 = vor.u32 %v14363_v0, %v12399_v46  ;;  %v14359_v22 = vld [vmem:[#allocation8 + $0x764] sm:$0xf]  ;;  %v12239_v43 = vld [vmem:[#allocation8 + $0x650] sm:$0xf0] }
 0x349   :  { %8091 = vmatpush.bf16.msrb.mxu1 %v12178_v9  ;;  %v4576_v33 = vmax.f32 %v4511_v58, 0.0  ;;  %8041 = vmatmul.bf16.vlgmr.msra.gmra.mxu2 %v15220_v7  ;;  %v12130_v9 = vor.u32 %v14295_v6, %v12127_v11  ;;  %v14255_v19 = vld [vmem:[#allocation8 + $0x424] sm:$0xf]  ;;  %v11967_v15 = vld [vmem:[#allocation8 + $0x430] sm:$0xf0]  ;;  %v12386_v49 = vor.u32 %v14359_v22, %v12383_v32 }
 0x34a   :  { %8111 = vmatpush.bf16.msrb.mxu2 %v12290_v8  ;;  %v11986_v8 = vor.u32 %v14259_v48, %v11983_v45  ;;  %v14287_v42 = vld [vmem:[#allocation8 + $0x524] sm:$0xf]  ;;  %v12095_v2 = vld [vmem:[#allocation8 + $0x530] sm:$0xf0]  ;;  %v11970_v5 = vor.u32 %v14255_v19, %v11967_v15 }
 0x34b   :  { %8073 = vmatpush.bf16.msrb.mxu0 %v12034_v23  ;;  %8129 = vmatpush.bf16.msrb.mxu3 %v12434_v4  ;;  %v15599_v53 = vpack.c.bf16 %v4576_v33, %v4560_v56  ;;  %v12111_v23 = vld [vmem:[#allocation8 + $0x550] sm:$0xf0]  ;;  %v7738_v4 = vpop.f32.mrf.mxu2  ;;  %v7757_v27 = vpop.f32.mrf.mxu3  ;;  %v14355_v40 = vld [vmem:[#allocation8 + $0x744] sm:$0xf] }
 0x34c   :  { %v7739_v16 = vadd.f32 %v7738_v4, %v7720_v21  ;;  %v7702_v20 = vpop.f32.mrf.mxu0  ;;  %v12114_v13 = vor.u32 %v14291_v34, %v12111_v23  ;;  %v12367_v37 = vld [vmem:[#allocation8 + $0x750] sm:$0xf0]  ;;  %v14319_v24 = vld [vmem:[#allocation8 + $0x624] sm:$0xf] }
 0x34d   :  { %8092 = vmatpush.bf16.msrb.mxu1 %v12162_v35  ;;  %v14323_v35 = vld [vmem:[#allocation8 + $0x644] sm:$0xf]  ;;  %7989 = vmatmul.bf16.gmra.mxu3 %v15599_v53  ;;  %v7721_v63 = vpop.f32.mrf.mxu1  ;;  %v7703_v39 = vadd.f32 %v7702_v20, %v15593_v12  ;;  %v11951_v6 = vld [vmem:[#allocation8 + $0x410] sm:$0xf0]  ;;  %v12370_v0 = vor.u32 %v14355_v40, %v12367_v37 }
 0x34e   :  { %8112 = vmatpush.bf16.msrb.mxu2 %v12274_v14  ;;  %v15603_v31 = vadd.f32 %v7757_v27, %v7739_v16  ;;  %v12242_v44 = vor.u32 %v14323_v35, %v12239_v43  ;;  %v14251_v38 = vld [vmem:[#allocation8 + $0x404] sm:$0xf]  ;;  %v12079_v14 = vld [vmem:[#allocation8 + $0x510] sm:$0xf0] }
 0x34f   :  { %8074 = vmatpush.bf16.msrb.mxu0 %v12018_v59  ;;  %8130 = vmatpush.bf16.msrb.mxu3 %v12418_v30  ;;  %v7722_v59 = vadd.f32 %v7721_v63, %v7703_v39  ;;  %v12098_v30 = vor.u32 %v14287_v42, %v12095_v2  ;;  %v14283_v58 = vld [vmem:[#allocation8 + $0x504] sm:$0xf]  ;;  %v12207_v21 = vld [vmem:[#allocation8 + $0x610] sm:$0xf0] }
 0x350   :  { %v14315_v11 = vld [vmem:[#allocation8 + $0x604] sm:$0xf]  ;;  %v12575_v26 = vld [vmem:[#allocation8 + $0x8f0] sm:$0xf0]  ;;  %v12082_v27 = vor.u32 %v14283_v58, %v12079_v14 }
 0x351   :  { %8093 = vmatpush.bf16.msrb.mxu1 %v12146_v3  ;;  %v12223_v3 = vld [vmem:[#allocation8 + $0x630] sm:$0xf0]  ;;  %v14407_v61 = vld [vmem:[#allocation8 + $0x8e4] sm:$0xf]  ;;  %v12210_v43 = vor.u32 %v14315_v11, %v12207_v21 }
 0x352   :  { %8113 = vmatpush.bf16.msrb.mxu2 %v12258_v51  ;;  %v12226_v46 = vor.u32 %v14319_v24, %v12223_v3  ;;  %v14471_v48 = vld [vmem:[#allocation8 + $0xae4] sm:$0xf]  ;;  %v11954_v51 = vor.u32 %v14251_v38, %v11951_v6  ;;  %v12831_v23 = vld [vmem:[#allocation8 + $0xaf0] sm:$0xf0]  ;;  %v12578_v35 = vor.u32 %v14407_v61, %v12575_v26  ;;  %8008 = vmatmul.bf16.gmra.mxu0 %v15187_v1 }
 0x353   :  { %8075 = vmatpush.bf16.msrb.mxu0 %v12002_v50  ;;  %8131 = vmatpush.bf16.msrb.mxu3 %v12402_v47  ;;  %v7740_v56 = vpop.f32.mrf.mxu2  ;;  %v15605_v33 = vpop.f32.mrf.mxu3  ;;  %v14439_v50 = vld [vmem:[#allocation8 + $0x9e4] sm:$0xf]  ;;  %v12351_v32 = vld [vmem:[#allocation8 + $0x730] sm:$0xf0]  ;;  %v12834_v39 = vor.u32 %v14471_v48, %v12831_v23 }
 0x354   :  { %v15607_v45 = vadd.f32 %v7740_v56, %v7722_v59  ;;  %v7705_v34 = vpop.f32.mrf.mxu0  ;;  %v14351_v22 = vld [vmem:[#allocation8 + $0x724] sm:$0xf]  ;;  %v12559_v63 = vld [vmem:[#allocation8 + $0x8d0] sm:$0xf0] }
 0x355   :  { %8094 = vmatpush.bf16.msrb.mxu1 %v12130_v9  ;;  %v12703_v9 = vld [vmem:[#allocation8 + $0x9f0] sm:$0xf0]  ;;  %v7724_v47 = vpop.f32.mrf.mxu1  ;;  %v7706_v4 = vadd.f32 %v7705_v34, %v15593_v12  ;;  %v14403_v20 = vld [vmem:[#allocation8 + $0x8c4] sm:$0xf]  ;;  %v12354_v42 = vor.u32 %v14351_v22, %v12351_v32 }
 0x356   :  { %8114 = vmatpush.bf16.msrb.mxu2 %v12242_v44  ;;  %v12706_v16 = vor.u32 %v14439_v50, %v12703_v9  ;;  %v12687_v19 = vld [vmem:[#allocation8 + $0x9d0] sm:$0xf0]  ;;  %v14467_v15 = vld [vmem:[#allocation8 + $0xac4] sm:$0xf]  ;;  %v12562_v40 = vor.u32 %v14403_v20, %v12559_v63 }
 0x357   :  { %8076 = vmatpush.bf16.msrb.mxu0 %v11986_v8  ;;  %8132 = vmatpush.bf16.msrb.mxu3 %v12386_v49  ;;  %v7725_v8 = vadd.f32 %v7724_v47, %v7706_v4  ;;  %v12815_v49 = vld [vmem:[#allocation8 + $0xad0] sm:$0xf0]  ;;  %v14347_v44 = vld [vmem:[#allocation8 + $0x704] sm:$0xf] }
 0x358   :  { %8027 = vmatmul.bf16.gmra.mxu1 %v15209_v36  ;;  %v12335_v2 = vld [vmem:[#allocation8 + $0x710] sm:$0xf0]  ;;  %v14399_v37 = vld [vmem:[#allocation8 + $0x8a4] sm:$0xf] }
 0x359   :  { %8095 = vmatpush.bf16.msrb.mxu1 %v12114_v13  ;;  %v14435_v13 = vld [vmem:[#allocation8 + $0x9c4] sm:$0xf]  ;;  %8046 = vmatmul.bf16.gmra.mxu2 %v15233_v17  ;;  %v12543_v24 = vld [vmem:[#allocation8 + $0x8b0] sm:$0xf0]  ;;  %v12338_v11 = vor.u32 %v14347_v44, %v12335_v2 }
 0x35a   :  { %8115 = vmatpush.bf16.msrb.mxu2 %v12226_v46  ;;  %v12690_v59 = vor.u32 %v14435_v13, %v12687_v19  ;;  %v14503_v3 = vld [vmem:[#allocation8 + $0xbe4] sm:$0xf]  ;;  %v12671_v14 = vld [vmem:[#allocation8 + $0x9b0] sm:$0xf0]  ;;  %v16042_v46 = vld [vmem:[#allocation24_spill] sm:$0xff]  ;;  %v12546_v48 = vor.u32 %v14399_v37, %v12543_v24 }
 0x35b   :  { %8077 = vmatpush.bf16.msrb.mxu0 %v11970_v5  ;;  %8133 = vmatpush.bf16.msrb.mxu3 %v12370_v0  ;;  %v12959_v5 = vld [vmem:[#allocation8 + $0xbf0] sm:$0xf0]  ;;  %v7743_v38 = vpop.f32.mrf.mxu2  ;;  %v7762_v6 = vpop.f32.mrf.mxu3  ;;  %v14431_v58 = vld [vmem:[#allocation8 + $0x9a4] sm:$0xf] }
 0x35c   :  { %v7744_v0 = vadd.f32 %v7743_v38, %v7725_v8  ;;  %v7707_v21 = vpop.f32.mrf.mxu0  ;;  %v14463_v26 = vld [vmem:[#allocation8 + $0xaa4] sm:$0xf]  ;;  %v12799_v56 = vld [vmem:[#allocation8 + $0xab0] sm:$0xf0]  ;;  %v12962_v50 = vor.u32 %v14503_v3, %v12959_v5 }
 0x35d   :  { %8096 = vmatpush.bf16.msrb.mxu1 %v12098_v30  ;;  %v12818_v30 = vor.u32 %v14467_v15, %v12815_v49  ;;  %8060 = vmatmul.bf16.vlgmr.msra.gmra.mxu3 %v16042_v46  ;;  %v7726_v61 = vpop.f32.mrf.mxu1  ;;  %v7708_v9 = vadd.f32 %v7707_v21, %v15593_v12  ;;  %v14395_v34 = vld [vmem:[#allocation8 + $0x884] sm:$0xf]  ;;  %v12527_v23 = vld [vmem:[#allocation8 + $0x890] sm:$0xf0] }
 0x35e   :  { %8116 = vmatpush.bf16.msrb.mxu2 %v12210_v43  ;;  %v15615_v47 = vadd.f32 %v7762_v6, %v7744_v0  ;;  %v14499_v22 = vld [vmem:[#allocation8 + $0xbc4] sm:$0xf]  ;;  %v12943_v32 = vld [vmem:[#allocation8 + $0xbd0] sm:$0xf0]  ;;  %v12530_v12 = vor.u32 %v14395_v34, %v12527_v23 }
 0x35f   :  { %8078 = vmatpush.bf16.msrb.mxu0 %v11954_v51  ;;  %8134 = vmatpush.bf16.msrb.mxu3 %v12354_v42  ;;  %v12674_v51 = vor.u32 %v14431_v58, %v12671_v14  ;;  %v7727_v4 = vadd.f32 %v7726_v61, %v7708_v9  ;;  %v12655_v43 = vld [vmem:[#allocation8 + $0x990] sm:$0xf0]  ;;  %v14459_v20 = vld [vmem:[#allocation8 + $0xa84] sm:$0xf]  ;;  %v16043_v61 = vld [vmem:[#allocation26_spill] sm:$0xff] }
 0x360   :  { %v12783_v63 = vld [vmem:[#allocation8 + $0xa90] sm:$0xf0]  ;;  %v14391_v8 = vld [vmem:[#allocation8 + $0x864] sm:$0xf] }
 0x361   :  { %8097 = vmatpush.bf16.msrb.mxu1 %v12082_v27  ;;  %v12802_v27 = vor.u32 %v14463_v26, %v12799_v56  ;;  %v12511_v13 = vld [vmem:[#allocation8 + $0x870] sm:$0xf0]  ;;  %v14495_v19 = vld [vmem:[#allocation8 + $0xba4] sm:$0xf]  ;;  %v12786_v5 = vor.u32 %v14459_v20, %v12783_v63  ;;  %v16044_v26 = vld [vmem:[#allocation28_spill] sm:$0xff] }
 0x362   :  { %8185 = vmatpush.bf16.msra.mxu2 %v12834_v39  ;;  %v12927_v15 = vld [vmem:[#allocation8 + $0xbb0] sm:$0xf0]  ;;  %v14423_v44 = vld [vmem:[#allocation8 + $0x964] sm:$0xf]  ;;  %v12514_v38 = vor.u32 %v14391_v8, %v12511_v13  ;;  %8079 = vmatmul.bf16.vlgmr.msrb.gmra.mxu0 %v16043_v61 }
 0x363   :  { %8147 = vmatpush.bf16.msra.mxu0 %v12578_v35  ;;  %v14427_v35 = vld [vmem:[#allocation8 + $0x984] sm:$0xf]  ;;  %8135 = vmatpush.bf16.msrb.mxu3 %v12338_v11  ;;  %v7745_v42 = vpop.f32.mrf.mxu2  ;;  %v15617_v49 = vpop.f32.mrf.mxu3  ;;  %v12639_v2 = vld [vmem:[#allocation8 + $0x970] sm:$0xf0]  ;;  %v12930_v24 = vor.u32 %v14495_v19, %v12927_v15 }
 0x364   :  { %v12658_v39 = vor.u32 %v14427_v35, %v12655_v43  ;;  %v7776_v37 = vpop.f32.mrf.mxu0  ;;  %v14455_v6 = vld [vmem:[#allocation8 + $0xa64] sm:$0xf]  ;;  %v12642_v58 = vor.u32 %v14423_v44, %v12639_v2  ;;  %v12495_v11 = vld [vmem:[#allocation8 + $0x850] sm:$0xf0]  ;;  %v7760_v43 = vadd.f32 %v15605_v33, %v15607_v45 }
 0x365   :  { %8166 = vmatpush.bf16.msra.mxu1 %v12706_v16  ;;  %v12946_v16 = vor.u32 %v14499_v22, %v12943_v32  ;;  %v7777_v3 = vadd.f32 %v7776_v37, %v15603_v31  ;;  %v14387_v14 = vld [vmem:[#allocation8 + $0x844] sm:$0xf]  ;;  %v12623_v56 = vld [vmem:[#allocation8 + $0x950] sm:$0xf0] }
 0x366   :  { %8186 = vmatpush.bf16.msra.mxu2 %v12818_v30  ;;  %v12767_v30 = vld [vmem:[#allocation8 + $0xa70] sm:$0xf0]  ;;  %v14419_v0 = vld [vmem:[#allocation8 + $0x944] sm:$0xf]  ;;  %v12498_v34 = vor.u32 %v14387_v14, %v12495_v11 }
 0x367   :  { %8148 = vmatpush.bf16.msra.mxu0 %v12562_v40  ;;  %8204 = vmatpush.bf16.msra.mxu3 %v12962_v50  ;;  %v15619_v40 = vadd.f32 %v7745_v42, %v7727_v4  ;;  %v14491_v50 = vld [vmem:[#allocation8 + $0xb84] sm:$0xf]  ;;  %v12911_v9 = vld [vmem:[#allocation8 + $0xb90] sm:$0xf0]  ;;  %v12770_v31 = vor.u32 %v14455_v6, %v12767_v30  ;;  %v12626_v22 = vor.u32 %v14419_v0, %v12623_v56 }
 0x368   :  { %8098 = vmatmul.bf16.vlgmr.msrb.gmra.mxu1 %v16044_v26  ;;  %v12751_v23 = vld [vmem:[#allocation8 + $0xa50] sm:$0xf0]  ;;  %v14383_v32 = vld [vmem:[#allocation8 + $0x824] sm:$0xf]  ;;  %v12914_v35 = vor.u32 %v14491_v50, %v12911_v9 }
 0x369   :  { %8167 = vmatpush.bf16.msra.mxu1 %v12690_v59  ;;  %v7795_v59 = vpop.f32.mrf.mxu1  ;;  %v12479_v4 = vld [vmem:[#allocation8 + $0x830] sm:$0xf0]  ;;  %v14487_v63 = vld [vmem:[#allocation8 + $0xb64] sm:$0xf] }
 0x36a   :  { %8187 = vmatpush.bf16.msra.mxu2 %v12802_v27  ;;  %v7796_v21 = vadd.f32 %v7795_v59, %v7777_v3  ;;  %v14415_v27 = vld [vmem:[#allocation8 + $0x924] sm:$0xf]  ;;  %v12607_v20 = vld [vmem:[#allocation8 + $0x930] sm:$0xf0]  ;;  %v12482_v2 = vor.u32 %v14383_v32, %v12479_v4 }
 0x36b   :  { %8149 = vmatpush.bf16.msra.mxu0 %v12546_v48  ;;  %8205 = vmatpush.bf16.msra.mxu3 %v12946_v16  ;;  %v16045_v48 = vld [vmem:[#allocation30_spill] sm:$0xff]  ;;  %v7814_v16 = vpop.f32.mrf.mxu2  ;;  %v12895_v8 = vld [vmem:[#allocation8 + $0xb70] sm:$0xf0]  ;;  %v14447_v37 = vld [vmem:[#allocation8 + $0xa24] sm:$0xf]  ;;  %v12610_v33 = vor.u32 %v14415_v27, %v12607_v20 }
 0x36c   :  { %8117 = vmatmul.bf16.vlgmr.msrb.gmra.mxu2 %v16045_v48  ;;  %v16046_v13 = vld [vmem:[#allocation25_spill] sm:$0xff]  ;;  %v7778_v19 = vpop.f32.mrf.mxu0  ;;  %v14379_v45 = vld [vmem:[#allocation8 + $0x804] sm:$0xf] }
 0x36d   :  { %8168 = vmatpush.bf16.msra.mxu1 %v12674_v51  ;;  %v14451_v51 = vld [vmem:[#allocation8 + $0xa44] sm:$0xf]  ;;  %8065 = vmatmul.bf16.gmra.mxu3 %v16046_v13  ;;  %v7779_v42 = vadd.f32 %v7778_v19, %v7760_v43  ;;  %v12735_v59 = vld [vmem:[#allocation8 + $0xa30] sm:$0xf0] }
 0x36e   :  { %8188 = vmatpush.bf16.msra.mxu2 %v12786_v5  ;;  %v12754_v44 = vor.u32 %v14451_v51, %v12751_v23  ;;  %v12463_v3 = vld [vmem:[#allocation8 + $0x810] sm:$0xf0]  ;;  %v14411_v5 = vld [vmem:[#allocation8 + $0x904] sm:$0xf]  ;;  %v12738_v0 = vor.u32 %v14447_v37, %v12735_v59 }
 0x36f   :  { %8150 = vmatpush.bf16.msra.mxu0 %v12530_v12  ;;  %8206 = vmatpush.bf16.msra.mxu3 %v12930_v24  ;;  %v7833_v12 = vpop.f32.mrf.mxu3  ;;  %v12591_v30 = vld [vmem:[#allocation8 + $0x910] sm:$0xf0]  ;;  %v14443_v11 = vld [vmem:[#allocation8 + $0xa04] sm:$0xf] }
 0x370   :  { %v13087_v14 = vld [vmem:[#allocation8 + $0xcf0] sm:$0xf0]  ;;  %v14567_v50 = vld [vmem:[#allocation8 + $0xde4] sm:$0xf] }
 0x371   :  { %8169 = vmatpush.bf16.msra.mxu1 %v12658_v39  ;;  %v7815_v39 = vadd.f32 %v7814_v16, %v7796_v21  ;;  %v7797_v15 = vpop.f32.mrf.mxu1  ;;  %v12466_v21 = vor.u32 %v14379_v45, %v12463_v3  ;;  %v12719_v56 = vld [vmem:[#allocation8 + $0xa10] sm:$0xf0]  ;;  %v14599_v51 = vld [vmem:[#allocation8 + $0xee4] sm:$0xf] }
 0x372   :  { %8189 = vmatpush.bf16.msra.mxu2 %v12770_v31  ;;  %v7798_v6 = vadd.f32 %v7797_v15, %v7779_v42  ;;  %v13215_v9 = vld [vmem:[#allocation8 + $0xdf0] sm:$0xf0]  ;;  %v12594_v31 = vor.u32 %v14411_v5, %v12591_v30  ;;  %v14483_v23 = vld [vmem:[#allocation8 + $0xb44] sm:$0xf] }
 0x373   :  { %8151 = vmatpush.bf16.msra.mxu0 %v12514_v38  ;;  %v15628_v24 = vadd.f32 %v7833_v12, %v7815_v39  ;;  %8207 = vmatpush.bf16.msra.mxu3 %v12914_v35  ;;  %v12898_v38 = vor.u32 %v14487_v63, %v12895_v8  ;;  %v7816_v32 = vpop.f32.mrf.mxu2  ;;  %v13343_v27 = vld [vmem:[#allocation8 + $0xef0] sm:$0xf0]  ;;  %v14531_v35 = vld [vmem:[#allocation8 + $0xcc4] sm:$0xf]  ;;  %v13218_v63 = vor.u32 %v14567_v50, %v13215_v9 }
 0x374   :  { %v13071_v43 = vld [vmem:[#allocation8 + $0xcd0] sm:$0xf0]  ;;  %v15632_v16 = vadd.f32 %v7816_v32, %v7798_v6  ;;  %v7781_v12 = vpop.f32.mrf.mxu0  ;;  %v12722_v39 = vor.u32 %v14443_v11, %v12719_v56  ;;  %v14563_v19 = vld [vmem:[#allocation8 + $0xdc4] sm:$0xf] }
 0x375   :  { %8170 = vmatpush.bf16.msra.mxu1 %v12642_v58  ;;  %v14535_v58 = vld [vmem:[#allocation8 + $0xce4] sm:$0xf]  ;;  %v7782_v8 = vadd.f32 %v7781_v12, %v15615_v47  ;;  %v13199_v15 = vld [vmem:[#allocation8 + $0xdd0] sm:$0xf0] }
 0x376   :  { %8190 = vmatpush.bf16.msra.mxu2 %v12754_v44  ;;  %v13346_v44 = vor.u32 %v14599_v51, %v13343_v27  ;;  %v14595_v37 = vld [vmem:[#allocation8 + $0xec4] sm:$0xf]  ;;  %v16048_v5 = vld [vmem:[#allocation29_spill] sm:$0xff] }
 0x377   :  { %8152 = vmatpush.bf16.msra.mxu0 %v12498_v34  ;;  %v13090_v34 = vor.u32 %v14535_v58, %v13087_v14  ;;  %8208 = vmatpush.bf16.msra.mxu3 %v12898_v38  ;;  %v15630_v4 = vpop.f32.mrf.mxu3  ;;  %v14479_v59 = vld [vmem:[#allocation8 + $0xb24] sm:$0xf]  ;;  %v13327_v38 = vld [vmem:[#allocation8 + $0xed0] sm:$0xf0]  ;;  %v13202_v58 = vor.u32 %v14563_v19, %v13199_v15 }
 0x378   :  { %v16047_v3 = vld [vmem:[#allocation27_spill] sm:$0xff]  ;;  %8103 = vmatmul.bf16.gmra.mxu1 %v16048_v5  ;;  %v13055_v6 = vld [vmem:[#allocation8 + $0xcb0] sm:$0xf0] }
 0x379   :  { %8171 = vmatpush.bf16.msra.mxu1 %v12626_v22  ;;  %v12879_v22 = vld [vmem:[#allocation8 + $0xb50] sm:$0xf0]  ;;  %v7800_v20 = vpop.f32.mrf.mxu1  ;;  %8084 = vmatmul.bf16.gmra.mxu0 %v16047_v3  ;;  %v14527_v47 = vld [vmem:[#allocation8 + $0xca4] sm:$0xf] }
 0x37a   :  { %8191 = vmatpush.bf16.msra.mxu2 %v12738_v0  ;;  %v12882_v42 = vor.u32 %v14483_v23, %v12879_v22  ;;  %v7801_v45 = vadd.f32 %v7800_v20, %v7782_v8  ;;  %v16049_v30 = vld [vmem:[#allocation31_spill] sm:$0xff]  ;;  %v13183_v11 = vld [vmem:[#allocation8 + $0xdb0] sm:$0xf0]  ;;  %v13058_v56 = vor.u32 %v14527_v47, %v13055_v6 }
 0x37b   :  { %8153 = vmatpush.bf16.msra.mxu0 %v12482_v2  ;;  %v13074_v2 = vor.u32 %v14531_v35, %v13071_v43  ;;  %v14559_v14 = vld [vmem:[#allocation8 + $0xda4] sm:$0xf]  ;;  %v7819_v51 = vpop.f32.mrf.mxu2  ;;  %v13311_v22 = vld [vmem:[#allocation8 + $0xeb0] sm:$0xf0]  ;;  %v16050_v43 = vld [vmem:[#allocation32_spill] sm:$0xff] }
 0x37c   :  { %8122 = vmatmul.bf16.gmra.mxu2 %v16049_v30  ;;  %8209 = vmatpush.bf16.msra.mxu3 %v12882_v42  ;;  %v14591_v50 = vld [vmem:[#allocation8 + $0xea4] sm:$0xf]  ;;  %v13039_v27 = vld [vmem:[#allocation8 + $0xc90] sm:$0xf0]  ;;  %v7820_v35 = vadd.f32 %v7819_v51, %v7801_v45  ;;  %v7783_v12 = vpop.f32.mrf.mxu0 }
 0x37d   :  { %8172 = vmatpush.bf16.msra.mxu1 %v12610_v33  ;;  %v12863_v33 = vld [vmem:[#allocation8 + $0xb30] sm:$0xf0]  ;;  %v14475_v9 = vld [vmem:[#allocation8 + $0xb04] sm:$0xf]  ;;  %8136 = vmatmul.bf16.vlgmr.msrb.gmra.mxu3 %v16050_v43 }
 0x37e   :  { %8192 = vmatpush.bf16.msra.mxu2 %v12722_v39  ;;  %v12866_v0 = vor.u32 %v14479_v59, %v12863_v33  ;;  %v14523_v32 = vld [vmem:[#allocation8 + $0xc84] sm:$0xf]  ;;  %v13471_v39 = vld [vmem:[#allocation8 + $0xff0] sm:$0xf0] }
 0x37f   :  { %8154 = vmatpush.bf16.msra.mxu0 %v12466_v21  ;;  %v13330_v21 = vor.u32 %v14595_v37, %v13327_v38  ;;  %v7838_v23 = vpop.f32.mrf.mxu3  ;;  %v14631_v8 = vld [vmem:[#allocation8 + $0xfe4] sm:$0xf]  ;;  %v13167_v42 = vld [vmem:[#allocation8 + $0xd90] sm:$0xf0] }
 0x380   :  { %8210 = vmatpush.bf16.msra.mxu3 %v12866_v0  ;;  %v14555_v15 = vld [vmem:[#allocation8 + $0xd84] sm:$0xf]  ;;  %v13295_v33 = vld [vmem:[#allocation8 + $0xe90] sm:$0xf0]  ;;  %v13474_v47 = vor.u32 %v14631_v8, %v13471_v39 }
 0x381   :  { %8173 = vmatpush.bf16.msra.mxu1 %v12594_v31  ;;  %v12847_v31 = vld [vmem:[#allocation8 + $0xb10] sm:$0xf0]  ;;  %v7802_v20 = vpop.f32.mrf.mxu1  ;;  %v14587_v37 = vld [vmem:[#allocation8 + $0xe84] sm:$0xf]  ;;  %v13170_v6 = vor.u32 %v14555_v15, %v13167_v42 }
 0x382   :  { %8261 = vmatpush.bf16.msrb.mxu2 %v13346_v44  ;;  %v12850_v44 = vor.u32 %v14475_v9, %v12847_v31  ;;  %v14519_v45 = vld [vmem:[#allocation8 + $0xc64] sm:$0xf]  ;;  %v13023_v38 = vld [vmem:[#allocation8 + $0xc70] sm:$0xf0] }
 0x383   :  { %8223 = vmatpush.bf16.msrb.mxu0 %v13090_v34  ;;  %v7765_v34 = vadd.f32 %v15617_v49, %v15619_v40  ;;  %v15641_v49 = vadd.f32 %v7838_v23, %v7820_v35  ;;  %v13314_v40 = vor.u32 %v14591_v50, %v13311_v22  ;;  %v13026_v0 = vor.u32 %v14519_v45, %v13023_v38  ;;  %v14583_v9 = vld [vmem:[#allocation8 + $0xe64] sm:$0xf]  ;;  %v7821_v50 = vpop.f32.mrf.mxu2  ;;  %v13007_v23 = vld [vmem:[#allocation8 + $0xc50] sm:$0xf0] }
 0x384   :  { %8211 = vmatpush.bf16.msra.mxu3 %v12850_v44  ;;  %v14515_v51 = vld [vmem:[#allocation8 + $0xc44] sm:$0xf]  ;;  %v13439_v44 = vld [vmem:[#allocation8 + $0xfb0] sm:$0xf0] }
 0x385   :  { %8242 = vmatpush.bf16.msrb.mxu1 %v13218_v63  ;;  %v13186_v63 = vor.u32 %v14559_v14, %v13183_v11  ;;  %v7784_v19 = vadd.f32 %v7783_v12, %v7765_v34  ;;  %v13151_v14 = vld [vmem:[#allocation8 + $0xd70] sm:$0xf0]  ;;  %v13298_v11 = vor.u32 %v14587_v37, %v13295_v33  ;;  %v14579_v15 = vld [vmem:[#allocation8 + $0xe44] sm:$0xf] }
 0x386   :  { %8262 = vmatpush.bf16.msrb.mxu2 %v13330_v21  ;;  %v14627_v21 = vld [vmem:[#allocation8 + $0xfc4] sm:$0xf]  ;;  %v13279_v34 = vld [vmem:[#allocation8 + $0xe70] sm:$0xf0] }
 0x387   :  { %8224 = vmatpush.bf16.msrb.mxu0 %v13074_v2  ;;  %v13042_v2 = vor.u32 %v14523_v32, %v13039_v27  ;;  %v7803_v59 = vadd.f32 %v7802_v20, %v7784_v19  ;;  %v15643_v31 = vpop.f32.mrf.mxu3  ;;  %v7852_v32 = vpop.f32.mrf.mxu0  ;;  %v14547_v20 = vld [vmem:[#allocation8 + $0xd44] sm:$0xf]  ;;  %v13282_v39 = vor.u32 %v14583_v9, %v13279_v34  ;;  %v13010_v19 = vor.u32 %v14515_v51, %v13007_v23  ;;  %v12991_v45 = vld [vmem:[#allocation8 + $0xc30] sm:$0xf0] }
 0x388   :  { %8280 = vmatpush.bf16.msrb.mxu3 %v13474_v47  ;;  %v7853_v12 = vadd.f32 %v7852_v32, %v15628_v24  ;;  %v14623_v42 = vld [vmem:[#allocation8 + $0xfa4] sm:$0xf]  ;;  %v16053_v38 = vld [vmem:[#allocation37_spill] sm:$0xff] }
 0x389   :  { %8243 = vmatpush.bf16.msrb.mxu1 %v13202_v58  ;;  %v14551_v58 = vld [vmem:[#allocation8 + $0xd64] sm:$0xf]  ;;  %v15645_v22 = vadd.f32 %v7821_v50, %v7803_v59  ;;  %v7871_v27 = vpop.f32.mrf.mxu1  ;;  %v13263_v59 = vld [vmem:[#allocation8 + $0xe50] sm:$0xf0] }
 0x38a   :  { %8263 = vmatpush.bf16.msrb.mxu2 %v13314_v40  ;;  %v13154_v35 = vor.u32 %v14551_v58, %v13151_v14  ;;  %v7872_v40 = vadd.f32 %v7871_v27, %v7853_v12  ;;  %v16052_v37 = vld [vmem:[#allocation35_spill] sm:$0xff]  ;;  %v13442_v58 = vor.u32 %v14623_v42, %v13439_v44  ;;  %v13266_v14 = vor.u32 %v14579_v15, %v13263_v59  ;;  %v13247_v51 = vld [vmem:[#allocation8 + $0xe30] sm:$0xf0] }
 0x38b   :  { %8225 = vmatpush.bf16.msrb.mxu0 %v13058_v56  ;;  %v13455_v56 = vld [vmem:[#allocation8 + $0xfd0] sm:$0xf0]  ;;  %8174 = vmatmul.bf16.vlgmr.msra.gmra.mxu1 %v16052_v37  ;;  %v14511_v33 = vld [vmem:[#allocation8 + $0xc24] sm:$0xf]  ;;  %v7890_v50 = vpop.f32.mrf.mxu2 }
 0x38c   :  { %v13458_v8 = vor.u32 %v14627_v21, %v13455_v56  ;;  %8193 = vmatmul.bf16.vlgmr.msra.gmra.mxu2 %v16053_v38  ;;  %v14543_v47 = vld [vmem:[#allocation8 + $0xd24] sm:$0xf]  ;;  %v13423_v21 = vld [vmem:[#allocation8 + $0xf90] sm:$0xf0]  ;;  %v7836_v56 = vadd.f32 %v15630_v4, %v15632_v16  ;;  %v7891_v27 = vadd.f32 %v7890_v50, %v7872_v40  ;;  %v11685_v4 = vld [vmem:[#allocation8 + $0x1e8] sm:$0xf] }
 0x38d   :  { %8244 = vmatpush.bf16.msrb.mxu1 %v13186_v63  ;;  %v13135_v63 = vld [vmem:[#allocation8 + $0xd50] sm:$0xf0]  ;;  %v14619_v9 = vld [vmem:[#allocation8 + $0xf84] sm:$0xf] }
 0x38e   :  { %8264 = vmatpush.bf16.msrb.mxu2 %v13298_v11  ;;  %v13138_v24 = vor.u32 %v14547_v20, %v13135_v63  ;;  %8281 = vmatpush.bf16.msrb.mxu3 %v13458_v8  ;;  %v12994_v11 = vor.u32 %v14511_v33, %v12991_v45  ;;  %v14507_v23 = vld [vmem:[#allocation8 + $0xc04] sm:$0xf]  ;;  %v12975_v32 = vld [vmem:[#allocation8 + $0xc10] sm:$0xf0]  ;;  %v11557_v8 = vld [vmem:[#allocation8 + $0xe8] sm:$0xf]  ;;  %v13426_v44 = vor.u32 %v14619_v9, %v13423_v21 }
 0x38f   :  { %8226 = vmatpush.bf16.msrb.mxu0 %v13042_v2  ;;  %v16051_v2 = vld [vmem:[#allocation34_spill] sm:$0xff]  ;;  %v7909_v34 = vpop.f32.mrf.mxu3  ;;  %v7854_v12 = vpop.f32.mrf.mxu0  ;;  %v14539_v15 = vld [vmem:[#allocation8 + $0xd04] sm:$0xf]  ;;  %v13103_v42 = vld [vmem:[#allocation8 + $0xd10] sm:$0xf0]  ;;  %v12978_v40 = vor.u32 %v14507_v23, %v12975_v32 }
 0x390   :  { %8155 = vmatmul.bf16.vlgmr.msra.gmra.mxu0 %v16051_v2  ;;  %v15654_v16 = vadd.f32 %v7909_v34, %v7891_v27  ;;  %v14186_v33 = vld [vmem:[#allocation8 + $0x1f4] sm:$0xf0]  ;;  %v14615_v45 = vld [vmem:[#allocation8 + $0xf64] sm:$0xf]  ;;  %v13407_v50 = vld [vmem:[#allocation8 + $0xf70] sm:$0xf0] }
 0x391   :  { %8245 = vmatpush.bf16.msrb.mxu1 %v13170_v6  ;;  %v13119_v6 = vld [vmem:[#allocation8 + $0xd30] sm:$0xf0]  ;;  %v7873_v20 = vpop.f32.mrf.mxu1  ;;  %v13410_v9 = vor.u32 %v14615_v45, %v13407_v50  ;;  %v11541_v21 = vld [vmem:[#allocation8 + $0xc8] sm:$0xf]  ;;  %v14150_v34 = vld [vmem:[#allocation8 + $0xd4] sm:$0xf0] }
 0x392   :  { %8265 = vmatpush.bf16.msrb.mxu2 %v13282_v39  ;;  %v13122_v63 = vor.u32 %v14543_v47, %v13119_v6  ;;  %v14154_v39 = vld [vmem:[#allocation8 + $0xf4] sm:$0xf0]  ;;  %8282 = vmatpush.bf16.msrb.mxu3 %v13442_v58  ;;  %v13231_v47 = vld [vmem:[#allocation8 + $0xe10] sm:$0xf0]  ;;  %v11686_v58 = vor.u32 %v14186_v33, %v11685_v4  ;;  %v14611_v27 = vld [vmem:[#allocation8 + $0xf44] sm:$0xf] }
 0x393   :  { %8227 = vmatpush.bf16.msrb.mxu0 %v13026_v0  ;;  %v14575_v0 = vld [vmem:[#allocation8 + $0xe24] sm:$0xf]  ;;  %v11558_v6 = vor.u32 %v14154_v39, %v11557_v8  ;;  %v7892_v23 = vpop.f32.mrf.mxu2  ;;  %v11797_v4 = vld [vmem:[#allocation8 + $0x2c8] sm:$0xf]  ;;  %v14214_v33 = vld [vmem:[#allocation8 + $0x2d4] sm:$0xf0] }
 0x394   :  { %v13250_v59 = vor.u32 %v14575_v0, %v13247_v51  ;;  %v11669_v0 = vld [vmem:[#allocation8 + $0x1c8] sm:$0xf]  ;;  %v14182_v51 = vld [vmem:[#allocation8 + $0x1d4] sm:$0xf0] }
 0x395   :  { %8246 = vmatpush.bf16.msrb.mxu1 %v13154_v35  ;;  %v16054_v35 = vld [vmem:[#allocation33_spill] sm:$0xff]  ;;  %v11653_v50 = vld [vmem:[#allocation8 + $0x1a8] sm:$0xf] }
 0x396   :  { %8141 = vmatmul.bf16.gmra.mxu3 %v16054_v35  ;;  %8266 = vmatpush.bf16.msrb.mxu2 %v13266_v14 }
 0x397   :  { %8228 = vmatpush.bf16.msrb.mxu0 %v13010_v19  ;;  %v7855_v19 = vadd.f32 %v7854_v12, %v7836_v56  ;;  %v13106_v56 = vor.u32 %v14539_v15, %v13103_v42  ;;  %8283 = vmatpush.bf16.msrb.mxu3 %v13426_v44  ;;  %v11813_v12 = vld [vmem:[#allocation8 + $0x2e8] sm:$0xf]  ;;  %v15656_v32 = vpop.f32.mrf.mxu3  ;;  %v7857_v8 = vpop.f32.mrf.mxu0  ;;  %v11670_v44 = vor.u32 %v14182_v51, %v11669_v0  ;;  %v14174_v0 = vld [vmem:[#allocation8 + $0x194] sm:$0xf0] }
 0x398   :  { %v7858_v15 = vadd.f32 %v7857_v8, %v15641_v49  ;;  %v7841_v51 = vadd.f32 %v15643_v31, %v15645_v22  ;;  %v11493_v31 = vld [vmem:[#allocation8 + $0x68] sm:$0xf]  ;;  %v14138_v22 = vld [vmem:[#allocation8 + $0x74] sm:$0xf0] }
 0x399   :  { %8247 = vmatpush.bf16.msrb.mxu1 %v13138_v24  ;;  %v7874_v35 = vadd.f32 %v7873_v20, %v7855_v19  ;;  %v14571_v24 = vld [vmem:[#allocation8 + $0xe04] sm:$0xf]  ;;  %v13391_v20 = vld [vmem:[#allocation8 + $0xf50] sm:$0xf0]  ;;  %v7876_v39 = vpop.f32.mrf.mxu1  ;;  %v11542_v19 = vor.u32 %v14150_v34, %v11541_v21  ;;  %v14142_v21 = vld [vmem:[#allocation8 + $0x94] sm:$0xf0] }
 0x39a   :  { %8267 = vmatpush.bf16.msrb.mxu2 %v13250_v59  ;;  %v13234_v14 = vor.u32 %v14571_v24, %v13231_v47  ;;  %v11525_v59 = vld [vmem:[#allocation8 + $0xa8] sm:$0xf]  ;;  %v13394_v45 = vor.u32 %v14611_v27, %v13391_v20  ;;  %v14178_v24 = vld [vmem:[#allocation8 + $0x1b4] sm:$0xf0]  ;;  %v14607_v47 = vld [vmem:[#allocation8 + $0xf24] sm:$0xf] }
 0x39b   :  { %8229 = vmatpush.bf16.msrb.mxu0 %v12994_v11  ;;  %v14218_v11 = vld [vmem:[#allocation8 + $0x2f4] sm:$0xf0]  ;;  %8284 = vmatpush.bf16.msrb.mxu3 %v13410_v9  ;;  %v11509_v9 = vld [vmem:[#allocation8 + $0x88] sm:$0xf]  ;;  %v14603_v27 = vld [vmem:[#allocation8 + $0xf04] sm:$0xf] }
 0x39c   :  { %v11814_v42 = vor.u32 %v14218_v11, %v11813_v12  ;;  %8179 = vmatmul.bf16.gmra.mxu1 %v16039_v55  ;;  %8198 = vmatmul.bf16.gmra.mxu2 %v15415_v29  ;;  %v11781_v12 = vld [vmem:[#allocation8 + $0x2a8] sm:$0xf]  ;;  %v14210_v34 = vld [vmem:[#allocation8 + $0x2b4] sm:$0xf0]  ;;  %v13359_v20 = vld [vmem:[#allocation8 + $0xf10] sm:$0xf0] }
 0x39d   :  { %8248 = vmatpush.bf16.msrb.mxu1 %v13122_v63  ;;  %v15658_v63 = vadd.f32 %v7892_v23, %v7874_v35  ;;  %v7877_v35 = vadd.f32 %v7876_v39, %v7858_v15  ;;  %v11637_v11 = vld [vmem:[#allocation8 + $0x188] sm:$0xf]  ;;  %v7895_v23 = vpop.f32.mrf.mxu2  ;;  %v16055_v39 = vld [vmem:[#allocation38_spill] sm:$0xff] }
 0x39e   :  { %8268 = vmatpush.bf16.msrb.mxu2 %v13234_v14 }
 0x39f   :  { %8230 = vmatpush.bf16.msrb.mxu0 %v12978_v40  ;;  %v14146_v40 = vld [vmem:[#allocation8 + $0xb4] sm:$0xf0]  ;;  %8285 = vmatpush.bf16.msrb.mxu3 %v13394_v45  ;;  %v7896_v8 = vadd.f32 %v7895_v23, %v7877_v35  ;;  %v11638_v45 = vor.u32 %v14174_v0, %v11637_v11 }
 0x3a0   :  { %8160 = vmatmul.bf16.gmra.mxu0 %v15369_v10  ;;  %v11526_v49 = vor.u32 %v14146_v40, %v11525_v59  ;;  %v7914_v59 = vpop.f32.mrf.mxu3  ;;  %v14206_v35 = vld [vmem:[#allocation8 + $0x294] sm:$0xf0] }
 0x3a1   :  { %8249 = vmatpush.bf16.msrb.mxu1 %v13106_v56  ;;  %v11798_v56 = vor.u32 %v14214_v33, %v11797_v4  ;;  %v7878_v15 = vpop.f32.mrf.mxu1  ;;  %v14250_v4 = vld [vmem:[#allocation8 + $0x3f4] sm:$0xf0]  ;;  %v11782_v33 = vor.u32 %v14210_v34, %v11781_v12  ;;  %v11749_v12 = vld [vmem:[#allocation8 + $0x268] sm:$0xf] }
 0x3a2   :  { %8337 = vmatpush.bf16.msra.mxu2 %v11814_v42  ;;  %v11510_v42 = vor.u32 %v14142_v21, %v11509_v9  ;;  %v14170_v23 = vld [vmem:[#allocation8 + $0x174] sm:$0xf0]  ;;  %v11494_v21 = vor.u32 %v14138_v22, %v11493_v31  ;;  %v11477_v34 = vld [vmem:[#allocation8 + $0x48] sm:$0xf] }
 0x3a3   :  { %8299 = vmatpush.bf16.msra.mxu0 %v11558_v6  ;;  %v13375_v6 = vld [vmem:[#allocation8 + $0xf30] sm:$0xf0]  ;;  %v14134_v11 = vld [vmem:[#allocation8 + $0x54] sm:$0xf0] }
 0x3a4   :  { %v13378_v14 = vor.u32 %v14607_v47, %v13375_v6  ;;  %v13362_v47 = vor.u32 %v14603_v27, %v13359_v20  ;;  %v11621_v6 = vld [vmem:[#allocation8 + $0x168] sm:$0xf]  ;;  %v14202_v0 = vld [vmem:[#allocation8 + $0x274] sm:$0xf0] }
 0x3a5   :  { %8318 = vmatpush.bf16.msra.mxu1 %v11686_v58  ;;  %v11654_v58 = vor.u32 %v14178_v24, %v11653_v50  ;;  %v11765_v50 = vld [vmem:[#allocation8 + $0x288] sm:$0xf]  ;;  %v15667_v24 = vadd.f32 %v7914_v59, %v7896_v8  ;;  %v14166_v8 = vld [vmem:[#allocation8 + $0x154] sm:$0xf0]  ;;  %v11750_v59 = vor.u32 %v14202_v0, %v11749_v12 }
 0x3a6   :  { %8212 = vmatmul.bf16.vlgmr.msra.gmra.mxu3 %v16055_v39  ;;  %8338 = vmatpush.bf16.msra.mxu2 %v11798_v56  ;;  %v11766_v56 = vor.u32 %v14206_v35, %v11765_v50  ;;  %v11925_v27 = vld [vmem:[#allocation8 + $0x3c8] sm:$0xf]  ;;  %v14246_v20 = vld [vmem:[#allocation8 + $0x3d4] sm:$0xf0] }
 0x3a7   :  { %8300 = vmatpush.bf16.msra.mxu0 %v11542_v19  ;;  %v7859_v19 = vpop.f32.mrf.mxu0  ;;  %8286 = vmatpush.bf16.msrb.mxu3 %v13378_v14  ;;  %v7897_v14 = vpop.f32.mrf.mxu2  ;;  %v14130_v50 = vld [vmem:[#allocation8 + $0x34] sm:$0xf0]  ;;  %v11926_v22 = vor.u32 %v14246_v20, %v11925_v27  ;;  %v11589_v35 = vld [vmem:[#allocation8 + $0x128] sm:$0xf] }
 0x3a8   :  { %v7860_v40 = vadd.f32 %v7859_v19, %v7841_v51  ;;  %v11605_v51 = vld [vmem:[#allocation8 + $0x148] sm:$0xf]  ;;  %v14198_v31 = vld [vmem:[#allocation8 + $0x254] sm:$0xf0] }
 0x3a9   :  { %8319 = vmatpush.bf16.msra.mxu1 %v11670_v44  ;;  %v11941_v44 = vld [vmem:[#allocation8 + $0x3e8] sm:$0xf]  ;;  %v14238_v20 = vld [vmem:[#allocation8 + $0x394] sm:$0xf0] }
 0x3aa   :  { %v11942_v9 = vor.u32 %v14250_v4, %v11941_v44  ;;  %8339 = vmatpush.bf16.msra.mxu2 %v11782_v33  ;;  %v11478_v44 = vor.u32 %v14134_v11, %v11477_v34  ;;  %v11733_v33 = vld [vmem:[#allocation8 + $0x248] sm:$0xf]  ;;  %v14126_v34 = vld [vmem:[#allocation8 + $0x14] sm:$0xf0] }
 0x3ab   :  { %8301 = vmatpush.bf16.msra.mxu0 %v11526_v49  ;;  %v7879_v49 = vadd.f32 %v7878_v15, %v7860_v40  ;;  %8287 = vmatpush.bf16.msrb.mxu3 %v13362_v47  ;;  %v11606_v40 = vor.u32 %v14166_v8, %v11605_v51  ;;  %v14162_v47 = vld [vmem:[#allocation8 + $0x134] sm:$0xf0]  ;;  %v11445_v12 = vld [vmem:[#allocation8 + $0x8] sm:$0xf] }
 0x3ac   :  { %8250 = vmatmul.bf16.vlgmr.msrb.gmra.mxu1 %v15561_v25  ;;  %8269 = vmatmul.bf16.vlgmr.msrb.gmra.mxu2 %v15564_v57  ;;  %v11573_v0 = vld [vmem:[#allocation8 + $0x108] sm:$0xf]  ;;  %v14158_v51 = vld [vmem:[#allocation8 + $0x114] sm:$0xf0] }
 0x3ad   :  { %8320 = vmatpush.bf16.msra.mxu1 %v11654_v58  ;;  %v11622_v58 = vor.u32 %v14170_v23, %v11621_v6  ;;  %v15669_v19 = vadd.f32 %v7897_v14, %v7879_v49  ;;  %v11909_v23 = vld [vmem:[#allocation8 + $0x3a8] sm:$0xf]  ;;  %v14242_v49 = vld [vmem:[#allocation8 + $0x3b4] sm:$0xf0]  ;;  %v7912_v14 = vadd.f32 %v15656_v32, %v15658_v63 }
 0x3ae   :  { %8340 = vmatpush.bf16.msra.mxu2 %v11766_v56  ;;  %v11590_v56 = vor.u32 %v14162_v47, %v11589_v35  ;;  %v11910_v11 = vor.u32 %v14242_v49, %v11909_v23  ;;  %v11893_v8 = vld [vmem:[#allocation8 + $0x388] sm:$0xf]  ;;  %v11574_v35 = vor.u32 %v14158_v51, %v11573_v0  ;;  %v14190_v63 = vld [vmem:[#allocation8 + $0x214] sm:$0xf0] }
 0x3af   :  { %8302 = vmatpush.bf16.msra.mxu0 %v11510_v42  ;;  %8356 = vmatpush.bf16.msra.mxu3 %v11942_v9  ;;  %v7928_v15 = vpop.f32.mrf.mxu0  ;;  %v7947_v42 = vpop.f32.mrf.mxu1  ;;  %v11717_v9 = vld [vmem:[#allocation8 + $0x228] sm:$0xf]  ;;  %v11894_v47 = vor.u32 %v14238_v20, %v11893_v8  ;;  %v14234_v25 = vld [vmem:[#allocation8 + $0x374] sm:$0xf0] }
 0x3b0   :  { %v7929_v4 = vadd.f32 %v7928_v15, %v15654_v16  ;;  %8231 = vmatmul.bf16.vlgmr.msrb.gmra.mxu0 %v15448_v54  ;;  %v7966_v27 = vpop.f32.mrf.mxu2  ;;  %v12069_v15 = vld [vmem:[#allocation8 + $0x4e8] sm:$0xf]  ;;  %v14342_v51 = vld [vmem:[#allocation8 + $0x6d4] sm:$0xf0] }
 0x3b1   :  { %8321 = vmatpush.bf16.msra.mxu1 %v11638_v45  ;;  %v11461_v45 = vld [vmem:[#allocation8 + $0x28] sm:$0xf] }
 0x3b2   :  { %v7948_v6 = vadd.f32 %v7947_v42, %v7929_v4  ;;  %v11462_v16 = vor.u32 %v14130_v50, %v11461_v45  ;;  %8341 = vmatpush.bf16.msra.mxu2 %v11750_v59  ;;  %v14282_v42 = vld [vmem:[#allocation8 + $0x4f4] sm:$0xf0]  ;;  %v16056_v4 = vld [vmem:[#allocation39_spill] sm:$0xff]  ;;  %v12197_v45 = vld [vmem:[#allocation8 + $0x5e8] sm:$0xf] }
 0x3b3   :  { %8303 = vmatpush.bf16.msra.mxu0 %v11494_v21  ;;  %v11734_v21 = vor.u32 %v14198_v31, %v11733_v33  ;;  %8357 = vmatpush.bf16.msra.mxu3 %v11926_v22  ;;  %v11446_v33 = vor.u32 %v14126_v34, %v11445_v12  ;;  %v14314_v50 = vld [vmem:[#allocation8 + $0x5f4] sm:$0xf0]  ;;  %v11701_v32 = vld [vmem:[#allocation8 + $0x208] sm:$0xf]  ;;  %v12070_v23 = vor.u32 %v14282_v42, %v12069_v15 }
 0x3b4   :  { %v11877_v57 = vld [vmem:[#allocation8 + $0x368] sm:$0xf]  ;;  %v14310_v34 = vld [vmem:[#allocation8 + $0x5d4] sm:$0xf0] }
 0x3b5   :  { %8322 = vmatpush.bf16.msra.mxu1 %v11622_v58  ;;  %v14194_v58 = vld [vmem:[#allocation8 + $0x234] sm:$0xf0]  ;;  %v12053_v12 = vld [vmem:[#allocation8 + $0x4c8] sm:$0xf] }
 0x3b6   :  { %8217 = vmatmul.bf16.gmra.mxu3 %v16056_v4  ;;  %8342 = vmatpush.bf16.msra.mxu2 %v11734_v21  ;;  %v11718_v22 = vor.u32 %v14194_v58, %v11717_v9  ;;  %v14346_v4 = vld [vmem:[#allocation8 + $0x6f4] sm:$0xf0]  ;;  %v12181_v58 = vld [vmem:[#allocation8 + $0x5c8] sm:$0xf] }
 0x3b7   :  { %8304 = vmatpush.bf16.msra.mxu0 %v11478_v44  ;;  %v15677_v44 = vadd.f32 %v7966_v27, %v7948_v6  ;;  %v7930_v59 = vpop.f32.mrf.mxu0  ;;  %8358 = vmatpush.bf16.msra.mxu3 %v11910_v11  ;;  %v12325_v6 = vld [vmem:[#allocation8 + $0x6e8] sm:$0xf]  ;;  %v12198_v27 = vor.u32 %v14314_v50, %v12197_v45  ;;  %v14278_v21 = vld [vmem:[#allocation8 + $0x4d4] sm:$0xf0] }
 0x3b8   :  { %v7931_v31 = vadd.f32 %v7930_v59, %v7912_v14  ;;  %v12326_v9 = vor.u32 %v14346_v4, %v12325_v6  ;;  %v12309_v11 = vld [vmem:[#allocation8 + $0x6c8] sm:$0xf]  ;;  %v7968_v0 = vpop.f32.mrf.mxu2  ;;  %v14230_v14 = vld [vmem:[#allocation8 + $0x354] sm:$0xf0]  ;;  %v12054_v59 = vor.u32 %v14278_v21, %v12053_v12 }
 0x3b9   :  { %8323 = vmatpush.bf16.msra.mxu1 %v11606_v40  ;;  %v7949_v40 = vpop.f32.mrf.mxu1  ;;  %v11861_v8 = vld [vmem:[#allocation8 + $0x348] sm:$0xf]  ;;  %v14274_v4 = vld [vmem:[#allocation8 + $0x4b4] sm:$0xf0] }
 0x3ba   :  { %v7950_v49 = vadd.f32 %v7949_v40, %v7931_v31  ;;  %8343 = vmatpush.bf16.msra.mxu2 %v11718_v22  ;;  %v12037_v45 = vld [vmem:[#allocation8 + $0x4a8] sm:$0xf]  ;;  %v14306_v31 = vld [vmem:[#allocation8 + $0x5b4] sm:$0xf0] }
 0x3bb   :  { %8305 = vmatpush.bf16.msra.mxu0 %v11462_v16  ;;  %v11702_v16 = vor.u32 %v14190_v63, %v11701_v32  ;;  %8359 = vmatpush.bf16.msra.mxu3 %v11894_v47  ;;  %v12165_v50 = vld [vmem:[#allocation8 + $0x5a8] sm:$0xf]  ;;  %v14338_v63 = vld [vmem:[#allocation8 + $0x6b4] sm:$0xf0] }
 0x3bc   :  { %v15680_v20 = vadd.f32 %v7968_v0, %v7950_v49  ;;  %v12293_v22 = vld [vmem:[#allocation8 + $0x6a8] sm:$0xf]  ;;  %8255 = vmatmul.bf16.gmra.mxu1 %v15581_v18  ;;  %8274 = vmatmul.bf16.gmra.mxu2 %v15583_v62  ;;  %v12166_v6 = vor.u32 %v14306_v31, %v12165_v50  ;;  %v14298_v31 = vld [vmem:[#allocation8 + $0x574] sm:$0xf0] }
 0x3bd   :  { %8324 = vmatpush.bf16.msra.mxu1 %v11590_v56  ;;  %v11878_v56 = vor.u32 %v14234_v25, %v11877_v57  ;;  %v12310_v25 = vor.u32 %v14342_v51, %v12309_v11  ;;  %v11862_v57 = vor.u32 %v14230_v14, %v11861_v8  ;;  %v11845_v47 = vld [vmem:[#allocation8 + $0x328] sm:$0xf]  ;;  %v14334_v11 = vld [vmem:[#allocation8 + $0x694] sm:$0xf0] }
 0x3be   :  { %8344 = vmatpush.bf16.msra.mxu2 %v11702_v16  ;;  %v12021_v49 = vld [vmem:[#allocation8 + $0x488] sm:$0xf]  ;;  %v12294_v16 = vor.u32 %v14338_v63, %v12293_v22  ;;  %v14222_v51 = vld [vmem:[#allocation8 + $0x314] sm:$0xf0] }
 0x3bf   :  { %8306 = vmatpush.bf16.msra.mxu0 %v11446_v33  ;;  %v7933_v15 = vpop.f32.mrf.mxu0  ;;  %v12182_v33 = vor.u32 %v14310_v34, %v12181_v58  ;;  %8360 = vmatpush.bf16.msra.mxu3 %v11878_v56  ;;  %v12149_v21 = vld [vmem:[#allocation8 + $0x588] sm:$0xf]  ;;  %v14330_v63 = vld [vmem:[#allocation8 + $0x674] sm:$0xf0] }
 0x3c0   :  { %v7934_v40 = vadd.f32 %v7933_v15, %v15667_v24  ;;  %8236 = vmatmul.bf16.gmra.mxu0 %v15459_v41  ;;  %v14226_v24 = vld [vmem:[#allocation8 + $0x334] sm:$0xf0]  ;;  %v12277_v56 = vld [vmem:[#allocation8 + $0x688] sm:$0xf]  ;;  %v7971_v34 = vpop.f32.mrf.mxu2 }
 0x3c1   :  { %8325 = vmatpush.bf16.msra.mxu1 %v11574_v35  ;;  %v7952_v42 = vpop.f32.mrf.mxu1  ;;  %v7916_v35 = vpop.f32.mrf.mxu3  ;;  %v11846_v12 = vor.u32 %v14226_v24, %v11845_v47  ;;  %v11829_v0 = vld [vmem:[#allocation8 + $0x308] sm:$0xf] }
 0x3c2   :  { %8413 = vmatpush.bf16.msrb.mxu2 %v12326_v9  ;;  %v7953_v32 = vadd.f32 %v7952_v42, %v7934_v40  ;;  %v14302_v9 = vld [vmem:[#allocation8 + $0x594] sm:$0xf0]  ;;  %v7917_v58 = vadd.f32 %v7916_v35, %v15669_v19  ;;  %v12278_v19 = vor.u32 %v14334_v11, %v12277_v56  ;;  %v12133_v50 = vld [vmem:[#allocation8 + $0x568] sm:$0xf] }
 0x3c3   :  { %8375 = vmatpush.bf16.msrb.mxu0 %v12070_v23  ;;  %v12038_v23 = vor.u32 %v14274_v4, %v12037_v45  ;;  %8361 = vmatpush.bf16.msra.mxu3 %v11862_v57  ;;  %v14378_v40 = vld [vmem:[#allocation8 + $0x7f4] sm:$0xf0]  ;;  %v12150_v45 = vor.u32 %v14302_v9, %v12149_v21  ;;  %v12005_v4 = vld [vmem:[#allocation8 + $0x468] sm:$0xf]  ;;  %v11830_v57 = vor.u32 %v14222_v51, %v11829_v0 }
 0x3c4   :  { %v15687_v8 = vadd.f32 %v7971_v34, %v7953_v32  ;;  %v12261_v32 = vld [vmem:[#allocation8 + $0x668] sm:$0xf]  ;;  %v14294_v56 = vld [vmem:[#allocation8 + $0x554] sm:$0xf0] }
 0x3c5   :  { %8394 = vmatpush.bf16.msrb.mxu1 %v12198_v27  ;;  %v14270_v27 = vld [vmem:[#allocation8 + $0x494] sm:$0xf0]  ;;  %v12117_v21 = vld [vmem:[#allocation8 + $0x548] sm:$0xf]  ;;  %v12262_v9 = vor.u32 %v14330_v63, %v12261_v32 }
 0x3c6   :  { %8414 = vmatpush.bf16.msrb.mxu2 %v12310_v25  ;;  %8288 = vmatmul.bf16.vlgmr.msrb.gmra.mxu3 %v15589_v60  ;;  %v12022_v42 = vor.u32 %v14270_v27, %v12021_v49  ;;  %v14266_v25 = vld [vmem:[#allocation8 + $0x474] sm:$0xf0]  ;;  %v12134_v27 = vor.u32 %v14298_v31, %v12133_v50  ;;  %v12421_v50 = vld [vmem:[#allocation8 + $0x7a8] sm:$0xf] }
 0x3c7   :  { %8376 = vmatpush.bf16.msrb.mxu0 %v12054_v59  ;;  %v7935_v14 = vpop.f32.mrf.mxu0  ;;  %v12453_v59 = vld [vmem:[#allocation8 + $0x7e8] sm:$0xf]  ;;  %8362 = vmatpush.bf16.msra.mxu3 %v11846_v12  ;;  %v14262_v12 = vld [vmem:[#allocation8 + $0x454] sm:$0xf0] }
 0x3c8   :  { %v12454_v47 = vor.u32 %v14378_v40, %v12453_v59  ;;  %v14374_v34 = vld [vmem:[#allocation8 + $0x7d4] sm:$0xf0]  ;;  %v7973_v11 = vpop.f32.mrf.mxu2  ;;  %v12118_v40 = vor.u32 %v14294_v56, %v12117_v21  ;;  %v12229_v32 = vld [vmem:[#allocation8 + $0x628] sm:$0xf] }
 0x3c9   :  { %8395 = vmatpush.bf16.msrb.mxu1 %v12182_v33  ;;  %v7954_v15 = vpop.f32.mrf.mxu1  ;;  %v7936_v33 = vadd.f32 %v7935_v14, %v7917_v58  ;;  %v7985_v35 = vpop.f32.mrf.mxu3  ;;  %v12437_v58 = vld [vmem:[#allocation8 + $0x7c8] sm:$0xf]  ;;  %v14326_v0 = vld [vmem:[#allocation8 + $0x654] sm:$0xf0] }
 0x3ca   :  { %8415 = vmatpush.bf16.msrb.mxu2 %v12294_v16  ;;  %v15691_v24 = vadd.f32 %v7985_v35, %v15677_v44  ;;  %v11989_v16 = vld [vmem:[#allocation8 + $0x448] sm:$0xf]  ;;  %v14370_v31 = vld [vmem:[#allocation8 + $0x7b4] sm:$0xf0] }
 0x3cb   :  { %8377 = vmatpush.bf16.msrb.mxu0 %v12038_v23  ;;  %v7955_v22 = vadd.f32 %v7954_v15, %v7936_v33  ;;  %v14756_v23 = vld [vmem:[#allocation10] sm:$0xf]  ;;  %8363 = vmatpush.bf16.msra.mxu3 %v11830_v57  ;;  %v12245_v44 = vld [vmem:[#allocation8 + $0x648] sm:$0xf]  ;;  %v12438_v33 = vor.u32 %v14374_v34, %v12437_v58  ;;  %v14290_v57 = vld [vmem:[#allocation8 + $0x534] sm:$0xf0]  ;;  %v12422_v21 = vor.u32 %v14370_v31, %v12421_v50 }
 0x3cc   :  { %v15693_v49 = vperm.slane %v14756_v23, 1  ;;  %8326 = vmatmul.bf16.vlgmr.msra.gmra.mxu1 %v15198_v28  ;;  %v14322_v63 = vld [vmem:[#allocation8 + $0x634] sm:$0xf0]  ;;  %8345 = vmatmul.bf16.vlgmr.msra.gmra.mxu2 %v15220_v7  ;;  %v12213_v56 = vld [vmem:[#allocation8 + $0x608] sm:$0xf]  ;;  %v8907_v34 = vmax.f32 %v15691_v24, 0.0 }
 0x3cd   :  { %8396 = vmatpush.bf16.msrb.mxu1 %v12166_v6  ;;  %v12006_v6 = vor.u32 %v14266_v25, %v12005_v4  ;;  %v15695_v51 = vadd.f32 %v7973_v11, %v7955_v22  ;;  %v14258_v4 = vld [vmem:[#allocation8 + $0x434] sm:$0xf0]  ;;  %v12101_v25 = vld [vmem:[#allocation8 + $0x528] sm:$0xf] }
 0x3ce   :  { %8416 = vmatpush.bf16.msrb.mxu2 %v12278_v19  ;;  %v12246_v19 = vor.u32 %v14326_v0, %v12245_v44  ;;  %v14318_v58 = vld [vmem:[#allocation8 + $0x614] sm:$0xf0]  ;;  %v12230_v44 = vor.u32 %v14322_v63, %v12229_v32 }
 0x3cf   :  { %8378 = vmatpush.bf16.msrb.mxu0 %v12022_v42  ;;  %8432 = vmatpush.bf16.msrb.mxu3 %v12454_v47  ;;  %v8004_v14 = vpop.f32.mrf.mxu0  ;;  %v11990_v42 = vor.u32 %v14262_v12, %v11989_v16  ;;  %v12085_v16 = vld [vmem:[#allocation8 + $0x508] sm:$0xf]  ;;  %v12102_v12 = vor.u32 %v14290_v57, %v12101_v25  ;;  %v14366_v0 = vld [vmem:[#allocation8 + $0x794] sm:$0xf0]  ;;  %v12214_v32 = vor.u32 %v14318_v58, %v12213_v56 }
 0x3d0   :  { %v8005_v59 = vadd.f32 %v8004_v14, %v15693_v49  ;;  %8307 = vmatmul.bf16.vlgmr.msra.gmra.mxu0 %v15176_v52  ;;  %v8042_v14 = vpop.f32.mrf.mxu2  ;;  %v14442_v24 = vld [vmem:[#allocation8 + $0x9f4] sm:$0xf0]  ;;  %v12837_v57 = vld [vmem:[#allocation8 + $0xae8] sm:$0xf] }
 0x3d1   :  { %8397 = vmatpush.bf16.msrb.mxu1 %v12150_v45  ;;  %v8023_v15 = vpop.f32.mrf.mxu1  ;;  %v11973_v45 = vld [vmem:[#allocation8 + $0x428] sm:$0xf]  ;;  %v7987_v22 = vpop.f32.mrf.mxu3  ;;  %v14470_v58 = vld [vmem:[#allocation8 + $0xad4] sm:$0xf0] }
 0x3d2   :  { %8417 = vmatpush.bf16.msrb.mxu2 %v12262_v9  ;;  %v8024_v35 = vadd.f32 %v8023_v15, %v8005_v59  ;;  %v7988_v47 = vadd.f32 %v7987_v22, %v15680_v20  ;;  %v11974_v23 = vor.u32 %v14258_v4, %v11973_v45  ;;  %v14286_v9 = vld [vmem:[#allocation8 + $0x514] sm:$0xf0]  ;;  %v12405_v20 = vld [vmem:[#allocation8 + $0x788] sm:$0xf] }
 0x3d3   :  { %8379 = vmatpush.bf16.msrb.mxu0 %v12006_v6  ;;  %v11957_v6 = vld [vmem:[#allocation8 + $0x408] sm:$0xf]  ;;  %8433 = vmatpush.bf16.msrb.mxu3 %v12438_v33  ;;  %v12086_v31 = vor.u32 %v14286_v9, %v12085_v16  ;;  %v12406_v22 = vor.u32 %v14366_v0, %v12405_v20  ;;  %v14358_v20 = vld [vmem:[#allocation8 + $0x754] sm:$0xf0] }
 0x3d4   :  { %v8911_v11 = vmax.f32 %v7988_v47, 0.0  ;;  %v12581_v15 = vld [vmem:[#allocation8 + $0x8e8] sm:$0xf]  ;;  %v14362_v47 = vld [vmem:[#allocation8 + $0x774] sm:$0xf0] }
 0x3d5   :  { %8398 = vmatpush.bf16.msrb.mxu1 %v12134_v27  ;;  %v14254_v27 = vld [vmem:[#allocation8 + $0x414] sm:$0xf0]  ;;  %v12709_v59 = vld [vmem:[#allocation8 + $0x9e8] sm:$0xf] }
 0x3d6   :  { %8418 = vmatpush.bf16.msrb.mxu2 %v12246_v19  ;;  %v15703_v45 = vpack.c.bf16 %v8911_v11, %v8907_v34  ;;  %8293 = vmatmul.bf16.gmra.mxu3 %v15599_v53  ;;  %v11958_v25 = vor.u32 %v14254_v27, %v11957_v6  ;;  %v14474_v19 = vld [vmem:[#allocation8 + $0xaf4] sm:$0xf0]  ;;  %v12693_v16 = vld [vmem:[#allocation8 + $0x9c8] sm:$0xf] }
 0x3d7   :  { %8380 = vmatpush.bf16.msrb.mxu0 %v11990_v42  ;;  %v14410_v42 = vld [vmem:[#allocation8 + $0x8f4] sm:$0xf0]  ;;  %v8006_v33 = vpop.f32.mrf.mxu0  ;;  %8434 = vmatpush.bf16.msrb.mxu3 %v12422_v21  ;;  %v12821_v9 = vld [vmem:[#allocation8 + $0xac8] sm:$0xf] }
 0x3d8   :  { %16057 = vst [vmem:[#allocation24_spill] sm:$0xff] %v15703_v45  ;;  %v8007_v50 = vadd.f32 %v8006_v33, %v15693_v49  ;;  %v12582_v63 = vor.u32 %v14410_v42, %v12581_v15  ;;  %v12838_v45 = vor.u32 %v14474_v19, %v12837_v57  ;;  %v14406_v6 = vld [vmem:[#allocation8 + $0x8d4] sm:$0xf0]  ;;  %v8044_v0 = vpop.f32.mrf.mxu2  ;;  %v12549_v15 = vld [vmem:[#allocation8 + $0x8a8] sm:$0xf] }
 0x3d9   :  { %8399 = vmatpush.bf16.msrb.mxu1 %v12118_v40  ;;  %v15705_v40 = vadd.f32 %v8042_v14, %v8024_v35  ;;  %v8025_v4 = vpop.f32.mrf.mxu1  ;;  %v12389_v35 = vld [vmem:[#allocation8 + $0x768] sm:$0xf]  ;;  %v7990_v11 = vpop.f32.mrf.mxu3  ;;  %v12710_v14 = vor.u32 %v14442_v24, %v12709_v59  ;;  %v14438_v21 = vld [vmem:[#allocation8 + $0x9d4] sm:$0xf0]  ;;  %v12822_v24 = vor.u32 %v14470_v58, %v12821_v9 }
 0x3da   :  { %8419 = vmatpush.bf16.msrb.mxu2 %v12230_v44  ;;  %v8026_v34 = vadd.f32 %v8025_v4, %v8007_v50  ;;  %v15710_v27 = vadd.f32 %v7990_v11, %v15687_v8  ;;  %v12373_v44 = vld [vmem:[#allocation8 + $0x748] sm:$0xf]  ;;  %v14402_v42 = vld [vmem:[#allocation8 + $0x8b4] sm:$0xf0]  ;;  %v12694_v4 = vor.u32 %v14438_v21, %v12693_v16 }
 0x3db   :  { %8381 = vmatpush.bf16.msrb.mxu0 %v11974_v23  ;;  %v12565_v23 = vld [vmem:[#allocation8 + $0x8c8] sm:$0xf]  ;;  %8435 = vmatpush.bf16.msrb.mxu3 %v12406_v22  ;;  %v12374_v57 = vor.u32 %v14358_v20, %v12373_v44  ;;  %v14434_v50 = vld [vmem:[#allocation8 + $0x9b4] sm:$0xf0]  ;;  %v12550_v22 = vor.u32 %v14402_v42, %v12549_v15 }
 0x3dc   :  { %v12566_v56 = vor.u32 %v14406_v6, %v12565_v23  ;;  %v15712_v8 = vadd.f32 %v8044_v0, %v8026_v34  ;;  %v12677_v19 = vld [vmem:[#allocation8 + $0x9a8] sm:$0xf]  ;;  %8331 = vmatmul.bf16.gmra.mxu1 %v15209_v36  ;;  %v14398_v11 = vld [vmem:[#allocation8 + $0x894] sm:$0xf0]  ;;  %8350 = vmatmul.bf16.gmra.mxu2 %v15233_v17  ;;  %v8915_v44 = vmax.f32 %v15710_v27, 0.0 }
 0x3dd   :  { %8400 = vmatpush.bf16.msrb.mxu1 %v12102_v12  ;;  %v12390_v12 = vor.u32 %v14362_v47, %v12389_v35  ;;  %v12533_v34 = vld [vmem:[#allocation8 + $0x888] sm:$0xf]  ;;  %v12678_v23 = vor.u32 %v14434_v50, %v12677_v19  ;;  %v14350_v15 = vld [vmem:[#allocation8 + $0x714] sm:$0xf0] }
 0x3de   :  { %8420 = vmatpush.bf16.msrb.mxu2 %v12214_v32  ;;  %v14466_v32 = vld [vmem:[#allocation8 + $0xab4] sm:$0xf0]  ;;  %v12661_v6 = vld [vmem:[#allocation8 + $0x988] sm:$0xf]  ;;  %v12534_v0 = vor.u32 %v14398_v11, %v12533_v34 }
 0x3df   :  { %8382 = vmatpush.bf16.msrb.mxu0 %v11958_v25  ;;  %v8009_v59 = vpop.f32.mrf.mxu0  ;;  %8436 = vmatpush.bf16.msrb.mxu3 %v12390_v12  ;;  %v14430_v12 = vld [vmem:[#allocation8 + $0x994] sm:$0xf0]  ;;  %v12789_v9 = vld [vmem:[#allocation8 + $0xa88] sm:$0xf] }
 0x3e0   :  { %v8010_v25 = vadd.f32 %v8009_v59, %v15693_v49  ;;  %8312 = vmatmul.bf16.gmra.mxu0 %v15187_v1  ;;  %v12341_v58 = vld [vmem:[#allocation8 + $0x708] sm:$0xf]  ;;  %v8047_v42 = vpop.f32.mrf.mxu2  ;;  %v14394_v59 = vld [vmem:[#allocation8 + $0x874] sm:$0xf0]  ;;  %v12662_v19 = vor.u32 %v14430_v12, %v12661_v6 }
 0x3e1   :  { %8401 = vmatpush.bf16.msrb.mxu1 %v12086_v31  ;;  %v8028_v33 = vpop.f32.mrf.mxu1  ;;  %v12805_v31 = vld [vmem:[#allocation8 + $0xaa8] sm:$0xf]  ;;  %v7992_v47 = vpop.f32.mrf.mxu3  ;;  %v14502_v12 = vld [vmem:[#allocation8 + $0xbd4] sm:$0xf0] }
 0x3e2   :  { %8489 = vmatpush.bf16.msra.mxu2 %v12838_v45  ;;  %v14354_v45 = vld [vmem:[#allocation8 + $0x734] sm:$0xf0]  ;;  %v8029_v35 = vadd.f32 %v8028_v33, %v8010_v25  ;;  %v12806_v16 = vor.u32 %v14466_v32, %v12805_v31  ;;  %v12965_v33 = vld [vmem:[#allocation8 + $0xbe8] sm:$0xf] }
 0x3e3   :  { %8451 = vmatpush.bf16.msra.mxu0 %v12582_v63  ;;  %v12357_v63 = vld [vmem:[#allocation8 + $0x728] sm:$0xf]  ;;  %8437 = vmatpush.bf16.msrb.mxu3 %v12374_v57 }
 0x3e4   :  { %v12358_v21 = vor.u32 %v14354_v45, %v12357_v63  ;;  %v15720_v25 = vadd.f32 %v8047_v42, %v8029_v35  ;;  %v12645_v32 = vld [vmem:[#allocation8 + $0x968] sm:$0xf]  ;;  %v14426_v63 = vld [vmem:[#allocation8 + $0x974] sm:$0xf0] }
 0x3e5   :  { %8470 = vmatpush.bf16.msra.mxu1 %v12710_v14  ;;  %v7993_v14 = vadd.f32 %v7992_v47, %v15695_v51  ;;  %v12517_v51 = vld [vmem:[#allocation8 + $0x868] sm:$0xf]  ;;  %v14458_v47 = vld [vmem:[#allocation8 + $0xa74] sm:$0xf0] }
 0x3e6   :  { %8490 = vmatpush.bf16.msra.mxu2 %v12822_v24  ;;  %8364 = vmatmul.bf16.vlgmr.msra.gmra.mxu3 %v16042_v46  ;;  %v12518_v45 = vor.u32 %v14394_v59, %v12517_v51  ;;  %v12773_v35 = vld [vmem:[#allocation8 + $0xa68] sm:$0xf]  ;;  %v14386_v59 = vld [vmem:[#allocation8 + $0x834] sm:$0xf0] }
 0x3e7   :  { %8452 = vmatpush.bf16.msra.mxu0 %v12566_v56  ;;  %v14462_v56 = vld [vmem:[#allocation8 + $0xa94] sm:$0xf0]  ;;  %v8919_v20 = vmax.f32 %v7993_v14, 0.0  ;;  %v8011_v24 = vpop.f32.mrf.mxu0  ;;  %8438 = vmatpush.bf16.msrb.mxu3 %v12358_v21  ;;  %v12501_v11 = vld [vmem:[#allocation8 + $0x848] sm:$0xf] }
 0x3e8   :  { %v8012_v27 = vadd.f32 %v8011_v24, %v15693_v49  ;;  %v12790_v31 = vor.u32 %v14462_v56, %v12789_v9  ;;  %v12949_v6 = vld [vmem:[#allocation8 + $0xbc8] sm:$0xf]  ;;  %v12646_v49 = vor.u32 %v14426_v63, %v12645_v32  ;;  %v14422_v9 = vld [vmem:[#allocation8 + $0x954] sm:$0xf0]  ;;  %v8049_v51 = vpop.f32.mrf.mxu2 }
 0x3e9   :  { %8471 = vmatpush.bf16.msra.mxu1 %v12694_v4  ;;  %v14506_v4 = vld [vmem:[#allocation8 + $0xbf4] sm:$0xf0]  ;;  %v8030_v57 = vpop.f32.mrf.mxu1  ;;  %v15723_v50 = vpack.c.bf16 %v8919_v20, %v8915_v44  ;;  %v8061_v42 = vpop.f32.mrf.mxu3  ;;  %v12629_v21 = vld [vmem:[#allocation8 + $0x948] sm:$0xf] }
 0x3ea   :  { %8491 = vmatpush.bf16.msra.mxu2 %v12806_v16  ;;  %v12966_v34 = vor.u32 %v14506_v4, %v12965_v33  ;;  %v8031_v14 = vadd.f32 %v8030_v57, %v8012_v27  ;;  %v8062_v44 = vadd.f32 %v8061_v42, %v15705_v40  ;;  %v12774_v16 = vor.u32 %v14458_v47, %v12773_v35  ;;  %v14454_v20 = vld [vmem:[#allocation8 + $0xa54] sm:$0xf0]  ;;  %v12933_v33 = vld [vmem:[#allocation8 + $0xba8] sm:$0xf] }
 0x3eb   :  { %8453 = vmatpush.bf16.msra.mxu0 %v12550_v22  ;;  %16058 = vst [vmem:[#allocation26_spill] sm:$0xff] %v15723_v50  ;;  %v12342_v22 = vor.u32 %v14350_v15, %v12341_v58  ;;  %v12757_v58 = vld [vmem:[#allocation8 + $0xa48] sm:$0xf]  ;;  %v14498_v4 = vld [vmem:[#allocation8 + $0xbb4] sm:$0xf0] }
 0x3ec   :  { %v12485_v15 = vld [vmem:[#allocation8 + $0x828] sm:$0xf]  ;;  %v15727_v24 = vadd.f32 %v8049_v51, %v8031_v14  ;;  %v14418_v32 = vld [vmem:[#allocation8 + $0x934] sm:$0xf0]  ;;  %v12934_v47 = vor.u32 %v14498_v4, %v12933_v33  ;;  %8402 = vmatmul.bf16.vlgmr.msrb.gmra.mxu1 %v16044_v26  ;;  %8421 = vmatmul.bf16.vlgmr.msrb.gmra.mxu2 %v16045_v48 }
 0x3ed   :  { %8472 = vmatpush.bf16.msra.mxu1 %v12678_v23  ;;  %v14390_v23 = vld [vmem:[#allocation8 + $0x854] sm:$0xf0]  ;;  %8439 = vmatpush.bf16.msrb.mxu3 %v12342_v22  ;;  %v12613_v22 = vld [vmem:[#allocation8 + $0x928] sm:$0xf]  ;;  %v12486_v63 = vor.u32 %v14386_v59, %v12485_v15 }
 0x3ee   :  { %8492 = vmatpush.bf16.msra.mxu2 %v12790_v31  ;;  %v12502_v56 = vor.u32 %v14390_v23, %v12501_v11  ;;  %v12758_v31 = vor.u32 %v14454_v20, %v12757_v58  ;;  %v14450_v35 = vld [vmem:[#allocation8 + $0xa34] sm:$0xf0]  ;;  %v12917_v23 = vld [vmem:[#allocation8 + $0xb88] sm:$0xf] }
 0x3ef   :  { %8454 = vmatpush.bf16.msra.mxu0 %v12534_v0  ;;  %v12950_v0 = vor.u32 %v14502_v12, %v12949_v6  ;;  %v8080_v40 = vpop.f32.mrf.mxu0  ;;  %v14382_v14 = vld [vmem:[#allocation8 + $0x814] sm:$0xf0]  ;;  %v12725_v58 = vld [vmem:[#allocation8 + $0xa08] sm:$0xf] }
 0x3f0   :  { %v8081_v27 = vadd.f32 %v8080_v40, %v8062_v44  ;;  %8383 = vmatmul.bf16.vlgmr.msrb.gmra.mxu0 %v16043_v61  ;;  %v14494_v6 = vld [vmem:[#allocation8 + $0xb94] sm:$0xf0]  ;;  %v12614_v44 = vor.u32 %v14418_v32, %v12613_v22  ;;  %v13221_v51 = vld [vmem:[#allocation8 + $0xde8] sm:$0xf] }
 0x3f1   :  { %8473 = vmatpush.bf16.msra.mxu1 %v12662_v19  ;;  %8508 = vmatpush.bf16.msra.mxu3 %v12966_v34  ;;  %v8099_v57 = vpop.f32.mrf.mxu1  ;;  %v12630_v19 = vor.u32 %v14422_v9, %v12629_v21  ;;  %v12469_v34 = vld [vmem:[#allocation8 + $0x808] sm:$0xf]  ;;  %v8063_v42 = vpop.f32.mrf.mxu3  ;;  %v14538_v21 = vld [vmem:[#allocation8 + $0xcf4] sm:$0xf0]  ;;  %v12918_v15 = vor.u32 %v14494_v6, %v12917_v23 }
 0x3f2   :  { %8493 = vmatpush.bf16.msra.mxu2 %v12774_v16  ;;  %v8100_v11 = vadd.f32 %v8099_v57, %v8081_v27  ;;  %v8064_v12 = vadd.f32 %v8063_v42, %v15712_v8  ;;  %v13093_v16 = vld [vmem:[#allocation8 + $0xce8] sm:$0xf]  ;;  %v14446_v20 = vld [vmem:[#allocation8 + $0xa14] sm:$0xf0]  ;;  %v8118_v8 = vpop.f32.mrf.mxu2 }
 0x3f3   :  { %8455 = vmatpush.bf16.msra.mxu0 %v12518_v45  ;;  %v12741_v45 = vld [vmem:[#allocation8 + $0xa28] sm:$0xf]  ;;  %v14570_v59 = vld [vmem:[#allocation8 + $0xdf4] sm:$0xf0]  ;;  %v13094_v4 = vor.u32 %v14538_v21, %v13093_v16 }
 0x3f4   :  { %v12742_v9 = vor.u32 %v14450_v35, %v12741_v45  ;;  %v13349_v33 = vld [vmem:[#allocation8 + $0xee8] sm:$0xf]  ;;  %v14602_v40 = vld [vmem:[#allocation8 + $0xef4] sm:$0xf0]  ;;  %v15733_v27 = vadd.f32 %v8118_v8, %v8100_v11 }
 0x3f5   :  { %8474 = vmatpush.bf16.msra.mxu1 %v12646_v49  ;;  %8509 = vmatpush.bf16.msra.mxu3 %v12950_v0  ;;  %v12597_v49 = vld [vmem:[#allocation8 + $0x908] sm:$0xf]  ;;  %v12470_v0 = vor.u32 %v14382_v14, %v12469_v34  ;;  %v14534_v45 = vld [vmem:[#allocation8 + $0xcd4] sm:$0xf0]  ;;  %v13222_v34 = vor.u32 %v14570_v59, %v13221_v51  ;;  %v13350_v42 = vor.u32 %v14602_v40, %v13349_v33 }
 0x3f6   :  { %8494 = vmatpush.bf16.msra.mxu2 %v12758_v31  ;;  %v12901_v57 = vld [vmem:[#allocation8 + $0xb68] sm:$0xf]  ;;  %8369 = vmatmul.bf16.gmra.mxu3 %v16046_v13  ;;  %v14566_v6 = vld [vmem:[#allocation8 + $0xdd4] sm:$0xf0] }
 0x3f7   :  { %8456 = vmatpush.bf16.msra.mxu0 %v12502_v56  ;;  %v14414_v56 = vld [vmem:[#allocation8 + $0x914] sm:$0xf0]  ;;  %v8082_v31 = vpop.f32.mrf.mxu0  ;;  %v13205_v23 = vld [vmem:[#allocation8 + $0xdc8] sm:$0xf] }
 0x3f8   :  { %v12598_v32 = vor.u32 %v14414_v56, %v12597_v49  ;;  %v8083_v35 = vadd.f32 %v8082_v31, %v8064_v12  ;;  %v13333_v11 = vld [vmem:[#allocation8 + $0xec8] sm:$0xf]  ;;  %v14598_v50 = vld [vmem:[#allocation8 + $0xed4] sm:$0xf0]  ;;  %v13206_v12 = vor.u32 %v14566_v6, %v13205_v23 }
 0x3f9   :  { %8475 = vmatpush.bf16.msra.mxu1 %v12630_v19  ;;  %8510 = vmatpush.bf16.msra.mxu3 %v12934_v47  ;;  %v14490_v19 = vld [vmem:[#allocation8 + $0xb74] sm:$0xf0]  ;;  %v8101_v22 = vpop.f32.mrf.mxu1  ;;  %v12726_v47 = vor.u32 %v14446_v20, %v12725_v58  ;;  %v8066_v21 = vpop.f32.mrf.mxu3  ;;  %v13334_v20 = vor.u32 %v14598_v50, %v13333_v11  ;;  %v13317_v59 = vld [vmem:[#allocation8 + $0xea8] sm:$0xf] }
 0x3fa   :  { %8495 = vmatpush.bf16.msra.mxu2 %v12742_v9  ;;  %v12902_v14 = vor.u32 %v14490_v19, %v12901_v57  ;;  %v8102_v16 = vadd.f32 %v8101_v22, %v8083_v35  ;;  %v14486_v49 = vld [vmem:[#allocation8 + $0xb54] sm:$0xf0]  ;;  %v8067_v56 = vadd.f32 %v8066_v21, %v15720_v25  ;;  %v13061_v9 = vld [vmem:[#allocation8 + $0xca8] sm:$0xf]  ;;  %v8120_v33 = vpop.f32.mrf.mxu2 }
 0x3fb   :  { %8457 = vmatpush.bf16.msra.mxu0 %v12486_v63  ;;  %v13077_v63 = vld [vmem:[#allocation8 + $0xcc8] sm:$0xf]  ;;  %v14530_v58 = vld [vmem:[#allocation8 + $0xcb4] sm:$0xf0] }
 0x3fc   :  { %v13078_v8 = vor.u32 %v14534_v45, %v13077_v63  ;;  %v14562_v51 = vld [vmem:[#allocation8 + $0xdb4] sm:$0xf0]  ;;  %v12869_v40 = vld [vmem:[#allocation8 + $0xb28] sm:$0xf]  ;;  %v15737_v19 = vadd.f32 %v8120_v33, %v8102_v16  ;;  %v13062_v22 = vor.u32 %v14530_v58, %v13061_v9  ;;  %8407 = vmatmul.bf16.gmra.mxu1 %v16048_v5  ;;  %8426 = vmatmul.bf16.gmra.mxu2 %v16049_v30 }
 0x3fd   :  { %8476 = vmatpush.bf16.msra.mxu1 %v12614_v44  ;;  %8511 = vmatpush.bf16.msra.mxu3 %v12918_v15  ;;  %v12885_v44 = vld [vmem:[#allocation8 + $0xb48] sm:$0xf]  ;;  %v14482_v57 = vld [vmem:[#allocation8 + $0xb34] sm:$0xf0] }
 0x3fe   :  { %8496 = vmatpush.bf16.msra.mxu2 %v12726_v47  ;;  %v13189_v15 = vld [vmem:[#allocation8 + $0xda8] sm:$0xf]  ;;  %v14526_v35 = vld [vmem:[#allocation8 + $0xc94] sm:$0xf0]  ;;  %v12870_v47 = vor.u32 %v14482_v57, %v12869_v40 }
 0x3ff   :  { %8458 = vmatpush.bf16.msra.mxu0 %v12470_v0  ;;  %v12886_v0 = vor.u32 %v14486_v49, %v12885_v44  ;;  %v8085_v25 = vpop.f32.mrf.mxu0  ;;  %v13190_v63 = vor.u32 %v14562_v51, %v13189_v15  ;;  %v13045_v45 = vld [vmem:[#allocation8 + $0xc88] sm:$0xf]  ;;  %v14590_v11 = vld [vmem:[#allocation8 + $0xe94] sm:$0xf0] }
 0x400   :  { %8388 = vmatmul.bf16.gmra.mxu0 %v16047_v3  ;;  %v12853_v16 = vld [vmem:[#allocation8 + $0xb08] sm:$0xf]  ;;  %v14478_v21 = vld [vmem:[#allocation8 + $0xb14] sm:$0xf0]  ;;  %v13046_v44 = vor.u32 %v14526_v35, %v13045_v45 }
 0x401   :  { %8477 = vmatpush.bf16.msra.mxu1 %v12598_v32  ;;  %8512 = vmatpush.bf16.msra.mxu3 %v12902_v14  ;;  %v8104_v31 = vpop.f32.mrf.mxu1  ;;  %v8086_v32 = vadd.f32 %v8085_v25, %v8067_v56  ;;  %v13301_v14 = vld [vmem:[#allocation8 + $0xe88] sm:$0xf]  ;;  %v8068_v6 = vpop.f32.mrf.mxu3  ;;  %v14634_v51 = vld [vmem:[#allocation8 + $0xff4] sm:$0xf0] }
 0x402   :  { %8565 = vmatpush.bf16.msrb.mxu2 %v13350_v42  ;;  %v14558_v42 = vld [vmem:[#allocation8 + $0xd94] sm:$0xf0]  ;;  %v13029_v56 = vld [vmem:[#allocation8 + $0xc68] sm:$0xf]  ;;  %v13302_v58 = vor.u32 %v14590_v11, %v13301_v14 }
 0x403   :  { %8527 = vmatpush.bf16.msrb.mxu0 %v13094_v4  ;;  %v14594_v4 = vld [vmem:[#allocation8 + $0xeb4] sm:$0xf0]  ;;  %v8105_v23 = vadd.f32 %v8104_v31, %v8086_v32  ;;  %v13157_v9 = vld [vmem:[#allocation8 + $0xd68] sm:$0xf] }
 0x404   :  { %v13318_v50 = vor.u32 %v14594_v4, %v13317_v59  ;;  %v13477_v15 = vld [vmem:[#allocation8 + $0xfe8] sm:$0xf]  ;;  %v8123_v59 = vpop.f32.mrf.mxu2  ;;  %v14586_v4 = vld [vmem:[#allocation8 + $0xe74] sm:$0xf0] }
 0x405   :  { %8546 = vmatpush.bf16.msrb.mxu1 %v13222_v34  ;;  %8513 = vmatpush.bf16.msra.mxu3 %v12886_v0  ;;  %v13173_v34 = vld [vmem:[#allocation8 + $0xd88] sm:$0xf]  ;;  %v14554_v0 = vld [vmem:[#allocation8 + $0xd74] sm:$0xf0]  ;;  %v15743_v40 = vadd.f32 %v8123_v59, %v8105_v23 }
 0x406   :  { %8566 = vmatpush.bf16.msrb.mxu2 %v13334_v20  ;;  %v13174_v49 = vor.u32 %v14558_v42, %v13173_v34  ;;  %v12854_v20 = vor.u32 %v14478_v21, %v12853_v16  ;;  %v13285_v33 = vld [vmem:[#allocation8 + $0xe68] sm:$0xf]  ;;  %8440 = vmatmul.bf16.vlgmr.msrb.gmra.mxu3 %v16050_v43  ;;  %v13158_v32 = vor.u32 %v14554_v0, %v13157_v9  ;;  %v14518_v45 = vld [vmem:[#allocation8 + $0xc54] sm:$0xf0] }
 0x407   :  { %8528 = vmatpush.bf16.msrb.mxu0 %v13078_v8  ;;  %v8069_v8 = vadd.f32 %v8068_v6, %v15727_v24  ;;  %v13478_v24 = vor.u32 %v14634_v51, %v13477_v15  ;;  %v8087_v57 = vpop.f32.mrf.mxu0  ;;  %v13141_v35 = vld [vmem:[#allocation8 + $0xd48] sm:$0xf]  ;;  %v14630_v42 = vld [vmem:[#allocation8 + $0xfd4] sm:$0xf0] }
 0x408   :  { %v13461_v34 = vld [vmem:[#allocation8 + $0xfc8] sm:$0xf]  ;;  %v14582_v11 = vld [vmem:[#allocation8 + $0xe54] sm:$0xf0] }
 0x409   :  { %8547 = vmatpush.bf16.msrb.mxu1 %v13206_v12  ;;  %v14522_v12 = vld [vmem:[#allocation8 + $0xc74] sm:$0xf0]  ;;  %8514 = vmatpush.bf16.msra.mxu3 %v12870_v47  ;;  %v8106_v25 = vpop.f32.mrf.mxu1  ;;  %v8137_v23 = vpop.f32.mrf.mxu3  ;;  %v13269_v6 = vld [vmem:[#allocation8 + $0xe48] sm:$0xf]  ;;  %v13462_v16 = vor.u32 %v14630_v42, %v13461_v34 }
 0x40a   :  { %8567 = vmatpush.bf16.msrb.mxu2 %v13318_v50  ;;  %v13030_v31 = vor.u32 %v14522_v12, %v13029_v56  ;;  %v13286_v50 = vor.u32 %v14586_v4, %v13285_v33  ;;  %v14550_v47 = vld [vmem:[#allocation8 + $0xd54] sm:$0xf0]  ;;  %v8138_v21 = vadd.f32 %v8137_v23, %v15733_v27  ;;  %v13125_v12 = vld [vmem:[#allocation8 + $0xd28] sm:$0xf]  ;;  %v13270_v9 = vor.u32 %v14582_v11, %v13269_v6  ;;  %v14152_v6 = vld [vmem:[#allocation8 + $0xec] sm:$0xf] }
 0x40b   :  { %8529 = vmatpush.bf16.msrb.mxu0 %v13062_v22  ;;  %v8088_v22 = vadd.f32 %v8087_v57, %v8069_v8  ;;  %v14514_v56 = vld [vmem:[#allocation8 + $0xc34] sm:$0xf0]  ;;  %v13253_v51 = vld [vmem:[#allocation8 + $0xe28] sm:$0xf]  ;;  %v11559_v11 = vld [vmem:[#allocation8 + $0xf8] sm:$0xf0] }
 0x40c   :  { %v14626_v0 = vld [vmem:[#allocation8 + $0xfb4] sm:$0xf0]  ;;  %v8125_v15 = vpop.f32.mrf.mxu2  ;;  %v12981_v57 = vld [vmem:[#allocation8 + $0xc08] sm:$0xf]  ;;  %8478 = vmatmul.bf16.vlgmr.msra.gmra.mxu1 %v16052_v37  ;;  %8497 = vmatmul.bf16.vlgmr.msra.gmra.mxu2 %v16053_v38 }
 0x40d   :  { %8548 = vmatpush.bf16.msrb.mxu1 %v13190_v63  ;;  %v13013_v63 = vld [vmem:[#allocation8 + $0xc48] sm:$0xf]  ;;  %8515 = vmatpush.bf16.msra.mxu3 %v12854_v20  ;;  %v8107_v14 = vadd.f32 %v8106_v25, %v8088_v22  ;;  %v14578_v59 = vld [vmem:[#allocation8 + $0xe34] sm:$0xf0] }
 0x40e   :  { %8568 = vmatpush.bf16.msrb.mxu2 %v13302_v58  ;;  %v13014_v8 = vor.u32 %v14518_v45, %v13013_v63  ;;  %v14546_v58 = vld [vmem:[#allocation8 + $0xd34] sm:$0xf0]  ;;  %v13445_v20 = vld [vmem:[#allocation8 + $0xfa8] sm:$0xf] }
 0x40f   :  { %8530 = vmatpush.bf16.msrb.mxu0 %v13046_v44  ;;  %v13142_v44 = vor.u32 %v14550_v47, %v13141_v35  ;;  %v15747_v33 = vadd.f32 %v8125_v15, %v8107_v14  ;;  %v8156_v4 = vpop.f32.mrf.mxu0  ;;  %v14510_v25 = vld [vmem:[#allocation8 + $0xc14] sm:$0xf0]  ;;  %v13126_v22 = vor.u32 %v14546_v58, %v13125_v12  ;;  %v13109_v63 = vld [vmem:[#allocation8 + $0xd08] sm:$0xf] }
 0x410   :  { %v14542_v45 = vld [vmem:[#allocation8 + $0xd14] sm:$0xf0]  ;;  %v13237_v35 = vld [vmem:[#allocation8 + $0xe08] sm:$0xf]  ;;  %8459 = vmatmul.bf16.vlgmr.msra.gmra.mxu0 %v16051_v2 }
 0x411   :  { %8549 = vmatpush.bf16.msrb.mxu1 %v13174_v49  ;;  %8584 = vmatpush.bf16.msrb.mxu3 %v13478_v24  ;;  %v12997_v49 = vld [vmem:[#allocation8 + $0xc28] sm:$0xf]  ;;  %v8175_v27 = vpop.f32.mrf.mxu1  ;;  %v14574_v47 = vld [vmem:[#allocation8 + $0xe14] sm:$0xf0]  ;;  %v8139_v23 = vpop.f32.mrf.mxu3  ;;  %v13110_v12 = vor.u32 %v14542_v45, %v13109_v63  ;;  %v14212_v63 = vld [vmem:[#allocation8 + $0x2cc] sm:$0xf] }
 0x412   :  { %8569 = vmatpush.bf16.msrb.mxu2 %v13286_v50  ;;  %v12998_v24 = vor.u32 %v14514_v56, %v12997_v49  ;;  %v13254_v50 = vor.u32 %v14578_v59, %v13253_v51  ;;  %v13429_v34 = vld [vmem:[#allocation8 + $0xf88] sm:$0xf]  ;;  %v14622_v42 = vld [vmem:[#allocation8 + $0xf94] sm:$0xf0]  ;;  %v14216_v49 = vld [vmem:[#allocation8 + $0x2ec] sm:$0xf]  ;;  %v13238_v58 = vor.u32 %v14574_v47, %v13237_v35 }
 0x413   :  { %8531 = vmatpush.bf16.msrb.mxu0 %v13030_v31  ;;  %v8157_v31 = vadd.f32 %v8156_v4, %v8138_v21  ;;  %v8140_v21 = vadd.f32 %v8139_v23, %v15737_v19  ;;  %v11815_v56 = vld [vmem:[#allocation8 + $0x2f8] sm:$0xf0]  ;;  %v14618_v15 = vld [vmem:[#allocation8 + $0xf74] sm:$0xf0]  ;;  %v14148_v19 = vld [vmem:[#allocation8 + $0xcc] sm:$0xf] }
 0x414   :  { %v8194_v51 = vpop.f32.mrf.mxu2  ;;  %v11818_v4 = vor.u32 %v14216_v49, %v11815_v56  ;;  %v11799_v45 = vld [vmem:[#allocation8 + $0x2d8] sm:$0xf0]  ;;  %v14176_v49 = vld [vmem:[#allocation8 + $0x1ac] sm:$0xf] }
 0x415   :  { %8550 = vmatpush.bf16.msrb.mxu1 %v13158_v32  ;;  %8585 = vmatpush.bf16.msrb.mxu3 %v13462_v16  ;;  %v13446_v32 = vor.u32 %v14626_v0, %v13445_v20  ;;  %v8176_v14 = vadd.f32 %v8175_v27, %v8157_v31  ;;  %v14184_v16 = vld [vmem:[#allocation8 + $0x1ec] sm:$0xf]  ;;  %v11562_v20 = vor.u32 %v14152_v6, %v11559_v11  ;;  %v13413_v0 = vld [vmem:[#allocation8 + $0xf68] sm:$0xf]  ;;  %v11543_v27 = vld [vmem:[#allocation8 + $0xd8] sm:$0xf0] }
 0x416   :  { %8570 = vmatpush.bf16.msrb.mxu2 %v13270_v9  ;;  %v13430_v9 = vor.u32 %v14622_v42, %v13429_v34  ;;  %v14180_v31 = vld [vmem:[#allocation8 + $0x1cc] sm:$0xf]  ;;  %v11546_v47 = vor.u32 %v14148_v19, %v11543_v27  ;;  %v13397_v34 = vld [vmem:[#allocation8 + $0xf48] sm:$0xf]  ;;  %v14614_v42 = vld [vmem:[#allocation8 + $0xf54] sm:$0xf0]  ;;  %v11802_v11 = vor.u32 %v14212_v63, %v11799_v45 }
 0x417   :  { %8532 = vmatpush.bf16.msrb.mxu0 %v13014_v8  ;;  %v12982_v8 = vor.u32 %v14510_v25, %v12981_v57  ;;  %v16059_v57 = vld [vmem:[#allocation33_spill] sm:$0xff]  ;;  %v8158_v25 = vpop.f32.mrf.mxu0  ;;  %v11655_v56 = vld [vmem:[#allocation8 + $0x1b8] sm:$0xf0]  ;;  %v14204_v45 = vld [vmem:[#allocation8 + $0x28c] sm:$0xf] }
 0x418   :  { %8445 = vmatmul.bf16.gmra.mxu3 %v16059_v57  ;;  %v8159_v35 = vadd.f32 %v8158_v25, %v8140_v21  ;;  %v13398_v21 = vor.u32 %v14614_v42, %v13397_v34  ;;  %v11639_v63 = vld [vmem:[#allocation8 + $0x198] sm:$0xf0]  ;;  %v14606_v34 = vld [vmem:[#allocation8 + $0xf14] sm:$0xf0] }
 0x419   :  { %8551 = vmatpush.bf16.msrb.mxu1 %v13142_v44  ;;  %v11687_v44 = vld [vmem:[#allocation8 + $0x1f8] sm:$0xf0]  ;;  %8586 = vmatpush.bf16.msrb.mxu3 %v13446_v32 }
 0x41a   :  { %8571 = vmatpush.bf16.msrb.mxu2 %v13254_v50  ;;  %v11690_v59 = vor.u32 %v14184_v16, %v11687_v44  ;;  %v11671_v32 = vld [vmem:[#allocation8 + $0x1d8] sm:$0xf0]  ;;  %v13414_v50 = vor.u32 %v14618_v15, %v13413_v0  ;;  %v14144_v16 = vld [vmem:[#allocation8 + $0xac] sm:$0xf]  ;;  %v14610_v0 = vld [vmem:[#allocation8 + $0xf34] sm:$0xf0] }
 0x41b   :  { %8533 = vmatpush.bf16.msrb.mxu0 %v12998_v24  ;;  %v15753_v24 = vadd.f32 %v8194_v51, %v8176_v14  ;;  %v8142_v14 = vpop.f32.mrf.mxu3  ;;  %v11674_v6 = vor.u32 %v14180_v31, %v11671_v32  ;;  %v14140_v51 = vld [vmem:[#allocation8 + $0x8c] sm:$0xf] }
 0x41c   :  { %v8143_v44 = vadd.f32 %v8142_v14, %v15743_v40  ;;  %v8196_v15 = vpop.f32.mrf.mxu2  ;;  %v11658_v40 = vor.u32 %v14176_v49, %v11655_v56  ;;  %v14172_v32 = vld [vmem:[#allocation8 + $0x18c] sm:$0xf]  ;;  %8483 = vmatmul.bf16.gmra.mxu1 %v16039_v55  ;;  %8502 = vmatmul.bf16.gmra.mxu2 %v15415_v29  ;;  %v11623_v49 = vld [vmem:[#allocation8 + $0x178] sm:$0xf0] }
 0x41d   :  { %8552 = vmatpush.bf16.msrb.mxu1 %v13126_v22  ;;  %v8177_v22 = vpop.f32.mrf.mxu1  ;;  %8587 = vmatpush.bf16.msrb.mxu3 %v13430_v9  ;;  %v14200_v56 = vld [vmem:[#allocation8 + $0x26c] sm:$0xf] }
 0x41e   :  { %8572 = vmatpush.bf16.msrb.mxu2 %v13238_v58  ;;  %v8178_v23 = vadd.f32 %v8177_v22, %v8159_v35  ;;  %v11783_v58 = vld [vmem:[#allocation8 + $0x2b8] sm:$0xf0] }
 0x41f   :  { %8534 = vmatpush.bf16.msrb.mxu0 %v12982_v8  ;;  %v11527_v8 = vld [vmem:[#allocation8 + $0xb8] sm:$0xf0]  ;;  %v8161_v19 = vpop.f32.mrf.mxu0 }
 0x420   :  { %v11530_v9 = vor.u32 %v14144_v16, %v11527_v8  ;;  %v8162_v31 = vadd.f32 %v8161_v19, %v8143_v44  ;;  %8464 = vmatmul.bf16.gmra.mxu0 %v15369_v10  ;;  %v11642_v16 = vor.u32 %v14172_v32, %v11639_v63  ;;  %v11607_v32 = vld [vmem:[#allocation8 + $0x158] sm:$0xf0]  ;;  %v14196_v63 = vld [vmem:[#allocation8 + $0x24c] sm:$0xf] }
 0x421   :  { %8553 = vmatpush.bf16.msrb.mxu1 %v13110_v12  ;;  %8588 = vmatpush.bf16.msrb.mxu3 %v13414_v50  ;;  %v14208_v12 = vld [vmem:[#allocation8 + $0x2ac] sm:$0xf]  ;;  %v11767_v50 = vld [vmem:[#allocation8 + $0x298] sm:$0xf0] }
 0x422   :  { %8641 = vmatpush.bf16.msra.mxu2 %v11818_v4  ;;  %v15757_v4 = vadd.f32 %v8196_v15, %v8178_v23  ;;  %v11786_v25 = vor.u32 %v14208_v12, %v11783_v58  ;;  %v14136_v23 = vld [vmem:[#allocation8 + $0x6c] sm:$0xf]  ;;  %v11770_v8 = vor.u32 %v14204_v45, %v11767_v50 }
 0x423   :  { %8603 = vmatpush.bf16.msra.mxu0 %v11562_v20  ;;  %v13381_v20 = vld [vmem:[#allocation8 + $0xf28] sm:$0xf]  ;;  %v8144_v14 = vpop.f32.mrf.mxu3  ;;  %v14248_v58 = vld [vmem:[#allocation8 + $0x3ec] sm:$0xf] }
 0x424   :  { %v13382_v22 = vor.u32 %v14610_v0, %v13381_v20  ;;  %v11943_v20 = vld [vmem:[#allocation8 + $0x3f8] sm:$0xf0]  ;;  %v8199_v0 = vpop.f32.mrf.mxu2  ;;  %v14244_v50 = vld [vmem:[#allocation8 + $0x3cc] sm:$0xf] }
 0x425   :  { %8622 = vmatpush.bf16.msra.mxu1 %v11690_v59  ;;  %v11511_v59 = vld [vmem:[#allocation8 + $0x98] sm:$0xf0]  ;;  %v8180_v27 = vpop.f32.mrf.mxu1  ;;  %8589 = vmatpush.bf16.msrb.mxu3 %v13398_v21  ;;  %v14168_v21 = vld [vmem:[#allocation8 + $0x16c] sm:$0xf]  ;;  %v11946_v15 = vor.u32 %v14248_v58, %v11943_v20 }
 0x426   :  { %8642 = vmatpush.bf16.msra.mxu2 %v11802_v11  ;;  %v11514_v35 = vor.u32 %v14140_v51, %v11511_v59  ;;  %v8181_v42 = vadd.f32 %v8180_v27, %v8162_v31  ;;  %v8145_v11 = vadd.f32 %v8144_v14, %v15747_v33  ;;  %v14132_v51 = vld [vmem:[#allocation8 + $0x4c] sm:$0xf]  ;;  %v11479_v33 = vld [vmem:[#allocation8 + $0x58] sm:$0xf0] }
 0x427   :  { %8604 = vmatpush.bf16.msra.mxu0 %v11546_v47  ;;  %v13365_v47 = vld [vmem:[#allocation8 + $0xf08] sm:$0xf]  ;;  %v8163_v19 = vpop.f32.mrf.mxu0  ;;  %v11482_v45 = vor.u32 %v14132_v51, %v11479_v33  ;;  %v11911_v58 = vld [vmem:[#allocation8 + $0x3b8] sm:$0xf0] }
 0x428   :  { %v13366_v44 = vor.u32 %v14606_v34, %v13365_v47  ;;  %v15763_v59 = vadd.f32 %v8199_v0, %v8181_v42  ;;  %8516 = vmatmul.bf16.vlgmr.msra.gmra.mxu3 %v16055_v39  ;;  %v8164_v31 = vadd.f32 %v8163_v19, %v8145_v11  ;;  %v11927_v47 = vld [vmem:[#allocation8 + $0x3d8] sm:$0xf0] }
 0x429   :  { %8623 = vmatpush.bf16.msra.mxu1 %v11674_v6  ;;  %v11495_v6 = vld [vmem:[#allocation8 + $0x78] sm:$0xf0]  ;;  %8590 = vmatpush.bf16.msrb.mxu3 %v13382_v22  ;;  %v14164_v22 = vld [vmem:[#allocation8 + $0x14c] sm:$0xf]  ;;  %v11930_v14 = vor.u32 %v14244_v50, %v11927_v47 }
 0x42a   :  { %8643 = vmatpush.bf16.msra.mxu2 %v11786_v25  ;;  %v11498_v12 = vor.u32 %v14136_v23, %v11495_v6  ;;  %v14128_v23 = vld [vmem:[#allocation8 + $0x2c] sm:$0xf]  ;;  %v11463_v6 = vld [vmem:[#allocation8 + $0x38] sm:$0xf0]  ;;  %v11610_v11 = vor.u32 %v14164_v22, %v11607_v32 }
 0x42b   :  { %8605 = vmatpush.bf16.msra.mxu0 %v11530_v9  ;;  %v11751_v9 = vld [vmem:[#allocation8 + $0x278] sm:$0xf0]  ;;  %v8213_v42 = vpop.f32.mrf.mxu3  ;;  %v14188_v32 = vld [vmem:[#allocation8 + $0x20c] sm:$0xf] }
 0x42c   :  { %v11754_v25 = vor.u32 %v14200_v56, %v11751_v9  ;;  %v11466_v56 = vor.u32 %v14128_v23, %v11463_v6  ;;  %v14240_v9 = vld [vmem:[#allocation8 + $0x3ac] sm:$0xf]  ;;  %v8201_v20 = vpop.f32.mrf.mxu2  ;;  %v11447_v51 = vld [vmem:[#allocation8 + $0x18] sm:$0xf0] }
 0x42d   :  { %8624 = vmatpush.bf16.msra.mxu1 %v11658_v40  ;;  %v8182_v27 = vpop.f32.mrf.mxu1  ;;  %v11626_v40 = vor.u32 %v14168_v21, %v11623_v49  ;;  %8591 = vmatpush.bf16.msrb.mxu3 %v13366_v44  ;;  %v14160_v44 = vld [vmem:[#allocation8 + $0x12c] sm:$0xf]  ;;  %v11591_v21 = vld [vmem:[#allocation8 + $0x138] sm:$0xf0]  ;;  %v11914_v0 = vor.u32 %v14240_v9, %v11911_v58 }
 0x42e   :  { %8644 = vmatpush.bf16.msra.mxu2 %v11770_v8  ;;  %v8183_v34 = vadd.f32 %v8182_v27, %v8164_v31  ;;  %v14192_v49 = vld [vmem:[#allocation8 + $0x22c] sm:$0xf]  ;;  %v11594_v27 = vor.u32 %v14160_v44, %v11591_v21  ;;  %v11575_v22 = vld [vmem:[#allocation8 + $0x118] sm:$0xf0] }
 0x42f   :  { %8606 = vmatpush.bf16.msra.mxu0 %v11514_v35  ;;  %v11735_v35 = vld [vmem:[#allocation8 + $0x258] sm:$0xf0]  ;;  %v14280_v47 = vld [vmem:[#allocation8 + $0x4ec] sm:$0xf] }
 0x430   :  { %v11738_v8 = vor.u32 %v14196_v63, %v11735_v35  ;;  %v15767_v33 = vadd.f32 %v8201_v20, %v8183_v34  ;;  %v11703_v63 = vld [vmem:[#allocation8 + $0x218] sm:$0xf0]  ;;  %v14236_v35 = vld [vmem:[#allocation8 + $0x38c] sm:$0xf]  ;;  %8535 = vmatmul.bf16.vlgmr.msrb.gmra.mxu0 %v15448_v54 }
 0x431   :  { %8625 = vmatpush.bf16.msra.mxu1 %v11642_v16  ;;  %8660 = vmatpush.bf16.msra.mxu3 %v11946_v15  ;;  %v8214_v16 = vadd.f32 %v8213_v42, %v15753_v24  ;;  %v14124_v15 = vld [vmem:[#allocation8 + $0xc] sm:$0xf]  ;;  %v8232_v24 = vpop.f32.mrf.mxu0  ;;  %v11895_v50 = vld [vmem:[#allocation8 + $0x398] sm:$0xf0]  ;;  %v11706_v9 = vor.u32 %v14188_v32, %v11703_v63 }
 0x432   :  { %8645 = vmatpush.bf16.msra.mxu2 %v11754_v25  ;;  %v11898_v23 = vor.u32 %v14236_v35, %v11895_v50  ;;  %v12071_v6 = vld [vmem:[#allocation8 + $0x4f8] sm:$0xf0]  ;;  %v16061_v44 = vld [vmem:[#allocation40_spill] sm:$0xff] }
 0x433   :  { %8607 = vmatpush.bf16.msra.mxu0 %v11498_v12  ;;  %v11719_v12 = vld [vmem:[#allocation8 + $0x238] sm:$0xf0]  ;;  %v8233_v31 = vadd.f32 %v8232_v24, %v8214_v16  ;;  %v8215_v34 = vpop.f32.mrf.mxu3  ;;  %v14312_v16 = vld [vmem:[#allocation8 + $0x5ec] sm:$0xf]  ;;  %8573 = vmatmul.bf16.vlgmr.msrb.gmra.mxu2 %v16061_v44 }
 0x434   :  { %v11722_v25 = vor.u32 %v14192_v49, %v11719_v12  ;;  %v12074_v49 = vor.u32 %v14280_v47, %v12071_v6  ;;  %v12327_v12 = vld [vmem:[#allocation8 + $0x6f8] sm:$0xf0]  ;;  %v8270_v24 = vpop.f32.mrf.mxu2  ;;  %v14340_v63 = vld [vmem:[#allocation8 + $0x6cc] sm:$0xf] }
 0x435   :  { %8626 = vmatpush.bf16.msra.mxu1 %v11626_v40  ;;  %8661 = vmatpush.bf16.msra.mxu3 %v11930_v14  ;;  %v8251_v19 = vpop.f32.mrf.mxu1  ;;  %v14156_v40 = vld [vmem:[#allocation8 + $0x10c] sm:$0xf]  ;;  %v12183_v35 = vld [vmem:[#allocation8 + $0x5d8] sm:$0xf0] }
 0x436   :  { %8646 = vmatpush.bf16.msra.mxu2 %v11738_v8  ;;  %v8252_v42 = vadd.f32 %v8251_v19, %v8233_v31  ;;  %v16060_v14 = vld [vmem:[#allocation36_spill] sm:$0xff]  ;;  %v8216_v8 = vadd.f32 %v8215_v34, %v15757_v4  ;;  %v11578_v21 = vor.u32 %v14156_v40, %v11575_v22  ;;  %v12055_v4 = vld [vmem:[#allocation8 + $0x4d8] sm:$0xf0]  ;;  %v16062_v40 = vld [vmem:[#allocation39_spill] sm:$0xff] }
 0x437   :  { %8608 = vmatpush.bf16.msra.mxu0 %v11482_v45  ;;  %v11450_v45 = vor.u32 %v14124_v15, %v11447_v51  ;;  %8554 = vmatmul.bf16.vlgmr.msrb.gmra.mxu1 %v16060_v14  ;;  %v11879_v15 = vld [vmem:[#allocation8 + $0x378] sm:$0xf0]  ;;  %v14276_v51 = vld [vmem:[#allocation8 + $0x4cc] sm:$0xf] }
 0x438   :  { %v14308_v31 = vld [vmem:[#allocation8 + $0x5cc] sm:$0xf]  ;;  %8521 = vmatmul.bf16.gmra.mxu3 %v16062_v40  ;;  %v12058_v32 = vor.u32 %v14276_v51, %v12055_v4  ;;  %v11863_v6 = vld [vmem:[#allocation8 + $0x358] sm:$0xf0] }
 0x439   :  { %8627 = vmatpush.bf16.msra.mxu1 %v11610_v11  ;;  %8662 = vmatpush.bf16.msra.mxu3 %v11914_v0  ;;  %v12199_v11 = vld [vmem:[#allocation8 + $0x5f8] sm:$0xf0]  ;;  %v14232_v0 = vld [vmem:[#allocation8 + $0x36c] sm:$0xf]  ;;  %v8234_v22 = vpop.f32.mrf.mxu0  ;;  %v12186_v47 = vor.u32 %v14308_v31, %v12183_v35 }
 0x43a   :  { %8647 = vmatpush.bf16.msra.mxu2 %v11722_v25  ;;  %v12202_v58 = vor.u32 %v14312_v16, %v12199_v11  ;;  %v11882_v19 = vor.u32 %v14232_v0, %v11879_v15  ;;  %v8235_v50 = vadd.f32 %v8234_v22, %v8216_v8  ;;  %v14272_v16 = vld [vmem:[#allocation8 + $0x4ac] sm:$0xf]  ;;  %v12023_v35 = vld [vmem:[#allocation8 + $0x498] sm:$0xf0] }
 0x43b   :  { %8609 = vmatpush.bf16.msra.mxu0 %v11466_v56  ;;  %v14344_v56 = vld [vmem:[#allocation8 + $0x6ec] sm:$0xf]  ;;  %v8218_v11 = vpop.f32.mrf.mxu3 }
 0x43c   :  { %v12330_v20 = vor.u32 %v14344_v56, %v12327_v12  ;;  %v12039_v56 = vld [vmem:[#allocation8 + $0x4b8] sm:$0xf0]  ;;  %v14304_v12 = vld [vmem:[#allocation8 + $0x5ac] sm:$0xf]  ;;  %v8219_v0 = vadd.f32 %v8218_v11, %v15763_v59  ;;  %v8272_v4 = vpop.f32.mrf.mxu2 }
 0x43d   :  { %8628 = vmatpush.bf16.msra.mxu1 %v11594_v27  ;;  %8663 = vmatpush.bf16.msra.mxu3 %v11898_v23  ;;  %v15773_v27 = vadd.f32 %v8270_v24, %v8252_v42  ;;  %v8253_v25 = vpop.f32.mrf.mxu1  ;;  %v14228_v23 = vld [vmem:[#allocation8 + $0x34c] sm:$0xf]  ;;  %v12042_v15 = vor.u32 %v14272_v16, %v12039_v56  ;;  %v11847_v24 = vld [vmem:[#allocation8 + $0x338] sm:$0xf0] }
 0x43e   :  { %8648 = vmatpush.bf16.msra.mxu2 %v11706_v9  ;;  %v8254_v42 = vadd.f32 %v8253_v25, %v8235_v50  ;;  %v14336_v8 = vld [vmem:[#allocation8 + $0x6ac] sm:$0xf]  ;;  %v12295_v9 = vld [vmem:[#allocation8 + $0x6b8] sm:$0xf0] }
 0x43f   :  { %8610 = vmatpush.bf16.msra.mxu0 %v11450_v45  ;;  %v12311_v45 = vld [vmem:[#allocation8 + $0x6d8] sm:$0xf0]  ;;  %v14224_v51 = vld [vmem:[#allocation8 + $0x32c] sm:$0xf] }
 0x440   :  { %v12314_v34 = vor.u32 %v14340_v63, %v12311_v45  ;;  %v11850_v31 = vor.u32 %v14224_v51, %v11847_v24  ;;  %v14300_v22 = vld [vmem:[#allocation8 + $0x58c] sm:$0xf]  ;;  %v12151_v25 = vld [vmem:[#allocation8 + $0x598] sm:$0xf0]  ;;  %8540 = vmatmul.bf16.gmra.mxu0 %v15459_v41 }
 0x441   :  { %8629 = vmatpush.bf16.msra.mxu1 %v11578_v21  ;;  %8664 = vmatpush.bf16.msra.mxu3 %v11882_v19  ;;  %v12167_v21 = vld [vmem:[#allocation8 + $0x5b8] sm:$0xf0]  ;;  %v14268_v19 = vld [vmem:[#allocation8 + $0x48c] sm:$0xf]  ;;  %v8237_v59 = vpop.f32.mrf.mxu0 }
 0x442   :  { %8717 = vmatpush.bf16.msrb.mxu2 %v12330_v20  ;;  %v12298_v20 = vor.u32 %v14336_v8, %v12295_v9  ;;  %v12026_v45 = vor.u32 %v14268_v19, %v12023_v35  ;;  %v14332_v50 = vld [vmem:[#allocation8 + $0x68c] sm:$0xf]  ;;  %v11831_v11 = vld [vmem:[#allocation8 + $0x318] sm:$0xf0] }
 0x443   :  { %8679 = vmatpush.bf16.msrb.mxu0 %v12074_v49  ;;  %v11866_v49 = vor.u32 %v14228_v23, %v11863_v6  ;;  %v8238_v23 = vadd.f32 %v8237_v59, %v8219_v0  ;;  %v14220_v16 = vld [vmem:[#allocation8 + $0x30c] sm:$0xf]  ;;  %v12135_v8 = vld [vmem:[#allocation8 + $0x578] sm:$0xf0]  ;;  %8578 = vmatmul.bf16.gmra.mxu2 %v15583_v62 }
 0x444   :  { %v14376_v19 = vld [vmem:[#allocation8 + $0x7ec] sm:$0xf]  ;;  %v8275_v35 = vpop.f32.mrf.mxu2 }
 0x445   :  { %8698 = vmatpush.bf16.msrb.mxu1 %v12202_v58  ;;  %v12170_v58 = vor.u32 %v14304_v12, %v12167_v21  ;;  %8665 = vmatpush.bf16.msra.mxu3 %v11866_v49  ;;  %v8256_v63 = vpop.f32.mrf.mxu1  ;;  %v14264_v49 = vld [vmem:[#allocation8 + $0x46c] sm:$0xf]  ;;  %v8220_v12 = vpop.f32.mrf.mxu3  ;;  %v12007_v21 = vld [vmem:[#allocation8 + $0x478] sm:$0xf0] }
 0x446   :  { %8718 = vmatpush.bf16.msrb.mxu2 %v12314_v34  ;;  %v12154_v34 = vor.u32 %v14300_v22, %v12151_v25  ;;  %v8257_v56 = vadd.f32 %v8256_v63, %v8238_v23  ;;  %v8221_v0 = vadd.f32 %v8220_v12, %v15767_v33  ;;  %v12010_v9 = vor.u32 %v14264_v49, %v12007_v21  ;;  %v11991_v25 = vld [vmem:[#allocation8 + $0x458] sm:$0xf0]  ;;  %v14292_v59 = vld [vmem:[#allocation8 + $0x54c] sm:$0xf] }
 0x447   :  { %8680 = vmatpush.bf16.msrb.mxu0 %v12058_v32  ;;  %v15777_v32 = vadd.f32 %v8272_v4, %v8254_v42  ;;  %8559 = vmatmul.bf16.gmra.mxu1 %v15581_v18  ;;  %v11834_v42 = vor.u32 %v14220_v16, %v11831_v11  ;;  %v12455_v4 = vld [vmem:[#allocation8 + $0x7f8] sm:$0xf0]  ;;  %v14324_v23 = vld [vmem:[#allocation8 + $0x64c] sm:$0xf] }
 0x448   :  { %v12458_v22 = vor.u32 %v14376_v19, %v12455_v4  ;;  %v12119_v63 = vld [vmem:[#allocation8 + $0x558] sm:$0xf0]  ;;  %v15783_v33 = vadd.f32 %v8275_v35, %v8257_v56  ;;  %8592 = vmatmul.bf16.vlgmr.msrb.gmra.mxu3 %v15589_v60  ;;  %v14372_v49 = vld [vmem:[#allocation8 + $0x7cc] sm:$0xf]  ;;  %v15789_v4 = vld [vmem:[#allocation10] sm:$0xf] }
 0x449   :  { %8699 = vmatpush.bf16.msrb.mxu1 %v12186_v47  ;;  %v12279_v47 = vld [vmem:[#allocation8 + $0x698] sm:$0xf0]  ;;  %8666 = vmatpush.bf16.msra.mxu3 %v11850_v31  ;;  %v14260_v31 = vld [vmem:[#allocation8 + $0x44c] sm:$0xf]  ;;  %v12122_v16 = vor.u32 %v14292_v59, %v12119_v63 }
 0x44a   :  { %8719 = vmatpush.bf16.msrb.mxu2 %v12298_v20  ;;  %v12282_v6 = vor.u32 %v14332_v50, %v12279_v47  ;;  %v12263_v20 = vld [vmem:[#allocation8 + $0x678] sm:$0xf0]  ;;  %v11994_v47 = vor.u32 %v14260_v31, %v11991_v25 }
 0x44b   :  { %8681 = vmatpush.bf16.msrb.mxu0 %v12042_v15  ;;  %v14296_v15 = vld [vmem:[#allocation8 + $0x56c] sm:$0xf]  ;;  %v12439_v12 = vld [vmem:[#allocation8 + $0x7d8] sm:$0xf0] }
 0x44c   :  { %v12138_v51 = vor.u32 %v14296_v15, %v12135_v8  ;;  %v12442_v15 = vor.u32 %v14372_v49, %v12439_v12  ;;  %v11975_v8 = vld [vmem:[#allocation8 + $0x438] sm:$0xf0]  ;;  %v8277_v59 = vpop.f32.mrf.mxu2  ;;  %v14316_v12 = vld [vmem:[#allocation8 + $0x60c] sm:$0xf] }
 0x44d   :  { %8700 = vmatpush.bf16.msrb.mxu1 %v12170_v58  ;;  %v14328_v58 = vld [vmem:[#allocation8 + $0x66c] sm:$0xf]  ;;  %8667 = vmatpush.bf16.msra.mxu3 %v11834_v42  ;;  %v8258_v50 = vpop.f32.mrf.mxu1  ;;  %v8289_v56 = vpop.f32.mrf.mxu3  ;;  %v12423_v25 = vld [vmem:[#allocation8 + $0x7b8] sm:$0xf0] }
 0x44e   :  { %8720 = vmatpush.bf16.msrb.mxu2 %v12282_v6  ;;  %v12266_v24 = vor.u32 %v14328_v58, %v12263_v20  ;;  %v14256_v42 = vld [vmem:[#allocation8 + $0x42c] sm:$0xf]  ;;  %v12103_v20 = vld [vmem:[#allocation8 + $0x538] sm:$0xf0] }
 0x44f   :  { %8682 = vmatpush.bf16.msrb.mxu0 %v12026_v45  ;;  %v8239_v45 = vpop.f32.mrf.mxu0  ;;  %v14288_v58 = vld [vmem:[#allocation8 + $0x52c] sm:$0xf]  ;;  %v11978_v19 = vor.u32 %v14256_v42, %v11975_v8  ;;  %v12087_v49 = vld [vmem:[#allocation8 + $0x518] sm:$0xf0] }
 0x450   :  { %v8240_v6 = vadd.f32 %v8239_v45, %v8221_v0  ;;  %v14320_v0 = vld [vmem:[#allocation8 + $0x62c] sm:$0xf]  ;;  %v12106_v31 = vor.u32 %v14288_v58, %v12103_v20  ;;  %v11959_v45 = vld [vmem:[#allocation8 + $0x418] sm:$0xf0]  ;;  %8611 = vmatmul.bf16.vlgmr.msra.gmra.mxu0 %v15176_v52 }
 0x451   :  { %8701 = vmatpush.bf16.msrb.mxu1 %v12154_v34  ;;  %v12247_v34 = vld [vmem:[#allocation8 + $0x658] sm:$0xf0]  ;;  %8736 = vmatpush.bf16.msrb.mxu3 %v12458_v22  ;;  %v14368_v22 = vld [vmem:[#allocation8 + $0x7ac] sm:$0xf] }
 0x452   :  { %8721 = vmatpush.bf16.msrb.mxu2 %v12266_v24  ;;  %v12250_v11 = vor.u32 %v14324_v23, %v12247_v34  ;;  %v8259_v21 = vadd.f32 %v8258_v50, %v8240_v6  ;;  %v15792_v24 = vperm.slane %v15789_v4, 2  ;;  %v12426_v63 = vor.u32 %v14368_v22, %v12423_v25  ;;  %v14284_v50 = vld [vmem:[#allocation8 + $0x50c] sm:$0xf]  ;;  %v12407_v8 = vld [vmem:[#allocation8 + $0x798] sm:$0xf0] }
 0x453   :  { %8683 = vmatpush.bf16.msrb.mxu0 %v12010_v9  ;;  %v15787_v9 = vadd.f32 %v8289_v56, %v15773_v27  ;;  %v14252_v27 = vld [vmem:[#allocation8 + $0x40c] sm:$0xf]  ;;  %v12711_v22 = vld [vmem:[#allocation8 + $0x9f8] sm:$0xf0]  ;;  %8649 = vmatmul.bf16.vlgmr.msra.gmra.mxu2 %v15220_v7 }
 0x454   :  { %v11962_v6 = vor.u32 %v14252_v27, %v11959_v45  ;;  %v14408_v58 = vld [vmem:[#allocation8 + $0x8ec] sm:$0xf] }
 0x455   :  { %8702 = vmatpush.bf16.msrb.mxu1 %v12138_v51  ;;  %v12231_v51 = vld [vmem:[#allocation8 + $0x638] sm:$0xf0]  ;;  %8737 = vmatpush.bf16.msrb.mxu3 %v12442_v15  ;;  %v8327_v34 = vpop.f32.mrf.mxu1  ;;  %v14364_v15 = vld [vmem:[#allocation8 + $0x78c] sm:$0xf]  ;;  %v8908_v52 = vmax.f32 %v15787_v9, 0.0 }
 0x456   :  { %8722 = vmatpush.bf16.msrb.mxu2 %v12250_v11  ;;  %v12234_v35 = vor.u32 %v14320_v0, %v12231_v51  ;;  %v12090_v11 = vor.u32 %v14284_v50, %v12087_v49  ;;  %v12583_v0 = vld [vmem:[#allocation8 + $0x8f8] sm:$0xf0]  ;;  %v14440_v51 = vld [vmem:[#allocation8 + $0x9ec] sm:$0xf] }
 0x457   :  { %8684 = vmatpush.bf16.msrb.mxu0 %v11994_v47  ;;  %v15794_v47 = vadd.f32 %v8277_v59, %v8259_v21  ;;  %v8308_v23 = vpop.f32.mrf.mxu0  ;;  %v8291_v21 = vpop.f32.mrf.mxu3  ;;  %8630 = vmatmul.bf16.vlgmr.msra.gmra.mxu1 %v15198_v28  ;;  %v14472_v59 = vld [vmem:[#allocation8 + $0xaec] sm:$0xf]  ;;  %v12391_v50 = vld [vmem:[#allocation8 + $0x778] sm:$0xf0] }
 0x458   :  { %v8309_v42 = vadd.f32 %v8308_v23, %v15792_v24  ;;  %v8292_v25 = vadd.f32 %v8291_v21, %v15777_v32  ;;  %v14360_v28 = vld [vmem:[#allocation8 + $0x76c] sm:$0xf]  ;;  %v8346_v23 = vpop.f32.mrf.mxu2  ;;  %8597 = vmatmul.bf16.gmra.mxu3 %v15599_v53 }
 0x459   :  { %8703 = vmatpush.bf16.msrb.mxu1 %v12122_v16  ;;  %v12215_v16 = vld [vmem:[#allocation8 + $0x618] sm:$0xf0]  ;;  %8738 = vmatpush.bf16.msrb.mxu3 %v12426_v63  ;;  %v12394_v32 = vor.u32 %v14360_v28, %v12391_v50  ;;  %v14404_v7 = vld [vmem:[#allocation8 + $0x8cc] sm:$0xf] }
 0x45a   :  { %8723 = vmatpush.bf16.msrb.mxu2 %v12234_v35  ;;  %v12218_v56 = vor.u32 %v14316_v12, %v12215_v16  ;;  %v8328_v20 = vadd.f32 %v8327_v34, %v8309_v42  ;;  %v12714_v35 = vor.u32 %v14440_v51, %v12711_v22  ;;  %v12839_v63 = vld [vmem:[#allocation8 + $0xaf8] sm:$0xf0]  ;;  %v8912_v45 = vmax.f32 %v8292_v25, 0.0  ;;  %v14400_v51 = vld [vmem:[#allocation8 + $0x8ac] sm:$0xf] }
 0x45b   :  { %8685 = vmatpush.bf16.msrb.mxu0 %v11978_v19  ;;  %v12410_v19 = vor.u32 %v14364_v15, %v12407_v8  ;;  %v12842_v27 = vor.u32 %v14472_v59, %v12839_v63  ;;  %v12567_v34 = vld [vmem:[#allocation8 + $0x8d8] sm:$0xf0] }
 0x45c   :  { %v15802_v49 = vpack.c.bf16 %v8912_v45, %v8908_v52  ;;  %v15804_v12 = vadd.f32 %v8346_v23, %v8328_v20  ;;  %v12570_v42 = vor.u32 %v14404_v7, %v12567_v34  ;;  %v12823_v15 = vld [vmem:[#allocation8 + $0xad8] sm:$0xf0]  ;;  %v14464_v45 = vld [vmem:[#allocation8 + $0xaac] sm:$0xf] }
 0x45d   :  { %8704 = vmatpush.bf16.msrb.mxu1 %v12106_v31  ;;  %v12586_v31 = vor.u32 %v14408_v58, %v12583_v0  ;;  %8739 = vmatpush.bf16.msrb.mxu3 %v12410_v19  ;;  %v8329_v9 = vpop.f32.mrf.mxu1  ;;  %v14356_v19 = vld [vmem:[#allocation8 + $0x74c] sm:$0xf]  ;;  %v12375_v0 = vld [vmem:[#allocation8 + $0x758] sm:$0xf0] }
 0x45e   :  { %8724 = vmatpush.bf16.msrb.mxu2 %v12218_v56  ;;  %v14468_v56 = vld [vmem:[#allocation8 + $0xacc] sm:$0xf]  ;;  %v12378_v25 = vor.u32 %v14356_v19, %v12375_v0  ;;  %v12679_v59 = vld [vmem:[#allocation8 + $0x9b8] sm:$0xf0] }
 0x45f   :  { %8686 = vmatpush.bf16.msrb.mxu0 %v11962_v6  ;;  %v14436_v6 = vld [vmem:[#allocation8 + $0x9cc] sm:$0xf]  ;;  %v8310_v16 = vpop.f32.mrf.mxu0  ;;  %v12826_v21 = vor.u32 %v14468_v56, %v12823_v15  ;;  %v8294_v20 = vpop.f32.mrf.mxu3  ;;  %v12807_v28 = vld [vmem:[#allocation8 + $0xab8] sm:$0xf0] }
 0x460   :  { %v8311_v8 = vadd.f32 %v8310_v16, %v15792_v24  ;;  %v15809_v63 = vadd.f32 %v8294_v20, %v15783_v33  ;;  %v12810_v50 = vor.u32 %v14464_v45, %v12807_v28  ;;  %v14352_v23 = vld [vmem:[#allocation8 + $0x72c] sm:$0xf]  ;;  %v8348_v7 = vpop.f32.mrf.mxu2  ;;  %v12535_v16 = vld [vmem:[#allocation8 + $0x898] sm:$0xf0]  ;;  %8616 = vmatmul.bf16.gmra.mxu0 %v15187_v1 }
 0x461   :  { %8705 = vmatpush.bf16.msrb.mxu1 %v12090_v11  ;;  %v12695_v11 = vld [vmem:[#allocation8 + $0x9d8] sm:$0xf0]  ;;  %8740 = vmatpush.bf16.msrb.mxu3 %v12394_v32 }
 0x462   :  { %8793 = vmatpush.bf16.msra.mxu2 %v12842_v27  ;;  %v12698_v58 = vor.u32 %v14436_v6, %v12695_v11  ;;  %v8330_v22 = vadd.f32 %v8329_v9, %v8311_v8  ;;  %v12359_v32 = vld [vmem:[#allocation8 + $0x738] sm:$0xf0]  ;;  %v14396_v6 = vld [vmem:[#allocation8 + $0x88c] sm:$0xf]  ;;  %v8916_v1 = vmax.f32 %v15809_v63, 0.0 }
 0x463   :  { %8755 = vmatpush.bf16.msra.mxu0 %v12586_v31  ;;  %v12551_v31 = vld [vmem:[#allocation8 + $0x8b8] sm:$0xf0]  ;;  %v12362_v34 = vor.u32 %v14352_v23, %v12359_v32  ;;  %v14428_v9 = vld [vmem:[#allocation8 + $0x98c] sm:$0xf]  ;;  %v12538_v56 = vor.u32 %v14396_v6, %v12535_v16  ;;  %8654 = vmatmul.bf16.gmra.mxu2 %v15233_v17 }
 0x464   :  { %v12554_v27 = vor.u32 %v14400_v51, %v12551_v31  ;;  %v12663_v15 = vld [vmem:[#allocation8 + $0x998] sm:$0xf0]  ;;  %v14460_v8 = vld [vmem:[#allocation8 + $0xa8c] sm:$0xf] }
 0x465   :  { %8774 = vmatpush.bf16.msra.mxu1 %v12714_v35  ;;  %v14432_v35 = vld [vmem:[#allocation8 + $0x9ac] sm:$0xf]  ;;  %8741 = vmatpush.bf16.msrb.mxu3 %v12378_v25  ;;  %v8332_v11 = vpop.f32.mrf.mxu1  ;;  %v12666_v19 = vor.u32 %v14428_v9, %v12663_v15  ;;  %v12343_v20 = vld [vmem:[#allocation8 + $0x718] sm:$0xf0] }
 0x466   :  { %8794 = vmatpush.bf16.msra.mxu2 %v12826_v21  ;;  %v12682_v52 = vor.u32 %v14432_v35, %v12679_v59  ;;  %v14348_v51 = vld [vmem:[#allocation8 + $0x70c] sm:$0xf]  ;;  %v12519_v59 = vld [vmem:[#allocation8 + $0x878] sm:$0xf0] }
 0x467   :  { %8756 = vmatpush.bf16.msra.mxu0 %v12570_v42  ;;  %v15811_v42 = vadd.f32 %v8348_v7, %v8330_v22  ;;  %v8313_v33 = vpop.f32.mrf.mxu0  ;;  %v14392_v25 = vld [vmem:[#allocation8 + $0x86c] sm:$0xf]  ;;  %v8296_v35 = vpop.f32.mrf.mxu3  ;;  %8635 = vmatmul.bf16.gmra.mxu1 %v15209_v36  ;;  %v12346_v22 = vor.u32 %v14348_v51, %v12343_v20  ;;  %v12775_v32 = vld [vmem:[#allocation8 + $0xa78] sm:$0xf0] }
 0x468   :  { %v8314_v21 = vadd.f32 %v8313_v33, %v15792_v24  ;;  %v8297_v45 = vadd.f32 %v8296_v35, %v15794_v47  ;;  %v12522_v28 = vor.u32 %v14392_v25, %v12519_v59  ;;  %v14456_v23 = vld [vmem:[#allocation8 + $0xa6c] sm:$0xf]  ;;  %v12967_v6 = vld [vmem:[#allocation8 + $0xbf8] sm:$0xf0]  ;;  %v8351_v16 = vpop.f32.mrf.mxu2  ;;  %8668 = vmatmul.bf16.vlgmr.msra.gmra.mxu3 %v16042_v46 }
 0x469   :  { %8775 = vmatpush.bf16.msra.mxu1 %v12698_v58  ;;  %v12791_v58 = vld [vmem:[#allocation8 + $0xa98] sm:$0xf0]  ;;  %8742 = vmatpush.bf16.msrb.mxu3 %v12362_v34  ;;  %v12778_v7 = vor.u32 %v14456_v23, %v12775_v32  ;;  %v14504_v36 = vld [vmem:[#allocation8 + $0xbec] sm:$0xf] }
 0x46a   :  { %8795 = vmatpush.bf16.msra.mxu2 %v12810_v50  ;;  %v12794_v0 = vor.u32 %v14460_v8, %v12791_v58  ;;  %v8333_v31 = vadd.f32 %v8332_v11, %v8314_v21  ;;  %v8920_v34 = vmax.f32 %v8297_v45, 0.0  ;;  %v12970_v9 = vor.u32 %v14504_v36, %v12967_v6  ;;  %v14388_v33 = vld [vmem:[#allocation8 + $0x84c] sm:$0xf]  ;;  %v12503_v47 = vld [vmem:[#allocation8 + $0x858] sm:$0xf0] }
 0x46b   :  { %8757 = vmatpush.bf16.msra.mxu0 %v12554_v27  ;;  %v14424_v27 = vld [vmem:[#allocation8 + $0x96c] sm:$0xf]  ;;  %v12506_v8 = vor.u32 %v14388_v33, %v12503_v47  ;;  %v12631_v58 = vld [vmem:[#allocation8 + $0x958] sm:$0xf0] }
 0x46c   :  { %v14420_v11 = vld [vmem:[#allocation8 + $0x94c] sm:$0xf]  ;;  %v15819_v17 = vadd.f32 %v8351_v16, %v8333_v31  ;;  %v12759_v63 = vld [vmem:[#allocation8 + $0xa58] sm:$0xf0] }
 0x46d   :  { %8776 = vmatpush.bf16.msra.mxu1 %v12682_v52  ;;  %v12647_v52 = vld [vmem:[#allocation8 + $0x978] sm:$0xf0]  ;;  %8743 = vmatpush.bf16.msrb.mxu3 %v12346_v22  ;;  %v8334_v15 = vpop.f32.mrf.mxu1  ;;  %v14452_v21 = vld [vmem:[#allocation8 + $0xa4c] sm:$0xf]  ;;  %v12634_v51 = vor.u32 %v14420_v11, %v12631_v58 }
 0x46e   :  { %v12650_v50 = vor.u32 %v14424_v27, %v12647_v52  ;;  %8796 = vmatpush.bf16.msra.mxu2 %v12794_v0  ;;  %v12762_v20 = vor.u32 %v14452_v21, %v12759_v63  ;;  %v14500_v25 = vld [vmem:[#allocation8 + $0xbcc] sm:$0xf]  ;;  %v12951_v31 = vld [vmem:[#allocation8 + $0xbd8] sm:$0xf0] }
 0x46f   :  { %8758 = vmatpush.bf16.msra.mxu0 %v12538_v56  ;;  %v8315_v56 = vpop.f32.mrf.mxu0  ;;  %v14384_v35 = vld [vmem:[#allocation8 + $0x82c] sm:$0xf]  ;;  %v8365_v22 = vpop.f32.mrf.mxu3  ;;  %v12954_v59 = vor.u32 %v14500_v25, %v12951_v31  ;;  %v12487_v27 = vld [vmem:[#allocation8 + $0x838] sm:$0xf0] }
 0x470   :  { %v8316_v0 = vadd.f32 %v8315_v56, %v15792_v24  ;;  %v14416_v52 = vld [vmem:[#allocation8 + $0x92c] sm:$0xf]  ;;  %v12615_v45 = vld [vmem:[#allocation8 + $0x938] sm:$0xf0]  ;;  %v8353_v6 = vpop.f32.mrf.mxu2  ;;  %8687 = vmatmul.bf16.vlgmr.msrb.gmra.mxu0 %v16043_v61 }
 0x471   :  { %8777 = vmatpush.bf16.msra.mxu1 %v12666_v19  ;;  %v15822_v19 = vpack.c.bf16 %v8920_v34, %v8916_v1  ;;  %8812 = vmatpush.bf16.msra.mxu3 %v12970_v9  ;;  %v12618_v24 = vor.u32 %v14416_v52, %v12615_v45  ;;  %v14448_v23 = vld [vmem:[#allocation8 + $0xa2c] sm:$0xf]  ;;  %v12743_v32 = vld [vmem:[#allocation8 + $0xa38] sm:$0xf0] }
 0x472   :  { %8797 = vmatpush.bf16.msra.mxu2 %v12778_v7  ;;  %v8335_v46 = vadd.f32 %v8334_v15, %v8316_v0  ;;  %v12746_v7 = vor.u32 %v14448_v23, %v12743_v32  ;;  %v14496_v1 = vld [vmem:[#allocation8 + $0xbac] sm:$0xf]  ;;  %v12935_v34 = vld [vmem:[#allocation8 + $0xbb8] sm:$0xf0] }
 0x473   :  { %8759 = vmatpush.bf16.msra.mxu0 %v12522_v28  ;;  %v15826_v28 = vadd.f32 %v8365_v22, %v15804_v12  ;;  %v14380_v36 = vld [vmem:[#allocation8 + $0x80c] sm:$0xf]  ;;  %v12938_v16 = vor.u32 %v14496_v1, %v12935_v34  ;;  %v12471_v9 = vld [vmem:[#allocation8 + $0x818] sm:$0xf0]  ;;  %8725 = vmatmul.bf16.vlgmr.msrb.gmra.mxu2 %v16045_v48 }
 0x474   :  { %v14412_v33 = vld [vmem:[#allocation8 + $0x90c] sm:$0xf]  ;;  %v12599_v47 = vld [vmem:[#allocation8 + $0x918] sm:$0xf0]  ;;  %v15828_v11 = vadd.f32 %v8353_v6, %v8335_v46  ;;  %v12474_v15 = vor.u32 %v14380_v36, %v12471_v9 }
 0x475   :  { %8778 = vmatpush.bf16.msra.mxu1 %v12650_v50  ;;  %v12490_v50 = vor.u32 %v14384_v35, %v12487_v27  ;;  %8813 = vmatpush.bf16.msra.mxu3 %v12954_v59  ;;  %v15832_v56 = vpop.f32.mrf.mxu1  ;;  %v14444_v58 = vld [vmem:[#allocation8 + $0xa0c] sm:$0xf]  ;;  %v12727_v21 = vld [vmem:[#allocation8 + $0xa18] sm:$0xf0] }
 0x476   :  { %8798 = vmatpush.bf16.msra.mxu2 %v12762_v20  ;;  %v12730_v63 = vor.u32 %v14444_v58, %v12727_v21  ;;  %v14492_v0 = vld [vmem:[#allocation8 + $0xb8c] sm:$0xf]  ;;  %v13095_v35 = vld [vmem:[#allocation8 + $0xcf8] sm:$0xf0] }
 0x477   :  { %8760 = vmatpush.bf16.msra.mxu0 %v12506_v8  ;;  %v15830_v12 = vpop.f32.mrf.mxu0  ;;  %v12602_v8 = vor.u32 %v14412_v33, %v12599_v47  ;;  %v14536_v20 = vld [vmem:[#allocation8 + $0xcec] sm:$0xf]  ;;  %v8367_v25 = vpop.f32.mrf.mxu3  ;;  %8706 = vmatmul.bf16.vlgmr.msrb.gmra.mxu1 %v16044_v26  ;;  %v13223_v22 = vld [vmem:[#allocation8 + $0xdf8] sm:$0xf0] }
 0x478   :  { %v14568_v46 = vld [vmem:[#allocation8 + $0xdec] sm:$0xf]  ;;  %v15837_v59 = vadd.f32 %v8367_v25, %v15811_v42  ;;  %v13098_v27 = vor.u32 %v14536_v20, %v13095_v35  ;;  %v12903_v26 = vld [vmem:[#allocation8 + $0xb78] sm:$0xf0]  ;;  %v15840_v32 = vpop.f32.mrf.mxu2  ;;  %8673 = vmatmul.bf16.gmra.mxu3 %v16046_v13 }
 0x479   :  { %8779 = vmatpush.bf16.msra.mxu1 %v12634_v51  ;;  %8814 = vmatpush.bf16.msra.mxu3 %v12938_v16  ;;  %v12919_v51 = vld [vmem:[#allocation8 + $0xb98] sm:$0xf0]  ;;  %v13226_v52 = vor.u32 %v14568_v46, %v13223_v22  ;;  %v14600_v45 = vld [vmem:[#allocation8 + $0xeec] sm:$0xf] }
 0x47a   :  { %8799 = vmatpush.bf16.msra.mxu2 %v12746_v7  ;;  %v12922_v31 = vor.u32 %v14492_v0, %v12919_v51  ;;  %v14488_v61 = vld [vmem:[#allocation8 + $0xb6c] sm:$0xf]  ;;  %v13079_v7 = vld [vmem:[#allocation8 + $0xcd8] sm:$0xf0] }
 0x47b   :  { %8761 = vmatpush.bf16.msra.mxu0 %v12490_v50  ;;  %v13351_v50 = vld [vmem:[#allocation8 + $0xef8] sm:$0xf0]  ;;  %v14532_v23 = vld [vmem:[#allocation8 + $0xccc] sm:$0xf]  ;;  %v12906_v42 = vor.u32 %v14488_v61, %v12903_v26 }
 0x47c   :  { %v14564_v1 = vld [vmem:[#allocation8 + $0xdcc] sm:$0xf]  ;;  %v13207_v48 = vld [vmem:[#allocation8 + $0xdd8] sm:$0xf0]  ;;  %v13082_v6 = vor.u32 %v14532_v23, %v13079_v7 }
 0x47d   :  { %8780 = vmatpush.bf16.msra.mxu1 %v12618_v24  ;;  %8815 = vmatpush.bf16.msra.mxu3 %v12922_v31  ;;  %v13354_v24 = vor.u32 %v14600_v45, %v13351_v50  ;;  %v15845_v36 = vpop.f32.mrf.mxu1  ;;  %v13210_v16 = vor.u32 %v14564_v1, %v13207_v48  ;;  %v14596_v9 = vld [vmem:[#allocation8 + $0xecc] sm:$0xf]  ;;  %v13335_v33 = vld [vmem:[#allocation8 + $0xed8] sm:$0xf0] }
 0x47e   :  { %8800 = vmatpush.bf16.msra.mxu2 %v12730_v63  ;;  %v13338_v47 = vor.u32 %v14596_v9, %v13335_v33  ;;  %v14528_v58 = vld [vmem:[#allocation8 + $0xcac] sm:$0xf]  ;;  %v13063_v0 = vld [vmem:[#allocation8 + $0xcb8] sm:$0xf0] }
 0x47f   :  { %8762 = vmatpush.bf16.msra.mxu0 %v12474_v15  ;;  %v15843_v34 = vpop.f32.mrf.mxu0  ;;  %v14484_v15 = vld [vmem:[#allocation8 + $0xb4c] sm:$0xf]  ;;  %v8370_v21 = vpop.f32.mrf.mxu3  ;;  %v13191_v51 = vld [vmem:[#allocation8 + $0xdb8] sm:$0xf0]  ;;  %v13066_v25 = vor.u32 %v14528_v58, %v13063_v0 }
 0x480   :  { %v14560_v13 = vld [vmem:[#allocation8 + $0xdac] sm:$0xf]  ;;  %v15848_v20 = vadd.f32 %v8370_v21, %v15819_v17  ;;  %v13319_v46 = vld [vmem:[#allocation8 + $0xeb8] sm:$0xf0]  ;;  %v15850_v50 = vpop.f32.mrf.mxu2  ;;  %8692 = vmatmul.bf16.gmra.mxu0 %v16047_v3 }
 0x481   :  { %8781 = vmatpush.bf16.msra.mxu1 %v12602_v8  ;;  %8816 = vmatpush.bf16.msra.mxu3 %v12906_v42  ;;  %v12887_v8 = vld [vmem:[#allocation8 + $0xb58] sm:$0xf0]  ;;  %v13194_v31 = vor.u32 %v14560_v13, %v13191_v51  ;;  %v14592_v35 = vld [vmem:[#allocation8 + $0xeac] sm:$0xf] }
 0x482   :  { %8869 = vmatpush.bf16.msrb.mxu2 %v13354_v24  ;;  %v12890_v63 = vor.u32 %v14484_v15, %v12887_v8  ;;  %v13322_v22 = vor.u32 %v14592_v35, %v13319_v46  ;;  %v14524_v45 = vld [vmem:[#allocation8 + $0xc8c] sm:$0xf]  ;;  %v13047_v61 = vld [vmem:[#allocation8 + $0xc98] sm:$0xf0] }
 0x483   :  { %8831 = vmatpush.bf16.msrb.mxu0 %v13098_v27  ;;  %v14480_v27 = vld [vmem:[#allocation8 + $0xb2c] sm:$0xf]  ;;  %v13175_v23 = vld [vmem:[#allocation8 + $0xd98] sm:$0xf0]  ;;  %v13050_v7 = vor.u32 %v14524_v45, %v13047_v61  ;;  %8730 = vmatmul.bf16.gmra.mxu2 %v16049_v30 }
 0x484   :  { %v14556_v26 = vld [vmem:[#allocation8 + $0xd8c] sm:$0xf]  ;;  %v12855_v33 = vld [vmem:[#allocation8 + $0xb18] sm:$0xf0] }
 0x485   :  { %8850 = vmatpush.bf16.msrb.mxu1 %v13226_v52  ;;  %8817 = vmatpush.bf16.msra.mxu3 %v12890_v63  ;;  %v12871_v52 = vld [vmem:[#allocation8 + $0xb38] sm:$0xf0]  ;;  %v15854_v42 = vpop.f32.mrf.mxu1  ;;  %v13178_v1 = vor.u32 %v14556_v26, %v13175_v23  ;;  %v14588_v48 = vld [vmem:[#allocation8 + $0xe8c] sm:$0xf] }
 0x486   :  { %8870 = vmatpush.bf16.msrb.mxu2 %v13338_v47  ;;  %v12874_v24 = vor.u32 %v14480_v27, %v12871_v52  ;;  %v14476_v9 = vld [vmem:[#allocation8 + $0xb0c] sm:$0xf]  ;;  %v13031_v58 = vld [vmem:[#allocation8 + $0xc78] sm:$0xf0] }
 0x487   :  { %8832 = vmatpush.bf16.msrb.mxu0 %v13082_v6  ;;  %v15852_v17 = vpop.f32.mrf.mxu0  ;;  %v13303_v6 = vld [vmem:[#allocation8 + $0xe98] sm:$0xf0]  ;;  %v14520_v47 = vld [vmem:[#allocation8 + $0xc6c] sm:$0xf]  ;;  %v8372_v15 = vpop.f32.mrf.mxu3  ;;  %8711 = vmatmul.bf16.gmra.mxu1 %v16048_v5  ;;  %v12858_v8 = vor.u32 %v14476_v9, %v12855_v33 }
 0x488   :  { %v14552_v21 = vld [vmem:[#allocation8 + $0xd6c] sm:$0xf]  ;;  %v13159_v63 = vld [vmem:[#allocation8 + $0xd78] sm:$0xf0]  ;;  %v15859_v0 = vadd.f32 %v8372_v15, %v15828_v11  ;;  %v13034_v13 = vor.u32 %v14520_v47, %v13031_v58  ;;  %8744 = vmatmul.bf16.vlgmr.msrb.gmra.mxu3 %v16050_v43 }
 0x489   :  { %8851 = vmatpush.bf16.msrb.mxu1 %v13210_v16  ;;  %8818 = vmatpush.bf16.msra.mxu3 %v12874_v24  ;;  %v13306_v16 = vor.u32 %v14588_v48, %v13303_v6  ;;  %v13162_v51 = vor.u32 %v14552_v21, %v13159_v63  ;;  %v14632_v3 = vld [vmem:[#allocation8 + $0xfec] sm:$0xf]  ;;  %v13479_v5 = vld [vmem:[#allocation8 + $0xff8] sm:$0xf0] }
 0x48a   :  { %8871 = vmatpush.bf16.msrb.mxu2 %v13322_v22  ;;  %v14516_v46 = vld [vmem:[#allocation8 + $0xc4c] sm:$0xf]  ;;  %v15862_v22 = vpop.f32.mrf.mxu2  ;;  %v13482_v27 = vor.u32 %v14632_v3, %v13479_v5  ;;  %v13015_v52 = vld [vmem:[#allocation8 + $0xc58] sm:$0xf0] }
 0x48b   :  { %8833 = vmatpush.bf16.msrb.mxu0 %v13066_v25  ;;  %v14584_v25 = vld [vmem:[#allocation8 + $0xe6c] sm:$0xf]  ;;  %v13143_v45 = vld [vmem:[#allocation8 + $0xd58] sm:$0xf0]  ;;  %v13018_v61 = vor.u32 %v14516_v46, %v13015_v52 }
 0x48c   :  { %v14548_v11 = vld [vmem:[#allocation8 + $0xd4c] sm:$0xf]  ;;  %v13463_v6 = vld [vmem:[#allocation8 + $0xfd8] sm:$0xf0] }
 0x48d   :  { %8852 = vmatpush.bf16.msrb.mxu1 %v13194_v31  ;;  %v13287_v31 = vld [vmem:[#allocation8 + $0xe78] sm:$0xf0]  ;;  %8819 = vmatpush.bf16.msra.mxu3 %v12858_v8  ;;  %v15867_v24 = vpop.f32.mrf.mxu1  ;;  %v13146_v26 = vor.u32 %v14548_v11, %v13143_v45  ;;  %v14580_v23 = vld [vmem:[#allocation8 + $0xe4c] sm:$0xf] }
 0x48e   :  { %8872 = vmatpush.bf16.msrb.mxu2 %v13306_v16  ;;  %v13290_v35 = vor.u32 %v14584_v25, %v13287_v31  ;;  %v14628_v48 = vld [vmem:[#allocation8 + $0xfcc] sm:$0xf]  ;;  %v12999_v43 = vld [vmem:[#allocation8 + $0xc38] sm:$0xf0] }
 0x48f   :  { %8834 = vmatpush.bf16.msrb.mxu0 %v13050_v7  ;;  %v15865_v30 = vpop.f32.mrf.mxu0  ;;  %v13271_v7 = vld [vmem:[#allocation8 + $0xe58] sm:$0xf0]  ;;  %v14512_v16 = vld [vmem:[#allocation8 + $0xc2c] sm:$0xf]  ;;  %v15869_v9 = vpop.f32.mrf.mxu3  ;;  %v13466_v33 = vor.u32 %v14628_v48, %v13463_v6 }
 0x490   :  { %v14544_v47 = vld [vmem:[#allocation8 + $0xd2c] sm:$0xf]  ;;  %v13127_v15 = vld [vmem:[#allocation8 + $0xd38] sm:$0xf0]  ;;  %v13002_v8 = vor.u32 %v14512_v16, %v12999_v43  ;;  %8763 = vmatmul.bf16.vlgmr.msra.gmra.mxu0 %v16051_v2 }
 0x491   :  { %8853 = vmatpush.bf16.msrb.mxu1 %v13178_v1  ;;  %8888 = vmatpush.bf16.msrb.mxu3 %v13482_v27  ;;  %v13274_v1 = vor.u32 %v14580_v23, %v13271_v7  ;;  %v13130_v58 = vor.u32 %v14544_v47, %v13127_v15  ;;  %v14576_v21 = vld [vmem:[#allocation8 + $0xe2c] sm:$0xf]  ;;  %v13255_v63 = vld [vmem:[#allocation8 + $0xe38] sm:$0xf0] }
 0x492   :  { %8873 = vmatpush.bf16.msrb.mxu2 %v13290_v35  ;;  %v13447_v25 = vld [vmem:[#allocation8 + $0xfb8] sm:$0xf0]  ;;  %v14508_v31 = vld [vmem:[#allocation8 + $0xc0c] sm:$0xf]  ;;  %v15871_v35 = vpop.f32.mrf.mxu2 }
 0x493   :  { %8835 = vmatpush.bf16.msrb.mxu0 %v13034_v13  ;;  %v13258_v13 = vor.u32 %v14576_v21, %v13255_v63  ;;  %v12983_v5 = vld [vmem:[#allocation8 + $0xc18] sm:$0xf0]  ;;  %v14540_v46 = vld [vmem:[#allocation8 + $0xd0c] sm:$0xf]  ;;  %8801 = vmatmul.bf16.vlgmr.msra.gmra.mxu2 %v16053_v38  ;;  %v14641_v21 = vld [vmem:[#allocation11 + $0x30] sm:$0xff] }
 0x494   :  { %v13111_v27 = vld [vmem:[#allocation8 + $0xd18] sm:$0xf0]  ;;  %v12986_v45 = vor.u32 %v14508_v31, %v12983_v5  ;;  %v14616_v47 = vld [vmem:[#allocation8 + $0xf6c] sm:$0xf]  ;;  %v14649_v63 = vld [vmem:[#allocation11 + $0x70] sm:$0xff] }
 0x495   :  { %8854 = vmatpush.bf16.msrb.mxu1 %v13162_v51  ;;  %8889 = vmatpush.bf16.msrb.mxu3 %v13466_v33  ;;  %v14624_v51 = vld [vmem:[#allocation8 + $0xfac] sm:$0xf]  ;;  %v15875_v11 = vpop.f32.mrf.mxu1  ;;  %v13239_v23 = vld [vmem:[#allocation8 + $0xe18] sm:$0xf0] }
 0x496   :  { %8874 = vmatpush.bf16.msrb.mxu2 %v13274_v1  ;;  %v13450_v3 = vor.u32 %v14624_v51, %v13447_v25  ;;  %v14620_v1 = vld [vmem:[#allocation8 + $0xf8c] sm:$0xf]  ;;  %v13431_v48 = vld [vmem:[#allocation8 + $0xf98] sm:$0xf0] }
 0x497   :  { %8836 = vmatpush.bf16.msrb.mxu0 %v13018_v61  ;;  %v15873_v52 = vpop.f32.mrf.mxu0  ;;  %v13114_v61 = vor.u32 %v14540_v46, %v13111_v27  ;;  %v15877_v6 = vpop.f32.mrf.mxu3  ;;  %8782 = vmatmul.bf16.vlgmr.msra.gmra.mxu1 %v16052_v37  ;;  %v13434_v16 = vor.u32 %v14620_v1, %v13431_v48  ;;  %v14642_v33 = vld [vmem:[#allocation11 + $0x38] sm:$0xff]  ;;  %v14612_v38 = vld [vmem:[#allocation8 + $0xf4c] sm:$0xf]  ;;  %v14657_v46 = vld [vmem:[#allocation11 + $0xb0] sm:$0xff] }
 0x498   :  { %v14650_v43 = vld [vmem:[#allocation11 + $0x78] sm:$0xff]  ;;  %8749 = vmatmul.bf16.gmra.mxu3 %v16059_v57  ;;  %v14648_v5 = vld [vmem:[#allocation11 + $0x68] sm:$0xff] }
 0x499   :  { %8855 = vmatpush.bf16.msrb.mxu1 %v13146_v26  ;;  %v14572_v26 = vld [vmem:[#allocation8 + $0xe0c] sm:$0xf]  ;;  %8890 = vmatpush.bf16.msrb.mxu3 %v13450_v3  ;;  %v13415_v15 = vld [vmem:[#allocation8 + $0xf78] sm:$0xf0] }
 0x49a   :  { %8875 = vmatpush.bf16.msrb.mxu2 %v13258_v13  ;;  %v13242_v7 = vor.u32 %v14572_v26, %v13239_v23  ;;  %v14658_v13 = vld [vmem:[#allocation11 + $0xb8] sm:$0xff]  ;;  %v14640_v3 = vld [vmem:[#allocation11 + $0x28] sm:$0xff]  ;;  %v14639_v26 = vld [vmem:[#allocation11 + $0x20] sm:$0xff] }
 0x49b   :  { %8837 = vmatpush.bf16.msrb.mxu0 %v13002_v8  ;;  %v15882_v8 = vpop.f32.mrf.mxu2  ;;  %v13399_v51 = vld [vmem:[#allocation8 + $0xf58] sm:$0xf0]  ;;  %v14608_v57 = vld [vmem:[#allocation8 + $0xf2c] sm:$0xf]  ;;  %v14647_v23 = vld [vmem:[#allocation11 + $0x60] sm:$0xff] }
 0x49c   :  { %v13402_v31 = vor.u32 %v14612_v38, %v13399_v51  ;;  %v13383_v27 = vld [vmem:[#allocation8 + $0xf38] sm:$0xf0]  ;;  %v14656_v48 = vld [vmem:[#allocation11 + $0xa8] sm:$0xff]  ;;  %v14645_v38 = vld [vmem:[#allocation11 + $0x50] sm:$0xff] }
 0x49d   :  { %8856 = vmatpush.bf16.msrb.mxu1 %v13130_v58  ;;  %8891 = vmatpush.bf16.msrb.mxu3 %v13434_v16  ;;  %v13418_v58 = vor.u32 %v14616_v47, %v13415_v15  ;;  %v15887_v37 = vpop.f32.mrf.mxu1  ;;  %v14604_v16 = vld [vmem:[#allocation8 + $0xf0c] sm:$0xf]  ;;  %v14638_v15 = vld [vmem:[#allocation11 + $0x18] sm:$0xff] }
 0x49e   :  { %8876 = vmatpush.bf16.msrb.mxu2 %v13242_v7 }
 0x49f   :  { %8838 = vmatpush.bf16.msrb.mxu0 %v12986_v45  ;;  %v15885_v2 = vpop.f32.mrf.mxu0  ;;  %v15889_v25 = vpop.f32.mrf.mxu3 }
 0x4a0   :  { %8768 = vmatmul.bf16.gmra.mxu0 %v15369_v10 }
 0x4a1   :  { %8857 = vmatpush.bf16.msrb.mxu1 %v13114_v61  ;;  %8892 = vmatpush.bf16.msrb.mxu3 %v13418_v58  ;;  %v13386_v61 = vor.u32 %v14608_v57, %v13383_v27  ;;  %v14646_v58 = vld [vmem:[#allocation11 + $0x58] sm:$0xff]  ;;  %v14635_v57 = vld [vmem:[#allocation11] sm:$0xff] }
 0x4a2   :  { %9229 = vmatpush.bf16.msra.mxu2 %v14658_v13  ;;  %v14637_v13 = vld [vmem:[#allocation11 + $0x10] sm:$0xff]  ;;  %v14643_v27 = vld [vmem:[#allocation11 + $0x40] sm:$0xff] }
 0x4a3   :  { %9191 = vmatpush.bf16.msra.mxu0 %v14642_v33  ;;  %v15891_v45 = vpop.f32.mrf.mxu2  ;;  %v13367_v33 = vld [vmem:[#allocation8 + $0xf18] sm:$0xf0]  ;;  %8806 = vmatmul.bf16.gmra.mxu2 %v15415_v29 }
 0x4a4   :  { %v13370_v47 = vor.u32 %v14604_v16, %v13367_v33  ;;  %v8385_v16 = vadd.f32 %v15830_v12, %v15826_v28 }
 0x4a5   :  { %9210 = vmatpush.bf16.msra.mxu1 %v14650_v43  ;;  %8893 = vmatpush.bf16.msrb.mxu3 %v13402_v31  ;;  %v15895_v1 = vpop.f32.mrf.mxu1  ;;  %v14636_v31 = vld [vmem:[#allocation11 + $0x8] sm:$0xff] }
 0x4a6   :  { %9230 = vmatpush.bf16.msra.mxu2 %v14657_v46 }
 0x4a7   :  { %9192 = vmatpush.bf16.msra.mxu0 %v14641_v21  ;;  %v15893_v7 = vpop.f32.mrf.mxu0  ;;  %v15897_v43 = vpop.f32.mrf.mxu3  ;;  %8787 = vmatmul.bf16.gmra.mxu1 %v16039_v55  ;;  %v14655_v21 = vld [vmem:[#allocation11 + $0xa0] sm:$0xff]  ;;  %v14654_v55 = vld [vmem:[#allocation11 + $0x98] sm:$0xff] }
 0x4a8   :  { %8820 = vmatmul.bf16.vlgmr.msra.gmra.mxu3 %v16055_v39 }
 0x4a9   :  { %9211 = vmatpush.bf16.msra.mxu1 %v14649_v63  ;;  %8894 = vmatpush.bf16.msrb.mxu3 %v13386_v61 }
 0x4aa   :  { %9231 = vmatpush.bf16.msra.mxu2 %v14656_v48  ;;  %v14651_v48 = vld [vmem:[#allocation11 + $0x80] sm:$0xff] }
 0x4ab   :  { %9193 = vmatpush.bf16.msra.mxu0 %v14640_v3  ;;  %v15902_v63 = vpop.f32.mrf.mxu2  ;;  %v14644_v3 = vld [vmem:[#allocation11 + $0x48] sm:$0xff] }
 0x4ad   :  { %9212 = vmatpush.bf16.msra.mxu1 %v14648_v5  ;;  %8895 = vmatpush.bf16.msrb.mxu3 %v13370_v47  ;;  %v15907_v10 = vpop.f32.mrf.mxu1  ;;  %v14653_v5 = vld [vmem:[#allocation11 + $0x90] sm:$0xff]  ;;  %v8387_v47 = vadd.f32 %v15843_v34, %v15837_v59 }
 0x4ae   :  { %9232 = vmatpush.bf16.msra.mxu2 %v14655_v21 }
 0x4af   :  { %9194 = vmatpush.bf16.msra.mxu0 %v14639_v26  ;;  %v15905_v51 = vpop.f32.mrf.mxu0  ;;  %v8517_v29 = vpop.f32.mrf.mxu3  ;;  %v14652_v26 = vld [vmem:[#allocation11 + $0x88] sm:$0xff] }
 0x4b0   :  { %8839 = vmatmul.bf16.vlgmr.msrb.gmra.mxu0 %v15448_v54  ;;  %v8404_v54 = vadd.f32 %v15832_v56, %v8385_v16 }
 0x4b1   :  { %9213 = vmatpush.bf16.msra.mxu1 %v14647_v23 }
 0x4b2   :  { %9233 = vmatpush.bf16.msra.mxu2 %v14654_v55 }
 0x4b3   :  { %9195 = vmatpush.bf16.msra.mxu0 %v14638_v15  ;;  %v15909_v46 = vpop.f32.mrf.mxu2  ;;  %8877 = vmatmul.bf16.vlgmr.msrb.gmra.mxu2 %v16061_v44  ;;  %v8406_v44 = vadd.f32 %v15845_v36, %v8387_v47  ;;  %v8390_v36 = vadd.f32 %v15852_v17, %v15848_v20 }
 0x4b5   :  { %9214 = vmatpush.bf16.msra.mxu1 %v14646_v58  ;;  %v8555_v61 = vpop.f32.mrf.mxu1 }
 0x4b6   :  { %9234 = vmatpush.bf16.msra.mxu2 %v14653_v5  ;;  %v5126_v5 = vperm.slane %v15789_v4, 3 }
 0x4b7   :  { %9196 = vmatpush.bf16.msra.mxu0 %v14637_v13  ;;  %v8536_v39 = vpop.f32.mrf.mxu0  ;;  %v8519_v23 = vpop.f32.mrf.mxu3  ;;  %8858 = vmatmul.bf16.vlgmr.msrb.gmra.mxu1 %v16060_v14  ;;  %v8423_v14 = vadd.f32 %v15840_v32, %v8404_v54  ;;  %v8425_v13 = vadd.f32 %v15850_v50, %v8406_v44 }
 0x4b8   :  { %8825 = vmatmul.bf16.gmra.mxu3 %v16062_v40 }
 0x4b9   :  { %9215 = vmatpush.bf16.msra.mxu1 %v14645_v38  ;;  %v8442_v28 = vadd.f32 %v15869_v9, %v8423_v14  ;;  %v8444_v59 = vadd.f32 %v15877_v6, %v8425_v13  ;;  %v8392_v6 = vadd.f32 %v15865_v30, %v15859_v0 }
 0x4ba   :  { %9235 = vmatpush.bf16.msra.mxu2 %v14652_v26 }
 0x4bb   :  { %9197 = vmatpush.bf16.msra.mxu0 %v14636_v31  ;;  %v8574_v33 = vpop.f32.mrf.mxu2  ;;  %v8461_v38 = vadd.f32 %v15873_v52, %v8442_v28  ;;  %v8463_v55 = vadd.f32 %v15885_v2, %v8444_v59 }
 0x4bd   :  { %9216 = vmatpush.bf16.msra.mxu1 %v14644_v3  ;;  %v8557_v58 = vpop.f32.mrf.mxu1  ;;  %v8480_v32 = vadd.f32 %v15875_v11, %v8461_v38  ;;  %v8482_v9 = vadd.f32 %v15887_v37, %v8463_v55 }
 0x4be   :  { %9236 = vmatpush.bf16.msra.mxu2 %v14651_v48 }
 0x4bf   :  { %9198 = vmatpush.bf16.msra.mxu0 %v14635_v57  ;;  %v8538_v15 = vpop.f32.mrf.mxu0  ;;  %v8522_v21 = vpop.f32.mrf.mxu3  ;;  %v8499_v50 = vadd.f32 %v15882_v8, %v8480_v32  ;;  %v8501_v2 = vadd.f32 %v15891_v45, %v8482_v9  ;;  %v8411_v8 = vadd.f32 %v15867_v24, %v8392_v6 }
 0x4c0   :  { %8844 = vmatmul.bf16.gmra.mxu0 %v15459_v41 }
 0x4c1   :  { %9217 = vmatpush.bf16.msra.mxu1 %v14643_v27  ;;  %v8518_v41 = vadd.f32 %v8517_v29, %v8499_v50  ;;  %v8520_v3 = vadd.f32 %v8519_v23, %v8501_v2  ;;  %v8430_v0 = vadd.f32 %v15871_v35, %v8411_v8  ;;  %v16063_v35 = vld [vmem:[#allocation24_spill] sm:$0xff] }
 0x4c3   :  { %v8576_v12 = vpop.f32.mrf.mxu2  ;;  %8882 = vmatmul.bf16.gmra.mxu2 %v15583_v62  ;;  %v8409_v62 = vadd.f32 %v15854_v42, %v8390_v36  ;;  %v8537_v31 = vadd.f32 %v8536_v39, %v8518_v41  ;;  %v8539_v37 = vadd.f32 %v8538_v15, %v8520_v3  ;;  %v8449_v42 = vadd.f32 %v15897_v43, %v8430_v0  ;;  %v16064_v41 = vld [vmem:[#allocation26_spill] sm:$0xff] }
 0x4c5   :  { %v15926_v34 = vpop.f32.mrf.mxu1  ;;  %v8428_v17 = vadd.f32 %v15862_v22, %v8409_v62  ;;  %v8556_v45 = vadd.f32 %v8555_v61, %v8537_v31  ;;  %v8558_v27 = vadd.f32 %v8557_v58, %v8539_v37  ;;  %v8468_v24 = vadd.f32 %v15905_v51, %v8449_v42 }
 0x4c7   :  { %v8541_v40 = vpop.f32.mrf.mxu0  ;;  %v8524_v56 = vpop.f32.mrf.mxu3  ;;  %8863 = vmatmul.bf16.gmra.mxu1 %v15581_v18  ;;  %v8447_v30 = vadd.f32 %v15889_v25, %v8428_v17  ;;  %v8575_v57 = vadd.f32 %v8574_v33, %v8556_v45  ;;  %v8577_v23 = vadd.f32 %v8576_v12, %v8558_v27  ;;  %v8487_v61 = vadd.f32 %v15907_v10, %v8468_v24 }
 0x4c8   :  { %8896 = vmatmul.bf16.vlgmr.msrb.gmra.mxu3 %v15589_v60 }
 0x4c9   :  { %v8466_v29 = vadd.f32 %v15893_v7, %v8447_v30  ;;  %v8506_v51 = vadd.f32 %v15909_v46, %v8487_v61 }
 0x4cb   :  { %v8579_v52 = vpop.f32.mrf.mxu2  ;;  %v8485_v25 = vadd.f32 %v15895_v1, %v8466_v29  ;;  %v8525_v1 = vadd.f32 %v8524_v56, %v8506_v51  ;;  %v14665_v51 = vld [vmem:[#allocation11 + $0xf0] sm:$0xff] }
 0x4cd   :  { %v8562_v11 = vpop.f32.mrf.mxu1  ;;  %v8504_v43 = vadd.f32 %v15902_v63, %v8485_v25 }
 0x4cf   :  { %v8543_v18 = vpop.f32.mrf.mxu0  ;;  %v8593_v20 = vpop.f32.mrf.mxu3  ;;  %v8523_v58 = vadd.f32 %v8522_v21, %v8504_v43 }
 0x4d0   :  { %v8594_v48 = vadd.f32 %v8593_v20, %v8575_v57  ;;  %9199 = vmatmul.bf16.vlgmr.msra.gmra.mxu0 %v16063_v35  ;;  %v8544_v38 = vadd.f32 %v8543_v18, %v8525_v1  ;;  %v14662_v1 = vld [vmem:[#allocation11 + $0xd8] sm:$0xff] }
 0x4d1   :  { %v8542_v28 = vadd.f32 %v8541_v40, %v8523_v58 }
 0x4d2   :  { %v8909_v33 = vmax.f32 %v8594_v48, 0.0  ;;  %v8563_v32 = vadd.f32 %v8562_v11, %v8544_v38 }
 0x4d3   :  { %v8581_v60 = vpop.f32.mrf.mxu2  ;;  %v8561_v10 = vadd.f32 %v15926_v34, %v8542_v28 }
 0x4d4   :  { %v8582_v9 = vadd.f32 %v8581_v60, %v8563_v32 }
 0x4d5   :  { %v8631_v26 = vpop.f32.mrf.mxu1  ;;  %v8580_v55 = vadd.f32 %v8579_v52, %v8561_v10  ;;  %v14661_v10 = vld [vmem:[#allocation11 + $0xd0] sm:$0xff] }
 0x4d7   :  { %v8612_v39 = vpop.f32.mrf.mxu0  ;;  %v8595_v16 = vpop.f32.mrf.mxu3  ;;  %9218 = vmatmul.bf16.vlgmr.msra.gmra.mxu1 %v15802_v49 }
 0x4d8   :  { %v8613_v22 = vadd.f32 %v8612_v39, %v5126_v5  ;;  %v8596_v7 = vadd.f32 %v8595_v16, %v8577_v23  ;;  %8901 = vmatmul.bf16.gmra.mxu3 %v15599_v53 }
 0x4da   :  { %v8632_v4 = vadd.f32 %v8631_v26, %v8613_v22  ;;  %v8913_v47 = vmax.f32 %v8596_v7, 0.0 }
 0x4db   :  { %v8650_v15 = vpop.f32.mrf.mxu2 }
 0x4dc   :  { %v8925_v54 = vpack.c.bf16 %v8913_v47, %v8909_v33  ;;  %v8651_v14 = vadd.f32 %v8650_v15, %v8632_v4  ;;  %v14666_v47 = vld [vmem:[#allocation11 + $0xf8] sm:$0xff] }
 0x4dd   :  { %v8633_v13 = vpop.f32.mrf.mxu1  ;;  %9248 = vmatpush.bf16.msra.mxu3 %v14666_v47 }
 0x4de   :  { %9237 = vmatmul.bf16.vlgmr.msra.gmra.mxu2 %v8925_v54  ;;  %v14664_v54 = vld [vmem:[#allocation11 + $0xe8] sm:$0xff] }
 0x4df   :  { %v8614_v44 = vpop.f32.mrf.mxu0  ;;  %v8598_v63 = vpop.f32.mrf.mxu3 }
 0x4e0   :  { %v8615_v49 = vadd.f32 %v8614_v44, %v5126_v5  ;;  %v8599_v53 = vadd.f32 %v8598_v63, %v8580_v55  ;;  %9204 = vmatmul.bf16.gmra.mxu0 %v16064_v41  ;;  %v14660_v55 = vld [vmem:[#allocation11 + $0xc8] sm:$0xff] }
 0x4e1   :  { %9249 = vmatpush.bf16.msra.mxu3 %v14665_v51 }
 0x4e2   :  { %v8634_v12 = vadd.f32 %v8633_v13, %v8615_v49  ;;  %v8917_v56 = vmax.f32 %v8599_v53, 0.0  ;;  %v14663_v49 = vld [vmem:[#allocation11 + $0xe0] sm:$0xff] }
 0x4e3   :  { %v8652_v59 = vpop.f32.mrf.mxu2 }
 0x4e4   :  { %v8653_v46 = vadd.f32 %v8652_v59, %v8634_v12 }
 0x4e5   :  { %v8636_v36 = vpop.f32.mrf.mxu1  ;;  %9250 = vmatpush.bf16.msra.mxu3 %v14664_v54 }
 0x4e7   :  { %v8617_v21 = vpop.f32.mrf.mxu0  ;;  %v8600_v2 = vpop.f32.mrf.mxu3  ;;  %9223 = vmatmul.bf16.gmra.mxu1 %v15822_v19 }
 0x4e8   :  { %v8618_v50 = vadd.f32 %v8617_v21, %v5126_v5  ;;  %v8601_v40 = vadd.f32 %v8600_v2, %v8582_v9 }
 0x4e9   :  { %9251 = vmatpush.bf16.msra.mxu3 %v14663_v49 }
 0x4ea   :  { %v8637_v6 = vadd.f32 %v8636_v36, %v8618_v50  ;;  %v8921_v18 = vmax.f32 %v8601_v40, 0.0 }
 0x4eb   :  { %v8655_v62 = vpop.f32.mrf.mxu2 }
 0x4ec   :  { %v8929_v34 = vpack.c.bf16 %v8921_v18, %v8917_v56  ;;  %v8656_v31 = vadd.f32 %v8655_v62, %v8637_v6 }
 0x4ed   :  { %v8638_v11 = vpop.f32.mrf.mxu1  ;;  %9252 = vmatpush.bf16.msra.mxu3 %v14662_v1 }
 0x4ee   :  { %9242 = vmatmul.bf16.gmra.mxu2 %v8929_v34 }
 0x4ef   :  { %v8619_v52 = vpop.f32.mrf.mxu0  ;;  %v8669_v17 = vpop.f32.mrf.mxu3 }
 0x4f0   :  { %v8620_v3 = vadd.f32 %v8619_v52, %v5126_v5  ;;  %v8670_v8 = vadd.f32 %v8669_v17, %v8651_v14 }
 0x4f1   :  { %9253 = vmatpush.bf16.msra.mxu3 %v14661_v10 }
 0x4f2   :  { %v8639_v20 = vadd.f32 %v8638_v11, %v8620_v3 }
 0x4f3   :  { %v8657_v37 = vpop.f32.mrf.mxu2 }
 0x4f4   :  { %v8658_v0 = vadd.f32 %v8657_v37, %v8639_v20 }
 0x4f5   :  { %v8707_v45 = vpop.f32.mrf.mxu1  ;;  %9254 = vmatpush.bf16.msra.mxu3 %v14660_v55 }
 0x4f7   :  { %v8688_v30 = vpop.f32.mrf.mxu0  ;;  %v8671_v60 = vpop.f32.mrf.mxu3 }
 0x4f8   :  { %v8672_v29 = vadd.f32 %v8671_v60, %v8653_v46  ;;  %v14659_v46 = vld [vmem:[#allocation11 + $0xc0] sm:$0xff]  ;;  %v8689_v21 = vadd.f32 %v8688_v30, %v8670_v8 }
 0x4f9   :  { %9255 = vmatpush.bf16.msra.mxu3 %v14659_v46 }
 0x4fa   :  { %v8708_v53 = vadd.f32 %v8707_v45, %v8689_v21 }
 0x4fb   :  { %v8726_v19 = vpop.f32.mrf.mxu2 }
 0x4fc   :  { %v8727_v41 = vadd.f32 %v8726_v19, %v8708_v53  ;;  %v9281_v53 = vld [vmem:[#allocation14 + $0x50] sm:$0xff] }
 0x4fd   :  { %v8709_v57 = vpop.f32.mrf.mxu1 }
 0x4ff   :  { %v8690_v42 = vpop.f32.mrf.mxu0  ;;  %v8674_v27 = vpop.f32.mrf.mxu3 }
 0x500   :  { %v8675_v39 = vadd.f32 %v8674_v27, %v8656_v31  ;;  %v8691_v9 = vadd.f32 %v8690_v42, %v8672_v29 }
 0x502   :  { %v8710_v40 = vadd.f32 %v8709_v57, %v8691_v9  ;;  %v9282_v9 = vld [vmem:[#allocation14 + $0x58] sm:$0xff] }
 0x503   :  { %v8728_v26 = vpop.f32.mrf.mxu2 }
 0x504   :  { %v8729_v56 = vadd.f32 %v8728_v26, %v8710_v40 }
 0x505   :  { %v15960_v23 = vpop.f32.mrf.mxu1 }
 0x507   :  { %v8693_v22 = vpop.f32.mrf.mxu0  ;;  %v8676_v24 = vpop.f32.mrf.mxu3 }
 0x508   :  { %v8677_v5 = vadd.f32 %v8676_v24, %v8658_v0  ;;  %v8694_v8 = vadd.f32 %v8693_v22, %v8675_v39 }
 0x50a   :  { %v8713_v29 = vadd.f32 %v15960_v23, %v8694_v8 }
 0x50b   :  { %v15962_v48 = vpop.f32.mrf.mxu2 }
 0x50c   :  { %v8732_v24 = vadd.f32 %v15962_v48, %v8713_v29  ;;  %v9271_v29 = vld [vmem:[#allocation14] sm:$0xff] }
 0x50d   :  { %v15964_v35 = vpop.f32.mrf.mxu1 }
 0x50f   :  { %v8695_v4 = vpop.f32.mrf.mxu0  ;;  %v8745_v16 = vpop.f32.mrf.mxu3 }
 0x510   :  { %v8746_v18 = vadd.f32 %v8745_v16, %v8727_v41  ;;  %v8696_v30 = vadd.f32 %v8695_v4, %v8677_v5 }
 0x512   :  { %v8715_v16 = vadd.f32 %v15964_v35, %v8696_v30  ;;  %v9274_v30 = vld [vmem:[#allocation14 + $0x18] sm:$0xff] }
 0x513   :  { %v15966_v25 = vpop.f32.mrf.mxu2 }
 0x515   :  { %v8783_v61 = vpop.f32.mrf.mxu1 }
 0x517   :  { %v8764_v7 = vpop.f32.mrf.mxu0  ;;  %v8747_v43 = vpop.f32.mrf.mxu3 }
 0x518   :  { %v8765_v62 = vadd.f32 %v8764_v7, %v8746_v18  ;;  %v8748_v34 = vadd.f32 %v8747_v43, %v8729_v56  ;;  %v8734_v43 = vadd.f32 %v15966_v25, %v8715_v16  ;;  %v9286_v25 = vld [vmem:[#allocation14 + $0x78] sm:$0xff]  ;;  %v9280_v56 = vld [vmem:[#allocation14 + $0x48] sm:$0xff] }
 0x519   :  { %9291 = vmatpush.msrb.mxu0 %v9286_v25  ;;  %14667 = vmatpush.msrb.mxu1 %v9286_v25 }
 0x51a   :  { %v8784_v20 = vadd.f32 %v8783_v61, %v8765_v62  ;;  %14668 = vmatpush.msrb.mxu2 %v9286_v25  ;;  %14669 = vmatpush.msrb.mxu3 %v9286_v25 }
 0x51b   :  { %v8802_v33 = vpop.f32.mrf.mxu2 }
 0x51c   :  { %v8803_v37 = vadd.f32 %v8802_v33, %v8784_v20 }
 0x51d   :  { %v8785_v14 = vpop.f32.mrf.mxu1 }
 0x51f   :  { %v8750_v15 = vpop.f32.mrf.mxu3  ;;  %v8766_v58 = vpop.f32.mrf.mxu0 }
 0x520   :  { %v8767_v11 = vadd.f32 %v8766_v58, %v8748_v34  ;;  %v8751_v39 = vadd.f32 %v8750_v15, %v8732_v24  ;;  %v9285_v15 = vld [vmem:[#allocation14 + $0x70] sm:$0xff]  ;;  %v9279_v34 = vld [vmem:[#allocation14 + $0x40] sm:$0xff] }
 0x521   :  { %9292 = vmatpush.msrb.mxu0 %v9285_v15  ;;  %14670 = vmatpush.msrb.mxu1 %v9285_v15 }
 0x522   :  { %v8786_v0 = vadd.f32 %v8785_v14, %v8767_v11  ;;  %14671 = vmatpush.msrb.mxu2 %v9285_v15  ;;  %14672 = vmatpush.msrb.mxu3 %v9285_v15  ;;  %v9278_v11 = vld [vmem:[#allocation14 + $0x38] sm:$0xff] }
 0x523   :  { %v8804_v44 = vpop.f32.mrf.mxu2 }
 0x524   :  { %v8805_v60 = vadd.f32 %v8804_v44, %v8786_v0  ;;  %v9275_v0 = vld [vmem:[#allocation14 + $0x20] sm:$0xff] }
 0x525   :  { %v8788_v63 = vpop.f32.mrf.mxu1 }
 0x527   :  { %v8752_v13 = vpop.f32.mrf.mxu3  ;;  %v8769_v28 = vpop.f32.mrf.mxu0 }
 0x528   :  { %v8770_v5 = vadd.f32 %v8769_v28, %v8751_v39  ;;  %v8753_v4 = vadd.f32 %v8752_v13, %v8734_v43 }
 0x52a   :  { %v8789_v14 = vadd.f32 %v8788_v63, %v8770_v5 }
 0x52b   :  { %v8807_v38 = vpop.f32.mrf.mxu2 }
 0x52c   :  { %v8808_v1 = vadd.f32 %v8807_v38, %v8789_v14  ;;  %v9283_v38 = vld [vmem:[#allocation14 + $0x60] sm:$0xff] }
 0x52d   :  { %v8790_v36 = vpop.f32.mrf.mxu1 }
 0x52f   :  { %v8821_v12 = vpop.f32.mrf.mxu3  ;;  %v8771_v59 = vpop.f32.mrf.mxu0 }
 0x530   :  { %v8822_v45 = vadd.f32 %v8821_v12, %v8803_v37  ;;  %v8772_v23 = vadd.f32 %v8771_v59, %v8753_v4  ;;  %v9276_v37 = vld [vmem:[#allocation14 + $0x28] sm:$0xff] }
 0x532   :  { %v8791_v35 = vadd.f32 %v8790_v36, %v8772_v23 }
 0x533   :  { %v8809_v50 = vpop.f32.mrf.mxu2 }
 0x534   :  { %v8810_v28 = vadd.f32 %v8809_v50, %v8791_v35 }
 0x535   :  { %v8859_v31 = vpop.f32.mrf.mxu1 }
 0x537   :  { %v8823_v32 = vpop.f32.mrf.mxu3  ;;  %v8840_v6 = vpop.f32.mrf.mxu0 }
 0x538   :  { %v8841_v19 = vadd.f32 %v8840_v6, %v8822_v45  ;;  %v8824_v42 = vadd.f32 %v8823_v32, %v8805_v60  ;;  %v9284_v32 = vld [vmem:[#allocation14 + $0x68] sm:$0xff]  ;;  %v9273_v60 = vld [vmem:[#allocation14 + $0x10] sm:$0xff] }
 0x539   :  { %9293 = vmatpush.msrb.mxu0 %v9284_v32  ;;  %14673 = vmatpush.msrb.mxu1 %v9284_v32  ;;  %v9272_v45 = vld [vmem:[#allocation14 + $0x8] sm:$0xff] }
 0x53a   :  { %v8860_v22 = vadd.f32 %v8859_v31, %v8841_v19  ;;  %14674 = vmatpush.msrb.mxu2 %v9284_v32  ;;  %14675 = vmatpush.msrb.mxu3 %v9284_v32 }
 0x53b   :  { %v8878_v52 = vpop.f32.mrf.mxu2  ;;  %9294 = vmatpush.msrb.mxu0 %v9283_v38  ;;  %14676 = vmatpush.msrb.mxu1 %v9283_v38 }
 0x53c   :  { %v8879_v33 = vadd.f32 %v8878_v52, %v8860_v22  ;;  %14677 = vmatpush.msrb.mxu2 %v9283_v38  ;;  %14678 = vmatpush.msrb.mxu3 %v9283_v38  ;;  %v14735_v38 = vld [vmem:[#allocation16] ss:$0 sm:$0xff] }
 0x53d   :  { %v8861_v57 = vpop.f32.mrf.mxu1  ;;  %9295 = vmatpush.msrb.mxu0 %v9282_v9  ;;  %14679 = vmatpush.msrb.mxu1 %v9282_v9 }
 0x53e   :  { %14680 = vmatpush.msrb.mxu2 %v9282_v9  ;;  %14681 = vmatpush.msrb.mxu3 %v9282_v9 }
 0x53f   :  { %v8826_v2 = vpop.f32.mrf.mxu3  ;;  %v8842_v17 = vpop.f32.mrf.mxu0  ;;  %9296 = vmatpush.msrb.mxu0 %v9281_v53  ;;  %14682 = vmatpush.msrb.mxu1 %v9281_v53 }
 0x540   :  { %v8843_v7 = vadd.f32 %v8842_v17, %v8824_v42  ;;  %v8827_v13 = vadd.f32 %v8826_v2, %v8808_v1  ;;  %14683 = vmatpush.msrb.mxu2 %v9281_v53  ;;  %14684 = vmatpush.msrb.mxu3 %v9281_v53  ;;  %v9277_v17 = vld [vmem:[#allocation14 + $0x30] sm:$0xff]  ;;  %v14734_v42 = vld [vmem:[#allocation13] ss:$0 sm:$0xff] }
 0x541   :  { %9297 = vmatpush.msrb.mxu0 %v9280_v56  ;;  %14685 = vmatpush.msrb.mxu1 %v9280_v56 }
 0x542   :  { %v8862_v47 = vadd.f32 %v8861_v57, %v8843_v7  ;;  %14686 = vmatpush.msrb.mxu2 %v9280_v56  ;;  %14687 = vmatpush.msrb.mxu3 %v9280_v56 }
 0x543   :  { %v8880_v27 = vpop.f32.mrf.mxu2  ;;  %9298 = vmatpush.msrb.mxu0 %v9279_v34  ;;  %14688 = vmatpush.msrb.mxu1 %v9279_v34 }
 0x544   :  { %v8881_v51 = vadd.f32 %v8880_v27, %v8862_v47  ;;  %14689 = vmatpush.msrb.mxu2 %v9279_v34  ;;  %14690 = vmatpush.msrb.mxu3 %v9279_v34 }
 0x545   :  { %v8864_v49 = vpop.f32.mrf.mxu1  ;;  %9299 = vmatpush.msrb.mxu0 %v9278_v11  ;;  %14691 = vmatpush.msrb.mxu1 %v9278_v11 }
 0x546   :  { %14692 = vmatpush.msrb.mxu2 %v9278_v11  ;;  %14693 = vmatpush.msrb.mxu3 %v9278_v11 }
 0x547   :  { %v8828_v3 = vpop.f32.mrf.mxu3  ;;  %v8845_v61 = vpop.f32.mrf.mxu0  ;;  %9300 = vmatpush.msrb.mxu0 %v9277_v17  ;;  %14694 = vmatpush.msrb.mxu1 %v9277_v17 }
 0x548   :  { %v8846_v63 = vadd.f32 %v8845_v61, %v8827_v13  ;;  %v8829_v46 = vadd.f32 %v8828_v3, %v8810_v28  ;;  %14695 = vmatpush.msrb.mxu2 %v9277_v17  ;;  %14696 = vmatpush.msrb.mxu3 %v9277_v17 }
 0x549   :  { %9301 = vmatpush.msrb.mxu0 %v9276_v37  ;;  %14697 = vmatpush.msrb.mxu1 %v9276_v37 }
 0x54a   :  { %v8865_v50 = vadd.f32 %v8864_v49, %v8846_v63  ;;  %14698 = vmatpush.msrb.mxu2 %v9276_v37  ;;  %14699 = vmatpush.msrb.mxu3 %v9276_v37 }
 0x54b   :  { %v8883_v48 = vpop.f32.mrf.mxu2  ;;  %9302 = vmatpush.msrb.mxu0 %v9275_v0  ;;  %14700 = vmatpush.msrb.mxu1 %v9275_v0 }
 0x54c   :  { %v8884_v41 = vadd.f32 %v8883_v48, %v8865_v50  ;;  %14701 = vmatpush.msrb.mxu2 %v9275_v0  ;;  %14702 = vmatpush.msrb.mxu3 %v9275_v0 }
 0x54d   :  { %v8866_v6 = vpop.f32.mrf.mxu1  ;;  %9303 = vmatpush.msrb.mxu0 %v9274_v30  ;;  %14703 = vmatpush.msrb.mxu1 %v9274_v30 }
 0x54e   :  { %14704 = vmatpush.msrb.mxu2 %v9274_v30  ;;  %14705 = vmatpush.msrb.mxu3 %v9274_v30 }
 0x54f   :  { %v8897_v26 = vpop.f32.mrf.mxu3  ;;  %v8847_v59 = vpop.f32.mrf.mxu0  ;;  %9304 = vmatpush.msrb.mxu0 %v9273_v60  ;;  %14706 = vmatpush.msrb.mxu1 %v9273_v60 }
 0x550   :  { %v8898_v58 = vadd.f32 %v8897_v26, %v8879_v33  ;;  %v8848_v36 = vadd.f32 %v8847_v59, %v8829_v46  ;;  %14707 = vmatpush.msrb.mxu2 %v9273_v60  ;;  %14708 = vmatpush.msrb.mxu3 %v9273_v60 }
 0x551   :  { %9305 = vmatpush.msrb.mxu0 %v9272_v45  ;;  %14709 = vmatpush.msrb.mxu1 %v9272_v45 }
 0x552   :  { %v8910_v12 = vmax.f32 %v8898_v58, 0.0  ;;  %v8867_v40 = vadd.f32 %v8866_v6, %v8848_v36  ;;  %14710 = vmatpush.msrb.mxu2 %v9272_v45  ;;  %14711 = vmatpush.msrb.mxu3 %v9272_v45 }
 0x553   :  { %v8885_v2 = vpop.f32.mrf.mxu2  ;;  %9306 = vmatpush.msrb.mxu0 %v9271_v29  ;;  %14712 = vmatpush.msrb.mxu1 %v9271_v29 }
 0x554   :  { %v8886_v18 = vadd.f32 %v8885_v2, %v8867_v40  ;;  %14713 = vmatpush.msrb.mxu2 %v9271_v29  ;;  %14714 = vmatpush.msrb.mxu3 %v9271_v29 }
 0x555   :  { %v9219_v57 = vpop.f32.mrf.mxu1 }
 0x557   :  { %v8899_v54 = vpop.f32.mrf.mxu3  ;;  %v9200_v19 = vpop.f32.mrf.mxu0 }
 0x558   :  { %v8900_v44 = vadd.f32 %v8899_v54, %v8881_v51  ;;  %v9201_v26 = vadd.f32 %v14734_v42, %v9200_v19 }
 0x55a   :  { %v8914_v10 = vmax.f32 %v8900_v44, 0.0  ;;  %v9220_v16 = vadd.f32 %v9219_v57, %v9201_v26 }
 0x55c   :  { %v8926_v55 = vpack.c.bf16 %v8914_v10, %v8910_v12 }
 0x55d   :  { %v9221_v7 = vpop.f32.mrf.mxu1 }
 0x55e   :  { %9256 = vmatmul.bf16.vlgmr.msra.gmra.mxu3 %v8926_v55 }
 0x55f   :  { %v8902_v21 = vpop.f32.mrf.mxu3  ;;  %v9202_v24 = vpop.f32.mrf.mxu0 }
 0x560   :  { %v8903_v62 = vadd.f32 %v8902_v21, %v8884_v41  ;;  %v9203_v61 = vadd.f32 %v14734_v42, %v9202_v24 }
 0x561   :  { %v9238_v27 = vpop.f32.mrf.mxu2 }
 0x562   :  { %v8918_v3 = vmax.f32 %v8903_v62, 0.0  ;;  %v9239_v43 = vadd.f32 %v9238_v27, %v9220_v16  ;;  %v9222_v47 = vadd.f32 %v9221_v7, %v9203_v61 }
 0x565   :  { %v9224_v14 = vpop.f32.mrf.mxu1 }
 0x567   :  { %v8904_v31 = vpop.f32.mrf.mxu3  ;;  %v9205_v33 = vpop.f32.mrf.mxu0 }
 0x568   :  { %v8905_v52 = vadd.f32 %v8904_v31, %v8886_v18  ;;  %v9206_v58 = vadd.f32 %v14734_v42, %v9205_v33 }
 0x569   :  { %v9240_v39 = vpop.f32.mrf.mxu2 }
 0x56a   :  { %v8922_v20 = vmax.f32 %v8905_v52, 0.0  ;;  %v9241_v23 = vadd.f32 %v9240_v39, %v9222_v47  ;;  %v9225_v48 = vadd.f32 %v9224_v14, %v9206_v58 }
 0x56c   :  { %v8930_v8 = vpack.c.bf16 %v8922_v20, %v8918_v3 }
 0x56d   :  { %v9226_v28 = vpop.f32.mrf.mxu1 }
 0x56e   :  { %9261 = vmatmul.bf16.gmra.mxu3 %v8930_v8 }
 0x56f   :  { %v9207_v1 = vpop.f32.mrf.mxu0 }
 0x570   :  { %v9208_v10 = vadd.f32 %v14734_v42, %v9207_v1 }
 0x571   :  { %v9243_v44 = vpop.f32.mrf.mxu2 }
 0x572   :  { %v9244_v35 = vadd.f32 %v9243_v44, %v9225_v48  ;;  %v9227_v55 = vadd.f32 %v9226_v28, %v9208_v10 }
 0x579   :  { %v9245_v13 = vpop.f32.mrf.mxu2 }
 0x57a   :  { %v9246_v32 = vadd.f32 %v9245_v13, %v9227_v55 }
 0x5e1   :  { %v9257_v22 = vpop.f32.mrf.mxu3 }
 0x5e2   :  { %v9258_v5 = vadd.f32 %v9257_v22, %v9239_v43 }
 0x5e4   :  { %v9267_v4 = vmax.f32 %v9258_v5, 0.0 }
 0x5e6   :  { %9307 = vmatmul.f32.vlgmr.msrb.gmra.mxu0 %v9267_v4 }
 0x5e9   :  { %v9259_v51 = vpop.f32.mrf.mxu3 }
 0x5ea   :  { %v9260_v54 = vadd.f32 %v9259_v51, %v9241_v23 }
 0x5ec   :  { %v9268_v49 = vmax.f32 %v9260_v54, 0.0 }
 0x5ee   :  { %9310 = vmatmul.f32.vlgmr.msrb.gmra.mxu1 %v9268_v49 }
 0x5f1   :  { %v9262_v12 = vpop.f32.mrf.mxu3 }
 0x5f2   :  { %v9263_v25 = vadd.f32 %v9262_v12, %v9244_v35 }
 0x5f4   :  { %v9269_v15 = vmax.f32 %v9263_v25, 0.0 }
 0x5f6   :  { %9313 = vmatmul.f32.vlgmr.msrb.gmra.mxu2 %v9269_v15 }
 0x5f9   :  { %v9264_v59 = vpop.f32.mrf.mxu3 }
 0x5fa   :  { %v9265_v63 = vadd.f32 %v9264_v59, %v9246_v32 }
 0x5fc   :  { %v9270_v46 = vmax.f32 %v9265_v63, 0.0 }
 0x5fe   :  { %9316 = vmatmul.f32.vlgmr.msrb.gmra.mxu3 %v9270_v46 }
 0x663   :  { %v9308_v21 = vpop.f32.mrf.mxu0 }
 0x664   :  { %v9309_v36 = vadd.f32 %v14735_v38, %v9308_v21 }
 0x666   :  { %9320 = vmax.xlane.f32.xlu0 %v9309_v36 }
 0x66b   :  { %v9311_v9 = vpop.f32.mrf.mxu1 }
 0x66c   :  { %v9312_v50 = vadd.f32 %v14735_v38, %v9311_v9 }
 0x66e   :  { %9322 = vmax.xlane.f32.xlu0 %v9312_v50 }
 0x679   :  { %v9314_v53 = vpop.f32.mrf.mxu2 }
 0x67a   :  { %v9315_v6 = vadd.f32 %v14735_v38, %v9314_v53 }
 0x67c   :  { %9324 = vmax.xlane.f32.xlu1 %v9315_v6 }
 0x681   :  { %v9317_v2 = vpop.f32.mrf.mxu3 }
 0x682   :  { %v9318_v41 = vadd.f32 %v14735_v38, %v9317_v2 }
 0x684   :  { %9326 = vmax.xlane.f32.xlu1 %v9318_v41 }
 0x6d9   :  { %v9321_v40 = vpop.xlane.xlu0 %9320 }
 0x6da   :  { %v9328_v56 = vsub.f32 %v9309_v36, %v9321_v40 }
 0x6dc   :  { %v9332_v18 = vmul.f32 1.442695, %v9328_v56 }
 0x6de   :  { %14736 = vpow2.f32 %v9332_v18 }
 0x6e1   :  { %v9323_v62 = vpop.xlane.xlu0 %9322 }
 0x6e2   :  { %v9329_v34 = vsub.f32 %v9312_v50, %v9323_v62 }
 0x6e4   :  { %v14737_v31 = vpop.eup %14736  ;;  %v9334_v52 = vmul.f32 1.442695, %v9329_v34 }
 0x6e5   :  { %9340 = vadd.xlane.f32.xlu2 %v14737_v31 }
 0x6e6   :  { %14738 = vpow2.f32 %v9334_v52 }
 0x6ec   :  { %v14739_v11 = vpop.eup %14738 }
 0x6ed   :  { %9342 = vadd.xlane.f32.xlu2 %v14739_v11 }
 0x6ef   :  { %v9325_v3 = vpop.xlane.xlu1 %9324 }
 0x6f0   :  { %v9330_v20 = vsub.f32 %v9315_v6, %v9325_v3 }
 0x6f2   :  { %v9336_v17 = vmul.f32 1.442695, %v9330_v20 }
 0x6f4   :  { %14740 = vpow2.f32 %v9336_v17 }
 0x6f7   :  { %v9327_v8 = vpop.xlane.xlu1 %9326 }
 0x6f8   :  { %v9331_v37 = vsub.f32 %v9318_v41, %v9327_v8 }
 0x6fa   :  { %v14741_v0 = vpop.eup %14740  ;;  %v9338_v30 = vmul.f32 1.442695, %v9331_v37 }
 0x6fb   :  { %9344 = vadd.xlane.f32.xlu0 %v14741_v0 }
 0x6fc   :  { %14742 = vpow2.f32 %v9338_v30 }
 0x702   :  { %v14743_v60 = vpop.eup %14742 }
 0x703   :  { %9346 = vadd.xlane.f32.xlu1 %v14743_v60 }
 0x758   :  { %v9341_v45 = vpop.xlane.xlu2 %9340 }
 0x759   :  { %14744 = vlog2.f32 %v9341_v45 }
 0x75f   :  { %v14745_v29 = vpop.eup %14744 }
 0x760   :  { %v9349_v19 = vmul.f32 0.6931472, %v14745_v29  ;;  %v9343_v42 = vpop.xlane.xlu2 %9342 }
 0x761   :  { %14746 = vlog2.f32 %v9343_v42 }
 0x762   :  { %v9356_v57 = vsub.f32 %v9328_v56, %v9349_v19 }
 0x764   :  { %9360 = vst [vmem:[#allocation17] sm:$0xff] %v9356_v57 }
 0x767   :  { %v14747_v27 = vpop.eup %14746 }
 0x768   :  { %v9351_v26 = vmul.f32 0.6931472, %v14747_v27 }
 0x76a   :  { %v9357_v24 = vsub.f32 %v9329_v34, %v9351_v26 }
 0x76c   :  { %9361 = vst [vmem:[#allocation17 + $0x8] sm:$0xff] %v9357_v24 }
 0x76e   :  { %v9345_v16 = vpop.xlane.xlu0 %9344 }
 0x76f   :  { %14748 = vlog2.f32 %v9345_v16 }
 0x775   :  { %v14749_v7 = vpop.eup %14748 }
 0x776   :  { %v9353_v43 = vmul.f32 0.6931472, %v14749_v7  ;;  %v9347_v39 = vpop.xlane.xlu1 %9346 }
 0x777   :  { %14750 = vlog2.f32 %v9347_v39 }
 0x778   :  { %v9358_v22 = vsub.f32 %v9330_v20, %v9353_v43 }
 0x77a   :  { %9362 = vst [vmem:[#allocation17 + $0x10] sm:$0xff] %v9358_v22 }
 0x77d   :  { %v14751_v61 = vpop.eup %14750 }
 0x77e   :  { %v9355_v5 = vmul.f32 0.6931472, %v14751_v61 }
 0x780   :  { %v9359_v4 = vsub.f32 %v9331_v37, %v9355_v5 }
 0x782   :  { %9363 = vst [vmem:[#allocation17 + $0x18] sm:$0xff] %v9359_v4 }
 0x783   :  { %9376 = dma.vmem_to_hbm [thread:$0]  %s9369_s8, 512, %s9371_s15, [#allocation4], %s15019_s14, %s15019_s14, %s15020_s5  }
 0x784   :  { %15008 = dma.done.wait [#allocation4], 512  }
 0x785   :  { %15009 = vsyncadd [#allocation4], 4294966784 }
 0x786   :  { %9381 = vsyncpa [#allocation3], 1 }
 0x787   :  { %9382 = vsyncpa [#allocation6], 1 }
 0x788   :  { %9383 = vsyncpa [#allocation9], 1 }
 0x789   :  { %9384 = vsyncpa [#allocation12], 1 }
 0x78a   :  { %9385 = vsyncpa [#allocation15], 1 }
 0x78b   :  { %9386 = vsyncpa [#allocation4], 1 }

</bundles_post_ra>
